<compile_context>
chip_gen: v7x
topology: tpu7x:2x2x1
jax: 0.10.0
libtpu: 0.0.40
codegen_flags: <defaults>
</compile_context>

<pallas_src>
import jax
import jax.numpy as jnp
from jax.experimental import pallas as pl
from jax.experimental.pallas import tpu as pltpu

CPAD = 128  # padded channel width (lane-dense)


# -----------------------------------------------------------------------------
# In-kernel helpers (called from the traced kernel body; all loops unrolled)
# -----------------------------------------------------------------------------
def _conv_shift(src_ref, w_ref, b_ref, dst_ref, *, W, Ho, kh, kw):
    """Valid conv on a flat (H*W(+pad), C) activation ref via the shift trick.

    Output dst_ref has Ho*W rows (full width; columns w >= W-kw+1 hold garbage
    that is cropped later by the pooling step).  Fused bias + ReLU epilogue.
    """
    n = Ho * W
    cpad = w_ref.shape[-1]
    acc = jnp.zeros((n, cpad), jnp.float32)
    for i in range(kh):
        for j in range(kw):
            patch = src_ref[pl.ds(i * W + j, n), :].astype(jnp.bfloat16)
            acc = acc + jnp.dot(patch, w_ref[i, j],
                                preferred_element_type=jnp.float32)
    dst_ref[...] = jnp.maximum(acc + b_ref[...], 0.0)


def _maxpool_flat(src_ref, tmp_ref, dst_ref, *, Hc, W, Wvalid):
    """2x2/stride-2 max pool of a flat (Hc*W, C) conv output (row = h*W + w).

    Only columns w < Wvalid are real conv outputs; W and Wvalid are even, so
    the invalid columns never mix with valid ones and are cropped on write.
    Result is written flat into dst_ref as rows h2*(Wvalid//2) + w2.
    """
    n = (Hc * W) // 2
    # pool over w: pairwise max of consecutive rows (W even => pairs stay in-row)
    ea = src_ref[pl.ds(0, n, stride=2), :]
    eb = src_ref[pl.ds(1, n, stride=2), :]
    tmp_ref[...] = jnp.maximum(ea, eb)
    # pool over h: max of consecutive row-blocks, crop invalid columns.
    W2, Wv2 = W // 2, Wvalid // 2
    for h2 in range(Hc // 2):
        r0 = tmp_ref[pl.ds((2 * h2) * W2, W2), :]
        r1 = tmp_ref[pl.ds((2 * h2 + 1) * W2, W2), :]
        m = jnp.maximum(r0, r1)
        dst_ref[pl.ds(h2 * Wv2, Wv2), :] = m[0:Wv2, :]


# -----------------------------------------------------------------------------
# Whole-network kernel (one grid step == one batch element)
# -----------------------------------------------------------------------------
def _net_kernel(p_ref, w1_ref, b1_ref, w2_ref, b2_ref, w3_ref, b3_ref,
                wf1_ref, bf1_ref, wf2_ref, bf2_ref, wf3_ref, bf3_ref,
                out_ref,
                c1_ref, t1_ref, a1_ref,
                c2_ref, t2_ref, a2_ref,
                c3_ref, t3_ref, a3_ref):
    f32 = jnp.float32
    bf16 = jnp.bfloat16

    # Zero the shift-trick overrun padding rows of the pooled-activation bufs.
    a1_ref[pl.ds(484, 8), :] = jnp.zeros((8, CPAD), f32)
    a2_ref[pl.ds(100, 8), :] = jnp.zeros((8, CPAD), f32)

    # ---- conv1 (3->10, 5x5) as one im2col matmul + bias + ReLU: 48 -> 44x44
    c1 = jnp.dot(p_ref[0], w1_ref[...], preferred_element_type=f32)
    c1_ref[...] = jnp.maximum(c1 + b1_ref[...], 0.0)
    # pool -> 22x22, stored flat in a1 (rows = h*22 + w)
    _maxpool_flat(c1_ref, t1_ref, a1_ref, Hc=44, W=44, Wvalid=44)

    # ---- conv2 (10->15, 3x3) + ReLU + pool: 22 -> 20 -> 10x10
    _conv_shift(a1_ref, w2_ref, b2_ref, c2_ref, W=22, Ho=20, kh=3, kw=3)
    _maxpool_flat(c2_ref, t2_ref, a2_ref, Hc=20, W=22, Wvalid=20)

    # ---- conv3 (15->20, 3x3) + ReLU + pool: 10 -> 8 -> 4x4
    _conv_shift(a2_ref, w3_ref, b3_ref, c3_ref, W=10, Ho=8, kh=3, kw=3)
    _maxpool_flat(c3_ref, t3_ref, a3_ref, Hc=8, W=10, Wvalid=8)

    # TODO(synk): Dropout(p=0.5) is identity here (eval-mode semantics).

    # ---- fc1 (320 -> 248, packed as (16 spatial, 128 ch, 256 out)) + ReLU
    a3 = a3_ref[...]                                   # (16, 128) f32
    acc = jnp.zeros((1, 256), f32)
    for s in range(16):
        acc = acc + jnp.dot(a3[s:s + 1, :].astype(bf16), wf1_ref[s],
                            preferred_element_type=f32)
    h1 = jnp.maximum(acc + bf1_ref[...], 0.0)          # (1, 256)

    # ---- fc2 (248 -> 128) + ReLU
    h2 = jnp.maximum(
        jnp.dot(h1.astype(bf16), wf2_ref[...], preferred_element_type=f32)
        + bf2_ref[...], 0.0)                           # (1, 128)

    # ---- fc3 (128 -> 27, padded to 128 lanes)
    y = jnp.dot(h2.astype(bf16), wf3_ref[...],
                preferred_element_type=f32) + bf3_ref[...]
    out_ref[0] = y


# -----------------------------------------------------------------------------
# Parameter construction (PyTorch-default-style uniform init, raw layout)
# -----------------------------------------------------------------------------
def _uniform(key, shape, bound):
    return jax.random.uniform(key, shape, jnp.float32, -bound, bound)


def init_params(key):
    ks = jax.random.split(key, 12)
    params = {}

    def conv_init(kw_, kb_, cout, cin, kh, kwid):
        fan_in = cin * kh * kwid
        bound = 1.0 / (fan_in ** 0.5)
        return (_uniform(kw_, (cout, cin, kh, kwid), bound),
                _uniform(kb_, (cout,), bound))

    def fc_init(kw_, kb_, out_f, in_f):
        bound = 1.0 / (in_f ** 0.5)
        return (_uniform(kw_, (out_f, in_f), bound),   # PyTorch Linear: (out, in)
                _uniform(kb_, (out_f,), bound))

    params["conv1_w"], params["conv1_b"] = conv_init(ks[0], ks[1], 10, 3, 5, 5)
    params["conv2_w"], params["conv2_b"] = conv_init(ks[2], ks[3], 15, 10, 3, 3)
    params["conv3_w"], params["conv3_b"] = conv_init(ks[4], ks[5], 20, 15, 3, 3)
    params["fc1_w"], params["fc1_b"] = fc_init(ks[6], ks[7], 248, 20 * 4 * 4)
    params["fc2_w"], params["fc2_b"] = fc_init(ks[8], ks[9], 128, 248)
    params["fc3_w"], params["fc3_b"] = fc_init(ks[10], ks[11], 27, 128)
    return params


# -----------------------------------------------------------------------------
# One-time packing of weights into kernel-ready, lane-dense (padded) layouts.
# -----------------------------------------------------------------------------
def prepare_params(params):
    f32 = jnp.float32
    bf16 = jnp.bfloat16

    def pack_bias(b, pad=CPAD):
        return jnp.zeros((1, pad), f32).at[0, :b.shape[0]].set(b)

    def pack_conv_im2col(w, cout_pad=CPAD):
        cout, cin, kh, kw = w.shape
        m = jnp.transpose(w, (2, 3, 1, 0)).reshape(kh * kw * cin, cout)
        return (jnp.zeros((kh * kw * cin, cout_pad), f32)
                .at[:, :cout].set(m).astype(bf16))

    def pack_conv_shift(w, cin_pad=CPAD, cout_pad=CPAD):
        cout, cin, kh, kw = w.shape
        m = jnp.transpose(w, (2, 3, 1, 0))             # (kh, kw, cin, cout)
        return (jnp.zeros((kh, kw, cin_pad, cout_pad), f32)
                .at[:, :, :cin, :cout].set(m).astype(bf16))

    packed = {
        "w1": pack_conv_im2col(params["conv1_w"]),     # (75, 128)
        "b1": pack_bias(params["conv1_b"]),
        "w2": pack_conv_shift(params["conv2_w"]),      # (3,3,128,128)
        "b2": pack_bias(params["conv2_b"]),
        "w3": pack_conv_shift(params["conv3_w"]),      # (3,3,128,128)
        "b3": pack_bias(params["conv3_b"]),
    }

    # fc1: PyTorch flatten order is feature = c*16 + (h*4 + w).  Re-index the
    # weight to (spatial s=h*4+w, channel(=128 padded), out(=256 padded)).
    wf1 = params["fc1_w"].reshape(248, 20, 16)          # (o, c, s)
    wf1 = jnp.transpose(wf1, (2, 1, 0))                 # (s, c, o)
    packed["wf1"] = (jnp.zeros((16, CPAD, 256), f32)
                     .at[:, :20, :248].set(wf1).astype(bf16))
    packed["bf1"] = jnp.zeros((1, 256), f32).at[0, :248].set(params["fc1_b"])

    packed["wf2"] = (jnp.zeros((256, 128), f32)
                     .at[:248, :].set(params["fc2_w"].T).astype(bf16))
    packed["bf2"] = pack_bias(params["fc2_b"])           # exactly 128 outputs

    packed["wf3"] = (jnp.zeros((128, 128), f32)
                     .at[:, :27].set(params["fc3_w"].T).astype(bf16))
    packed["bf3"] = jnp.zeros((1, 128), f32).at[0, :27].set(params["fc3_b"])
    return packed


# -----------------------------------------------------------------------------
# Full forward pass (input NCHW, like PyTorch).  One pallas_call for the net.
# -----------------------------------------------------------------------------
def net_forward(packed, x_nchw):
    B = x_nchw.shape[0]
    x = jnp.transpose(x_nchw, (0, 2, 3, 1))              # NCHW -> NHWC (B,48,48,3)

    # conv1 im2col in the wrapper (Cin=3): (B, 44*44, 5*5*3) bf16.
    cols = [x[:, i:i + 44, j:j + 44, :] for i in range(5) for j in range(5)]
    p = jnp.stack(cols, axis=3).reshape(B, 44 * 44, 75).astype(jnp.bfloat16)

    const2 = lambda b: (0, 0)
    const3 = lambda b: (0, 0, 0)
    const4 = lambda b: (0, 0, 0, 0)

    out = pl.pallas_call(
        _net_kernel,
        out_shape=jax.ShapeDtypeStruct((B, 1, 128), jnp.float32),
        grid=(B,),
        in_specs=[
            pl.BlockSpec((1, 44 * 44, 75), lambda b: (b, 0, 0)),   # conv1 patches
            pl.BlockSpec((75, CPAD), const2),                      # w1
            pl.BlockSpec((1, CPAD), const2),                       # b1
            pl.BlockSpec((3, 3, CPAD, CPAD), const4),              # w2
            pl.BlockSpec((1, CPAD), const2),                       # b2
            pl.BlockSpec((3, 3, CPAD, CPAD), const4),              # w3
            pl.BlockSpec((1, CPAD), const2),                       # b3
            pl.BlockSpec((16, CPAD, 256), const3),                 # wf1
            pl.BlockSpec((1, 256), const2),                        # bf1
            pl.BlockSpec((256, 128), const2),                      # wf2
            pl.BlockSpec((1, 128), const2),                        # bf2
            pl.BlockSpec((128, 128), const2),                      # wf3
            pl.BlockSpec((1, 128), const2),                        # bf3
        ],
        out_specs=pl.BlockSpec((1, 1, 128), lambda b: (b, 0, 0)),
        scratch_shapes=[
            pltpu.VMEM((44 * 44, CPAD), jnp.float32),   # conv1 out (flat 44x44)
            pltpu.VMEM((968, CPAD), jnp.float32),       # pool1 tmp
            pltpu.VMEM((484 + 8, CPAD), jnp.float32),   # a1: 22x22 (+pad rows)
            pltpu.VMEM((20 * 22, CPAD), jnp.float32),   # conv2 out (full width)
            pltpu.VMEM((220, CPAD), jnp.float32),       # pool2 tmp
            pltpu.VMEM((100 + 8, CPAD), jnp.float32),   # a2: 10x10 (+pad rows)
            pltpu.VMEM((8 * 10, CPAD), jnp.float32),    # conv3 out (full width)
            pltpu.VMEM((40, CPAD), jnp.float32),        # pool3 tmp
            pltpu.VMEM((16, CPAD), jnp.float32),        # a3: 4x4
        ],
        compiler_params=pltpu.CompilerParams(
            dimension_semantics=("parallel",)),
    )(p, packed["w1"], packed["b1"], packed["w2"], packed["b2"],
      packed["w3"], packed["b3"], packed["wf1"], packed["bf1"],
      packed["wf2"], packed["bf2"], packed["wf3"], packed["bf3"])

    return out.reshape(B, 128)[:, :27]


# -----------------------------------------------------------------------------
# Pure-JAX (XLA) reference, used only as a correctness cross-check.
# -----------------------------------------------------------------------------
def _reference_forward(params, x_nchw):
    x = jnp.transpose(x_nchw, (0, 2, 3, 1))

    def conv(x, w, b):
        w_hwio = jnp.transpose(w, (2, 3, 1, 0))
        y = jax.lax.conv_general_dilated(
            x, w_hwio, window_strides=(1, 1), padding="VALID",
            dimension_numbers=("NHWC", "HWIO", "NHWC"))
        return jax.nn.relu(y + b)

    def pool(x):
        return jax.lax.reduce_window(x, -jnp.inf, jax.lax.max,
                                     (1, 2, 2, 1), (1, 2, 2, 1), "VALID")

    x = pool(conv(x, params["conv1_w"], params["conv1_b"]))
    x = pool(conv(x, params["conv2_w"], params["conv2_b"]))
    x = pool(conv(x, params["conv3_w"], params["conv3_b"]))
    x = jnp.transpose(x, (0, 3, 1, 2)).reshape(x.shape[0], -1)
    x = jax.nn.relu(x @ params["fc1_w"].T + params["fc1_b"])
    x = jax.nn.relu(x @ params["fc2_w"].T + params["fc2_b"])
    return x @ params["fc3_w"].T + params["fc3_b"]


if __name__ == "__main__":
    key = jax.random.PRNGKey(0)
    pkey, xkey = jax.random.split(key)
    params = init_params(pkey)
    packed = prepare_params(params)

    # Input spatial size is pinned to 48x48 by the 20*4*4 flatten in the model.
    x = jax.random.normal(xkey, (2, 3, 48, 48), dtype=jnp.float32)

    fwd = jax.jit(net_forward)
    out = fwd(packed, x)
    jax.block_until_ready(out)

    assert out.shape == (2, 27), out.shape
    assert out.dtype == jnp.float32
    assert bool(jnp.all(jnp.isfinite(out)))

    # Loose tolerance: kernel matmuls run in bf16 (f32 accumulation).
    ref = _reference_forward(params, x)
    assert bool(jnp.allclose(out, ref, atol=5e-2, rtol=5e-2))

    print("KERNEL_OK")
</pallas_src>

<mosaic_0001>
module attributes {stable_mosaic.version = 11 : i64} {
  func.func @_net_kernel(%arg0: i32, %arg1: memref<1x1936x75xbf16, #tpu.memory_space<vmem>>, %arg2: memref<75x128xbf16, #tpu.memory_space<vmem>>, %arg3: memref<1x128xf32, #tpu.memory_space<vmem>>, %arg4: memref<3x3x128x128xbf16, #tpu.memory_space<vmem>>, %arg5: memref<1x128xf32, #tpu.memory_space<vmem>>, %arg6: memref<3x3x128x128xbf16, #tpu.memory_space<vmem>>, %arg7: memref<1x128xf32, #tpu.memory_space<vmem>>, %arg8: memref<16x128x256xbf16, #tpu.memory_space<vmem>>, %arg9: memref<1x256xf32, #tpu.memory_space<vmem>>, %arg10: memref<256x128xbf16, #tpu.memory_space<vmem>>, %arg11: memref<1x128xf32, #tpu.memory_space<vmem>>, %arg12: memref<128x128xbf16, #tpu.memory_space<vmem>>, %arg13: memref<1x128xf32, #tpu.memory_space<vmem>>, %arg14: memref<1x1x128xf32, #tpu.memory_space<vmem>>, %arg15: memref<1936x128xf32, #tpu.memory_space<vmem>>, %arg16: memref<968x128xf32, #tpu.memory_space<vmem>>, %arg17: memref<492x128xf32, #tpu.memory_space<vmem>>, %arg18: memref<440x128xf32, #tpu.memory_space<vmem>>, %arg19: memref<220x128xf32, #tpu.memory_space<vmem>>, %arg20: memref<108x128xf32, #tpu.memory_space<vmem>>, %arg21: memref<80x128xf32, #tpu.memory_space<vmem>>, %arg22: memref<40x128xf32, #tpu.memory_space<vmem>>, %arg23: memref<16x128xf32, #tpu.memory_space<vmem>>) attributes {dimension_semantics = [#tpu.dimension_semantics<parallel>], iteration_bounds = array<i64: 2>, scalar_prefetch = 0 : i64, scratch_operands = 9 : i64, tpu.core_type = #tpu.core_type<tc>, window_params = [{transform_indices = @transform_0, window_bounds = array<i64: 1, 1936, 75>}, {pipeline_mode = #tpu.pipeline_mode<synchronous>, transform_indices = @transform_1, window_bounds = array<i64: 75, 128>}, {pipeline_mode = #tpu.pipeline_mode<synchronous>, transform_indices = @transform_2, window_bounds = array<i64: 1, 128>}, {pipeline_mode = #tpu.pipeline_mode<synchronous>, transform_indices = @transform_3, window_bounds = array<i64: 3, 3, 128, 128>}, {pipeline_mode = #tpu.pipeline_mode<synchronous>, transform_indices = @transform_4, window_bounds = array<i64: 1, 128>}, {pipeline_mode = #tpu.pipeline_mode<synchronous>, transform_indices = @transform_5, window_bounds = array<i64: 3, 3, 128, 128>}, {pipeline_mode = #tpu.pipeline_mode<synchronous>, transform_indices = @transform_6, window_bounds = array<i64: 1, 128>}, {pipeline_mode = #tpu.pipeline_mode<synchronous>, transform_indices = @transform_7, window_bounds = array<i64: 16, 128, 256>}, {pipeline_mode = #tpu.pipeline_mode<synchronous>, transform_indices = @transform_8, window_bounds = array<i64: 1, 256>}, {pipeline_mode = #tpu.pipeline_mode<synchronous>, transform_indices = @transform_9, window_bounds = array<i64: 256, 128>}, {pipeline_mode = #tpu.pipeline_mode<synchronous>, transform_indices = @transform_10, window_bounds = array<i64: 1, 128>}, {pipeline_mode = #tpu.pipeline_mode<synchronous>, transform_indices = @transform_11, window_bounds = array<i64: 128, 128>}, {pipeline_mode = #tpu.pipeline_mode<synchronous>, transform_indices = @transform_12, window_bounds = array<i64: 1, 128>}, {transform_indices = @transform_13, window_bounds = array<i64: 1, 1, 128>}]} {
    %cst = arith.constant 0.000000e+00 : f32
    %0 = vector.broadcast %cst : f32 to vector<8x128xf32>
    %c484 = arith.constant 484 : index
    %c0 = arith.constant 0 : index
    %1 = vector.load %arg17[%c484, %c0] : memref<492x128xf32, #tpu.memory_space<vmem>>, vector<8x128xf32>
    tpu.vector_store %arg17[%c484, %c0], %0 {strides = array<i32>} : memref<492x128xf32, #tpu.memory_space<vmem>>, vector<8x128xf32>,
    %cst_0 = arith.constant 0.000000e+00 : f32
    %2 = vector.broadcast %cst_0 : f32 to vector<8x128xf32>
    %c100 = arith.constant 100 : index
    %c0_1 = arith.constant 0 : index
    %3 = vector.load %arg20[%c100, %c0_1] : memref<108x128xf32, #tpu.memory_space<vmem>>, vector<8x128xf32>
    tpu.vector_store %arg20[%c100, %c0_1], %2 {strides = array<i32>} : memref<108x128xf32, #tpu.memory_space<vmem>>, vector<8x128xf32>,
    %c0_2 = arith.constant 0 : index
    %c0_3 = arith.constant 0 : index
    %c0_4 = arith.constant 0 : index
    %4 = vector.load %arg1[%c0_2, %c0_3, %c0_4] : memref<1x1936x75xbf16, #tpu.memory_space<vmem>>, vector<1x1936x75xbf16>
    %5 = vector.shape_cast %4 : vector<1x1936x75xbf16> to vector<1936x75xbf16>
    %c0_5 = arith.constant 0 : index
    %c0_6 = arith.constant 0 : index
    %6 = vector.load %arg2[%c0_5, %c0_6] : memref<75x128xbf16, #tpu.memory_space<vmem>>, vector<75x128xbf16>
    %cst_7 = arith.constant dense<0.000000e+00> : vector<1936x128xf32>
    %7 = tpu.matmul %5, %6, %cst_7 {dimension_numbers = #tpu.dot_dimension_numbers<[1], [0], [0], [1], [0, 0, 1, 1], [], []>} : vector<1936x75xbf16>, vector<75x128xbf16>, vector<1936x128xf32> -> vector<1936x128xf32>
    %c0_8 = arith.constant 0 : index
    %c0_9 = arith.constant 0 : index
    %8 = vector.load %arg3[%c0_8, %c0_9] : memref<1x128xf32, #tpu.memory_space<vmem>>, vector<1x128xf32>
    %9 = vector.broadcast %8 : vector<1x128xf32> to vector<1936x128xf32>
    %10 = arith.addf %7, %9 : vector<1936x128xf32>
    %cst_10 = arith.constant 0.000000e+00 : f32
    %11 = vector.broadcast %cst_10 : f32 to vector<1936x128xf32>
    %12 = arith.maximumf %10, %11 : vector<1936x128xf32>
    %c0_11 = arith.constant 0 : index
    %c0_12 = arith.constant 0 : index
    %13 = vector.load %arg15[%c0_11, %c0_12] : memref<1936x128xf32, #tpu.memory_space<vmem>>, vector<1936x128xf32>
    tpu.vector_store %arg15[%c0_11, %c0_12], %12 {strides = array<i32>} : memref<1936x128xf32, #tpu.memory_space<vmem>>, vector<1936x128xf32>,
    %c0_13 = arith.constant 0 : index
    %c0_14 = arith.constant 0 : index
    %14 = tpu.strided_load %arg15[%c0_13, %c0_14] {strides = array<i32: 2, 1>} : memref<1936x128xf32, #tpu.memory_space<vmem>>, vector<968x128xf32>
    %c1 = arith.constant 1 : index
    %c0_15 = arith.constant 0 : index
    %15 = tpu.strided_load %arg15[%c1, %c0_15] {strides = array<i32: 2, 1>} : memref<1936x128xf32, #tpu.memory_space<vmem>>, vector<968x128xf32>
    %16 = arith.maximumf %14, %15 : vector<968x128xf32>
    %c0_16 = arith.constant 0 : index
    %c0_17 = arith.constant 0 : index
    %17 = vector.load %arg16[%c0_16, %c0_17] : memref<968x128xf32, #tpu.memory_space<vmem>>, vector<968x128xf32>
    tpu.vector_store %arg16[%c0_16, %c0_17], %16 {strides = array<i32>} : memref<968x128xf32, #tpu.memory_space<vmem>>, vector<968x128xf32>,
    %c0_18 = arith.constant 0 : index
    %c0_19 = arith.constant 0 : index
    %18 = vector.load %arg16[%c0_18, %c0_19] : memref<968x128xf32, #tpu.memory_space<vmem>>, vector<22x128xf32>
    %c22 = arith.constant 22 : index
    %c0_20 = arith.constant 0 : index
    %19 = vector.load %arg16[%c22, %c0_20] : memref<968x128xf32, #tpu.memory_space<vmem>>, vector<22x128xf32>
    %20 = arith.maximumf %18, %19 : vector<22x128xf32>
    %c0_21 = arith.constant 0 : index
    %c0_22 = arith.constant 0 : index
    %21 = vector.load %arg17[%c0_21, %c0_22] : memref<492x128xf32, #tpu.memory_space<vmem>>, vector<22x128xf32>
    tpu.vector_store %arg17[%c0_21, %c0_22], %20 {strides = array<i32>} : memref<492x128xf32, #tpu.memory_space<vmem>>, vector<22x128xf32>,
    %c44 = arith.constant 44 : index
    %c0_23 = arith.constant 0 : index
    %22 = vector.load %arg16[%c44, %c0_23] : memref<968x128xf32, #tpu.memory_space<vmem>>, vector<22x128xf32>
    %c66 = arith.constant 66 : index
    %c0_24 = arith.constant 0 : index
    %23 = vector.load %arg16[%c66, %c0_24] : memref<968x128xf32, #tpu.memory_space<vmem>>, vector<22x128xf32>
    %24 = arith.maximumf %22, %23 : vector<22x128xf32>
    %c22_25 = arith.constant 22 : index
    %c0_26 = arith.constant 0 : index
    %25 = vector.load %arg17[%c22_25, %c0_26] : memref<492x128xf32, #tpu.memory_space<vmem>>, vector<22x128xf32>
    tpu.vector_store %arg17[%c22_25, %c0_26], %24 {strides = array<i32>} : memref<492x128xf32, #tpu.memory_space<vmem>>, vector<22x128xf32>,
    %c88 = arith.constant 88 : index
    %c0_27 = arith.constant 0 : index
    %26 = vector.load %arg16[%c88, %c0_27] : memref<968x128xf32, #tpu.memory_space<vmem>>, vector<22x128xf32>
    %c110 = arith.constant 110 : index
    %c0_28 = arith.constant 0 : index
    %27 = vector.load %arg16[%c110, %c0_28] : memref<968x128xf32, #tpu.memory_space<vmem>>, vector<22x128xf32>
    %28 = arith.maximumf %26, %27 : vector<22x128xf32>
    %c44_29 = arith.constant 44 : index
    %c0_30 = arith.constant 0 : index
    %29 = vector.load %arg17[%c44_29, %c0_30] : memref<492x128xf32, #tpu.memory_space<vmem>>, vector<22x128xf32>
    tpu.vector_store %arg17[%c44_29, %c0_30], %28 {strides = array<i32>} : memref<492x128xf32, #tpu.memory_space<vmem>>, vector<22x128xf32>,
    %c132 = arith.constant 132 : index
    %c0_31 = arith.constant 0 : index
    %30 = vector.load %arg16[%c132, %c0_31] : memref<968x128xf32, #tpu.memory_space<vmem>>, vector<22x128xf32>
    %c154 = arith.constant 154 : index
    %c0_32 = arith.constant 0 : index
    %31 = vector.load %arg16[%c154, %c0_32] : memref<968x128xf32, #tpu.memory_space<vmem>>, vector<22x128xf32>
    %32 = arith.maximumf %30, %31 : vector<22x128xf32>
    %c66_33 = arith.constant 66 : index
    %c0_34 = arith.constant 0 : index
    %33 = vector.load %arg17[%c66_33, %c0_34] : memref<492x128xf32, #tpu.memory_space<vmem>>, vector<22x128xf32>
    tpu.vector_store %arg17[%c66_33, %c0_34], %32 {strides = array<i32>} : memref<492x128xf32, #tpu.memory_space<vmem>>, vector<22x128xf32>,
    %c176 = arith.constant 176 : index
    %c0_35 = arith.constant 0 : index
    %34 = vector.load %arg16[%c176, %c0_35] : memref<968x128xf32, #tpu.memory_space<vmem>>, vector<22x128xf32>
    %c198 = arith.constant 198 : index
    %c0_36 = arith.constant 0 : index
    %35 = vector.load %arg16[%c198, %c0_36] : memref<968x128xf32, #tpu.memory_space<vmem>>, vector<22x128xf32>
    %36 = arith.maximumf %34, %35 : vector<22x128xf32>
    %c88_37 = arith.constant 88 : index
    %c0_38 = arith.constant 0 : index
    %37 = vector.load %arg17[%c88_37, %c0_38] : memref<492x128xf32, #tpu.memory_space<vmem>>, vector<22x128xf32>
    tpu.vector_store %arg17[%c88_37, %c0_38], %36 {strides = array<i32>} : memref<492x128xf32, #tpu.memory_space<vmem>>, vector<22x128xf32>,
    %c220 = arith.constant 220 : index
    %c0_39 = arith.constant 0 : index
    %38 = vector.load %arg16[%c220, %c0_39] : memref<968x128xf32, #tpu.memory_space<vmem>>, vector<22x128xf32>
    %c242 = arith.constant 242 : index
    %c0_40 = arith.constant 0 : index
    %39 = vector.load %arg16[%c242, %c0_40] : memref<968x128xf32, #tpu.memory_space<vmem>>, vector<22x128xf32>
    %40 = arith.maximumf %38, %39 : vector<22x128xf32>
    %c110_41 = arith.constant 110 : index
    %c0_42 = arith.constant 0 : index
    %41 = vector.load %arg17[%c110_41, %c0_42] : memref<492x128xf32, #tpu.memory_space<vmem>>, vector<22x128xf32>
    tpu.vector_store %arg17[%c110_41, %c0_42], %40 {strides = array<i32>} : memref<492x128xf32, #tpu.memory_space<vmem>>, vector<22x128xf32>,
    %c264 = arith.constant 264 : index
    %c0_43 = arith.constant 0 : index
    %42 = vector.load %arg16[%c264, %c0_43] : memref<968x128xf32, #tpu.memory_space<vmem>>, vector<22x128xf32>
    %c286 = arith.constant 286 : index
    %c0_44 = arith.constant 0 : index
    %43 = vector.load %arg16[%c286, %c0_44] : memref<968x128xf32, #tpu.memory_space<vmem>>, vector<22x128xf32>
    %44 = arith.maximumf %42, %43 : vector<22x128xf32>
    %c132_45 = arith.constant 132 : index
    %c0_46 = arith.constant 0 : index
    %45 = vector.load %arg17[%c132_45, %c0_46] : memref<492x128xf32, #tpu.memory_space<vmem>>, vector<22x128xf32>
    tpu.vector_store %arg17[%c132_45, %c0_46], %44 {strides = array<i32>} : memref<492x128xf32, #tpu.memory_space<vmem>>, vector<22x128xf32>,
    %c308 = arith.constant 308 : index
    %c0_47 = arith.constant 0 : index
    %46 = vector.load %arg16[%c308, %c0_47] : memref<968x128xf32, #tpu.memory_space<vmem>>, vector<22x128xf32>
    %c330 = arith.constant 330 : index
    %c0_48 = arith.constant 0 : index
    %47 = vector.load %arg16[%c330, %c0_48] : memref<968x128xf32, #tpu.memory_space<vmem>>, vector<22x128xf32>
    %48 = arith.maximumf %46, %47 : vector<22x128xf32>
    %c154_49 = arith.constant 154 : index
    %c0_50 = arith.constant 0 : index
    %49 = vector.load %arg17[%c154_49, %c0_50] : memref<492x128xf32, #tpu.memory_space<vmem>>, vector<22x128xf32>
    tpu.vector_store %arg17[%c154_49, %c0_50], %48 {strides = array<i32>} : memref<492x128xf32, #tpu.memory_space<vmem>>, vector<22x128xf32>,
    %c352 = arith.constant 352 : index
    %c0_51 = arith.constant 0 : index
    %50 = vector.load %arg16[%c352, %c0_51] : memref<968x128xf32, #tpu.memory_space<vmem>>, vector<22x128xf32>
    %c374 = arith.constant 374 : index
    %c0_52 = arith.constant 0 : index
    %51 = vector.load %arg16[%c374, %c0_52] : memref<968x128xf32, #tpu.memory_space<vmem>>, vector<22x128xf32>
    %52 = arith.maximumf %50, %51 : vector<22x128xf32>
    %c176_53 = arith.constant 176 : index
    %c0_54 = arith.constant 0 : index
    %53 = vector.load %arg17[%c176_53, %c0_54] : memref<492x128xf32, #tpu.memory_space<vmem>>, vector<22x128xf32>
    tpu.vector_store %arg17[%c176_53, %c0_54], %52 {strides = array<i32>} : memref<492x128xf32, #tpu.memory_space<vmem>>, vector<22x128xf32>,
    %c396 = arith.constant 396 : index
    %c0_55 = arith.constant 0 : index
    %54 = vector.load %arg16[%c396, %c0_55] : memref<968x128xf32, #tpu.memory_space<vmem>>, vector<22x128xf32>
    %c418 = arith.constant 418 : index
    %c0_56 = arith.constant 0 : index
    %55 = vector.load %arg16[%c418, %c0_56] : memref<968x128xf32, #tpu.memory_space<vmem>>, vector<22x128xf32>
    %56 = arith.maximumf %54, %55 : vector<22x128xf32>
    %c198_57 = arith.constant 198 : index
    %c0_58 = arith.constant 0 : index
    %57 = vector.load %arg17[%c198_57, %c0_58] : memref<492x128xf32, #tpu.memory_space<vmem>>, vector<22x128xf32>
    tpu.vector_store %arg17[%c198_57, %c0_58], %56 {strides = array<i32>} : memref<492x128xf32, #tpu.memory_space<vmem>>, vector<22x128xf32>,
    %c440 = arith.constant 440 : index
    %c0_59 = arith.constant 0 : index
    %58 = vector.load %arg16[%c440, %c0_59] : memref<968x128xf32, #tpu.memory_space<vmem>>, vector<22x128xf32>
    %c462 = arith.constant 462 : index
    %c0_60 = arith.constant 0 : index
    %59 = vector.load %arg16[%c462, %c0_60] : memref<968x128xf32, #tpu.memory_space<vmem>>, vector<22x128xf32>
    %60 = arith.maximumf %58, %59 : vector<22x128xf32>
    %c220_61 = arith.constant 220 : index
    %c0_62 = arith.constant 0 : index
    %61 = vector.load %arg17[%c220_61, %c0_62] : memref<492x128xf32, #tpu.memory_space<vmem>>, vector<22x128xf32>
    tpu.vector_store %arg17[%c220_61, %c0_62], %60 {strides = array<i32>} : memref<492x128xf32, #tpu.memory_space<vmem>>, vector<22x128xf32>,
    %c484_63 = arith.constant 484 : index
    %c0_64 = arith.constant 0 : index
    %62 = vector.load %arg16[%c484_63, %c0_64] : memref<968x128xf32, #tpu.memory_space<vmem>>, vector<22x128xf32>
    %c506 = arith.constant 506 : index
    %c0_65 = arith.constant 0 : index
    %63 = vector.load %arg16[%c506, %c0_65] : memref<968x128xf32, #tpu.memory_space<vmem>>, vector<22x128xf32>
    %64 = arith.maximumf %62, %63 : vector<22x128xf32>
    %c242_66 = arith.constant 242 : index
    %c0_67 = arith.constant 0 : index
    %65 = vector.load %arg17[%c242_66, %c0_67] : memref<492x128xf32, #tpu.memory_space<vmem>>, vector<22x128xf32>
    tpu.vector_store %arg17[%c242_66, %c0_67], %64 {strides = array<i32>} : memref<492x128xf32, #tpu.memory_space<vmem>>, vector<22x128xf32>,
    %c528 = arith.constant 528 : index
    %c0_68 = arith.constant 0 : index
    %66 = vector.load %arg16[%c528, %c0_68] : memref<968x128xf32, #tpu.memory_space<vmem>>, vector<22x128xf32>
    %c550 = arith.constant 550 : index
    %c0_69 = arith.constant 0 : index
    %67 = vector.load %arg16[%c550, %c0_69] : memref<968x128xf32, #tpu.memory_space<vmem>>, vector<22x128xf32>
    %68 = arith.maximumf %66, %67 : vector<22x128xf32>
    %c264_70 = arith.constant 264 : index
    %c0_71 = arith.constant 0 : index
    %69 = vector.load %arg17[%c264_70, %c0_71] : memref<492x128xf32, #tpu.memory_space<vmem>>, vector<22x128xf32>
    tpu.vector_store %arg17[%c264_70, %c0_71], %68 {strides = array<i32>} : memref<492x128xf32, #tpu.memory_space<vmem>>, vector<22x128xf32>,
    %c572 = arith.constant 572 : index
    %c0_72 = arith.constant 0 : index
    %70 = vector.load %arg16[%c572, %c0_72] : memref<968x128xf32, #tpu.memory_space<vmem>>, vector<22x128xf32>
    %c594 = arith.constant 594 : index
    %c0_73 = arith.constant 0 : index
    %71 = vector.load %arg16[%c594, %c0_73] : memref<968x128xf32, #tpu.memory_space<vmem>>, vector<22x128xf32>
    %72 = arith.maximumf %70, %71 : vector<22x128xf32>
    %c286_74 = arith.constant 286 : index
    %c0_75 = arith.constant 0 : index
    %73 = vector.load %arg17[%c286_74, %c0_75] : memref<492x128xf32, #tpu.memory_space<vmem>>, vector<22x128xf32>
    tpu.vector_store %arg17[%c286_74, %c0_75], %72 {strides = array<i32>} : memref<492x128xf32, #tpu.memory_space<vmem>>, vector<22x128xf32>,
    %c616 = arith.constant 616 : index
    %c0_76 = arith.constant 0 : index
    %74 = vector.load %arg16[%c616, %c0_76] : memref<968x128xf32, #tpu.memory_space<vmem>>, vector<22x128xf32>
    %c638 = arith.constant 638 : index
    %c0_77 = arith.constant 0 : index
    %75 = vector.load %arg16[%c638, %c0_77] : memref<968x128xf32, #tpu.memory_space<vmem>>, vector<22x128xf32>
    %76 = arith.maximumf %74, %75 : vector<22x128xf32>
    %c308_78 = arith.constant 308 : index
    %c0_79 = arith.constant 0 : index
    %77 = vector.load %arg17[%c308_78, %c0_79] : memref<492x128xf32, #tpu.memory_space<vmem>>, vector<22x128xf32>
    tpu.vector_store %arg17[%c308_78, %c0_79], %76 {strides = array<i32>} : memref<492x128xf32, #tpu.memory_space<vmem>>, vector<22x128xf32>,
    %c660 = arith.constant 660 : index
    %c0_80 = arith.constant 0 : index
    %78 = vector.load %arg16[%c660, %c0_80] : memref<968x128xf32, #tpu.memory_space<vmem>>, vector<22x128xf32>
    %c682 = arith.constant 682 : index
    %c0_81 = arith.constant 0 : index
    %79 = vector.load %arg16[%c682, %c0_81] : memref<968x128xf32, #tpu.memory_space<vmem>>, vector<22x128xf32>
    %80 = arith.maximumf %78, %79 : vector<22x128xf32>
    %c330_82 = arith.constant 330 : index
    %c0_83 = arith.constant 0 : index
    %81 = vector.load %arg17[%c330_82, %c0_83] : memref<492x128xf32, #tpu.memory_space<vmem>>, vector<22x128xf32>
    tpu.vector_store %arg17[%c330_82, %c0_83], %80 {strides = array<i32>} : memref<492x128xf32, #tpu.memory_space<vmem>>, vector<22x128xf32>,
    %c704 = arith.constant 704 : index
    %c0_84 = arith.constant 0 : index
    %82 = vector.load %arg16[%c704, %c0_84] : memref<968x128xf32, #tpu.memory_space<vmem>>, vector<22x128xf32>
    %c726 = arith.constant 726 : index
    %c0_85 = arith.constant 0 : index
    %83 = vector.load %arg16[%c726, %c0_85] : memref<968x128xf32, #tpu.memory_space<vmem>>, vector<22x128xf32>
    %84 = arith.maximumf %82, %83 : vector<22x128xf32>
    %c352_86 = arith.constant 352 : index
    %c0_87 = arith.constant 0 : index
    %85 = vector.load %arg17[%c352_86, %c0_87] : memref<492x128xf32, #tpu.memory_space<vmem>>, vector<22x128xf32>
    tpu.vector_store %arg17[%c352_86, %c0_87], %84 {strides = array<i32>} : memref<492x128xf32, #tpu.memory_space<vmem>>, vector<22x128xf32>,
    %c748 = arith.constant 748 : index
    %c0_88 = arith.constant 0 : index
    %86 = vector.load %arg16[%c748, %c0_88] : memref<968x128xf32, #tpu.memory_space<vmem>>, vector<22x128xf32>
    %c770 = arith.constant 770 : index
    %c0_89 = arith.constant 0 : index
    %87 = vector.load %arg16[%c770, %c0_89] : memref<968x128xf32, #tpu.memory_space<vmem>>, vector<22x128xf32>
    %88 = arith.maximumf %86, %87 : vector<22x128xf32>
    %c374_90 = arith.constant 374 : index
    %c0_91 = arith.constant 0 : index
    %89 = vector.load %arg17[%c374_90, %c0_91] : memref<492x128xf32, #tpu.memory_space<vmem>>, vector<22x128xf32>
    tpu.vector_store %arg17[%c374_90, %c0_91], %88 {strides = array<i32>} : memref<492x128xf32, #tpu.memory_space<vmem>>, vector<22x128xf32>,
    %c792 = arith.constant 792 : index
    %c0_92 = arith.constant 0 : index
    %90 = vector.load %arg16[%c792, %c0_92] : memref<968x128xf32, #tpu.memory_space<vmem>>, vector<22x128xf32>
    %c814 = arith.constant 814 : index
    %c0_93 = arith.constant 0 : index
    %91 = vector.load %arg16[%c814, %c0_93] : memref<968x128xf32, #tpu.memory_space<vmem>>, vector<22x128xf32>
    %92 = arith.maximumf %90, %91 : vector<22x128xf32>
    %c396_94 = arith.constant 396 : index
    %c0_95 = arith.constant 0 : index
    %93 = vector.load %arg17[%c396_94, %c0_95] : memref<492x128xf32, #tpu.memory_space<vmem>>, vector<22x128xf32>
    tpu.vector_store %arg17[%c396_94, %c0_95], %92 {strides = array<i32>} : memref<492x128xf32, #tpu.memory_space<vmem>>, vector<22x128xf32>,
    %c836 = arith.constant 836 : index
    %c0_96 = arith.constant 0 : index
    %94 = vector.load %arg16[%c836, %c0_96] : memref<968x128xf32, #tpu.memory_space<vmem>>, vector<22x128xf32>
    %c858 = arith.constant 858 : index
    %c0_97 = arith.constant 0 : index
    %95 = vector.load %arg16[%c858, %c0_97] : memref<968x128xf32, #tpu.memory_space<vmem>>, vector<22x128xf32>
    %96 = arith.maximumf %94, %95 : vector<22x128xf32>
    %c418_98 = arith.constant 418 : index
    %c0_99 = arith.constant 0 : index
    %97 = vector.load %arg17[%c418_98, %c0_99] : memref<492x128xf32, #tpu.memory_space<vmem>>, vector<22x128xf32>
    tpu.vector_store %arg17[%c418_98, %c0_99], %96 {strides = array<i32>} : memref<492x128xf32, #tpu.memory_space<vmem>>, vector<22x128xf32>,
    %c880 = arith.constant 880 : index
    %c0_100 = arith.constant 0 : index
    %98 = vector.load %arg16[%c880, %c0_100] : memref<968x128xf32, #tpu.memory_space<vmem>>, vector<22x128xf32>
    %c902 = arith.constant 902 : index
    %c0_101 = arith.constant 0 : index
    %99 = vector.load %arg16[%c902, %c0_101] : memref<968x128xf32, #tpu.memory_space<vmem>>, vector<22x128xf32>
    %100 = arith.maximumf %98, %99 : vector<22x128xf32>
    %c440_102 = arith.constant 440 : index
    %c0_103 = arith.constant 0 : index
    %101 = vector.load %arg17[%c440_102, %c0_103] : memref<492x128xf32, #tpu.memory_space<vmem>>, vector<22x128xf32>
    tpu.vector_store %arg17[%c440_102, %c0_103], %100 {strides = array<i32>} : memref<492x128xf32, #tpu.memory_space<vmem>>, vector<22x128xf32>,
    %c924 = arith.constant 924 : index
    %c0_104 = arith.constant 0 : index
    %102 = vector.load %arg16[%c924, %c0_104] : memref<968x128xf32, #tpu.memory_space<vmem>>, vector<22x128xf32>
    %c946 = arith.constant 946 : index
    %c0_105 = arith.constant 0 : index
    %103 = vector.load %arg16[%c946, %c0_105] : memref<968x128xf32, #tpu.memory_space<vmem>>, vector<22x128xf32>
    %104 = arith.maximumf %102, %103 : vector<22x128xf32>
    %c462_106 = arith.constant 462 : index
    %c0_107 = arith.constant 0 : index
    %105 = vector.load %arg17[%c462_106, %c0_107] : memref<492x128xf32, #tpu.memory_space<vmem>>, vector<22x128xf32>
    tpu.vector_store %arg17[%c462_106, %c0_107], %104 {strides = array<i32>} : memref<492x128xf32, #tpu.memory_space<vmem>>, vector<22x128xf32>,
    %cst_108 = arith.constant 0.000000e+00 : f32
    %106 = vector.broadcast %cst_108 : f32 to vector<440x128xf32>
    %c0_109 = arith.constant 0 : index
    %c0_110 = arith.constant 0 : index
    %107 = vector.load %arg17[%c0_109, %c0_110] : memref<492x128xf32, #tpu.memory_space<vmem>>, vector<440x128xf32>
    %108 = arith.truncf %107 : vector<440x128xf32> to vector<440x128xbf16>
    %c0_111 = arith.constant 0 : index
    %c0_112 = arith.constant 0 : index
    %c0_113 = arith.constant 0 : index
    %c0_114 = arith.constant 0 : index
    %109 = vector.load %arg4[%c0_111, %c0_112, %c0_113, %c0_114] : memref<3x3x128x128xbf16, #tpu.memory_space<vmem>>, vector<1x1x128x128xbf16>
    %110 = vector.shape_cast %109 : vector<1x1x128x128xbf16> to vector<128x128xbf16>
    %cst_115 = arith.constant dense<0.000000e+00> : vector<440x128xf32>
    %111 = tpu.matmul %108, %110, %cst_115 {dimension_numbers = #tpu.dot_dimension_numbers<[1], [0], [0], [1], [0, 0, 1, 1], [], []>} : vector<440x128xbf16>, vector<128x128xbf16>, vector<440x128xf32> -> vector<440x128xf32>
    %112 = arith.addf %106, %111 : vector<440x128xf32>
    %c1_116 = arith.constant 1 : index
    %c0_117 = arith.constant 0 : index
    %113 = vector.load %arg17[%c1_116, %c0_117] : memref<492x128xf32, #tpu.memory_space<vmem>>, vector<440x128xf32>
    %114 = arith.truncf %113 : vector<440x128xf32> to vector<440x128xbf16>
    %c0_118 = arith.constant 0 : index
    %c1_119 = arith.constant 1 : index
    %c0_120 = arith.constant 0 : index
    %c0_121 = arith.constant 0 : index
    %115 = vector.load %arg4[%c0_118, %c1_119, %c0_120, %c0_121] : memref<3x3x128x128xbf16, #tpu.memory_space<vmem>>, vector<1x1x128x128xbf16>
    %116 = vector.shape_cast %115 : vector<1x1x128x128xbf16> to vector<128x128xbf16>
    %cst_122 = arith.constant dense<0.000000e+00> : vector<440x128xf32>
    %117 = tpu.matmul %114, %116, %cst_122 {dimension_numbers = #tpu.dot_dimension_numbers<[1], [0], [0], [1], [0, 0, 1, 1], [], []>} : vector<440x128xbf16>, vector<128x128xbf16>, vector<440x128xf32> -> vector<440x128xf32>
    %118 = arith.addf %112, %117 : vector<440x128xf32>
    %c2 = arith.constant 2 : index
    %c0_123 = arith.constant 0 : index
    %119 = vector.load %arg17[%c2, %c0_123] : memref<492x128xf32, #tpu.memory_space<vmem>>, vector<440x128xf32>
    %120 = arith.truncf %119 : vector<440x128xf32> to vector<440x128xbf16>
    %c0_124 = arith.constant 0 : index
    %c2_125 = arith.constant 2 : index
    %c0_126 = arith.constant 0 : index
    %c0_127 = arith.constant 0 : index
    %121 = vector.load %arg4[%c0_124, %c2_125, %c0_126, %c0_127] : memref<3x3x128x128xbf16, #tpu.memory_space<vmem>>, vector<1x1x128x128xbf16>
    %122 = vector.shape_cast %121 : vector<1x1x128x128xbf16> to vector<128x128xbf16>
    %cst_128 = arith.constant dense<0.000000e+00> : vector<440x128xf32>
    %123 = tpu.matmul %120, %122, %cst_128 {dimension_numbers = #tpu.dot_dimension_numbers<[1], [0], [0], [1], [0, 0, 1, 1], [], []>} : vector<440x128xbf16>, vector<128x128xbf16>, vector<440x128xf32> -> vector<440x128xf32>
    %124 = arith.addf %118, %123 : vector<440x128xf32>
    %c22_129 = arith.constant 22 : index
    %c0_130 = arith.constant 0 : index
    %125 = vector.load %arg17[%c22_129, %c0_130] : memref<492x128xf32, #tpu.memory_space<vmem>>, vector<440x128xf32>
    %126 = arith.truncf %125 : vector<440x128xf32> to vector<440x128xbf16>
    %c1_131 = arith.constant 1 : index
    %c0_132 = arith.constant 0 : index
    %c0_133 = arith.constant 0 : index
    %c0_134 = arith.constant 0 : index
    %127 = vector.load %arg4[%c1_131, %c0_132, %c0_133, %c0_134] : memref<3x3x128x128xbf16, #tpu.memory_space<vmem>>, vector<1x1x128x128xbf16>
    %128 = vector.shape_cast %127 : vector<1x1x128x128xbf16> to vector<128x128xbf16>
    %cst_135 = arith.constant dense<0.000000e+00> : vector<440x128xf32>
    %129 = tpu.matmul %126, %128, %cst_135 {dimension_numbers = #tpu.dot_dimension_numbers<[1], [0], [0], [1], [0, 0, 1, 1], [], []>} : vector<440x128xbf16>, vector<128x128xbf16>, vector<440x128xf32> -> vector<440x128xf32>
    %130 = arith.addf %124, %129 : vector<440x128xf32>
    %c23 = arith.constant 23 : index
    %c0_136 = arith.constant 0 : index
    %131 = vector.load %arg17[%c23, %c0_136] : memref<492x128xf32, #tpu.memory_space<vmem>>, vector<440x128xf32>
    %132 = arith.truncf %131 : vector<440x128xf32> to vector<440x128xbf16>
    %c1_137 = arith.constant 1 : index
    %c1_138 = arith.constant 1 : index
    %c0_139 = arith.constant 0 : index
    %c0_140 = arith.constant 0 : index
    %133 = vector.load %arg4[%c1_137, %c1_138, %c0_139, %c0_140] : memref<3x3x128x128xbf16, #tpu.memory_space<vmem>>, vector<1x1x128x128xbf16>
    %134 = vector.shape_cast %133 : vector<1x1x128x128xbf16> to vector<128x128xbf16>
    %cst_141 = arith.constant dense<0.000000e+00> : vector<440x128xf32>
    %135 = tpu.matmul %132, %134, %cst_141 {dimension_numbers = #tpu.dot_dimension_numbers<[1], [0], [0], [1], [0, 0, 1, 1], [], []>} : vector<440x128xbf16>, vector<128x128xbf16>, vector<440x128xf32> -> vector<440x128xf32>
    %136 = arith.addf %130, %135 : vector<440x128xf32>
    %c24 = arith.constant 24 : index
    %c0_142 = arith.constant 0 : index
    %137 = vector.load %arg17[%c24, %c0_142] : memref<492x128xf32, #tpu.memory_space<vmem>>, vector<440x128xf32>
    %138 = arith.truncf %137 : vector<440x128xf32> to vector<440x128xbf16>
    %c1_143 = arith.constant 1 : index
    %c2_144 = arith.constant 2 : index
    %c0_145 = arith.constant 0 : index
    %c0_146 = arith.constant 0 : index
    %139 = vector.load %arg4[%c1_143, %c2_144, %c0_145, %c0_146] : memref<3x3x128x128xbf16, #tpu.memory_space<vmem>>, vector<1x1x128x128xbf16>
    %140 = vector.shape_cast %139 : vector<1x1x128x128xbf16> to vector<128x128xbf16>
    %cst_147 = arith.constant dense<0.000000e+00> : vector<440x128xf32>
    %141 = tpu.matmul %138, %140, %cst_147 {dimension_numbers = #tpu.dot_dimension_numbers<[1], [0], [0], [1], [0, 0, 1, 1], [], []>} : vector<440x128xbf16>, vector<128x128xbf16>, vector<440x128xf32> -> vector<440x128xf32>
    %142 = arith.addf %136, %141 : vector<440x128xf32>
    %c44_148 = arith.constant 44 : index
    %c0_149 = arith.constant 0 : index
    %143 = vector.load %arg17[%c44_148, %c0_149] : memref<492x128xf32, #tpu.memory_space<vmem>>, vector<440x128xf32>
    %144 = arith.truncf %143 : vector<440x128xf32> to vector<440x128xbf16>
    %c2_150 = arith.constant 2 : index
    %c0_151 = arith.constant 0 : index
    %c0_152 = arith.constant 0 : index
    %c0_153 = arith.constant 0 : index
    %145 = vector.load %arg4[%c2_150, %c0_151, %c0_152, %c0_153] : memref<3x3x128x128xbf16, #tpu.memory_space<vmem>>, vector<1x1x128x128xbf16>
    %146 = vector.shape_cast %145 : vector<1x1x128x128xbf16> to vector<128x128xbf16>
    %cst_154 = arith.constant dense<0.000000e+00> : vector<440x128xf32>
    %147 = tpu.matmul %144, %146, %cst_154 {dimension_numbers = #tpu.dot_dimension_numbers<[1], [0], [0], [1], [0, 0, 1, 1], [], []>} : vector<440x128xbf16>, vector<128x128xbf16>, vector<440x128xf32> -> vector<440x128xf32>
    %148 = arith.addf %142, %147 : vector<440x128xf32>
    %c45 = arith.constant 45 : index
    %c0_155 = arith.constant 0 : index
    %149 = vector.load %arg17[%c45, %c0_155] : memref<492x128xf32, #tpu.memory_space<vmem>>, vector<440x128xf32>
    %150 = arith.truncf %149 : vector<440x128xf32> to vector<440x128xbf16>
    %c2_156 = arith.constant 2 : index
    %c1_157 = arith.constant 1 : index
    %c0_158 = arith.constant 0 : index
    %c0_159 = arith.constant 0 : index
    %151 = vector.load %arg4[%c2_156, %c1_157, %c0_158, %c0_159] : memref<3x3x128x128xbf16, #tpu.memory_space<vmem>>, vector<1x1x128x128xbf16>
    %152 = vector.shape_cast %151 : vector<1x1x128x128xbf16> to vector<128x128xbf16>
    %cst_160 = arith.constant dense<0.000000e+00> : vector<440x128xf32>
    %153 = tpu.matmul %150, %152, %cst_160 {dimension_numbers = #tpu.dot_dimension_numbers<[1], [0], [0], [1], [0, 0, 1, 1], [], []>} : vector<440x128xbf16>, vector<128x128xbf16>, vector<440x128xf32> -> vector<440x128xf32>
    %154 = arith.addf %148, %153 : vector<440x128xf32>
    %c46 = arith.constant 46 : index
    %c0_161 = arith.constant 0 : index
    %155 = vector.load %arg17[%c46, %c0_161] : memref<492x128xf32, #tpu.memory_space<vmem>>, vector<440x128xf32>
    %156 = arith.truncf %155 : vector<440x128xf32> to vector<440x128xbf16>
    %c2_162 = arith.constant 2 : index
    %c2_163 = arith.constant 2 : index
    %c0_164 = arith.constant 0 : index
    %c0_165 = arith.constant 0 : index
    %157 = vector.load %arg4[%c2_162, %c2_163, %c0_164, %c0_165] : memref<3x3x128x128xbf16, #tpu.memory_space<vmem>>, vector<1x1x128x128xbf16>
    %158 = vector.shape_cast %157 : vector<1x1x128x128xbf16> to vector<128x128xbf16>
    %cst_166 = arith.constant dense<0.000000e+00> : vector<440x128xf32>
    %159 = tpu.matmul %156, %158, %cst_166 {dimension_numbers = #tpu.dot_dimension_numbers<[1], [0], [0], [1], [0, 0, 1, 1], [], []>} : vector<440x128xbf16>, vector<128x128xbf16>, vector<440x128xf32> -> vector<440x128xf32>
    %160 = arith.addf %154, %159 : vector<440x128xf32>
    %c0_167 = arith.constant 0 : index
    %c0_168 = arith.constant 0 : index
    %161 = vector.load %arg5[%c0_167, %c0_168] : memref<1x128xf32, #tpu.memory_space<vmem>>, vector<1x128xf32>
    %162 = vector.broadcast %161 : vector<1x128xf32> to vector<440x128xf32>
    %163 = arith.addf %160, %162 : vector<440x128xf32>
    %cst_169 = arith.constant 0.000000e+00 : f32
    %164 = vector.broadcast %cst_169 : f32 to vector<440x128xf32>
    %165 = arith.maximumf %163, %164 : vector<440x128xf32>
    %c0_170 = arith.constant 0 : index
    %c0_171 = arith.constant 0 : index
    %166 = vector.load %arg18[%c0_170, %c0_171] : memref<440x128xf32, #tpu.memory_space<vmem>>, vector<440x128xf32>
    tpu.vector_store %arg18[%c0_170, %c0_171], %165 {strides = array<i32>} : memref<440x128xf32, #tpu.memory_space<vmem>>, vector<440x128xf32>,
    %c0_172 = arith.constant 0 : index
    %c0_173 = arith.constant 0 : index
    %167 = tpu.strided_load %arg18[%c0_172, %c0_173] {strides = array<i32: 2, 1>} : memref<440x128xf32, #tpu.memory_space<vmem>>, vector<220x128xf32>
    %c1_174 = arith.constant 1 : index
    %c0_175 = arith.constant 0 : index
    %168 = tpu.strided_load %arg18[%c1_174, %c0_175] {strides = array<i32: 2, 1>} : memref<440x128xf32, #tpu.memory_space<vmem>>, vector<220x128xf32>
    %169 = arith.maximumf %167, %168 : vector<220x128xf32>
    %c0_176 = arith.constant 0 : index
    %c0_177 = arith.constant 0 : index
    %170 = vector.load %arg19[%c0_176, %c0_177] : memref<220x128xf32, #tpu.memory_space<vmem>>, vector<220x128xf32>
    tpu.vector_store %arg19[%c0_176, %c0_177], %169 {strides = array<i32>} : memref<220x128xf32, #tpu.memory_space<vmem>>, vector<220x128xf32>,
    %c0_178 = arith.constant 0 : index
    %c0_179 = arith.constant 0 : index
    %171 = vector.load %arg19[%c0_178, %c0_179] : memref<220x128xf32, #tpu.memory_space<vmem>>, vector<11x128xf32>
    %c11 = arith.constant 11 : index
    %c0_180 = arith.constant 0 : index
    %172 = vector.load %arg19[%c11, %c0_180] : memref<220x128xf32, #tpu.memory_space<vmem>>, vector<11x128xf32>
    %173 = arith.maximumf %171, %172 : vector<11x128xf32>
    %174 = vector.extract_strided_slice %173 {offsets = [0, 0], sizes = [10, 128], strides = [1, 1]} : vector<11x128xf32> to vector<10x128xf32>
    %c0_181 = arith.constant 0 : index
    %c0_182 = arith.constant 0 : index
    %175 = vector.load %arg20[%c0_181, %c0_182] : memref<108x128xf32, #tpu.memory_space<vmem>>, vector<10x128xf32>
    tpu.vector_store %arg20[%c0_181, %c0_182], %174 {strides = array<i32>} : memref<108x128xf32, #tpu.memory_space<vmem>>, vector<10x128xf32>,
    %c22_183 = arith.constant 22 : index
    %c0_184 = arith.constant 0 : index
    %176 = vector.load %arg19[%c22_183, %c0_184] : memref<220x128xf32, #tpu.memory_space<vmem>>, vector<11x128xf32>
    %c33 = arith.constant 33 : index
    %c0_185 = arith.constant 0 : index
    %177 = vector.load %arg19[%c33, %c0_185] : memref<220x128xf32, #tpu.memory_space<vmem>>, vector<11x128xf32>
    %178 = arith.maximumf %176, %177 : vector<11x128xf32>
    %179 = vector.extract_strided_slice %178 {offsets = [0, 0], sizes = [10, 128], strides = [1, 1]} : vector<11x128xf32> to vector<10x128xf32>
    %c10 = arith.constant 10 : index
    %c0_186 = arith.constant 0 : index
    %180 = vector.load %arg20[%c10, %c0_186] : memref<108x128xf32, #tpu.memory_space<vmem>>, vector<10x128xf32>
    tpu.vector_store %arg20[%c10, %c0_186], %179 {strides = array<i32>} : memref<108x128xf32, #tpu.memory_space<vmem>>, vector<10x128xf32>,
    %c44_187 = arith.constant 44 : index
    %c0_188 = arith.constant 0 : index
    %181 = vector.load %arg19[%c44_187, %c0_188] : memref<220x128xf32, #tpu.memory_space<vmem>>, vector<11x128xf32>
    %c55 = arith.constant 55 : index
    %c0_189 = arith.constant 0 : index
    %182 = vector.load %arg19[%c55, %c0_189] : memref<220x128xf32, #tpu.memory_space<vmem>>, vector<11x128xf32>
    %183 = arith.maximumf %181, %182 : vector<11x128xf32>
    %184 = vector.extract_strided_slice %183 {offsets = [0, 0], sizes = [10, 128], strides = [1, 1]} : vector<11x128xf32> to vector<10x128xf32>
    %c20 = arith.constant 20 : index
    %c0_190 = arith.constant 0 : index
    %185 = vector.load %arg20[%c20, %c0_190] : memref<108x128xf32, #tpu.memory_space<vmem>>, vector<10x128xf32>
    tpu.vector_store %arg20[%c20, %c0_190], %184 {strides = array<i32>} : memref<108x128xf32, #tpu.memory_space<vmem>>, vector<10x128xf32>,
    %c66_191 = arith.constant 66 : index
    %c0_192 = arith.constant 0 : index
    %186 = vector.load %arg19[%c66_191, %c0_192] : memref<220x128xf32, #tpu.memory_space<vmem>>, vector<11x128xf32>
    %c77 = arith.constant 77 : index
    %c0_193 = arith.constant 0 : index
    %187 = vector.load %arg19[%c77, %c0_193] : memref<220x128xf32, #tpu.memory_space<vmem>>, vector<11x128xf32>
    %188 = arith.maximumf %186, %187 : vector<11x128xf32>
    %189 = vector.extract_strided_slice %188 {offsets = [0, 0], sizes = [10, 128], strides = [1, 1]} : vector<11x128xf32> to vector<10x128xf32>
    %c30 = arith.constant 30 : index
    %c0_194 = arith.constant 0 : index
    %190 = vector.load %arg20[%c30, %c0_194] : memref<108x128xf32, #tpu.memory_space<vmem>>, vector<10x128xf32>
    tpu.vector_store %arg20[%c30, %c0_194], %189 {strides = array<i32>} : memref<108x128xf32, #tpu.memory_space<vmem>>, vector<10x128xf32>,
    %c88_195 = arith.constant 88 : index
    %c0_196 = arith.constant 0 : index
    %191 = vector.load %arg19[%c88_195, %c0_196] : memref<220x128xf32, #tpu.memory_space<vmem>>, vector<11x128xf32>
    %c99 = arith.constant 99 : index
    %c0_197 = arith.constant 0 : index
    %192 = vector.load %arg19[%c99, %c0_197] : memref<220x128xf32, #tpu.memory_space<vmem>>, vector<11x128xf32>
    %193 = arith.maximumf %191, %192 : vector<11x128xf32>
    %194 = vector.extract_strided_slice %193 {offsets = [0, 0], sizes = [10, 128], strides = [1, 1]} : vector<11x128xf32> to vector<10x128xf32>
    %c40 = arith.constant 40 : index
    %c0_198 = arith.constant 0 : index
    %195 = vector.load %arg20[%c40, %c0_198] : memref<108x128xf32, #tpu.memory_space<vmem>>, vector<10x128xf32>
    tpu.vector_store %arg20[%c40, %c0_198], %194 {strides = array<i32>} : memref<108x128xf32, #tpu.memory_space<vmem>>, vector<10x128xf32>,
    %c110_199 = arith.constant 110 : index
    %c0_200 = arith.constant 0 : index
    %196 = vector.load %arg19[%c110_199, %c0_200] : memref<220x128xf32, #tpu.memory_space<vmem>>, vector<11x128xf32>
    %c121 = arith.constant 121 : index
    %c0_201 = arith.constant 0 : index
    %197 = vector.load %arg19[%c121, %c0_201] : memref<220x128xf32, #tpu.memory_space<vmem>>, vector<11x128xf32>
    %198 = arith.maximumf %196, %197 : vector<11x128xf32>
    %199 = vector.extract_strided_slice %198 {offsets = [0, 0], sizes = [10, 128], strides = [1, 1]} : vector<11x128xf32> to vector<10x128xf32>
    %c50 = arith.constant 50 : index
    %c0_202 = arith.constant 0 : index
    %200 = vector.load %arg20[%c50, %c0_202] : memref<108x128xf32, #tpu.memory_space<vmem>>, vector<10x128xf32>
    tpu.vector_store %arg20[%c50, %c0_202], %199 {strides = array<i32>} : memref<108x128xf32, #tpu.memory_space<vmem>>, vector<10x128xf32>,
    %c132_203 = arith.constant 132 : index
    %c0_204 = arith.constant 0 : index
    %201 = vector.load %arg19[%c132_203, %c0_204] : memref<220x128xf32, #tpu.memory_space<vmem>>, vector<11x128xf32>
    %c143 = arith.constant 143 : index
    %c0_205 = arith.constant 0 : index
    %202 = vector.load %arg19[%c143, %c0_205] : memref<220x128xf32, #tpu.memory_space<vmem>>, vector<11x128xf32>
    %203 = arith.maximumf %201, %202 : vector<11x128xf32>
    %204 = vector.extract_strided_slice %203 {offsets = [0, 0], sizes = [10, 128], strides = [1, 1]} : vector<11x128xf32> to vector<10x128xf32>
    %c60 = arith.constant 60 : index
    %c0_206 = arith.constant 0 : index
    %205 = vector.load %arg20[%c60, %c0_206] : memref<108x128xf32, #tpu.memory_space<vmem>>, vector<10x128xf32>
    tpu.vector_store %arg20[%c60, %c0_206], %204 {strides = array<i32>} : memref<108x128xf32, #tpu.memory_space<vmem>>, vector<10x128xf32>,
    %c154_207 = arith.constant 154 : index
    %c0_208 = arith.constant 0 : index
    %206 = vector.load %arg19[%c154_207, %c0_208] : memref<220x128xf32, #tpu.memory_space<vmem>>, vector<11x128xf32>
    %c165 = arith.constant 165 : index
    %c0_209 = arith.constant 0 : index
    %207 = vector.load %arg19[%c165, %c0_209] : memref<220x128xf32, #tpu.memory_space<vmem>>, vector<11x128xf32>
    %208 = arith.maximumf %206, %207 : vector<11x128xf32>
    %209 = vector.extract_strided_slice %208 {offsets = [0, 0], sizes = [10, 128], strides = [1, 1]} : vector<11x128xf32> to vector<10x128xf32>
    %c70 = arith.constant 70 : index
    %c0_210 = arith.constant 0 : index
    %210 = vector.load %arg20[%c70, %c0_210] : memref<108x128xf32, #tpu.memory_space<vmem>>, vector<10x128xf32>
    tpu.vector_store %arg20[%c70, %c0_210], %209 {strides = array<i32>} : memref<108x128xf32, #tpu.memory_space<vmem>>, vector<10x128xf32>,
    %c176_211 = arith.constant 176 : index
    %c0_212 = arith.constant 0 : index
    %211 = vector.load %arg19[%c176_211, %c0_212] : memref<220x128xf32, #tpu.memory_space<vmem>>, vector<11x128xf32>
    %c187 = arith.constant 187 : index
    %c0_213 = arith.constant 0 : index
    %212 = vector.load %arg19[%c187, %c0_213] : memref<220x128xf32, #tpu.memory_space<vmem>>, vector<11x128xf32>
    %213 = arith.maximumf %211, %212 : vector<11x128xf32>
    %214 = vector.extract_strided_slice %213 {offsets = [0, 0], sizes = [10, 128], strides = [1, 1]} : vector<11x128xf32> to vector<10x128xf32>
    %c80 = arith.constant 80 : index
    %c0_214 = arith.constant 0 : index
    %215 = vector.load %arg20[%c80, %c0_214] : memref<108x128xf32, #tpu.memory_space<vmem>>, vector<10x128xf32>
    tpu.vector_store %arg20[%c80, %c0_214], %214 {strides = array<i32>} : memref<108x128xf32, #tpu.memory_space<vmem>>, vector<10x128xf32>,
    %c198_215 = arith.constant 198 : index
    %c0_216 = arith.constant 0 : index
    %216 = vector.load %arg19[%c198_215, %c0_216] : memref<220x128xf32, #tpu.memory_space<vmem>>, vector<11x128xf32>
    %c209 = arith.constant 209 : index
    %c0_217 = arith.constant 0 : index
    %217 = vector.load %arg19[%c209, %c0_217] : memref<220x128xf32, #tpu.memory_space<vmem>>, vector<11x128xf32>
    %218 = arith.maximumf %216, %217 : vector<11x128xf32>
    %219 = vector.extract_strided_slice %218 {offsets = [0, 0], sizes = [10, 128], strides = [1, 1]} : vector<11x128xf32> to vector<10x128xf32>
    %c90 = arith.constant 90 : index
    %c0_218 = arith.constant 0 : index
    %220 = vector.load %arg20[%c90, %c0_218] : memref<108x128xf32, #tpu.memory_space<vmem>>, vector<10x128xf32>
    tpu.vector_store %arg20[%c90, %c0_218], %219 {strides = array<i32>} : memref<108x128xf32, #tpu.memory_space<vmem>>, vector<10x128xf32>,
    %cst_219 = arith.constant 0.000000e+00 : f32
    %221 = vector.broadcast %cst_219 : f32 to vector<80x128xf32>
    %c0_220 = arith.constant 0 : index
    %c0_221 = arith.constant 0 : index
    %222 = vector.load %arg20[%c0_220, %c0_221] : memref<108x128xf32, #tpu.memory_space<vmem>>, vector<80x128xf32>
    %223 = arith.truncf %222 : vector<80x128xf32> to vector<80x128xbf16>
    %c0_222 = arith.constant 0 : index
    %c0_223 = arith.constant 0 : index
    %c0_224 = arith.constant 0 : index
    %c0_225 = arith.constant 0 : index
    %224 = vector.load %arg6[%c0_222, %c0_223, %c0_224, %c0_225] : memref<3x3x128x128xbf16, #tpu.memory_space<vmem>>, vector<1x1x128x128xbf16>
    %225 = vector.shape_cast %224 : vector<1x1x128x128xbf16> to vector<128x128xbf16>
    %cst_226 = arith.constant dense<0.000000e+00> : vector<80x128xf32>
    %226 = tpu.matmul %223, %225, %cst_226 {dimension_numbers = #tpu.dot_dimension_numbers<[1], [0], [0], [1], [0, 0, 1, 1], [], []>} : vector<80x128xbf16>, vector<128x128xbf16>, vector<80x128xf32> -> vector<80x128xf32>
    %227 = arith.addf %221, %226 : vector<80x128xf32>
    %c1_227 = arith.constant 1 : index
    %c0_228 = arith.constant 0 : index
    %228 = vector.load %arg20[%c1_227, %c0_228] : memref<108x128xf32, #tpu.memory_space<vmem>>, vector<80x128xf32>
    %229 = arith.truncf %228 : vector<80x128xf32> to vector<80x128xbf16>
    %c0_229 = arith.constant 0 : index
    %c1_230 = arith.constant 1 : index
    %c0_231 = arith.constant 0 : index
    %c0_232 = arith.constant 0 : index
    %230 = vector.load %arg6[%c0_229, %c1_230, %c0_231, %c0_232] : memref<3x3x128x128xbf16, #tpu.memory_space<vmem>>, vector<1x1x128x128xbf16>
    %231 = vector.shape_cast %230 : vector<1x1x128x128xbf16> to vector<128x128xbf16>
    %cst_233 = arith.constant dense<0.000000e+00> : vector<80x128xf32>
    %232 = tpu.matmul %229, %231, %cst_233 {dimension_numbers = #tpu.dot_dimension_numbers<[1], [0], [0], [1], [0, 0, 1, 1], [], []>} : vector<80x128xbf16>, vector<128x128xbf16>, vector<80x128xf32> -> vector<80x128xf32>
    %233 = arith.addf %227, %232 : vector<80x128xf32>
    %c2_234 = arith.constant 2 : index
    %c0_235 = arith.constant 0 : index
    %234 = vector.load %arg20[%c2_234, %c0_235] : memref<108x128xf32, #tpu.memory_space<vmem>>, vector<80x128xf32>
    %235 = arith.truncf %234 : vector<80x128xf32> to vector<80x128xbf16>
    %c0_236 = arith.constant 0 : index
    %c2_237 = arith.constant 2 : index
    %c0_238 = arith.constant 0 : index
    %c0_239 = arith.constant 0 : index
    %236 = vector.load %arg6[%c0_236, %c2_237, %c0_238, %c0_239] : memref<3x3x128x128xbf16, #tpu.memory_space<vmem>>, vector<1x1x128x128xbf16>
    %237 = vector.shape_cast %236 : vector<1x1x128x128xbf16> to vector<128x128xbf16>
    %cst_240 = arith.constant dense<0.000000e+00> : vector<80x128xf32>
    %238 = tpu.matmul %235, %237, %cst_240 {dimension_numbers = #tpu.dot_dimension_numbers<[1], [0], [0], [1], [0, 0, 1, 1], [], []>} : vector<80x128xbf16>, vector<128x128xbf16>, vector<80x128xf32> -> vector<80x128xf32>
    %239 = arith.addf %233, %238 : vector<80x128xf32>
    %c10_241 = arith.constant 10 : index
    %c0_242 = arith.constant 0 : index
    %240 = vector.load %arg20[%c10_241, %c0_242] : memref<108x128xf32, #tpu.memory_space<vmem>>, vector<80x128xf32>
    %241 = arith.truncf %240 : vector<80x128xf32> to vector<80x128xbf16>
    %c1_243 = arith.constant 1 : index
    %c0_244 = arith.constant 0 : index
    %c0_245 = arith.constant 0 : index
    %c0_246 = arith.constant 0 : index
    %242 = vector.load %arg6[%c1_243, %c0_244, %c0_245, %c0_246] : memref<3x3x128x128xbf16, #tpu.memory_space<vmem>>, vector<1x1x128x128xbf16>
    %243 = vector.shape_cast %242 : vector<1x1x128x128xbf16> to vector<128x128xbf16>
    %cst_247 = arith.constant dense<0.000000e+00> : vector<80x128xf32>
    %244 = tpu.matmul %241, %243, %cst_247 {dimension_numbers = #tpu.dot_dimension_numbers<[1], [0], [0], [1], [0, 0, 1, 1], [], []>} : vector<80x128xbf16>, vector<128x128xbf16>, vector<80x128xf32> -> vector<80x128xf32>
    %245 = arith.addf %239, %244 : vector<80x128xf32>
    %c11_248 = arith.constant 11 : index
    %c0_249 = arith.constant 0 : index
    %246 = vector.load %arg20[%c11_248, %c0_249] : memref<108x128xf32, #tpu.memory_space<vmem>>, vector<80x128xf32>
    %247 = arith.truncf %246 : vector<80x128xf32> to vector<80x128xbf16>
    %c1_250 = arith.constant 1 : index
    %c1_251 = arith.constant 1 : index
    %c0_252 = arith.constant 0 : index
    %c0_253 = arith.constant 0 : index
    %248 = vector.load %arg6[%c1_250, %c1_251, %c0_252, %c0_253] : memref<3x3x128x128xbf16, #tpu.memory_space<vmem>>, vector<1x1x128x128xbf16>
    %249 = vector.shape_cast %248 : vector<1x1x128x128xbf16> to vector<128x128xbf16>
    %cst_254 = arith.constant dense<0.000000e+00> : vector<80x128xf32>
    %250 = tpu.matmul %247, %249, %cst_254 {dimension_numbers = #tpu.dot_dimension_numbers<[1], [0], [0], [1], [0, 0, 1, 1], [], []>} : vector<80x128xbf16>, vector<128x128xbf16>, vector<80x128xf32> -> vector<80x128xf32>
    %251 = arith.addf %245, %250 : vector<80x128xf32>
    %c12 = arith.constant 12 : index
    %c0_255 = arith.constant 0 : index
    %252 = vector.load %arg20[%c12, %c0_255] : memref<108x128xf32, #tpu.memory_space<vmem>>, vector<80x128xf32>
    %253 = arith.truncf %252 : vector<80x128xf32> to vector<80x128xbf16>
    %c1_256 = arith.constant 1 : index
    %c2_257 = arith.constant 2 : index
    %c0_258 = arith.constant 0 : index
    %c0_259 = arith.constant 0 : index
    %254 = vector.load %arg6[%c1_256, %c2_257, %c0_258, %c0_259] : memref<3x3x128x128xbf16, #tpu.memory_space<vmem>>, vector<1x1x128x128xbf16>
    %255 = vector.shape_cast %254 : vector<1x1x128x128xbf16> to vector<128x128xbf16>
    %cst_260 = arith.constant dense<0.000000e+00> : vector<80x128xf32>
    %256 = tpu.matmul %253, %255, %cst_260 {dimension_numbers = #tpu.dot_dimension_numbers<[1], [0], [0], [1], [0, 0, 1, 1], [], []>} : vector<80x128xbf16>, vector<128x128xbf16>, vector<80x128xf32> -> vector<80x128xf32>
    %257 = arith.addf %251, %256 : vector<80x128xf32>
    %c20_261 = arith.constant 20 : index
    %c0_262 = arith.constant 0 : index
    %258 = vector.load %arg20[%c20_261, %c0_262] : memref<108x128xf32, #tpu.memory_space<vmem>>, vector<80x128xf32>
    %259 = arith.truncf %258 : vector<80x128xf32> to vector<80x128xbf16>
    %c2_263 = arith.constant 2 : index
    %c0_264 = arith.constant 0 : index
    %c0_265 = arith.constant 0 : index
    %c0_266 = arith.constant 0 : index
    %260 = vector.load %arg6[%c2_263, %c0_264, %c0_265, %c0_266] : memref<3x3x128x128xbf16, #tpu.memory_space<vmem>>, vector<1x1x128x128xbf16>
    %261 = vector.shape_cast %260 : vector<1x1x128x128xbf16> to vector<128x128xbf16>
    %cst_267 = arith.constant dense<0.000000e+00> : vector<80x128xf32>
    %262 = tpu.matmul %259, %261, %cst_267 {dimension_numbers = #tpu.dot_dimension_numbers<[1], [0], [0], [1], [0, 0, 1, 1], [], []>} : vector<80x128xbf16>, vector<128x128xbf16>, vector<80x128xf32> -> vector<80x128xf32>
    %263 = arith.addf %257, %262 : vector<80x128xf32>
    %c21 = arith.constant 21 : index
    %c0_268 = arith.constant 0 : index
    %264 = vector.load %arg20[%c21, %c0_268] : memref<108x128xf32, #tpu.memory_space<vmem>>, vector<80x128xf32>
    %265 = arith.truncf %264 : vector<80x128xf32> to vector<80x128xbf16>
    %c2_269 = arith.constant 2 : index
    %c1_270 = arith.constant 1 : index
    %c0_271 = arith.constant 0 : index
    %c0_272 = arith.constant 0 : index
    %266 = vector.load %arg6[%c2_269, %c1_270, %c0_271, %c0_272] : memref<3x3x128x128xbf16, #tpu.memory_space<vmem>>, vector<1x1x128x128xbf16>
    %267 = vector.shape_cast %266 : vector<1x1x128x128xbf16> to vector<128x128xbf16>
    %cst_273 = arith.constant dense<0.000000e+00> : vector<80x128xf32>
    %268 = tpu.matmul %265, %267, %cst_273 {dimension_numbers = #tpu.dot_dimension_numbers<[1], [0], [0], [1], [0, 0, 1, 1], [], []>} : vector<80x128xbf16>, vector<128x128xbf16>, vector<80x128xf32> -> vector<80x128xf32>
    %269 = arith.addf %263, %268 : vector<80x128xf32>
    %c22_274 = arith.constant 22 : index
    %c0_275 = arith.constant 0 : index
    %270 = vector.load %arg20[%c22_274, %c0_275] : memref<108x128xf32, #tpu.memory_space<vmem>>, vector<80x128xf32>
    %271 = arith.truncf %270 : vector<80x128xf32> to vector<80x128xbf16>
    %c2_276 = arith.constant 2 : index
    %c2_277 = arith.constant 2 : index
    %c0_278 = arith.constant 0 : index
    %c0_279 = arith.constant 0 : index
    %272 = vector.load %arg6[%c2_276, %c2_277, %c0_278, %c0_279] : memref<3x3x128x128xbf16, #tpu.memory_space<vmem>>, vector<1x1x128x128xbf16>
    %273 = vector.shape_cast %272 : vector<1x1x128x128xbf16> to vector<128x128xbf16>
    %cst_280 = arith.constant dense<0.000000e+00> : vector<80x128xf32>
    %274 = tpu.matmul %271, %273, %cst_280 {dimension_numbers = #tpu.dot_dimension_numbers<[1], [0], [0], [1], [0, 0, 1, 1], [], []>} : vector<80x128xbf16>, vector<128x128xbf16>, vector<80x128xf32> -> vector<80x128xf32>
    %275 = arith.addf %269, %274 : vector<80x128xf32>
    %c0_281 = arith.constant 0 : index
    %c0_282 = arith.constant 0 : index
    %276 = vector.load %arg7[%c0_281, %c0_282] : memref<1x128xf32, #tpu.memory_space<vmem>>, vector<1x128xf32>
    %277 = vector.broadcast %276 : vector<1x128xf32> to vector<80x128xf32>
    %278 = arith.addf %275, %277 : vector<80x128xf32>
    %cst_283 = arith.constant 0.000000e+00 : f32
    %279 = vector.broadcast %cst_283 : f32 to vector<80x128xf32>
    %280 = arith.maximumf %278, %279 : vector<80x128xf32>
    %c0_284 = arith.constant 0 : index
    %c0_285 = arith.constant 0 : index
    %281 = vector.load %arg21[%c0_284, %c0_285] : memref<80x128xf32, #tpu.memory_space<vmem>>, vector<80x128xf32>
    tpu.vector_store %arg21[%c0_284, %c0_285], %280 {strides = array<i32>} : memref<80x128xf32, #tpu.memory_space<vmem>>, vector<80x128xf32>,
    %c0_286 = arith.constant 0 : index
    %c0_287 = arith.constant 0 : index
    %282 = tpu.strided_load %arg21[%c0_286, %c0_287] {strides = array<i32: 2, 1>} : memref<80x128xf32, #tpu.memory_space<vmem>>, vector<40x128xf32>
    %c1_288 = arith.constant 1 : index
    %c0_289 = arith.constant 0 : index
    %283 = tpu.strided_load %arg21[%c1_288, %c0_289] {strides = array<i32: 2, 1>} : memref<80x128xf32, #tpu.memory_space<vmem>>, vector<40x128xf32>
    %284 = arith.maximumf %282, %283 : vector<40x128xf32>
    %c0_290 = arith.constant 0 : index
    %c0_291 = arith.constant 0 : index
    %285 = vector.load %arg22[%c0_290, %c0_291] : memref<40x128xf32, #tpu.memory_space<vmem>>, vector<40x128xf32>
    tpu.vector_store %arg22[%c0_290, %c0_291], %284 {strides = array<i32>} : memref<40x128xf32, #tpu.memory_space<vmem>>, vector<40x128xf32>,
    %c0_292 = arith.constant 0 : index
    %c0_293 = arith.constant 0 : index
    %286 = vector.load %arg22[%c0_292, %c0_293] : memref<40x128xf32, #tpu.memory_space<vmem>>, vector<5x128xf32>
    %c5 = arith.constant 5 : index
    %c0_294 = arith.constant 0 : index
    %287 = vector.load %arg22[%c5, %c0_294] : memref<40x128xf32, #tpu.memory_space<vmem>>, vector<5x128xf32>
    %288 = arith.maximumf %286, %287 : vector<5x128xf32>
    %289 = vector.extract_strided_slice %288 {offsets = [0, 0], sizes = [4, 128], strides = [1, 1]} : vector<5x128xf32> to vector<4x128xf32>
    %c0_295 = arith.constant 0 : index
    %c0_296 = arith.constant 0 : index
    %290 = vector.load %arg23[%c0_295, %c0_296] : memref<16x128xf32, #tpu.memory_space<vmem>>, vector<4x128xf32>
    tpu.vector_store %arg23[%c0_295, %c0_296], %289 {strides = array<i32>} : memref<16x128xf32, #tpu.memory_space<vmem>>, vector<4x128xf32>,
    %c10_297 = arith.constant 10 : index
    %c0_298 = arith.constant 0 : index
    %291 = vector.load %arg22[%c10_297, %c0_298] : memref<40x128xf32, #tpu.memory_space<vmem>>, vector<5x128xf32>
    %c15 = arith.constant 15 : index
    %c0_299 = arith.constant 0 : index
    %292 = vector.load %arg22[%c15, %c0_299] : memref<40x128xf32, #tpu.memory_space<vmem>>, vector<5x128xf32>
    %293 = arith.maximumf %291, %292 : vector<5x128xf32>
    %294 = vector.extract_strided_slice %293 {offsets = [0, 0], sizes = [4, 128], strides = [1, 1]} : vector<5x128xf32> to vector<4x128xf32>
    %c4 = arith.constant 4 : index
    %c0_300 = arith.constant 0 : index
    %295 = vector.load %arg23[%c4, %c0_300] : memref<16x128xf32, #tpu.memory_space<vmem>>, vector<4x128xf32>
    tpu.vector_store %arg23[%c4, %c0_300], %294 {strides = array<i32>} : memref<16x128xf32, #tpu.memory_space<vmem>>, vector<4x128xf32>,
    %c20_301 = arith.constant 20 : index
    %c0_302 = arith.constant 0 : index
    %296 = vector.load %arg22[%c20_301, %c0_302] : memref<40x128xf32, #tpu.memory_space<vmem>>, vector<5x128xf32>
    %c25 = arith.constant 25 : index
    %c0_303 = arith.constant 0 : index
    %297 = vector.load %arg22[%c25, %c0_303] : memref<40x128xf32, #tpu.memory_space<vmem>>, vector<5x128xf32>
    %298 = arith.maximumf %296, %297 : vector<5x128xf32>
    %299 = vector.extract_strided_slice %298 {offsets = [0, 0], sizes = [4, 128], strides = [1, 1]} : vector<5x128xf32> to vector<4x128xf32>
    %c8 = arith.constant 8 : index
    %c0_304 = arith.constant 0 : index
    %300 = vector.load %arg23[%c8, %c0_304] : memref<16x128xf32, #tpu.memory_space<vmem>>, vector<4x128xf32>
    tpu.vector_store %arg23[%c8, %c0_304], %299 {strides = array<i32>} : memref<16x128xf32, #tpu.memory_space<vmem>>, vector<4x128xf32>,
    %c30_305 = arith.constant 30 : index
    %c0_306 = arith.constant 0 : index
    %301 = vector.load %arg22[%c30_305, %c0_306] : memref<40x128xf32, #tpu.memory_space<vmem>>, vector<5x128xf32>
    %c35 = arith.constant 35 : index
    %c0_307 = arith.constant 0 : index
    %302 = vector.load %arg22[%c35, %c0_307] : memref<40x128xf32, #tpu.memory_space<vmem>>, vector<5x128xf32>
    %303 = arith.maximumf %301, %302 : vector<5x128xf32>
    %304 = vector.extract_strided_slice %303 {offsets = [0, 0], sizes = [4, 128], strides = [1, 1]} : vector<5x128xf32> to vector<4x128xf32>
    %c12_308 = arith.constant 12 : index
    %c0_309 = arith.constant 0 : index
    %305 = vector.load %arg23[%c12_308, %c0_309] : memref<16x128xf32, #tpu.memory_space<vmem>>, vector<4x128xf32>
    tpu.vector_store %arg23[%c12_308, %c0_309], %304 {strides = array<i32>} : memref<16x128xf32, #tpu.memory_space<vmem>>, vector<4x128xf32>,
    %c0_310 = arith.constant 0 : index
    %c0_311 = arith.constant 0 : index
    %306 = vector.load %arg23[%c0_310, %c0_311] : memref<16x128xf32, #tpu.memory_space<vmem>>, vector<16x128xf32>
    %cst_312 = arith.constant 0.000000e+00 : f32
    %307 = vector.broadcast %cst_312 : f32 to vector<1x256xf32>
    %308 = vector.extract_strided_slice %306 {offsets = [0, 0], sizes = [1, 128], strides = [1, 1]} : vector<16x128xf32> to vector<1x128xf32>
    %309 = arith.truncf %308 : vector<1x128xf32> to vector<1x128xbf16>
    %c0_313 = arith.constant 0 : index
    %c0_314 = arith.constant 0 : index
    %c0_315 = arith.constant 0 : index
    %310 = vector.load %arg8[%c0_313, %c0_314, %c0_315] : memref<16x128x256xbf16, #tpu.memory_space<vmem>>, vector<1x128x256xbf16>
    %311 = vector.shape_cast %310 : vector<1x128x256xbf16> to vector<128x256xbf16>
    %cst_316 = arith.constant dense<0.000000e+00> : vector<1x256xf32>
    %312 = tpu.matmul %309, %311, %cst_316 {dimension_numbers = #tpu.dot_dimension_numbers<[1], [0], [0], [1], [0, 0, 1, 1], [], []>} : vector<1x128xbf16>, vector<128x256xbf16>, vector<1x256xf32> -> vector<1x256xf32>
    %313 = arith.addf %307, %312 : vector<1x256xf32>
    %314 = vector.extract_strided_slice %306 {offsets = [1, 0], sizes = [1, 128], strides = [1, 1]} : vector<16x128xf32> to vector<1x128xf32>
    %315 = arith.truncf %314 : vector<1x128xf32> to vector<1x128xbf16>
    %c1_317 = arith.constant 1 : index
    %c0_318 = arith.constant 0 : index
    %c0_319 = arith.constant 0 : index
    %316 = vector.load %arg8[%c1_317, %c0_318, %c0_319] : memref<16x128x256xbf16, #tpu.memory_space<vmem>>, vector<1x128x256xbf16>
    %317 = vector.shape_cast %316 : vector<1x128x256xbf16> to vector<128x256xbf16>
    %cst_320 = arith.constant dense<0.000000e+00> : vector<1x256xf32>
    %318 = tpu.matmul %315, %317, %cst_320 {dimension_numbers = #tpu.dot_dimension_numbers<[1], [0], [0], [1], [0, 0, 1, 1], [], []>} : vector<1x128xbf16>, vector<128x256xbf16>, vector<1x256xf32> -> vector<1x256xf32>
    %319 = arith.addf %313, %318 : vector<1x256xf32>
    %320 = vector.extract_strided_slice %306 {offsets = [2, 0], sizes = [1, 128], strides = [1, 1]} : vector<16x128xf32> to vector<1x128xf32>
    %321 = arith.truncf %320 : vector<1x128xf32> to vector<1x128xbf16>
    %c2_321 = arith.constant 2 : index
    %c0_322 = arith.constant 0 : index
    %c0_323 = arith.constant 0 : index
    %322 = vector.load %arg8[%c2_321, %c0_322, %c0_323] : memref<16x128x256xbf16, #tpu.memory_space<vmem>>, vector<1x128x256xbf16>
    %323 = vector.shape_cast %322 : vector<1x128x256xbf16> to vector<128x256xbf16>
    %cst_324 = arith.constant dense<0.000000e+00> : vector<1x256xf32>
    %324 = tpu.matmul %321, %323, %cst_324 {dimension_numbers = #tpu.dot_dimension_numbers<[1], [0], [0], [1], [0, 0, 1, 1], [], []>} : vector<1x128xbf16>, vector<128x256xbf16>, vector<1x256xf32> -> vector<1x256xf32>
    %325 = arith.addf %319, %324 : vector<1x256xf32>
    %326 = vector.extract_strided_slice %306 {offsets = [3, 0], sizes = [1, 128], strides = [1, 1]} : vector<16x128xf32> to vector<1x128xf32>
    %327 = arith.truncf %326 : vector<1x128xf32> to vector<1x128xbf16>
    %c3 = arith.constant 3 : index
    %c0_325 = arith.constant 0 : index
    %c0_326 = arith.constant 0 : index
    %328 = vector.load %arg8[%c3, %c0_325, %c0_326] : memref<16x128x256xbf16, #tpu.memory_space<vmem>>, vector<1x128x256xbf16>
    %329 = vector.shape_cast %328 : vector<1x128x256xbf16> to vector<128x256xbf16>
    %cst_327 = arith.constant dense<0.000000e+00> : vector<1x256xf32>
    %330 = tpu.matmul %327, %329, %cst_327 {dimension_numbers = #tpu.dot_dimension_numbers<[1], [0], [0], [1], [0, 0, 1, 1], [], []>} : vector<1x128xbf16>, vector<128x256xbf16>, vector<1x256xf32> -> vector<1x256xf32>
    %331 = arith.addf %325, %330 : vector<1x256xf32>
    %332 = vector.extract_strided_slice %306 {offsets = [4, 0], sizes = [1, 128], strides = [1, 1]} : vector<16x128xf32> to vector<1x128xf32>
    %333 = arith.truncf %332 : vector<1x128xf32> to vector<1x128xbf16>
    %c4_328 = arith.constant 4 : index
    %c0_329 = arith.constant 0 : index
    %c0_330 = arith.constant 0 : index
    %334 = vector.load %arg8[%c4_328, %c0_329, %c0_330] : memref<16x128x256xbf16, #tpu.memory_space<vmem>>, vector<1x128x256xbf16>
    %335 = vector.shape_cast %334 : vector<1x128x256xbf16> to vector<128x256xbf16>
    %cst_331 = arith.constant dense<0.000000e+00> : vector<1x256xf32>
    %336 = tpu.matmul %333, %335, %cst_331 {dimension_numbers = #tpu.dot_dimension_numbers<[1], [0], [0], [1], [0, 0, 1, 1], [], []>} : vector<1x128xbf16>, vector<128x256xbf16>, vector<1x256xf32> -> vector<1x256xf32>
    %337 = arith.addf %331, %336 : vector<1x256xf32>
    %338 = vector.extract_strided_slice %306 {offsets = [5, 0], sizes = [1, 128], strides = [1, 1]} : vector<16x128xf32> to vector<1x128xf32>
    %339 = arith.truncf %338 : vector<1x128xf32> to vector<1x128xbf16>
    %c5_332 = arith.constant 5 : index
    %c0_333 = arith.constant 0 : index
    %c0_334 = arith.constant 0 : index
    %340 = vector.load %arg8[%c5_332, %c0_333, %c0_334] : memref<16x128x256xbf16, #tpu.memory_space<vmem>>, vector<1x128x256xbf16>
    %341 = vector.shape_cast %340 : vector<1x128x256xbf16> to vector<128x256xbf16>
    %cst_335 = arith.constant dense<0.000000e+00> : vector<1x256xf32>
    %342 = tpu.matmul %339, %341, %cst_335 {dimension_numbers = #tpu.dot_dimension_numbers<[1], [0], [0], [1], [0, 0, 1, 1], [], []>} : vector<1x128xbf16>, vector<128x256xbf16>, vector<1x256xf32> -> vector<1x256xf32>
    %343 = arith.addf %337, %342 : vector<1x256xf32>
    %344 = vector.extract_strided_slice %306 {offsets = [6, 0], sizes = [1, 128], strides = [1, 1]} : vector<16x128xf32> to vector<1x128xf32>
    %345 = arith.truncf %344 : vector<1x128xf32> to vector<1x128xbf16>
    %c6 = arith.constant 6 : index
    %c0_336 = arith.constant 0 : index
    %c0_337 = arith.constant 0 : index
    %346 = vector.load %arg8[%c6, %c0_336, %c0_337] : memref<16x128x256xbf16, #tpu.memory_space<vmem>>, vector<1x128x256xbf16>
    %347 = vector.shape_cast %346 : vector<1x128x256xbf16> to vector<128x256xbf16>
    %cst_338 = arith.constant dense<0.000000e+00> : vector<1x256xf32>
    %348 = tpu.matmul %345, %347, %cst_338 {dimension_numbers = #tpu.dot_dimension_numbers<[1], [0], [0], [1], [0, 0, 1, 1], [], []>} : vector<1x128xbf16>, vector<128x256xbf16>, vector<1x256xf32> -> vector<1x256xf32>
    %349 = arith.addf %343, %348 : vector<1x256xf32>
    %350 = vector.extract_strided_slice %306 {offsets = [7, 0], sizes = [1, 128], strides = [1, 1]} : vector<16x128xf32> to vector<1x128xf32>
    %351 = arith.truncf %350 : vector<1x128xf32> to vector<1x128xbf16>
    %c7 = arith.constant 7 : index
    %c0_339 = arith.constant 0 : index
    %c0_340 = arith.constant 0 : index
    %352 = vector.load %arg8[%c7, %c0_339, %c0_340] : memref<16x128x256xbf16, #tpu.memory_space<vmem>>, vector<1x128x256xbf16>
    %353 = vector.shape_cast %352 : vector<1x128x256xbf16> to vector<128x256xbf16>
    %cst_341 = arith.constant dense<0.000000e+00> : vector<1x256xf32>
    %354 = tpu.matmul %351, %353, %cst_341 {dimension_numbers = #tpu.dot_dimension_numbers<[1], [0], [0], [1], [0, 0, 1, 1], [], []>} : vector<1x128xbf16>, vector<128x256xbf16>, vector<1x256xf32> -> vector<1x256xf32>
    %355 = arith.addf %349, %354 : vector<1x256xf32>
    %356 = vector.extract_strided_slice %306 {offsets = [8, 0], sizes = [1, 128], strides = [1, 1]} : vector<16x128xf32> to vector<1x128xf32>
    %357 = arith.truncf %356 : vector<1x128xf32> to vector<1x128xbf16>
    %c8_342 = arith.constant 8 : index
    %c0_343 = arith.constant 0 : index
    %c0_344 = arith.constant 0 : index
    %358 = vector.load %arg8[%c8_342, %c0_343, %c0_344] : memref<16x128x256xbf16, #tpu.memory_space<vmem>>, vector<1x128x256xbf16>
    %359 = vector.shape_cast %358 : vector<1x128x256xbf16> to vector<128x256xbf16>
    %cst_345 = arith.constant dense<0.000000e+00> : vector<1x256xf32>
    %360 = tpu.matmul %357, %359, %cst_345 {dimension_numbers = #tpu.dot_dimension_numbers<[1], [0], [0], [1], [0, 0, 1, 1], [], []>} : vector<1x128xbf16>, vector<128x256xbf16>, vector<1x256xf32> -> vector<1x256xf32>
    %361 = arith.addf %355, %360 : vector<1x256xf32>
    %362 = vector.extract_strided_slice %306 {offsets = [9, 0], sizes = [1, 128], strides = [1, 1]} : vector<16x128xf32> to vector<1x128xf32>
    %363 = arith.truncf %362 : vector<1x128xf32> to vector<1x128xbf16>
    %c9 = arith.constant 9 : index
    %c0_346 = arith.constant 0 : index
    %c0_347 = arith.constant 0 : index
    %364 = vector.load %arg8[%c9, %c0_346, %c0_347] : memref<16x128x256xbf16, #tpu.memory_space<vmem>>, vector<1x128x256xbf16>
    %365 = vector.shape_cast %364 : vector<1x128x256xbf16> to vector<128x256xbf16>
    %cst_348 = arith.constant dense<0.000000e+00> : vector<1x256xf32>
    %366 = tpu.matmul %363, %365, %cst_348 {dimension_numbers = #tpu.dot_dimension_numbers<[1], [0], [0], [1], [0, 0, 1, 1], [], []>} : vector<1x128xbf16>, vector<128x256xbf16>, vector<1x256xf32> -> vector<1x256xf32>
    %367 = arith.addf %361, %366 : vector<1x256xf32>
    %368 = vector.extract_strided_slice %306 {offsets = [10, 0], sizes = [1, 128], strides = [1, 1]} : vector<16x128xf32> to vector<1x128xf32>
    %369 = arith.truncf %368 : vector<1x128xf32> to vector<1x128xbf16>
    %c10_349 = arith.constant 10 : index
    %c0_350 = arith.constant 0 : index
    %c0_351 = arith.constant 0 : index
    %370 = vector.load %arg8[%c10_349, %c0_350, %c0_351] : memref<16x128x256xbf16, #tpu.memory_space<vmem>>, vector<1x128x256xbf16>
    %371 = vector.shape_cast %370 : vector<1x128x256xbf16> to vector<128x256xbf16>
    %cst_352 = arith.constant dense<0.000000e+00> : vector<1x256xf32>
    %372 = tpu.matmul %369, %371, %cst_352 {dimension_numbers = #tpu.dot_dimension_numbers<[1], [0], [0], [1], [0, 0, 1, 1], [], []>} : vector<1x128xbf16>, vector<128x256xbf16>, vector<1x256xf32> -> vector<1x256xf32>
    %373 = arith.addf %367, %372 : vector<1x256xf32>
    %374 = vector.extract_strided_slice %306 {offsets = [11, 0], sizes = [1, 128], strides = [1, 1]} : vector<16x128xf32> to vector<1x128xf32>
    %375 = arith.truncf %374 : vector<1x128xf32> to vector<1x128xbf16>
    %c11_353 = arith.constant 11 : index
    %c0_354 = arith.constant 0 : index
    %c0_355 = arith.constant 0 : index
    %376 = vector.load %arg8[%c11_353, %c0_354, %c0_355] : memref<16x128x256xbf16, #tpu.memory_space<vmem>>, vector<1x128x256xbf16>
    %377 = vector.shape_cast %376 : vector<1x128x256xbf16> to vector<128x256xbf16>
    %cst_356 = arith.constant dense<0.000000e+00> : vector<1x256xf32>
    %378 = tpu.matmul %375, %377, %cst_356 {dimension_numbers = #tpu.dot_dimension_numbers<[1], [0], [0], [1], [0, 0, 1, 1], [], []>} : vector<1x128xbf16>, vector<128x256xbf16>, vector<1x256xf32> -> vector<1x256xf32>
    %379 = arith.addf %373, %378 : vector<1x256xf32>
    %380 = vector.extract_strided_slice %306 {offsets = [12, 0], sizes = [1, 128], strides = [1, 1]} : vector<16x128xf32> to vector<1x128xf32>
    %381 = arith.truncf %380 : vector<1x128xf32> to vector<1x128xbf16>
    %c12_357 = arith.constant 12 : index
    %c0_358 = arith.constant 0 : index
    %c0_359 = arith.constant 0 : index
    %382 = vector.load %arg8[%c12_357, %c0_358, %c0_359] : memref<16x128x256xbf16, #tpu.memory_space<vmem>>, vector<1x128x256xbf16>
    %383 = vector.shape_cast %382 : vector<1x128x256xbf16> to vector<128x256xbf16>
    %cst_360 = arith.constant dense<0.000000e+00> : vector<1x256xf32>
    %384 = tpu.matmul %381, %383, %cst_360 {dimension_numbers = #tpu.dot_dimension_numbers<[1], [0], [0], [1], [0, 0, 1, 1], [], []>} : vector<1x128xbf16>, vector<128x256xbf16>, vector<1x256xf32> -> vector<1x256xf32>
    %385 = arith.addf %379, %384 : vector<1x256xf32>
    %386 = vector.extract_strided_slice %306 {offsets = [13, 0], sizes = [1, 128], strides = [1, 1]} : vector<16x128xf32> to vector<1x128xf32>
    %387 = arith.truncf %386 : vector<1x128xf32> to vector<1x128xbf16>
    %c13 = arith.constant 13 : index
    %c0_361 = arith.constant 0 : index
    %c0_362 = arith.constant 0 : index
    %388 = vector.load %arg8[%c13, %c0_361, %c0_362] : memref<16x128x256xbf16, #tpu.memory_space<vmem>>, vector<1x128x256xbf16>
    %389 = vector.shape_cast %388 : vector<1x128x256xbf16> to vector<128x256xbf16>
    %cst_363 = arith.constant dense<0.000000e+00> : vector<1x256xf32>
    %390 = tpu.matmul %387, %389, %cst_363 {dimension_numbers = #tpu.dot_dimension_numbers<[1], [0], [0], [1], [0, 0, 1, 1], [], []>} : vector<1x128xbf16>, vector<128x256xbf16>, vector<1x256xf32> -> vector<1x256xf32>
    %391 = arith.addf %385, %390 : vector<1x256xf32>
    %392 = vector.extract_strided_slice %306 {offsets = [14, 0], sizes = [1, 128], strides = [1, 1]} : vector<16x128xf32> to vector<1x128xf32>
    %393 = arith.truncf %392 : vector<1x128xf32> to vector<1x128xbf16>
    %c14 = arith.constant 14 : index
    %c0_364 = arith.constant 0 : index
    %c0_365 = arith.constant 0 : index
    %394 = vector.load %arg8[%c14, %c0_364, %c0_365] : memref<16x128x256xbf16, #tpu.memory_space<vmem>>, vector<1x128x256xbf16>
    %395 = vector.shape_cast %394 : vector<1x128x256xbf16> to vector<128x256xbf16>
    %cst_366 = arith.constant dense<0.000000e+00> : vector<1x256xf32>
    %396 = tpu.matmul %393, %395, %cst_366 {dimension_numbers = #tpu.dot_dimension_numbers<[1], [0], [0], [1], [0, 0, 1, 1], [], []>} : vector<1x128xbf16>, vector<128x256xbf16>, vector<1x256xf32> -> vector<1x256xf32>
    %397 = arith.addf %391, %396 : vector<1x256xf32>
    %398 = vector.extract_strided_slice %306 {offsets = [15, 0], sizes = [1, 128], strides = [1, 1]} : vector<16x128xf32> to vector<1x128xf32>
    %399 = arith.truncf %398 : vector<1x128xf32> to vector<1x128xbf16>
    %c15_367 = arith.constant 15 : index
    %c0_368 = arith.constant 0 : index
    %c0_369 = arith.constant 0 : index
    %400 = vector.load %arg8[%c15_367, %c0_368, %c0_369] : memref<16x128x256xbf16, #tpu.memory_space<vmem>>, vector<1x128x256xbf16>
    %401 = vector.shape_cast %400 : vector<1x128x256xbf16> to vector<128x256xbf16>
    %cst_370 = arith.constant dense<0.000000e+00> : vector<1x256xf32>
    %402 = tpu.matmul %399, %401, %cst_370 {dimension_numbers = #tpu.dot_dimension_numbers<[1], [0], [0], [1], [0, 0, 1, 1], [], []>} : vector<1x128xbf16>, vector<128x256xbf16>, vector<1x256xf32> -> vector<1x256xf32>
    %403 = arith.addf %397, %402 : vector<1x256xf32>
    %c0_371 = arith.constant 0 : index
    %c0_372 = arith.constant 0 : index
    %404 = vector.load %arg9[%c0_371, %c0_372] : memref<1x256xf32, #tpu.memory_space<vmem>>, vector<1x256xf32>
    %405 = arith.addf %403, %404 : vector<1x256xf32>
    %cst_373 = arith.constant 0.000000e+00 : f32
    %406 = vector.broadcast %cst_373 : f32 to vector<1x256xf32>
    %407 = arith.maximumf %405, %406 : vector<1x256xf32>
    %408 = arith.truncf %407 : vector<1x256xf32> to vector<1x256xbf16>
    %c0_374 = arith.constant 0 : index
    %c0_375 = arith.constant 0 : index
    %409 = vector.load %arg10[%c0_374, %c0_375] : memref<256x128xbf16, #tpu.memory_space<vmem>>, vector<256x128xbf16>
    %cst_376 = arith.constant dense<0.000000e+00> : vector<1x128xf32>
    %410 = tpu.matmul %408, %409, %cst_376 {dimension_numbers = #tpu.dot_dimension_numbers<[1], [0], [0], [1], [0, 0, 1, 1], [], []>} : vector<1x256xbf16>, vector<256x128xbf16>, vector<1x128xf32> -> vector<1x128xf32>
    %c0_377 = arith.constant 0 : index
    %c0_378 = arith.constant 0 : index
    %411 = vector.load %arg11[%c0_377, %c0_378] : memref<1x128xf32, #tpu.memory_space<vmem>>, vector<1x128xf32>
    %412 = arith.addf %410, %411 : vector<1x128xf32>
    %cst_379 = arith.constant 0.000000e+00 : f32
    %413 = vector.broadcast %cst_379 : f32 to vector<1x128xf32>
    %414 = arith.maximumf %412, %413 : vector<1x128xf32>
    %415 = arith.truncf %414 : vector<1x128xf32> to vector<1x128xbf16>
    %c0_380 = arith.constant 0 : index
    %c0_381 = arith.constant 0 : index
    %416 = vector.load %arg12[%c0_380, %c0_381] : memref<128x128xbf16, #tpu.memory_space<vmem>>, vector<128x128xbf16>
    %cst_382 = arith.constant dense<0.000000e+00> : vector<1x128xf32>
    %417 = tpu.matmul %415, %416, %cst_382 {dimension_numbers = #tpu.dot_dimension_numbers<[1], [0], [0], [1], [0, 0, 1, 1], [], []>} : vector<1x128xbf16>, vector<128x128xbf16>, vector<1x128xf32> -> vector<1x128xf32>
    %c0_383 = arith.constant 0 : index
    %c0_384 = arith.constant 0 : index
    %418 = vector.load %arg13[%c0_383, %c0_384] : memref<1x128xf32, #tpu.memory_space<vmem>>, vector<1x128xf32>
    %419 = arith.addf %417, %418 : vector<1x128xf32>
    %c0_385 = arith.constant 0 : index
    %c0_386 = arith.constant 0 : index
    %c0_387 = arith.constant 0 : index
    %420 = vector.load %arg14[%c0_385, %c0_386, %c0_387] : memref<1x1x128xf32, #tpu.memory_space<vmem>>, vector<1x1x128xf32>
    %421 = vector.shape_cast %420 : vector<1x1x128xf32> to vector<1x128xf32>
    %422 = vector.shape_cast %419 : vector<1x128xf32> to vector<1x1x128xf32>
    tpu.vector_store %arg14[%c0_385, %c0_386, %c0_387], %422 {strides = array<i32>} : memref<1x1x128xf32, #tpu.memory_space<vmem>>, vector<1x1x128xf32>,
    return
  }
  func.func @transform_0(%arg0: i32) -> (i32, i32, i32) {
    %c0_i32 = arith.constant 0 : i32
    %c0_i32_0 = arith.constant 0 : i32
    %c0_i32_1 = arith.constant 0 : i32
    return %arg0, %c0_i32, %c0_i32_0 : i32, i32, i32
  }
  func.func @transform_1(%arg0: i32) -> (i32, i32) {
    %c0_i32 = arith.constant 0 : i32
    %c0_i32_0 = arith.constant 0 : i32
    %c0_i32_1 = arith.constant 0 : i32
    return %c0_i32, %c0_i32_0 : i32, i32
  }
  func.func @transform_2(%arg0: i32) -> (i32, i32) {
    %c0_i32 = arith.constant 0 : i32
    %c0_i32_0 = arith.constant 0 : i32
    %c0_i32_1 = arith.constant 0 : i32
    return %c0_i32, %c0_i32_0 : i32, i32
  }
  func.func @transform_3(%arg0: i32) -> (i32, i32, i32, i32) {
    %c0_i32 = arith.constant 0 : i32
    %c0_i32_0 = arith.constant 0 : i32
    %c0_i32_1 = arith.constant 0 : i32
    %c0_i32_2 = arith.constant 0 : i32
    %c0_i32_3 = arith.constant 0 : i32
    return %c0_i32, %c0_i32_0, %c0_i32_1, %c0_i32_2 : i32, i32, i32, i32
  }
  func.func @transform_4(%arg0: i32) -> (i32, i32) {
    %c0_i32 = arith.constant 0 : i32
    %c0_i32_0 = arith.constant 0 : i32
    %c0_i32_1 = arith.constant 0 : i32
    return %c0_i32, %c0_i32_0 : i32, i32
  }
  func.func @transform_5(%arg0: i32) -> (i32, i32, i32, i32) {
    %c0_i32 = arith.constant 0 : i32
    %c0_i32_0 = arith.constant 0 : i32
    %c0_i32_1 = arith.constant 0 : i32
    %c0_i32_2 = arith.constant 0 : i32
    %c0_i32_3 = arith.constant 0 : i32
    return %c0_i32, %c0_i32_0, %c0_i32_1, %c0_i32_2 : i32, i32, i32, i32
  }
  func.func @transform_6(%arg0: i32) -> (i32, i32) {
    %c0_i32 = arith.constant 0 : i32
    %c0_i32_0 = arith.constant 0 : i32
    %c0_i32_1 = arith.constant 0 : i32
    return %c0_i32, %c0_i32_0 : i32, i32
  }
  func.func @transform_7(%arg0: i32) -> (i32, i32, i32) {
    %c0_i32 = arith.constant 0 : i32
    %c0_i32_0 = arith.constant 0 : i32
    %c0_i32_1 = arith.constant 0 : i32
    %c0_i32_2 = arith.constant 0 : i32
    return %c0_i32, %c0_i32_0, %c0_i32_1 : i32, i32, i32
  }
  func.func @transform_8(%arg0: i32) -> (i32, i32) {
    %c0_i32 = arith.constant 0 : i32
    %c0_i32_0 = arith.constant 0 : i32
    %c0_i32_1 = arith.constant 0 : i32
    return %c0_i32, %c0_i32_0 : i32, i32
  }
  func.func @transform_9(%arg0: i32) -> (i32, i32) {
    %c0_i32 = arith.constant 0 : i32
    %c0_i32_0 = arith.constant 0 : i32
    %c0_i32_1 = arith.constant 0 : i32
    return %c0_i32, %c0_i32_0 : i32, i32
  }
  func.func @transform_10(%arg0: i32) -> (i32, i32) {
    %c0_i32 = arith.constant 0 : i32
    %c0_i32_0 = arith.constant 0 : i32
    %c0_i32_1 = arith.constant 0 : i32
    return %c0_i32, %c0_i32_0 : i32, i32
  }
  func.func @transform_11(%arg0: i32) -> (i32, i32) {
    %c0_i32 = arith.constant 0 : i32
    %c0_i32_0 = arith.constant 0 : i32
    %c0_i32_1 = arith.constant 0 : i32
    return %c0_i32, %c0_i32_0 : i32, i32
  }
  func.func @transform_12(%arg0: i32) -> (i32, i32) {
    %c0_i32 = arith.constant 0 : i32
    %c0_i32_0 = arith.constant 0 : i32
    %c0_i32_1 = arith.constant 0 : i32
    return %c0_i32, %c0_i32_0 : i32, i32
  }
  func.func @transform_13(%arg0: i32) -> (i32, i32, i32) {
    %c0_i32 = arith.constant 0 : i32
    %c0_i32_0 = arith.constant 0 : i32
    %c0_i32_1 = arith.constant 0 : i32
    return %arg0, %c0_i32, %c0_i32_0 : i32, i32, i32
  }
}

</mosaic_0001>

<bundles_post_ra>
// kernel: net_forward.1
= control target key start
LH: loop header
LB: loop body
LE: loop exit
PB: predicated region body
PF: predicated region fallthrough
CT: control target
= control target key end

     0   :  { %s20351_s0 = inlined_call_operand.vmem [shape: bf16[2,1936,75], index: 0, kind: input, shape index: {}]   ;;  %s20352_s1 = inlined_call_operand.vmem [shape: bf16[75,128], index: 1, kind: input, shape index: {}]   ;;  %s20353_s2 = inlined_call_operand.vmem [shape: f32[1,128], index: 2, kind: input, shape index: {}]   ;;  %s20354_s3 = inlined_call_operand.vmem [shape: bf16[3,3,128,128], index: 3, kind: input, shape index: {}]   ;;  %s20355_s4 = inlined_call_operand.vmem [shape: f32[1,128], index: 4, kind: input, shape index: {}]   ;;  %s20356_s5 = inlined_call_operand.vmem [shape: bf16[3,3,128,128], index: 5, kind: input, shape index: {}]   ;;  %s20357_s6 = inlined_call_operand.vmem [shape: f32[1,128], index: 6, kind: input, shape index: {}]   ;;  %s20358_s7 = inlined_call_operand.vmem [shape: bf16[16,128,256], index: 7, kind: input, shape index: {}]   ;;  %s20359_s8 = inlined_call_operand.vmem [shape: f32[1,256], index: 8, kind: input, shape index: {}]   ;;  %s20360_s9 = inlined_call_operand.vmem [shape: bf16[256,128], index: 9, kind: input, shape index: {}]   ;;  %s20361_s10 = inlined_call_operand.vmem [shape: f32[1,128], index: 10, kind: input, shape index: {}]   ;;  %s20362_s11 = inlined_call_operand.vmem [shape: bf16[128,128], index: 11, kind: input, shape index: {}]   ;;  %s20363_s12 = inlined_call_operand.vmem [shape: f32[1,128], index: 12, kind: input, shape index: {}]   ;;  %s20364_s13 = inlined_call_operand.hbm [shape: f32[2,1,128], index: 13, kind: output, shape index: {}]  }
   0x1   :  { %20365 = sst [smem:[#allocation15_spill]] %s20351_s0 }
   0x2   :  { %18 = vsyncpa [#allocation12], 0 }
   0x3   :  { %20 = vsyncpa [#allocation12 + $0x1], 0  ;;  %s17337_s25 = smov 0   ;;  %s17339_s26 = smov 0  }
   0x4   :  { %s17341_s27 = smov 0   ;;  %s17343_s28 = smov 0  }
   0x5 LB: > { %s17358_s29 = sadd.s32 4294967295, %s17260_s28   ;;  %s12782_s30 = sadd.s32 4294967294, %s17260_s28   ;;  %s17260_s28 = sphi %s17343_s28, %s20374_s28   ;;  %s17256_s27 = sphi %s17341_s27, %s20373_s27   ;;  %s17252_s26 = sphi %s17339_s26, %s20372_s26   ;;  %s17248_s25 = sphi %s17337_s25, %s20371_s25  }
   0x6   : > { %s17362_s14 = sadd.s32 1, %s17260_s28   ;;  %s311_s15 = sadd.s32 1, %s17256_s27 }
   0x7   : > { %s308_s16 = ssub.s32 %s17260_s28, %s17362_s14  ;;  %p321_p0 = scmp.ne.s32.totalorder %s17256_s27, %s17252_s26 }
   0x8   : > { %p309_p1 = scmp.eq.s32.totalorder %s308_s16, 0  ;;  %p322_p2 = scmp.eq.s32.totalorder %s17358_s29, 1 }
   0x9   : > { %p327_p3 = scmp.ne.s32.totalorder %s17252_s26, %s17248_s25  ;;  %p328_p4 = scmp.eq.s32.totalorder %s12782_s30, 1 }
   0xa   : > { %s17373_s17 = scalar_select %p309_p1, %s17256_s27, %s311_s15  }
   0xb   : > { %p17375_p5 = por %p322_p2, %p321_p0  ;;  %p17379_p6 = por %p328_p4, %p327_p3 }
   0xc   : > { %20366 = sst [smem:[#allocation14_spill]] %s17373_s17  ;;  %p12785_p7 = scmp.ge.s32.totalorder %s17260_s28, 1 }
   0xd   : > { %p390_p8 = scmp.lt.s32.totalorder %s17260_s28, 3 }
   0xf   : > { %p391_p9 = pnand %p12785_p7, %p390_p8 }
  0x10   : > { %v16504_v0 = vld [vmem:[%s20352_s1] sm:$0xff] (!%p391_p9)   ;;  %v17262_v1 = vmov (!%p391_p9), 0.0   ;;  %v16505_v2 = vld [vmem:[%s20352_s1 + $0x8] sm:$0xff] (!%p391_p9)   ;;  %vm1698_vm0 = vcmask (!%p391_p9), 1044480   ;;  %vm1699_vm1 = vcmask (!%p391_p9), 1045504   ;;  %v16506_v3 = vld [vmem:[%s20352_s1 + $0x10] sm:$0xff] (!%p391_p9)  }
  0x11   : > { %394 = sbr.rel (%p391_p9) target bundleno = 3622 (0xe26), region = 72  ;;  %14558 = vmatprep.subr.bf16.mxu0 (!%p391_p9), %v17262_v1  ;;  %439 = vst [vmem:[#allocation4 + $0x1e4] sm:$0xff] (!%p391_p9), %v17262_v1  ;;  %440 = vst [vmem:[#allocation7 + $0x64] sm:$0xff] (!%p391_p9), %v17262_v1  ;;  %v17263_v4 = vmov (!%p391_p9), 65535   ;;  %p433_p10 = scmp.lt.s32.totalorder (!%p391_p9), %s17358_s29, 1  ;;  %vm17264_vm2 = vmmov (!%p391_p9), 0  }
  0x12   : > { %14559 = vmatpush3.bf16.msra.mxu0 (!%p391_p9), %v16504_v0  ;;  %v1700_v5 = vsel (!%p391_p9), %vm1698_vm0, 4294967295, %v17263_v4  ;;  %14568 = vmatprep.mubr.msk.bf16.mxu0 (!%p391_p9), %vm17264_vm2, %v17262_v1  ;;  %v16507_v7 = vld [vmem:[%s20352_s1 + $0x18] sm:$0xff] (!%p391_p9)   ;;  %v16508_v8 = vld [vmem:[%s20352_s1 + $0x20] sm:$0x3f] (!%p391_p9)   ;;  %s20369_s0 = sld [smem:[#allocation15_spill]] (!%p391_p9)  ;;  %vm1334_vm3 = vcmask (!%p391_p9), 613376  }
  0x13   : > { %14560 = vmatprep.subr.bf16.mxu0 (!%p391_p9), %v17262_v1  ;;  %v1701_v6 = vsel (!%p391_p9), %vm1699_vm1, %v1700_v5, 0  ;;  %v16547_v33 = vld [vmem:[%s20354_s3 + $0x40] sm:$0xff] (!%p391_p9)   ;;  %v16548_v35 = vld [vmem:[%s20354_s3 + $0x48] sm:$0xff] (!%p391_p9)   ;;  %v16550_v36 = vld [vmem:[%s20354_s3 + $0x50] sm:$0xff] (!%p391_p9)   ;;  %s431_s24 = sand.u32 (!%p391_p9), 1, %s17252_s26   ;;  %s13957_s16 = sshll.u32 (!%p391_p9), %s17358_s29, 4 }
  0x14   : > { %v1703_v9 = vand.u32 (!%p391_p9), %v16508_v8, %v1701_v6  ;;  %15052 = vmatprep.subr.bf16.mxu1 (!%p391_p9), %v16547_v33  ;;  %v16551_v38 = vld [vmem:[%s20354_s3 + $0x58] sm:$0xff] (!%p391_p9)   ;;  %v16553_v39 = vld [vmem:[%s20354_s3 + $0x60] sm:$0xff] (!%p391_p9)   ;;  %v16554_v41 = vld [vmem:[%s20354_s3 + $0x68] sm:$0xff] (!%p391_p9)   ;;  %s432_s20 = scalar_lea.vmem (!%p391_p9), [#allocation11], %s431_s24  ;;  %s17266_s30 = smov (!%p391_p9), [#allocation11]  }
  0x15   : > { %15053 = vmatpush3.bf16.msra.mxu1 (!%p391_p9), %v16547_v33  ;;  %v16556_v42 = vld [vmem:[%s20354_s3 + $0x70] sm:$0xff] (!%p391_p9)   ;;  %v16557_v44 = vld [vmem:[%s20354_s3 + $0x78] sm:$0xff] (!%p391_p9)   ;;  %v17551_v46 = vld [vmem:[%s20353_s2] ss:$0 sm:$0xff] (!%p391_p9)  ;;  %s12727_s21 = sshll.u32 (!%p391_p9), %s432_s20, 4  ;;  %s20311_s21 = int_to_ptr.vmem [resolvable:$true] %s12727_s21 }
  0x16   : > { %14561 = vmatpush3.bf16.msra.mxu0 (!%p391_p9), %v16505_v2  ;;  %15054 = vmatprep.subr.bf16.mxu1 (!%p391_p9), %v16548_v35 }
  0x17   : > { %14562 = vmatprep.subr.bf16.mxu0 (!%p391_p9), %v17262_v1 }
  0x18   : > { %s434_s15 = scalar_select %p433_p10, %s17358_s29, 1  ;;  %v17487_v28 = vld [vmem:[#allocation4 + $0x1e4] sm:$0xff] }
  0x19   : > { %15055 = vmatpush3.bf16.msra.mxu1 %v16548_v35  ;;  %s17198_s29 = scalar_lea.vmem %s20311_s21, 16 }
  0x1a   : > { %s16460_s23 = smul.u32 968, %s434_s15  ;;  %14563 = vmatpush3.bf16.msra.mxu0 %v16506_v3  ;;  %15056 = vmatprep.subr.bf16.mxu1 %v16550_v36  ;;  %p17199_p11 = scmp.ne.s32.totalorder %s20311_s21, %s17198_s29 }
  0x1b   : > { %14564 = vmatprep.subr.bf16.mxu0 %v17262_v1  ;;  %s17202_s15 = sshll.u32 %s17266_s30, 4  ;;  %s17203_s15 = int_to_ptr.vmem [resolvable:$false] %s17202_s15 }
  0x1c   : > { %s17413_s17 = scalar_lea.vmem %s20369_s0, %s16460_s23  ;;  %s20309_s0 = scalar_lea.hbm %s20364_s13, %s13957_s16 }
  0x1d   : > { %v16509_v10 = vld [vmem:[%s17413_s17] sm:$0xff]   ;;  %v16510_v11 = vld [vmem:[%s17413_s17 + $0x8] sm:$0xff]   ;;  %v16511_v12 = vld [vmem:[%s17413_s17 + $0x10] sm:$0xff]   ;;  %15057 = vmatpush3.bf16.msra.mxu1 %v16550_v36  ;;  %p17200_p12 = pnand %p17199_p11, %p17375_p5  ;;  %s17204_s22 = scalar_lea.vmem %s17203_s15, 32 }
  0x1e   : > { %14565 = vmatpush3.bf16.msra.mxu0 %v16507_v7  ;;  %v16512_v13 = vld [vmem:[%s17413_s17 + $0x18] sm:$0xff]   ;;  %v16513_v14 = vld [vmem:[%s17413_s17 + $0x20] sm:$0xff]   ;;  %v16514_v15 = vld [vmem:[%s17413_s17 + $0x28] sm:$0xff]   ;;  %15058 = vmatprep.subr.bf16.mxu1 %v16551_v38  ;;  %p17205_p0 = scmp.lt.s32.totalorder %s20311_s21, %s17203_s15  ;;  %p17206_p1 = scmp.lt.s32.totalorder %s17204_s22, %s17198_s29 }
  0x1f   : > { %14566 = vmatprep.subr.bf16.mxu0 %v17262_v1  ;;  %v16515_v16 = vld [vmem:[%s17413_s17 + $0x30] sm:$0xff]   ;;  %v16516_v17 = vld [vmem:[%s17413_s17 + $0x38] sm:$0xff]   ;;  %v16517_v18 = vld [vmem:[%s17413_s17 + $0x40] sm:$0xff]   ;;  %p17201_p13 = pneg %p17200_p12 }
  0x20   : > { %v16518_v19 = vld [vmem:[%s17413_s17 + $0x48] sm:$0xff]   ;;  %v16519_v20 = vld [vmem:[%s17413_s17 + $0x50] sm:$0xff]   ;;  %v16520_v21 = vld [vmem:[%s17413_s17 + $0x58] sm:$0xff]   ;;  %p17207_p2 = por %p17206_p1, %p17205_p0 }
  0x21   : > { %v16521_v22 = vld [vmem:[%s17413_s17 + $0x60] sm:$0xff]   ;;  %v16522_v23 = vld [vmem:[%s17413_s17 + $0x68] sm:$0xff]   ;;  %v16523_v24 = vld [vmem:[%s17413_s17 + $0x70] sm:$0xff]   ;;  %15059 = vmatpush3.bf16.msra.mxu1 %v16551_v38 }
  0x22   : > { %14567 = vmatpush3.bf16.msra.mxu0 %v1703_v9  ;;  %v16524_v25 = vld [vmem:[%s17413_s17 + $0x78] sm:$0xff]   ;;  %v16525_v26 = vld [vmem:[%s17413_s17 + $0x80] sm:$0xff]   ;;  %v16526_v27 = vld [vmem:[%s17413_s17 + $0x88] sm:$0xff]   ;;  %15060 = vmatprep.subr.bf16.mxu1 %v16553_v39  ;;  %p17208_p3 = pnand %p17207_p2, %p17201_p13 }
  0x23   : > { %15700 = vmatprep.subr.bf16.mxu0 %v17262_v1  ;;  %v16527_v29 = vld [vmem:[%s17413_s17 + $0x90] sm:$0xff]   ;;  %v16528_v30 = vld [vmem:[%s17413_s17 + $0x98] sm:$0xff]   ;;  %v16529_v31 = vld [vmem:[%s17413_s17 + $0xa0] sm:$0xff]  }
  0x24   : > { %v16530_v32 = vld [vmem:[%s17413_s17 + $0xa8] sm:$0xff]   ;;  %v16531_v34 = vld [vmem:[%s17413_s17 + $0xb0] sm:$0xff]   ;;  %v16532_v37 = vld [vmem:[%s17413_s17 + $0xb8] sm:$0xff]  }
  0x25   : > { %14569 = vmatmul.mubr.msk.bf16.vlgmr.msra.gmra.mrb[0].mxu0 %vm1334_vm3, %v16509_v10  ;;  %15061 = vmatpush3.bf16.msra.mxu1 %v16553_v39  ;;  %v16533_v40 = vld [vmem:[%s17413_s17 + $0xc0] sm:$0xff]   ;;  %v16534_v43 = vld [vmem:[%s17413_s17 + $0xc8] sm:$0xff]   ;;  %v16535_v45 = vld [vmem:[%s17413_s17 + $0xd0] sm:$0xff]  }
  0x26   : > { %14572 = vmatprep.mubr.msk.bf16.mxu0 %vm17264_vm2, %v17262_v1  ;;  %15062 = vmatprep.subr.bf16.mxu1 %v16554_v41  ;;  %v16536_v47 = vld [vmem:[%s17413_s17 + $0xd8] sm:$0xff]   ;;  %v16537_v56 = vld [vmem:[%s17413_s17 + $0xe0] sm:$0xff]   ;;  %v16538_v4 = vld [vmem:[%s17413_s17 + $0xe8] sm:$0xff]  }
  0x29   : > { %15063 = vmatpush3.bf16.msra.mxu1 %v16554_v41 }
  0x2a   : > { %15064 = vmatprep.subr.bf16.mxu1 %v16556_v42 }
  0x2d   : > { %14573 = vmatmul.mubr.msk.bf16.gmra.mrb[4].mxu0 %vm1334_vm3, %v16510_v11  ;;  %15065 = vmatpush3.bf16.msra.mxu1 %v16556_v42  ;;  %v16541_v42 = vld [vmem:[%s17413_s17 + $0x100] sm:$0xff]  }
  0x2e   : > { %14576 = vmatprep.mubr.msk.bf16.mxu0 %vm17264_vm2, %v17262_v1  ;;  %15066 = vmatprep.subr.bf16.mxu1 %v16557_v44 }
  0x31   : > { %15067 = vmatpush3.bf16.msra.mxu1 %v16557_v44 }
  0x35   : > { %14577 = vmatmul.mubr.msk.bf16.gmra.mrb[8].mxu0 %vm1334_vm3, %v16511_v12 }
  0x36   : > { %14580 = vmatprep.mubr.msk.bf16.mxu0 %vm17264_vm2, %v17262_v1 }
  0x3d   : > { %14581 = vmatmul.mubr.msk.bf16.gmra.mrb[12].mxu0 %vm1334_vm3, %v16512_v13 }
  0x3e   : > { %14584 = vmatprep.mubr.msk.bf16.mxu0 %vm17264_vm2, %v17262_v1 }
  0x45   : > { %14585 = vmatmul.mubr.msk.bf16.gmra.mrb[16].mxu0 %vm1334_vm3, %v16513_v14 }
  0x46   : > { %14588 = vmatprep.mubr.msk.bf16.mxu0 %vm17264_vm2, %v17262_v1 }
  0x4d   : > { %14589 = vmatmul.mubr.msk.bf16.gmra.mrb[20].mxu0 %vm1334_vm3, %v16514_v15 }
  0x4e   : > { %14592 = vmatprep.mubr.msk.bf16.mxu0 %vm17264_vm2, %v17262_v1 }
  0x55   : > { %14593 = vmatmul.mubr.msk.bf16.gmra.mrb[24].mxu0 %vm1334_vm3, %v16515_v16  ;;  %v16539_v16 = vld [vmem:[%s17413_s17 + $0xf0] sm:$0xff]  }
  0x56   : > { %14596 = vmatprep.mubr.msk.bf16.mxu0 %vm17264_vm2, %v17262_v1 }
  0x5d   : > { %14597 = vmatmul.mubr.msk.bf16.gmra.mrb[28].mxu0 %vm1334_vm3, %v16516_v17 }
  0x5e   : > { %14600 = vmatprep.mubr.msk.bf16.mxu0 %vm17264_vm2, %v17262_v1 }
  0x65   : > { %14601 = vmatmul.mubr.msk.bf16.gmra.mrb[32].mxu0 %vm1334_vm3, %v16517_v18 }
  0x66   : > { %14604 = vmatprep.mubr.msk.bf16.mxu0 %vm17264_vm2, %v17262_v1 }
  0x6d   : > { %14605 = vmatmul.mubr.msk.bf16.gmra.mrb[36].mxu0 %vm1334_vm3, %v16518_v19 }
  0x6e   : > { %14608 = vmatprep.mubr.msk.bf16.mxu0 %vm17264_vm2, %v17262_v1 }
  0x75   : > { %14609 = vmatmul.mubr.msk.bf16.gmra.mrb[40].mxu0 %vm1334_vm3, %v16519_v20 }
  0x76   : > { %14612 = vmatprep.mubr.msk.bf16.mxu0 %vm17264_vm2, %v17262_v1 }
  0x7d   : > { %14613 = vmatmul.mubr.msk.bf16.gmra.mrb[44].mxu0 %vm1334_vm3, %v16520_v21 }
  0x7e   : > { %14616 = vmatprep.mubr.msk.bf16.mxu0 %vm17264_vm2, %v17262_v1 }
  0x85   : > { %14617 = vmatmul.mubr.msk.bf16.gmra.mrb[48].mxu0 %vm1334_vm3, %v16521_v22 }
  0x86   : > { %14620 = vmatprep.mubr.msk.bf16.mxu0 %vm17264_vm2, %v17262_v1 }
  0x8d   : > { %14621 = vmatmul.mubr.msk.bf16.gmra.mrb[52].mxu0 %vm1334_vm3, %v16522_v23 }
  0x8e   : > { %14624 = vmatprep.mubr.msk.bf16.mxu0 %vm17264_vm2, %v17262_v1 }
  0x95   : > { %14625 = vmatmul.mubr.msk.bf16.gmra.mrb[56].mxu0 %vm1334_vm3, %v16523_v24 }
  0x96   : > { %14628 = vmatprep.mubr.msk.bf16.mxu0 %vm17264_vm2, %v17262_v1 }
  0x9d   : > { %14629 = vmatmul.mubr.msk.bf16.gmra.mrb[60].mxu0 %vm1334_vm3, %v16524_v25 }
  0x9e   : > { %14632 = vmatprep.mubr.msk.bf16.mxu0 %vm17264_vm2, %v17262_v1 }
  0xa5   : > { %14633 = vmatmul.mubr.msk.bf16.gmra.mrb[64].mxu0 %vm1334_vm3, %v16525_v26 }
  0xa6   : > { %14636 = vmatprep.mubr.msk.bf16.mxu0 %vm17264_vm2, %v17262_v1 }
  0xad   : > { %14637 = vmatmul.mubr.msk.bf16.gmra.mrb[68].mxu0 %vm1334_vm3, %v16526_v27 }
  0xae   : > { %14640 = vmatprep.mubr.msk.bf16.mxu0 %vm17264_vm2, %v17487_v28 }
  0xb5   : > { %14641 = vmatmul.mubr.msk.bf16.gmra.mrb[72].mxu0 %vm1334_vm3, %v16527_v29  ;;  %v16540_v29 = vld [vmem:[%s17413_s17 + $0xf8] sm:$0xff]  }
  0xb6   : > { %14644 = vmatprep.mubr.msk.bf16.mxu0 %vm17264_vm2, %v17487_v28 }
  0xbd   : > { %14645 = vmatmul.mubr.msk.bf16.gmra.mrb[76].mxu0 %vm1334_vm3, %v16528_v30 }
  0xbe   : > { %14648 = vmatprep.mubr.msk.bf16.mxu0 %vm17264_vm2, %v17487_v28 }
  0xc5   : > { %14649 = vmatmul.mubr.msk.bf16.gmra.mrb[80].mxu0 %vm1334_vm3, %v16529_v31 }
  0xc6   : > { %14652 = vmatprep.mubr.msk.bf16.mxu0 %vm17264_vm2, %v17487_v28 }
  0xcd   : > { %14653 = vmatmul.mubr.msk.bf16.gmra.mrb[84].mxu0 %vm1334_vm3, %v16530_v32 }
  0xce   : > { %14656 = vmatprep.mubr.msk.bf16.mxu0 %vm17264_vm2, %v17487_v28 }
  0xd5   : > { %14657 = vmatmul.mubr.msk.bf16.gmra.mrb[88].mxu0 %vm1334_vm3, %v16531_v34 }
  0xd6   : > { %14660 = vmatprep.mubr.msk.bf16.mxu0 %vm17264_vm2, %v17487_v28 }
  0xdd   : > { %14661 = vmatmul.mubr.msk.bf16.gmra.mrb[92].mxu0 %vm1334_vm3, %v16532_v37 }
  0xde   : > { %14664 = vmatprep.mubr.msk.bf16.mxu0 %vm17264_vm2, %v17487_v28 }
  0xe5   : > { %14665 = vmatmul.mubr.msk.bf16.gmra.mrb[96].mxu0 %vm1334_vm3, %v16533_v40 }
  0xe6   : > { %14668 = vmatprep.mubr.msk.bf16.mxu0 %vm17264_vm2, %v17487_v28 }
  0xed   : > { %14669 = vmatmul.mubr.msk.bf16.gmra.mrb[100].mxu0 %vm1334_vm3, %v16534_v43 }
  0xee   : > { %14672 = vmatprep.mubr.msk.bf16.mxu0 %vm17264_vm2, %v17487_v28 }
  0xf5   : > { %14673 = vmatmul.mubr.msk.bf16.gmra.mrb[104].mxu0 %vm1334_vm3, %v16535_v45 }
  0xf6   : > { %14676 = vmatprep.mubr.msk.bf16.mxu0 %vm17264_vm2, %v17487_v28 }
  0xf8   : > { %v1739_v48 = vpop.f32.mrb[0].mxu0 }
  0xf9   : > { %v1740_v49 = vadd.f32 %v17551_v46, %v1739_v48  ;;  %v14570_v50 = vpop.f32.mrb[1].mxu0 }
  0xfa   : > { %v1742_v51 = vpop.f32.mrb[2].mxu0 }
  0xfb   : > { %v2706_v52 = vmax.f32 %v1740_v49, 0.0  ;;  %v1743_v53 = vadd.f32 %v17551_v46, %v1742_v51  ;;  %v14571_v54 = vpop.f32.mrb[3].mxu0 }
  0xfc   : > { %v16542_v54 = vld [vmem:[%s17413_s17 + $0x108] sm:$0xff]  }
  0xfd   : > { %2948 = vst [vmem:[#allocation2] sm:$0xff] %v2706_v52  ;;  %v2707_v55 = vmax.f32 %v1743_v53, 0.0  ;;  %14677 = vmatmul.mubr.msk.bf16.gmra.mrb[108].mxu0 %vm1334_vm3, %v16536_v47 }
  0xfe   : > { %14680 = vmatprep.mubr.msk.bf16.mxu0 %vm17264_vm2, %v17487_v28 }
  0xff   : > { %2949 = vst [vmem:[#allocation2 + $0x8] sm:$0xff] %v2707_v55 }
 0x100   : > { %v1747_v57 = vpop.f32.mrb[4].mxu0 }
 0x101   : > { %v1748_v58 = vadd.f32 %v17551_v46, %v1747_v57  ;;  %v14574_v59 = vpop.f32.mrb[5].mxu0 }
 0x102   : > { %v1750_v60 = vpop.f32.mrb[6].mxu0 }
 0x103   : > { %v2708_v61 = vmax.f32 %v1748_v58, 0.0  ;;  %v1751_v62 = vadd.f32 %v17551_v46, %v1750_v60  ;;  %v14575_v63 = vpop.f32.mrb[7].mxu0 }
 0x105   : > { %2950 = vst [vmem:[#allocation2 + $0x10] sm:$0xff] %v2708_v61  ;;  %v2709_v0 = vmax.f32 %v1751_v62, 0.0  ;;  %14681 = vmatmul.mubr.msk.bf16.gmra.mrb[112].mxu0 %vm1334_vm3, %v16537_v56 }
 0x106   : > { %v17566_v1 = vld [vmem:[#allocation2] ss:$2 sm:$0xff]  ;;  %v17568_v2 = vld [vmem:[#allocation2 + $0x1] ss:$2 sm:$0xff]  ;;  %14684 = vmatprep.mubr.msk.bf16.mxu0 %vm17264_vm2, %v17487_v28 }
 0x107   : > { %v3673_v3 = vmax.f32 %v17566_v1, %v17568_v2  ;;  %2951 = vst [vmem:[#allocation2 + $0x18] sm:$0xff] %v2709_v0  ;;  %v16543_v2 = vld [vmem:[%s17413_s17 + $0x110] sm:$0xff]  }
 0x108   : > { %v1755_v5 = vpop.f32.mrb[8].mxu0 }
 0x109   : > { %v1756_v6 = vadd.f32 %v17551_v46, %v1755_v5  ;;  %v14578_v7 = vpop.f32.mrb[9].mxu0  ;;  %v17611_v5 = vld [vmem:[#allocation4 + $0x1e4] sm:$0xff] }
 0x10a   : > { %v1758_v8 = vpop.f32.mrb[10].mxu0 }
 0x10b   : > { %v2710_v9 = vmax.f32 %v1756_v6, 0.0  ;;  %v1759_v10 = vadd.f32 %v17551_v46, %v1758_v8  ;;  %v14579_v11 = vpop.f32.mrb[11].mxu0 }
 0x10d   : > { %2952 = vst [vmem:[#allocation2 + $0x20] sm:$0xff] %v2710_v9  ;;  %v2711_v12 = vmax.f32 %v1759_v10, 0.0  ;;  %14685 = vmatmul.mubr.msk.bf16.gmra.mrb[116].mxu0 %vm1334_vm3, %v16538_v4 }
 0x10e   : > { %v17578_v13 = vld [vmem:[#allocation2 + $0x10] ss:$2 sm:$0xff]  ;;  %v17580_v14 = vld [vmem:[#allocation2 + $0x11] ss:$2 sm:$0xff]  ;;  %14688 = vmatprep.mubr.msk.bf16.mxu0 %vm17264_vm2, %v17487_v28 }
 0x10f   : > { %v3674_v15 = vmax.f32 %v17578_v13, %v17580_v14  ;;  %2953 = vst [vmem:[#allocation2 + $0x28] sm:$0xff] %v2711_v12 }
 0x110   : > { %v1763_v17 = vpop.f32.mrb[12].mxu0 }
 0x111   : > { %v1764_v18 = vadd.f32 %v17551_v46, %v1763_v17  ;;  %v14582_v19 = vpop.f32.mrb[13].mxu0 }
 0x112   : > { %v1766_v20 = vpop.f32.mrb[14].mxu0 }
 0x113   : > { %v2712_v21 = vmax.f32 %v1764_v18, 0.0  ;;  %v1767_v22 = vadd.f32 %v17551_v46, %v1766_v20  ;;  %v14583_v23 = vpop.f32.mrb[15].mxu0 }
 0x114   : > { %v16544_v23 = vld [vmem:[%s17413_s17 + $0x118] sm:$0xff]  }
 0x115   : > { %2954 = vst [vmem:[#allocation2 + $0x30] sm:$0xff] %v2712_v21  ;;  %v2713_v24 = vmax.f32 %v1767_v22, 0.0  ;;  %14689 = vmatmul.mubr.msk.bf16.gmra.mrb[120].mxu0 %vm1334_vm3, %v16539_v16 }
 0x116   : > { %v3194_v25 = vld [vmem:[#allocation2 + $0x20] ss:$2 sm:$0xff]  ;;  %v3436_v26 = vld [vmem:[#allocation2 + $0x21] ss:$2 sm:$0xff]  ;;  %14692 = vmatprep.mubr.msk.bf16.mxu0 %vm17264_vm2, %v17487_v28 }
 0x117   : > { %v3675_v27 = vmax.f32 %v3194_v25, %v3436_v26  ;;  %2955 = vst [vmem:[#allocation2 + $0x38] sm:$0xff] %v2713_v24 }
 0x118   : > { %v1771_v30 = vpop.f32.mrb[16].mxu0 }
 0x119   : > { %3796 = vst [vmem:[#allocation3 + $0x10] sm:$0xff] %v3675_v27  ;;  %v1772_v31 = vadd.f32 %v17551_v46, %v1771_v30  ;;  %v14586_v32 = vpop.f32.mrb[17].mxu0 }
 0x11a   : > { %v1774_v33 = vpop.f32.mrb[18].mxu0 }
 0x11b   : > { %v2714_v34 = vmax.f32 %v1772_v31, 0.0  ;;  %v1775_v35 = vadd.f32 %v17551_v46, %v1774_v33  ;;  %v14587_v36 = vpop.f32.mrb[19].mxu0 }
 0x11d   : > { %2956 = vst [vmem:[#allocation2 + $0x40] sm:$0xff] %v2714_v34  ;;  %v2715_v37 = vmax.f32 %v1775_v35, 0.0  ;;  %14693 = vmatmul.mubr.msk.bf16.gmra.mrb[124].mxu0 %vm1334_vm3, %v16540_v29 }
 0x11e   : > { %v3196_v38 = vld [vmem:[#allocation2 + $0x30] ss:$2 sm:$0xff]  ;;  %v3438_v39 = vld [vmem:[#allocation2 + $0x31] ss:$2 sm:$0xff]  ;;  %14696 = vmatprep.mubr.msk.bf16.mxu0 %vm17264_vm2, %v17487_v28 }
 0x11f   : > { %v3676_v40 = vmax.f32 %v3196_v38, %v3438_v39  ;;  %2957 = vst [vmem:[#allocation2 + $0x48] sm:$0xff] %v2715_v37  ;;  %v16545_v37 = vld [vmem:[%s17413_s17 + $0x120] sm:$0xff]  }
 0x120   : > { %v1779_v41 = vpop.f32.mrb[20].mxu0  ;;  %v3917_v20 = vld [vmem:[#allocation3 + $0x10] sm:$0x3f] }
 0x121   : > { %3797 = vst [vmem:[#allocation3 + $0x18] sm:$0xff] %v3676_v40  ;;  %v1780_v43 = vadd.f32 %v17551_v46, %v1779_v41  ;;  %v14590_v44 = vpop.f32.mrb[21].mxu0 }
 0x122   : > { %v1782_v45 = vpop.f32.mrb[22].mxu0 }
 0x123   : > { %v2716_v47 = vmax.f32 %v1780_v43, 0.0  ;;  %v1783_v48 = vadd.f32 %v17551_v46, %v1782_v45  ;;  %v14591_v49 = vpop.f32.mrb[23].mxu0 }
 0x125   : > { %2958 = vst [vmem:[#allocation2 + $0x50] sm:$0xff] %v2716_v47  ;;  %v2717_v50 = vmax.f32 %v1783_v48, 0.0  ;;  %14697 = vmatmul.mubr.msk.bf16.gmra.mrb[128].mxu0 %vm1334_vm3, %v16541_v42 }
 0x126   : > { %v3198_v51 = vld [vmem:[#allocation2 + $0x40] ss:$2 sm:$0xff]  ;;  %v3440_v52 = vld [vmem:[#allocation2 + $0x41] ss:$2 sm:$0xff]  ;;  %14700 = vmatprep.mubr.msk.bf16.mxu0 %vm17264_vm2, %v17487_v28 }
 0x127   : > { %v3677_v53 = vmax.f32 %v3198_v51, %v3440_v52  ;;  %2959 = vst [vmem:[#allocation2 + $0x58] sm:$0xff] %v2717_v50 }
 0x128   : > { %v1787_v55 = vpop.f32.mrb[24].mxu0  ;;  %v3918_v56 = vld [vmem:[#allocation3 + $0x16] sm:$0xff] }
 0x129   : > { %3798 = vst [vmem:[#allocation3 + $0x20] sm:$0xff] %v3677_v53  ;;  %v1788_v57 = vadd.f32 %v17551_v46, %v1787_v55  ;;  %v14594_v58 = vpop.f32.mrb[25].mxu0  ;;  %v3921_v59 = vmax.f32 %v3673_v3, %v3918_v56  ;;  %v16546_v53 = vld [vmem:[%s17413_s17 + $0x128] sm:$0xff]  }
 0x12a   : > { %v1790_v60 = vpop.f32.mrb[26].mxu0 }
 0x12b   : > { %v2718_v61 = vmax.f32 %v1788_v57, 0.0  ;;  %v1791_v62 = vadd.f32 %v17551_v46, %v1790_v60  ;;  %v14595_v63 = vpop.f32.mrb[27].mxu0  ;;  %3924 = vst [vmem:[#allocation4] sm:$0xff] %v3921_v59 }
 0x12d   : > { %2960 = vst [vmem:[#allocation2 + $0x60] sm:$0xff] %v2718_v61  ;;  %v2719_v28 = vmax.f32 %v1791_v62, 0.0  ;;  %14701 = vmatmul.mubr.msk.bf16.gmra.mrb[132].mxu0 %vm1334_vm3, %v16542_v54 }
 0x12e   : > { %v3200_v0 = vld [vmem:[#allocation2 + $0x50] ss:$2 sm:$0xff]  ;;  %v3442_v4 = vld [vmem:[#allocation2 + $0x51] ss:$2 sm:$0xff]  ;;  %14704 = vmatprep.mubr.msk.bf16.mxu0 %vm17264_vm2, %v17611_v5 }
 0x12f   : > { %v3678_v1 = vmax.f32 %v3200_v0, %v3442_v4  ;;  %2961 = vst [vmem:[#allocation2 + $0x68] sm:$0xff] %v2719_v28  ;;  %v16549_v0 = vld [vmem:[%s17413_s17 + $0x130] sm:$0xff]  }
 0x130   : > { %v1795_v3 = vpop.f32.mrb[28].mxu0  ;;  %v3919_v6 = vld [vmem:[#allocation3 + $0x1e] sm:$0xff] }
 0x131   : > { %3799 = vst [vmem:[#allocation3 + $0x28] sm:$0xff] %v3678_v1  ;;  %v1796_v7 = vadd.f32 %v17551_v46, %v1795_v3  ;;  %v14598_v8 = vpop.f32.mrb[29].mxu0  ;;  %v3922_v9 = vmax.f32 %v3674_v15, %v3919_v6 }
 0x132   : > { %v1798_v10 = vpop.f32.mrb[30].mxu0 }
 0x133   : > { %v2720_v11 = vmax.f32 %v1796_v7, 0.0  ;;  %v1799_v12 = vadd.f32 %v17551_v46, %v1798_v10  ;;  %v14599_v16 = vpop.f32.mrb[31].mxu0  ;;  %3925 = vst [vmem:[#allocation4 + $0x8] sm:$0xff] %v3922_v9 }
 0x135   : > { %2962 = vst [vmem:[#allocation2 + $0x70] sm:$0xff] %v2720_v11  ;;  %v2721_v17 = vmax.f32 %v1799_v12, 0.0  ;;  %14705 = vmatmul.mubr.msk.bf16.gmra.mrb[136].mxu0 %vm1334_vm3, %v16543_v2 }
 0x136   : > { %v3202_v18 = vld [vmem:[#allocation2 + $0x60] ss:$2 sm:$0xff]  ;;  %v3444_v19 = vld [vmem:[#allocation2 + $0x61] ss:$2 sm:$0xff]  ;;  %14708 = vmatprep.mubr.msk.bf16.mxu0 %vm17264_vm2, %v17611_v5 }
 0x137   : > { %v3679_v21 = vmax.f32 %v3202_v18, %v3444_v19  ;;  %2963 = vst [vmem:[#allocation2 + $0x78] sm:$0xff] %v2721_v17  ;;  %v16552_v18 = vld [vmem:[%s17413_s17 + $0x138] sm:$0xff]  }
 0x138   : > { %v1803_v13 = vpop.f32.mrb[32].mxu0  ;;  %v3920_v14 = vld [vmem:[#allocation3 + $0x26] sm:$0x3f] }
 0x139   : > { %3800 = vst [vmem:[#allocation3 + $0x30] sm:$0xff] %v3679_v21  ;;  %v1804_v15 = vadd.f32 %v17551_v46, %v1803_v13  ;;  %v14602_v22 = vpop.f32.mrb[33].mxu0  ;;  %v3923_v24 = vmax.f32 %v3917_v20, %v3920_v14 }
 0x13a   : > { %v1806_v25 = vpop.f32.mrb[34].mxu0  ;;  %v4278_v39 = vld [vmem:[#allocation4 + $0x1] sm:$0xff] }
 0x13b   : > { %v2722_v26 = vmax.f32 %v1804_v15, 0.0  ;;  %v1807_v27 = vadd.f32 %v17551_v46, %v1806_v25  ;;  %v14603_v29 = vpop.f32.mrb[35].mxu0  ;;  %3926 = vst [vmem:[#allocation4 + $0x10] sm:$0x3f] %v3923_v24 }
 0x13d   : > { %2964 = vst [vmem:[#allocation2 + $0x80] sm:$0xff] %v2722_v26  ;;  %v2723_v30 = vmax.f32 %v1807_v27, 0.0  ;;  %14709 = vmatmul.mubr.msk.bf16.gmra.mrb[140].mxu0 %vm1334_vm3, %v16544_v23 }
 0x13e   : > { %v3204_v31 = vld [vmem:[#allocation2 + $0x70] ss:$2 sm:$0xff]  ;;  %v3446_v32 = vld [vmem:[#allocation2 + $0x71] ss:$2 sm:$0xff]  ;;  %14712 = vmatprep.mubr.msk.bf16.mxu0 %vm17264_vm2, %v17611_v5 }
 0x13f   : > { %v3680_v33 = vmax.f32 %v3204_v31, %v3446_v32  ;;  %2965 = vst [vmem:[#allocation2 + $0x88] sm:$0xff] %v2723_v30 }
 0x140   : > { %v1811_v34 = vpop.f32.mrb[36].mxu0  ;;  %v3927_v11 = vld [vmem:[#allocation3 + $0x2c] sm:$0xff] }
 0x141   : > { %3801 = vst [vmem:[#allocation3 + $0x38] sm:$0xff] %v3680_v33  ;;  %v1812_v35 = vadd.f32 %v17551_v46, %v1811_v34  ;;  %v14606_v36 = vpop.f32.mrb[37].mxu0  ;;  %v16555_v33 = vld [vmem:[%s17413_s17 + $0x140] sm:$0xff]  }
 0x142   : > { %v1814_v38 = vpop.f32.mrb[38].mxu0  ;;  %v4279_v40 = vld [vmem:[#allocation4 + $0x9] sm:$0xff] }
 0x143   : > { %v2724_v41 = vmax.f32 %v1812_v35, 0.0  ;;  %v1815_v42 = vadd.f32 %v17551_v46, %v1814_v38  ;;  %v14607_v43 = vpop.f32.mrb[39].mxu0  ;;  %v4333_v44 = vpack.c.bf16 %v4279_v40, %v4278_v39 }
 0x145   : > { %2966 = vst [vmem:[#allocation2 + $0x90] sm:$0xff] %v2724_v41  ;;  %v2725_v45 = vmax.f32 %v1815_v42, 0.0  ;;  %14713 = vmatmul.mubr.msk.bf16.gmra.mrb[144].mxu0 %vm1334_vm3, %v16545_v37  ;;  %15068 = vmatprep.mubr.bf16.mxu1 %v4333_v44 }
 0x146   : > { %v3206_v47 = vld [vmem:[#allocation2 + $0x80] ss:$2 sm:$0xff]  ;;  %v3448_v48 = vld [vmem:[#allocation2 + $0x81] ss:$2 sm:$0xff]  ;;  %14716 = vmatprep.mubr.msk.bf16.mxu0 %vm17264_vm2, %v17611_v5 }
 0x147   : > { %v3681_v49 = vmax.f32 %v3206_v47, %v3448_v48  ;;  %2967 = vst [vmem:[#allocation2 + $0x98] sm:$0xff] %v2725_v45  ;;  %v16558_v48 = vld [vmem:[%s17413_s17 + $0x148] sm:$0xff]  }
 0x148   : > { %v1819_v50 = vpop.f32.mrb[40].mxu0  ;;  %v3928_v25 = vld [vmem:[#allocation3 + $0x34] sm:$0xff] }
 0x149   : > { %3802 = vst [vmem:[#allocation3 + $0x40] sm:$0xff] %v3681_v49  ;;  %v1820_v51 = vadd.f32 %v17551_v46, %v1819_v50  ;;  %v14610_v52 = vpop.f32.mrb[41].mxu0 }
 0x14a   : > { %v1822_v54 = vpop.f32.mrb[42].mxu0 }
 0x14b   : > { %v2726_v55 = vmax.f32 %v1820_v51, 0.0  ;;  %v1823_v56 = vadd.f32 %v17551_v46, %v1822_v54  ;;  %v14611_v57 = vpop.f32.mrb[43].mxu0 }
 0x14d   : > { %2968 = vst [vmem:[#allocation2 + $0xa0] sm:$0xff] %v2726_v55  ;;  %v2727_v58 = vmax.f32 %v1823_v56, 0.0  ;;  %14717 = vmatmul.mubr.msk.bf16.gmra.mrb[148].mxu0 %vm1334_vm3, %v16546_v53 }
 0x14e   : > { %v3208_v59 = vld [vmem:[#allocation2 + $0x90] ss:$2 sm:$0xff]  ;;  %v3450_v60 = vld [vmem:[#allocation2 + $0x91] ss:$2 sm:$0xff]  ;;  %14720 = vmatprep.mubr.msk.bf16.mxu0 %vm17264_vm2, %v17611_v5 }
 0x14f   : > { %v3682_v61 = vmax.f32 %v3208_v59, %v3450_v60  ;;  %2969 = vst [vmem:[#allocation2 + $0xa8] sm:$0xff] %v2727_v58 }
 0x150   : > { %v1827_v62 = vpop.f32.mrb[44].mxu0  ;;  %v3929_v29 = vld [vmem:[#allocation3 + $0x3c] sm:$0x3f] }
 0x151   : > { %3803 = vst [vmem:[#allocation3 + $0x48] sm:$0xff] %v3682_v61  ;;  %v1828_v63 = vadd.f32 %v17551_v46, %v1827_v62  ;;  %v14614_v28 = vpop.f32.mrb[45].mxu0 }
 0x152   : > { %v1830_v4 = vpop.f32.mrb[46].mxu0 }
 0x153   : > { %v2728_v1 = vmax.f32 %v1828_v63, 0.0  ;;  %v1831_v2 = vadd.f32 %v17551_v46, %v1830_v4  ;;  %v14615_v3 = vpop.f32.mrb[47].mxu0  ;;  %v16559_v63 = vld [vmem:[%s17413_s17 + $0x150] sm:$0xff]  }
 0x155   : > { %2970 = vst [vmem:[#allocation2 + $0xb0] sm:$0xff] %v2728_v1  ;;  %v2729_v6 = vmax.f32 %v1831_v2, 0.0  ;;  %14721 = vmatmul.mubr.msk.bf16.gmra.mrb[152].mxu0 %vm1334_vm3, %v16549_v0 }
 0x156   : > { %v3210_v7 = vld [vmem:[#allocation2 + $0xa0] ss:$2 sm:$0xff]  ;;  %v3452_v8 = vld [vmem:[#allocation2 + $0xa1] ss:$2 sm:$0xff]  ;;  %14724 = vmatprep.mubr.msk.bf16.mxu0 %vm17264_vm2, %v17611_v5 }
 0x157   : > { %v3683_v9 = vmax.f32 %v3210_v7, %v3452_v8  ;;  %2971 = vst [vmem:[#allocation2 + $0xb8] sm:$0xff] %v2729_v6 }
 0x158   : > { %v1835_v10 = vpop.f32.mrb[48].mxu0  ;;  %v3930_v12 = vld [vmem:[#allocation3 + $0x42] sm:$0xff] }
 0x159   : > { %3804 = vst [vmem:[#allocation3 + $0x50] sm:$0xff] %v3683_v9  ;;  %v1836_v16 = vadd.f32 %v17551_v46, %v1835_v10  ;;  %v14618_v17 = vpop.f32.mrb[49].mxu0  ;;  %v3933_v19 = vmax.f32 %v3927_v11, %v3930_v12  ;;  %v17687_v9 = vld [vmem:[%s20353_s2] ss:$0 sm:$0xff]  ;;  %v16560_v11 = vld [vmem:[%s17413_s17 + $0x158] sm:$0xff]  }
 0x15a   : > { %v1838_v20 = vpop.f32.mrb[50].mxu0 }
 0x15b   : > { %v2730_v21 = vmax.f32 %v1836_v16, 0.0  ;;  %v1839_v13 = vadd.f32 %v17551_v46, %v1838_v20  ;;  %v14619_v14 = vpop.f32.mrb[51].mxu0  ;;  %3936 = vst [vmem:[#allocation4 + $0x16] sm:$0xff] %v3933_v19 }
 0x15d   : > { %2972 = vst [vmem:[#allocation2 + $0xc0] sm:$0xff] %v2730_v21  ;;  %v2731_v15 = vmax.f32 %v1839_v13, 0.0  ;;  %14725 = vmatmul.mubr.msk.bf16.gmra.mrb[156].mxu0 %vm1334_vm3, %v16552_v18 }
 0x15e   : > { %v17652_v22 = vld [vmem:[#allocation2 + $0xb0] ss:$2 sm:$0xff]  ;;  %v17654_v23 = vld [vmem:[#allocation2 + $0xb1] ss:$2 sm:$0xff]  ;;  %14728 = vmatprep.mubr.msk.bf16.mxu0 %vm17264_vm2, %v17611_v5 }
 0x15f   : > { %v3684_v24 = vmax.f32 %v17652_v22, %v17654_v23  ;;  %2973 = vst [vmem:[#allocation2 + $0xc8] sm:$0xff] %v2731_v15 }
 0x160   : > { %v1843_v26 = vpop.f32.mrb[52].mxu0  ;;  %v3931_v27 = vld [vmem:[#allocation3 + $0x4a] sm:$0xff]  ;;  %v3932_v30 = vld [vmem:[#allocation3 + $0x52] sm:$0x3f] }
 0x161   : > { %v1844_v31 = vadd.f32 %v17551_v46, %v1843_v26  ;;  %v14622_v32 = vpop.f32.mrb[53].mxu0  ;;  %v3934_v34 = vmax.f32 %v3928_v25, %v3931_v27  ;;  %v3935_v35 = vmax.f32 %v3929_v29, %v3932_v30  ;;  %v16561_v27 = vld [vmem:[%s17413_s17 + $0x160] sm:$0xff]  }
 0x162   : > { %v1846_v36 = vpop.f32.mrb[54].mxu0  ;;  %v4280_v50 = vld [vmem:[#allocation4 + $0x11] sm:$0xff] }
 0x163   : > { %v2732_v37 = vmax.f32 %v1844_v31, 0.0  ;;  %v1847_v38 = vadd.f32 %v17551_v46, %v1846_v36  ;;  %v14623_v39 = vpop.f32.mrb[55].mxu0  ;;  %3937 = vst [vmem:[#allocation4 + $0x1e] sm:$0xff] %v3934_v34  ;;  %3938 = vst [vmem:[#allocation4 + $0x26] sm:$0x3f] %v3935_v35 }
 0x164   : > { %v16562_v39 = vld [vmem:[%s17413_s17 + $0x168] sm:$0xff]  }
 0x165   : > { %2974 = vst [vmem:[#allocation2 + $0xd0] sm:$0xff] %v2732_v37  ;;  %v2733_v40 = vmax.f32 %v1847_v38, 0.0  ;;  %14729 = vmatmul.mubr.msk.bf16.gmra.mrb[160].mxu0 %vm1334_vm3, %v16555_v33 }
 0x166   : > { %v17664_v41 = vld [vmem:[#allocation2 + $0xc0] ss:$2 sm:$0xff]  ;;  %v17666_v42 = vld [vmem:[#allocation2 + $0xc1] ss:$2 sm:$0xff]  ;;  %14732 = vmatprep.mubr.msk.bf16.mxu0 %vm17264_vm2, %v17611_v5 }
 0x167   : > { %v3685_v43 = vmax.f32 %v17664_v41, %v17666_v42  ;;  %2975 = vst [vmem:[#allocation2 + $0xd8] sm:$0xff] %v2733_v40 }
 0x168   : > { %v1851_v44 = vpop.f32.mrb[56].mxu0 }
 0x169   : > { %v1852_v45 = vadd.f32 %v17551_v46, %v1851_v44  ;;  %v14626_v47 = vpop.f32.mrb[57].mxu0 }
 0x16a   : > { %v1854_v49 = vpop.f32.mrb[58].mxu0  ;;  %v4281_v51 = vld [vmem:[#allocation4 + $0x19] sm:$0xff] }
 0x16b   : > { %v2734_v52 = vmax.f32 %v1852_v45, 0.0  ;;  %v1855_v53 = vadd.f32 %v17551_v46, %v1854_v49  ;;  %v14627_v54 = vpop.f32.mrb[59].mxu0  ;;  %v4334_v55 = vpack.c.bf16 %v4281_v51, %v4280_v50  ;;  %v4282_v45 = vld [vmem:[#allocation4 + $0x21] sm:$0xff] }
 0x16d   : > { %2976 = vst [vmem:[#allocation2 + $0xe0] sm:$0xff] %v2734_v52  ;;  %v2735_v56 = vmax.f32 %v1855_v53, 0.0  ;;  %14733 = vmatmul.mubr.msk.bf16.gmra.mrb[164].mxu0 %vm1334_vm3, %v16558_v48  ;;  %15069 = vmatmul.mubr.bf16.vlgmr.msra.gmra.mrb[0].mxu1 %v4334_v55 }
 0x16e   : > { %v3216_v57 = vld [vmem:[#allocation2 + $0xd0] ss:$2 sm:$0xff]  ;;  %v3458_v58 = vld [vmem:[#allocation2 + $0xd1] ss:$2 sm:$0xff]  ;;  %14736 = vmatprep.mubr.msk.bf16.mxu0 %vm17264_vm2, %v17611_v5 }
 0x16f   : > { %v3686_v59 = vmax.f32 %v3216_v57, %v3458_v58  ;;  %2977 = vst [vmem:[#allocation2 + $0xe8] sm:$0xff] %v2735_v56  ;;  %v16563_v58 = vld [vmem:[%s17413_s17 + $0x170] sm:$0xff]  }
 0x170   : > { %v1859_v60 = vpop.f32.mrb[60].mxu0 }
 0x171   : > { %3807 = vst [vmem:[#allocation3 + $0x68] sm:$0xff] %v3686_v59  ;;  %v1860_v61 = vadd.f32 %v17551_v46, %v1859_v60  ;;  %v14630_v62 = vpop.f32.mrb[61].mxu0 }
 0x172   : > { %v1862_v28 = vpop.f32.mrb[62].mxu0 }
 0x173   : > { %v2736_v0 = vmax.f32 %v1860_v61, 0.0  ;;  %v1863_v4 = vadd.f32 %v17551_v46, %v1862_v28  ;;  %v14631_v1 = vpop.f32.mrb[63].mxu0 }
 0x175   : > { %2978 = vst [vmem:[#allocation2 + $0xf0] sm:$0xff] %v2736_v0  ;;  %v2737_v2 = vmax.f32 %v1863_v4, 0.0  ;;  %14737 = vmatmul.mubr.msk.bf16.gmra.mrb[168].mxu0 %vm1334_vm3, %v16559_v63 }
 0x176   : > { %v3218_v3 = vld [vmem:[#allocation2 + $0xe0] ss:$2 sm:$0xff]  ;;  %v3460_v6 = vld [vmem:[#allocation2 + $0xe1] ss:$2 sm:$0xff]  ;;  %14740 = vmatprep.mubr.msk.bf16.mxu0 %vm17264_vm2, %v17611_v5 }
 0x177   : > { %v3687_v7 = vmax.f32 %v3218_v3, %v3460_v6  ;;  %2979 = vst [vmem:[#allocation2 + $0xf8] sm:$0xff] %v2737_v2 }
 0x178   : > { %v1867_v8 = vpop.f32.mrb[64].mxu0 }
 0x179   : > { %3808 = vst [vmem:[#allocation3 + $0x70] sm:$0xff] %v3687_v7  ;;  %v1868_v46 = vadd.f32 %v17687_v9, %v1867_v8  ;;  %v14634_v10 = vpop.f32.mrb[65].mxu0  ;;  %v16564_v7 = vld [vmem:[%s17413_s17 + $0x178] sm:$0xff]  }
 0x17a   : > { %v1870_v12 = vpop.f32.mrb[66].mxu0 }
 0x17b   : > { %v2738_v16 = vmax.f32 %v1868_v46, 0.0  ;;  %v1871_v17 = vadd.f32 %v17687_v9, %v1870_v12  ;;  %v14635_v18 = vpop.f32.mrb[67].mxu0 }
 0x17d   : > { %2980 = vst [vmem:[#allocation2 + $0x100] sm:$0xff] %v2738_v16  ;;  %v2739_v19 = vmax.f32 %v1871_v17, 0.0  ;;  %14741 = vmatmul.mubr.msk.bf16.gmra.mrb[172].mxu0 %vm1334_vm3, %v16560_v11 }
 0x17e   : > { %v3220_v20 = vld [vmem:[#allocation2 + $0xf0] ss:$2 sm:$0xff]  ;;  %v3462_v21 = vld [vmem:[#allocation2 + $0xf1] ss:$2 sm:$0xff]  ;;  %14744 = vmatprep.mubr.msk.bf16.mxu0 %vm17264_vm2, %v17611_v5 }
 0x17f   : > { %v3688_v13 = vmax.f32 %v3220_v20, %v3462_v21  ;;  %2981 = vst [vmem:[#allocation2 + $0x108] sm:$0xff] %v2739_v19 }
 0x180   : > { %v1875_v14 = vpop.f32.mrb[68].mxu0  ;;  %v3942_v15 = vld [vmem:[#allocation3 + $0x6e] sm:$0xff] }
 0x181   : > { %3809 = vst [vmem:[#allocation3 + $0x78] sm:$0xff] %v3688_v13  ;;  %v1876_v25 = vadd.f32 %v17687_v9, %v1875_v14  ;;  %v14638_v26 = vpop.f32.mrb[69].mxu0  ;;  %v3945_v29 = vmax.f32 %v3684_v24, %v3942_v15 }
 0x182   : > { %v1878_v30 = vpop.f32.mrb[70].mxu0 }
 0x183   : > { %v2740_v31 = vmax.f32 %v1876_v25, 0.0  ;;  %v1879_v32 = vadd.f32 %v17687_v9, %v1878_v30  ;;  %v14639_v33 = vpop.f32.mrb[71].mxu0  ;;  %3948 = vst [vmem:[#allocation4 + $0x2c] sm:$0xff] %v3945_v29  ;;  %v16565_v25 = vld [vmem:[%s17413_s17 + $0x180] sm:$0xff]  }
 0x185   : > { %2982 = vst [vmem:[#allocation2 + $0x110] sm:$0xff] %v2740_v31  ;;  %v2741_v34 = vmax.f32 %v1879_v32, 0.0  ;;  %14745 = vmatmul.mubr.msk.bf16.gmra.mrb[176].mxu0 %vm1334_vm3, %v16561_v27 }
 0x186   : > { %v3222_v35 = vld [vmem:[#allocation2 + $0x100] ss:$2 sm:$0xff]  ;;  %v3464_v36 = vld [vmem:[#allocation2 + $0x101] ss:$2 sm:$0xff]  ;;  %14748 = vmatprep.mubr.msk.bf16.mxu0 %vm17264_vm2, %v17611_v5 }
 0x187   : > { %v3689_v37 = vmax.f32 %v3222_v35, %v3464_v36  ;;  %2983 = vst [vmem:[#allocation2 + $0x118] sm:$0xff] %v2741_v34 }
 0x188   : > { %v1883_v22 = vpop.f32.mrb[72].mxu0  ;;  %v3943_v23 = vld [vmem:[#allocation3 + $0x76] sm:$0xff] }
 0x189   : > { %3810 = vst [vmem:[#allocation3 + $0x80] sm:$0xff] %v3689_v37  ;;  %v1884_v24 = vadd.f32 %v17687_v9, %v1883_v22  ;;  %v14642_v38 = vpop.f32.mrb[73].mxu0  ;;  %v3946_v40 = vmax.f32 %v3685_v43, %v3943_v23  ;;  %v3941_v43 = vld [vmem:[#allocation3 + $0x68] sm:$0x3f]  ;;  %v16566_v22 = vld [vmem:[%s17413_s17 + $0x188] sm:$0xff]  }
 0x18a   : > { %v1886_v44 = vpop.f32.mrb[74].mxu0  ;;  %v4283_v47 = vld [vmem:[#allocation4 + $0x29] sm:$0xff] }
 0x18b   : > { %v2742_v48 = vmax.f32 %v1884_v24, 0.0  ;;  %v1887_v49 = vadd.f32 %v17687_v9, %v1886_v44  ;;  %v14643_v50 = vpop.f32.mrb[75].mxu0  ;;  %v4335_v51 = vpack.c.bf16 %v4283_v47, %v4282_v45  ;;  %3949 = vst [vmem:[#allocation4 + $0x34] sm:$0xff] %v3946_v40 }
 0x18d   : > { %2984 = vst [vmem:[#allocation2 + $0x120] sm:$0xff] %v2742_v48  ;;  %v2743_v52 = vmax.f32 %v1887_v49, 0.0  ;;  %14749 = vmatmul.mubr.msk.bf16.gmra.mrb[180].mxu0 %vm1334_vm3, %v16562_v39  ;;  %15072 = vmatprep.mubr.bf16.mxu1 %v4335_v51 }
 0x18e   : > { %v3224_v53 = vld [vmem:[#allocation2 + $0x110] ss:$2 sm:$0xff]  ;;  %v3466_v54 = vld [vmem:[#allocation2 + $0x111] ss:$2 sm:$0xff]  ;;  %14752 = vmatprep.mubr.msk.bf16.mxu0 %vm17264_vm2, %v17611_v5 }
 0x18f   : > { %v3690_v41 = vmax.f32 %v3224_v53, %v3466_v54  ;;  %2985 = vst [vmem:[#allocation2 + $0x128] sm:$0xff] %v2743_v52  ;;  %v16567_v53 = vld [vmem:[%s17413_s17 + $0x190] sm:$0xff]  }
 0x190   : > { %v1891_v42 = vpop.f32.mrb[76].mxu0  ;;  %v3944_v55 = vld [vmem:[#allocation3 + $0x7e] sm:$0x3f] }
 0x191   : > { %3811 = vst [vmem:[#allocation3 + $0x88] sm:$0xff] %v3690_v41  ;;  %v1892_v56 = vadd.f32 %v17687_v9, %v1891_v42  ;;  %v14646_v57 = vpop.f32.mrb[77].mxu0  ;;  %v3947_v59 = vmax.f32 %v3941_v43, %v3944_v55 }
 0x192   : > { %v1894_v60 = vpop.f32.mrb[78].mxu0  ;;  %v4284_v46 = vld [vmem:[#allocation4 + $0x31] sm:$0xff] }
 0x193   : > { %v2744_v61 = vmax.f32 %v1892_v56, 0.0  ;;  %v1895_v62 = vadd.f32 %v17687_v9, %v1894_v60  ;;  %v14647_v63 = vpop.f32.mrb[79].mxu0  ;;  %3950 = vst [vmem:[#allocation4 + $0x3c] sm:$0x3f] %v3947_v59 }
 0x195   : > { %2986 = vst [vmem:[#allocation2 + $0x130] sm:$0xff] %v2744_v61  ;;  %v2745_v28 = vmax.f32 %v1895_v62, 0.0  ;;  %14753 = vmatmul.mubr.msk.bf16.gmra.mrb[184].mxu0 %vm1334_vm3, %v16563_v58 }
 0x196   : > { %v3226_v0 = vld [vmem:[#allocation2 + $0x120] ss:$2 sm:$0xff]  ;;  %v3468_v4 = vld [vmem:[#allocation2 + $0x121] ss:$2 sm:$0xff]  ;;  %14756 = vmatprep.mubr.msk.bf16.mxu0 %vm17264_vm2, %v17611_v5 }
 0x197   : > { %v3691_v1 = vmax.f32 %v3226_v0, %v3468_v4  ;;  %2987 = vst [vmem:[#allocation2 + $0x138] sm:$0xff] %v2745_v28 }
 0x198   : > { %v1899_v2 = vpop.f32.mrb[80].mxu0  ;;  %v3951_v49 = vld [vmem:[#allocation3 + $0x84] sm:$0xff] }
 0x199   : > { %3812 = vst [vmem:[#allocation3 + $0x90] sm:$0xff] %v3691_v1  ;;  %v1900_v3 = vadd.f32 %v17687_v9, %v1899_v2  ;;  %v14650_v6 = vpop.f32.mrb[81].mxu0  ;;  %v16568_v1 = vld [vmem:[%s17413_s17 + $0x198] sm:$0xff]  }
 0x19a   : > { %v1902_v8 = vpop.f32.mrb[82].mxu0  ;;  %v4285_v10 = vld [vmem:[#allocation4 + $0x39] sm:$0xff] }
 0x19b   : > { %v2746_v11 = vmax.f32 %v1900_v3, 0.0  ;;  %v1903_v12 = vadd.f32 %v17687_v9, %v1902_v8  ;;  %v14651_v16 = vpop.f32.mrb[83].mxu0  ;;  %v4336_v17 = vpack.c.bf16 %v4285_v10, %v4284_v46 }
 0x19d   : > { %2988 = vst [vmem:[#allocation2 + $0x140] sm:$0xff] %v2746_v11  ;;  %v2747_v18 = vmax.f32 %v1903_v12, 0.0  ;;  %14757 = vmatmul.mubr.msk.bf16.gmra.mrb[188].mxu0 %vm1334_vm3, %v16564_v7  ;;  %15073 = vmatmul.mubr.bf16.gmra.mrb[4].mxu1 %v4336_v17 }
 0x19e   : > { %v3228_v19 = vld [vmem:[#allocation2 + $0x130] ss:$2 sm:$0xff]  ;;  %v3470_v20 = vld [vmem:[#allocation2 + $0x131] ss:$2 sm:$0xff]  ;;  %14760 = vmatprep.mubr.msk.bf16.mxu0 %vm17264_vm2, %v17611_v5 }
 0x19f   : > { %v3692_v21 = vmax.f32 %v3228_v19, %v3470_v20  ;;  %2989 = vst [vmem:[#allocation2 + $0x148] sm:$0xff] %v2747_v18  ;;  %v16569_v20 = vld [vmem:[%s17413_s17 + $0x1a0] sm:$0xff]  }
 0x1a0   : > { %v1907_v13 = vpop.f32.mrb[84].mxu0  ;;  %v3952_v60 = vld [vmem:[#allocation3 + $0x8c] sm:$0xff] }
 0x1a1   : > { %3813 = vst [vmem:[#allocation3 + $0x98] sm:$0xff] %v3692_v21  ;;  %v1908_v14 = vadd.f32 %v17687_v9, %v1907_v13  ;;  %v14654_v15 = vpop.f32.mrb[85].mxu0 }
 0x1a2   : > { %v1910_v26 = vpop.f32.mrb[86].mxu0 }
 0x1a3   : > { %v2748_v27 = vmax.f32 %v1908_v14, 0.0  ;;  %v1911_v29 = vadd.f32 %v17687_v9, %v1910_v26  ;;  %v14655_v30 = vpop.f32.mrb[87].mxu0 }
 0x1a5   : > { %2990 = vst [vmem:[#allocation2 + $0x150] sm:$0xff] %v2748_v27  ;;  %v2749_v31 = vmax.f32 %v1911_v29, 0.0  ;;  %14761 = vmatmul.mubr.msk.bf16.gmra.mrb[192].mxu0 %vm1334_vm3, %v16565_v25 }
 0x1a6   : > { %v3230_v32 = vld [vmem:[#allocation2 + $0x140] ss:$2 sm:$0xff]  ;;  %v3472_v33 = vld [vmem:[#allocation2 + $0x141] ss:$2 sm:$0xff]  ;;  %14764 = vmatprep.mubr.msk.bf16.mxu0 %vm17264_vm2, %v17611_v5 }
 0x1a7   : > { %v3693_v34 = vmax.f32 %v3230_v32, %v3472_v33  ;;  %2991 = vst [vmem:[#allocation2 + $0x158] sm:$0xff] %v2749_v31 }
 0x1a8   : > { %v1915_v35 = vpop.f32.mrb[88].mxu0  ;;  %v3953_v63 = vld [vmem:[#allocation3 + $0x94] sm:$0x3f] }
 0x1a9   : > { %3814 = vst [vmem:[#allocation3 + $0xa0] sm:$0xff] %v3693_v34  ;;  %v1916_v36 = vadd.f32 %v17687_v9, %v1915_v35  ;;  %v14658_v37 = vpop.f32.mrb[89].mxu0 }
 0x1aa   : > { %v1918_v23 = vpop.f32.mrb[90].mxu0 }
 0x1ab   : > { %v2750_v24 = vmax.f32 %v1916_v36, 0.0  ;;  %v1919_v38 = vadd.f32 %v17687_v9, %v1918_v23  ;;  %v14659_v39 = vpop.f32.mrb[91].mxu0  ;;  %v16570_v36 = vld [vmem:[%s17413_s17 + $0x1a8] sm:$0xff]  }
 0x1ad   : > { %2992 = vst [vmem:[#allocation2 + $0x160] sm:$0xff] %v2750_v24  ;;  %v2751_v40 = vmax.f32 %v1919_v38, 0.0  ;;  %14765 = vmatmul.mubr.msk.bf16.gmra.mrb[196].mxu0 %vm1334_vm3, %v16566_v22 }
 0x1ae   : > { %v3232_v44 = vld [vmem:[#allocation2 + $0x150] ss:$2 sm:$0xff]  ;;  %v3474_v45 = vld [vmem:[#allocation2 + $0x151] ss:$2 sm:$0xff]  ;;  %14768 = vmatprep.mubr.msk.bf16.mxu0 %vm17264_vm2, %v17611_v5 }
 0x1af   : > { %v3694_v47 = vmax.f32 %v3232_v44, %v3474_v45  ;;  %2993 = vst [vmem:[#allocation2 + $0x168] sm:$0xff] %v2751_v40 }
 0x1b0   : > { %v1923_v48 = vpop.f32.mrb[92].mxu0  ;;  %v3954_v50 = vld [vmem:[#allocation3 + $0x9a] sm:$0xff] }
 0x1b1   : > { %3815 = vst [vmem:[#allocation3 + $0xa8] sm:$0xff] %v3694_v47  ;;  %v1924_v51 = vadd.f32 %v17687_v9, %v1923_v48  ;;  %v14662_v52 = vpop.f32.mrb[93].mxu0  ;;  %v3957_v54 = vmax.f32 %v3951_v49, %v3954_v50  ;;  %v16571_v49 = vld [vmem:[%s17413_s17 + $0x1b0] sm:$0xff]  }
 0x1b2   : > { %v1926_v41 = vpop.f32.mrb[94].mxu0 }
 0x1b3   : > { %v2752_v42 = vmax.f32 %v1924_v51, 0.0  ;;  %v1927_v43 = vadd.f32 %v17687_v9, %v1926_v41  ;;  %v14663_v55 = vpop.f32.mrb[95].mxu0  ;;  %3960 = vst [vmem:[#allocation4 + $0x42] sm:$0xff] %v3957_v54 }
 0x1b5   : > { %2994 = vst [vmem:[#allocation2 + $0x170] sm:$0xff] %v2752_v42  ;;  %v2753_v56 = vmax.f32 %v1927_v43, 0.0  ;;  %14769 = vmatmul.mubr.msk.bf16.gmra.mrb[200].mxu0 %vm1334_vm3, %v16567_v53 }
 0x1b6   : > { %v17741_v57 = vld [vmem:[#allocation2 + $0x160] ss:$2 sm:$0xff]  ;;  %v17743_v58 = vld [vmem:[#allocation2 + $0x161] ss:$2 sm:$0xff]  ;;  %14772 = vmatprep.mubr.msk.bf16.mxu0 %vm17264_vm2, %v17611_v5 }
 0x1b7   : > { %v3695_v59 = vmax.f32 %v17741_v57, %v17743_v58  ;;  %2995 = vst [vmem:[#allocation2 + $0x178] sm:$0xff] %v2753_v56 }
 0x1b8   : > { %v1931_v61 = vpop.f32.mrb[96].mxu0  ;;  %v3955_v62 = vld [vmem:[#allocation3 + $0xa2] sm:$0xff]  ;;  %v3956_v28 = vld [vmem:[#allocation3 + $0xaa] sm:$0x3f] }
 0x1b9   : > { %v1932_v0 = vadd.f32 %v17687_v9, %v1931_v61  ;;  %v14666_v4 = vpop.f32.mrb[97].mxu0  ;;  %v3958_v2 = vmax.f32 %v3952_v60, %v3955_v62  ;;  %v3959_v3 = vmax.f32 %v3953_v63, %v3956_v28  ;;  %v16572_v62 = vld [vmem:[%s17413_s17 + $0x1b8] sm:$0xff]  }
 0x1ba   : > { %v1934_v6 = vpop.f32.mrb[98].mxu0  ;;  %v4286_v13 = vld [vmem:[#allocation4 + $0x41] sm:$0xff] }
 0x1bb   : > { %v2754_v7 = vmax.f32 %v1932_v0, 0.0  ;;  %v1935_v8 = vadd.f32 %v17687_v9, %v1934_v6  ;;  %v14667_v46 = vpop.f32.mrb[99].mxu0  ;;  %3961 = vst [vmem:[#allocation4 + $0x4a] sm:$0xff] %v3958_v2  ;;  %3962 = vst [vmem:[#allocation4 + $0x52] sm:$0x3f] %v3959_v3 }
 0x1bc   : > { %v16573_v46 = vld [vmem:[%s17413_s17 + $0x1c0] sm:$0xff]  }
 0x1bd   : > { %2996 = vst [vmem:[#allocation2 + $0x180] sm:$0xff] %v2754_v7  ;;  %v2755_v10 = vmax.f32 %v1935_v8, 0.0  ;;  %14773 = vmatmul.mubr.msk.bf16.gmra.mrb[204].mxu0 %vm1334_vm3, %v16568_v1 }
 0x1be   : > { %v17753_v11 = vld [vmem:[#allocation2 + $0x170] ss:$2 sm:$0xff]  ;;  %v17755_v12 = vld [vmem:[#allocation2 + $0x171] ss:$2 sm:$0xff]  ;;  %14776 = vmatprep.mubr.msk.bf16.mxu0 %vm17264_vm2, %v17611_v5 }
 0x1bf   : > { %v3696_v16 = vmax.f32 %v17753_v11, %v17755_v12  ;;  %2997 = vst [vmem:[#allocation2 + $0x188] sm:$0xff] %v2755_v10 }
 0x1c0   : > { %v1939_v17 = vpop.f32.mrb[100].mxu0 }
 0x1c1   : > { %v1940_v18 = vadd.f32 %v17687_v9, %v1939_v17  ;;  %v14670_v19 = vpop.f32.mrb[101].mxu0 }
 0x1c2   : > { %v1942_v21 = vpop.f32.mrb[102].mxu0  ;;  %v4287_v14 = vld [vmem:[#allocation4 + $0x49] sm:$0xff] }
 0x1c3   : > { %v2756_v15 = vmax.f32 %v1940_v18, 0.0  ;;  %v1943_v25 = vadd.f32 %v17687_v9, %v1942_v21  ;;  %v14671_v26 = vpop.f32.mrb[103].mxu0  ;;  %v4337_v27 = vpack.c.bf16 %v4287_v14, %v4286_v13  ;;  %v17795_v14 = vld [vmem:[#allocation4 + $0x1e4] sm:$0xff] }
 0x1c5   : > { %2998 = vst [vmem:[#allocation2 + $0x190] sm:$0xff] %v2756_v15  ;;  %v2757_v29 = vmax.f32 %v1943_v25, 0.0  ;;  %14777 = vmatmul.mubr.msk.bf16.gmra.mrb[208].mxu0 %vm1334_vm3, %v16569_v20  ;;  %15076 = vmatprep.mubr.bf16.mxu1 %v4337_v27  ;;  %v16574_v27 = vld [vmem:[%s17413_s17 + $0x1c8] sm:$0xff]  }
 0x1c6   : > { %v3238_v30 = vld [vmem:[#allocation2 + $0x180] ss:$2 sm:$0xff]  ;;  %v3480_v31 = vld [vmem:[#allocation2 + $0x181] ss:$2 sm:$0xff]  ;;  %14780 = vmatprep.mubr.msk.bf16.mxu0 %vm17264_vm2, %v17611_v5 }
 0x1c7   : > { %v3697_v32 = vmax.f32 %v3238_v30, %v3480_v31  ;;  %2999 = vst [vmem:[#allocation2 + $0x198] sm:$0xff] %v2757_v29 }
 0x1c8   : > { %v1947_v33 = vpop.f32.mrb[104].mxu0 }
 0x1c9   : > { %3818 = vst [vmem:[#allocation3 + $0xc0] sm:$0xff] %v3697_v32  ;;  %v1948_v34 = vadd.f32 %v17687_v9, %v1947_v33  ;;  %v14674_v35 = vpop.f32.mrb[105].mxu0 }
 0x1ca   : > { %v1950_v37 = vpop.f32.mrb[106].mxu0 }
 0x1cb   : > { %v2758_v22 = vmax.f32 %v1948_v34, 0.0  ;;  %v1951_v23 = vadd.f32 %v17687_v9, %v1950_v37  ;;  %v14675_v24 = vpop.f32.mrb[107].mxu0 }
 0x1cd   : > { %3000 = vst [vmem:[#allocation2 + $0x1a0] sm:$0xff] %v2758_v22  ;;  %v2759_v38 = vmax.f32 %v1951_v23, 0.0  ;;  %14781 = vmatmul.mubr.msk.bf16.gmra.mrb[212].mxu0 %vm1334_vm3, %v16570_v36 }
 0x1ce   : > { %v3240_v39 = vld [vmem:[#allocation2 + $0x190] ss:$2 sm:$0xff]  ;;  %v3482_v40 = vld [vmem:[#allocation2 + $0x191] ss:$2 sm:$0xff]  ;;  %14784 = vmatprep.mubr.msk.bf16.mxu0 %vm17264_vm2, %v17611_v5 }
 0x1cf   : > { %v3698_v44 = vmax.f32 %v3240_v39, %v3482_v40  ;;  %3001 = vst [vmem:[#allocation2 + $0x1a8] sm:$0xff] %v2759_v38 }
 0x1d0   : > { %v1955_v45 = vpop.f32.mrb[108].mxu0 }
 0x1d1   : > { %3819 = vst [vmem:[#allocation3 + $0xc8] sm:$0xff] %v3698_v44  ;;  %v1956_v47 = vadd.f32 %v17687_v9, %v1955_v45  ;;  %v14678_v48 = vpop.f32.mrb[109].mxu0  ;;  %v16575_v44 = vld [vmem:[%s17413_s17 + $0x1d0] sm:$0xff]  }
 0x1d2   : > { %v1958_v50 = vpop.f32.mrb[110].mxu0 }
 0x1d3   : > { %v2760_v51 = vmax.f32 %v1956_v47, 0.0  ;;  %v1959_v52 = vadd.f32 %v17687_v9, %v1958_v50  ;;  %v14679_v53 = vpop.f32.mrb[111].mxu0 }
 0x1d5   : > { %3002 = vst [vmem:[#allocation2 + $0x1b0] sm:$0xff] %v2760_v51  ;;  %v2761_v54 = vmax.f32 %v1959_v52, 0.0  ;;  %14785 = vmatmul.mubr.msk.bf16.gmra.mrb[216].mxu0 %vm1334_vm3, %v16571_v49 }
 0x1d6   : > { %v3242_v41 = vld [vmem:[#allocation2 + $0x1a0] ss:$2 sm:$0xff]  ;;  %v3484_v42 = vld [vmem:[#allocation2 + $0x1a1] ss:$2 sm:$0xff]  ;;  %14788 = vmatprep.mubr.msk.bf16.mxu0 %vm17264_vm2, %v17611_v5 }
 0x1d7   : > { %v3699_v43 = vmax.f32 %v3242_v41, %v3484_v42  ;;  %3003 = vst [vmem:[#allocation2 + $0x1b8] sm:$0xff] %v2761_v54 }
 0x1d8   : > { %v1963_v55 = vpop.f32.mrb[112].mxu0  ;;  %v3966_v56 = vld [vmem:[#allocation3 + $0xc6] sm:$0xff] }
 0x1d9   : > { %3820 = vst [vmem:[#allocation3 + $0xd0] sm:$0xff] %v3699_v43  ;;  %v1964_v60 = vadd.f32 %v17687_v9, %v1963_v55  ;;  %v14682_v61 = vpop.f32.mrb[113].mxu0  ;;  %v3969_v63 = vmax.f32 %v3695_v59, %v3966_v56  ;;  %v16576_v43 = vld [vmem:[%s17413_s17 + $0x1d8] sm:$0xff]  }
 0x1da   : > { %v1966_v28 = vpop.f32.mrb[114].mxu0 }
 0x1db   : > { %v2762_v0 = vmax.f32 %v1964_v60, 0.0  ;;  %v1967_v4 = vadd.f32 %v17687_v9, %v1966_v28  ;;  %v14683_v1 = vpop.f32.mrb[115].mxu0  ;;  %3972 = vst [vmem:[#allocation4 + $0x58] sm:$0xff] %v3969_v63 }
 0x1dd   : > { %3004 = vst [vmem:[#allocation2 + $0x1c0] sm:$0xff] %v2762_v0  ;;  %v2763_v2 = vmax.f32 %v1967_v4, 0.0  ;;  %14789 = vmatmul.mubr.msk.bf16.gmra.mrb[220].mxu0 %vm1334_vm3, %v16572_v62 }
 0x1de   : > { %v3244_v3 = vld [vmem:[#allocation2 + $0x1b0] ss:$2 sm:$0xff]  ;;  %v3486_v6 = vld [vmem:[#allocation2 + $0x1b1] ss:$2 sm:$0xff]  ;;  %14792 = vmatprep.mubr.msk.bf16.mxu0 %vm17264_vm2, %v17611_v5 }
 0x1df   : > { %v3700_v7 = vmax.f32 %v3244_v3, %v3486_v6  ;;  %3005 = vst [vmem:[#allocation2 + $0x1c8] sm:$0xff] %v2763_v2  ;;  %v16577_v3 = vld [vmem:[%s17413_s17 + $0x1e0] sm:$0xff]  }
 0x1e0   : > { %v1971_v57 = vpop.f32.mrb[116].mxu0  ;;  %v3967_v58 = vld [vmem:[#allocation3 + $0xce] sm:$0xff] }
 0x1e1   : > { %3821 = vst [vmem:[#allocation3 + $0xd8] sm:$0xff] %v3700_v7  ;;  %v1972_v59 = vadd.f32 %v17687_v9, %v1971_v57  ;;  %v14686_v8 = vpop.f32.mrb[117].mxu0  ;;  %v3970_v10 = vmax.f32 %v3696_v16, %v3967_v58  ;;  %v3965_v16 = vld [vmem:[#allocation3 + $0xc0] sm:$0x3f] }
 0x1e2   : > { %v1974_v17 = vpop.f32.mrb[118].mxu0  ;;  %v4288_v31 = vld [vmem:[#allocation4 + $0x51] sm:$0xff] }
 0x1e3   : > { %v2764_v18 = vmax.f32 %v1972_v59, 0.0  ;;  %v1975_v19 = vadd.f32 %v17687_v9, %v1974_v17  ;;  %v14687_v20 = vpop.f32.mrb[119].mxu0  ;;  %3973 = vst [vmem:[#allocation4 + $0x60] sm:$0xff] %v3970_v10 }
 0x1e5   : > { %3006 = vst [vmem:[#allocation2 + $0x1d0] sm:$0xff] %v2764_v18  ;;  %v2765_v5 = vmax.f32 %v1975_v19, 0.0  ;;  %14793 = vmatmul.mubr.msk.bf16.gmra.mrb[224].mxu0 %vm1334_vm3, %v16573_v46 }
 0x1e6   : > { %v3246_v21 = vld [vmem:[#allocation2 + $0x1c0] ss:$2 sm:$0xff]  ;;  %v3488_v13 = vld [vmem:[#allocation2 + $0x1c1] ss:$2 sm:$0xff]  ;;  %14796 = vmatprep.mubr.msk.bf16.mxu0 %vm17264_vm2, %v17795_v14 }
 0x1e7   : > { %v3701_v11 = vmax.f32 %v3246_v21, %v3488_v13  ;;  %3007 = vst [vmem:[#allocation2 + $0x1d8] sm:$0xff] %v2765_v5  ;;  %v16578_v21 = vld [vmem:[%s17413_s17 + $0x1e8] sm:$0xff]  }
 0x1e8   : > { %v1979_v12 = vpop.f32.mrb[120].mxu0  ;;  %v3968_v15 = vld [vmem:[#allocation3 + $0xd6] sm:$0x3f] }
 0x1e9   : > { %3822 = vst [vmem:[#allocation3 + $0xe0] sm:$0xff] %v3701_v11  ;;  %v1980_v25 = vadd.f32 %v17687_v9, %v1979_v12  ;;  %v14690_v26 = vpop.f32.mrb[121].mxu0  ;;  %v3971_v29 = vmax.f32 %v3965_v16, %v3968_v15 }
 0x1ea   : > { %v1982_v30 = vpop.f32.mrb[122].mxu0  ;;  %v4289_v32 = vld [vmem:[#allocation4 + $0x59] sm:$0xff] }
 0x1eb   : > { %v2766_v33 = vmax.f32 %v1980_v25, 0.0  ;;  %v1983_v34 = vadd.f32 %v17687_v9, %v1982_v30  ;;  %v14691_v35 = vpop.f32.mrb[123].mxu0  ;;  %v4338_v36 = vpack.c.bf16 %v4289_v32, %v4288_v31  ;;  %3974 = vst [vmem:[#allocation4 + $0x68] sm:$0x3f] %v3971_v29 }
 0x1ed   : > { %3008 = vst [vmem:[#allocation2 + $0x1e0] sm:$0xff] %v2766_v33  ;;  %v2767_v37 = vmax.f32 %v1983_v34, 0.0  ;;  %14797 = vmatmul.mubr.msk.bf16.gmra.mrb[228].mxu0 %vm1334_vm3, %v16574_v27  ;;  %15077 = vmatmul.mubr.bf16.gmra.mrb[8].mxu1 %v4338_v36 }
 0x1ee   : > { %v3248_v22 = vld [vmem:[#allocation2 + $0x1d0] ss:$2 sm:$0xff]  ;;  %v3490_v23 = vld [vmem:[#allocation2 + $0x1d1] ss:$2 sm:$0xff]  ;;  %14800 = vmatprep.mubr.msk.bf16.mxu0 %vm17264_vm2, %v17795_v14 }
 0x1ef   : > { %v3702_v24 = vmax.f32 %v3248_v22, %v3490_v23  ;;  %3009 = vst [vmem:[#allocation2 + $0x1e8] sm:$0xff] %v2767_v37  ;;  %v16579_v37 = vld [vmem:[%s17413_s17 + $0x1f0] sm:$0xff]  }
 0x1f0   : > { %v1987_v38 = vpop.f32.mrb[124].mxu0  ;;  %v3975_v18 = vld [vmem:[#allocation3 + $0xdc] sm:$0xff] }
 0x1f1   : > { %3823 = vst [vmem:[#allocation3 + $0xe8] sm:$0xff] %v3702_v24  ;;  %v1988_v39 = vadd.f32 %v17687_v9, %v1987_v38  ;;  %v14694_v40 = vpop.f32.mrb[125].mxu0 }
 0x1f2   : > { %v1990_v45 = vpop.f32.mrb[126].mxu0  ;;  %v4290_v38 = vld [vmem:[#allocation4 + $0x61] sm:$0xff] }
 0x1f3   : > { %v2768_v47 = vmax.f32 %v1988_v39, 0.0  ;;  %v1991_v48 = vadd.f32 %v17687_v9, %v1990_v45  ;;  %v14695_v49 = vpop.f32.mrb[127].mxu0 }
 0x1f5   : > { %3010 = vst [vmem:[#allocation2 + $0x1f0] sm:$0xff] %v2768_v47  ;;  %v2769_v50 = vmax.f32 %v1991_v48, 0.0  ;;  %14801 = vmatmul.mubr.msk.bf16.gmra.mrb[232].mxu0 %vm1334_vm3, %v16575_v44 }
 0x1f6   : > { %v3250_v51 = vld [vmem:[#allocation2 + $0x1e0] ss:$2 sm:$0xff]  ;;  %v3492_v52 = vld [vmem:[#allocation2 + $0x1e1] ss:$2 sm:$0xff]  ;;  %14804 = vmatprep.mubr.msk.bf16.mxu0 %vm17264_vm2, %v17795_v14 }
 0x1f7   : > { %v3703_v53 = vmax.f32 %v3250_v51, %v3492_v52  ;;  %3011 = vst [vmem:[#allocation2 + $0x1f8] sm:$0xff] %v2769_v50 }
 0x1f8   : > { %v1995_v54 = vpop.f32.mrb[128].mxu0  ;;  %v3976_v30 = vld [vmem:[#allocation3 + $0xe4] sm:$0xff] }
 0x1f9   : > { %3824 = vst [vmem:[#allocation3 + $0xf0] sm:$0xff] %v3703_v53  ;;  %v1996_v41 = vadd.f32 %v17687_v9, %v1995_v54  ;;  %v14698_v42 = vpop.f32.mrb[129].mxu0 }
 0x1fa   : > { %v1998_v55 = vpop.f32.mrb[130].mxu0 }
 0x1fb   : > { %v2770_v56 = vmax.f32 %v1996_v41, 0.0  ;;  %v1999_v60 = vadd.f32 %v17687_v9, %v1998_v55  ;;  %v14699_v61 = vpop.f32.mrb[131].mxu0  ;;  %v16580_v41 = vld [vmem:[%s17413_s17 + $0x1f8] sm:$0xff]  }
 0x1fd   : > { %3012 = vst [vmem:[#allocation2 + $0x200] sm:$0xff] %v2770_v56  ;;  %v2771_v62 = vmax.f32 %v1999_v60, 0.0  ;;  %14805 = vmatmul.mubr.msk.bf16.gmra.mrb[236].mxu0 %vm1334_vm3, %v16576_v43 }
 0x1fe   : > { %v3252_v63 = vld [vmem:[#allocation2 + $0x1f0] ss:$2 sm:$0xff]  ;;  %v3494_v28 = vld [vmem:[#allocation2 + $0x1f1] ss:$2 sm:$0xff]  ;;  %14808 = vmatprep.mubr.msk.bf16.mxu0 %vm17264_vm2, %v17795_v14 }
 0x1ff   : > { %v3704_v0 = vmax.f32 %v3252_v63, %v3494_v28  ;;  %3013 = vst [vmem:[#allocation2 + $0x208] sm:$0xff] %v2771_v62 }
 0x200   : > { %v2003_v4 = vpop.f32.mrb[132].mxu0  ;;  %v3977_v32 = vld [vmem:[#allocation3 + $0xec] sm:$0x3f] }
 0x201   : > { %3825 = vst [vmem:[#allocation3 + $0xf8] sm:$0xff] %v3704_v0  ;;  %v2004_v1 = vadd.f32 %v17687_v9, %v2003_v4  ;;  %v14702_v2 = vpop.f32.mrb[133].mxu0 }
 0x202   : > { %v2006_v6 = vpop.f32.mrb[134].mxu0 }
 0x203   : > { %v2772_v7 = vmax.f32 %v2004_v1, 0.0  ;;  %v2007_v57 = vadd.f32 %v17687_v9, %v2006_v6  ;;  %v14703_v58 = vpop.f32.mrb[135].mxu0  ;;  %v16581_v6 = vld [vmem:[%s17413_s17 + $0x200] sm:$0xff]  }
 0x205   : > { %3014 = vst [vmem:[#allocation2 + $0x210] sm:$0xff] %v2772_v7  ;;  %v2773_v59 = vmax.f32 %v2007_v57, 0.0  ;;  %14809 = vmatmul.mubr.msk.bf16.gmra.mrb[240].mxu0 %vm1334_vm3, %v16577_v3 }
 0x206   : > { %v3254_v8 = vld [vmem:[#allocation2 + $0x200] ss:$2 sm:$0xff]  ;;  %v3496_v46 = vld [vmem:[#allocation2 + $0x201] ss:$2 sm:$0xff]  ;;  %14812 = vmatprep.mubr.msk.bf16.mxu0 %vm17264_vm2, %v17795_v14 }
 0x207   : > { %v3705_v10 = vmax.f32 %v3254_v8, %v3496_v46  ;;  %3015 = vst [vmem:[#allocation2 + $0x218] sm:$0xff] %v2773_v59 }
 0x208   : > { %v2011_v17 = vpop.f32.mrb[136].mxu0  ;;  %v3978_v19 = vld [vmem:[#allocation3 + $0xf2] sm:$0xff] }
 0x209   : > { %3826 = vst [vmem:[#allocation3 + $0x100] sm:$0xff] %v3705_v10  ;;  %v2012_v20 = vadd.f32 %v17687_v9, %v2011_v17  ;;  %v14706_v5 = vpop.f32.mrb[137].mxu0  ;;  %v3981_v13 = vmax.f32 %v3975_v18, %v3978_v19 }
 0x20a   : > { %v2014_v11 = vpop.f32.mrb[138].mxu0  ;;  %v16582_v5 = vld [vmem:[%s17413_s17 + $0x208] sm:$0xff]  }
 0x20b   : > { %v2774_v12 = vmax.f32 %v2012_v20, 0.0  ;;  %v2015_v16 = vadd.f32 %v17687_v9, %v2014_v11  ;;  %v14707_v15 = vpop.f32.mrb[139].mxu0  ;;  %3984 = vst [vmem:[#allocation4 + $0x6e] sm:$0xff] %v3981_v13 }
 0x20d   : > { %3016 = vst [vmem:[#allocation2 + $0x220] sm:$0xff] %v2774_v12  ;;  %v2775_v25 = vmax.f32 %v2015_v16, 0.0  ;;  %14813 = vmatmul.mubr.msk.bf16.gmra.mrb[244].mxu0 %vm1334_vm3, %v16578_v21 }
 0x20e   : > { %v17827_v26 = vld [vmem:[#allocation2 + $0x210] ss:$2 sm:$0xff]  ;;  %v17829_v27 = vld [vmem:[#allocation2 + $0x211] ss:$2 sm:$0xff]  ;;  %14816 = vmatprep.mubr.msk.bf16.mxu0 %vm17264_vm2, %v17795_v14 }
 0x20f   : > { %v3706_v29 = vmax.f32 %v17827_v26, %v17829_v27  ;;  %3017 = vst [vmem:[#allocation2 + $0x228] sm:$0xff] %v2775_v25 }
 0x210   : > { %v2019_v31 = vpop.f32.mrb[140].mxu0  ;;  %v3979_v33 = vld [vmem:[#allocation3 + $0xfa] sm:$0xff]  ;;  %v3980_v34 = vld [vmem:[#allocation3 + $0x102] sm:$0x3f] }
 0x211   : > { %v2020_v35 = vadd.f32 %v17687_v9, %v2019_v31  ;;  %v14710_v36 = vpop.f32.mrb[141].mxu0  ;;  %v3982_v22 = vmax.f32 %v3976_v30, %v3979_v33  ;;  %v3983_v23 = vmax.f32 %v3977_v32, %v3980_v34 }
 0x212   : > { %v2022_v24 = vpop.f32.mrb[142].mxu0  ;;  %v4291_v39 = vld [vmem:[#allocation4 + $0x69] sm:$0xff] }
 0x213   : > { %v2776_v40 = vmax.f32 %v2020_v35, 0.0  ;;  %v2023_v44 = vadd.f32 %v17687_v9, %v2022_v24  ;;  %v14711_v45 = vpop.f32.mrb[143].mxu0  ;;  %v4339_v47 = vpack.c.bf16 %v4291_v39, %v4290_v38  ;;  %3985 = vst [vmem:[#allocation4 + $0x76] sm:$0xff] %v3982_v22  ;;  %3986 = vst [vmem:[#allocation4 + $0x7e] sm:$0x3f] %v3983_v23  ;;  %v16583_v35 = vld [vmem:[%s17413_s17 + $0x210] sm:$0xff]  }
 0x215   : > { %3018 = vst [vmem:[#allocation2 + $0x230] sm:$0xff] %v2776_v40  ;;  %v2777_v48 = vmax.f32 %v2023_v44, 0.0  ;;  %14817 = vmatmul.mubr.msk.bf16.gmra.mrb[248].mxu0 %vm1334_vm3, %v16579_v37  ;;  %15080 = vmatprep.mubr.bf16.mxu1 %v4339_v47  ;;  %v16584_v47 = vld [vmem:[%s17413_s17 + $0x218] sm:$0xff]  }
 0x216   : > { %v17839_v49 = vld [vmem:[#allocation2 + $0x220] ss:$2 sm:$0xff]  ;;  %v17841_v50 = vld [vmem:[#allocation2 + $0x221] ss:$2 sm:$0xff]  ;;  %14820 = vmatprep.mubr.msk.bf16.mxu0 %vm17264_vm2, %v17795_v14 }
 0x217   : > { %v3707_v51 = vmax.f32 %v17839_v49, %v17841_v50  ;;  %3019 = vst [vmem:[#allocation2 + $0x238] sm:$0xff] %v2777_v48 }
 0x218   : > { %v2027_v52 = vpop.f32.mrb[144].mxu0 }
 0x219   : > { %v2028_v53 = vadd.f32 %v17687_v9, %v2027_v52  ;;  %v14714_v54 = vpop.f32.mrb[145].mxu0 }
 0x21a   : > { %v2030_v42 = vpop.f32.mrb[146].mxu0  ;;  %v4292_v43 = vld [vmem:[#allocation4 + $0x71] sm:$0xff]  ;;  %v4293_v55 = vld [vmem:[#allocation4 + $0x79] sm:$0xff] }
 0x21b   : > { %v2778_v56 = vmax.f32 %v2028_v53, 0.0  ;;  %v2031_v60 = vadd.f32 %v17687_v9, %v2030_v42  ;;  %v14715_v61 = vpop.f32.mrb[147].mxu0  ;;  %v4340_v62 = vpack.c.bf16 %v4293_v55, %v4292_v43 }
 0x21d   : > { %3020 = vst [vmem:[#allocation2 + $0x240] sm:$0xff] %v2778_v56  ;;  %v2779_v63 = vmax.f32 %v2031_v60, 0.0  ;;  %14821 = vmatmul.mubr.msk.bf16.gmra.mrb[252].mxu0 %vm1334_vm3, %v16580_v41  ;;  %15081 = vmatmul.mubr.bf16.gmra.mrb[12].mxu1 %v4340_v62  ;;  %v16585_v62 = vld [vmem:[%s17413_s17 + $0x220] sm:$0xff]  }
 0x21e   : > { %v3260_v28 = vld [vmem:[#allocation2 + $0x230] ss:$2 sm:$0xff]  ;;  %v3502_v0 = vld [vmem:[#allocation2 + $0x231] ss:$2 sm:$0xff]  ;;  %14824 = vmatprep.mubr.msk.bf16.mxu0 %vm17264_vm2, %v17795_v14 }
 0x21f   : > { %v3708_v4 = vmax.f32 %v3260_v28, %v3502_v0  ;;  %3021 = vst [vmem:[#allocation2 + $0x248] sm:$0xff] %v2779_v63 }
 0x220   : > { %v2035_v1 = vpop.f32.mrb[148].mxu0 }
 0x221   : > { %3829 = vst [vmem:[#allocation3 + $0x118] sm:$0xff] %v3708_v4  ;;  %v2036_v2 = vadd.f32 %v17687_v9, %v2035_v1  ;;  %v14718_v3 = vpop.f32.mrb[149].mxu0 }
 0x222   : > { %v2038_v7 = vpop.f32.mrb[150].mxu0 }
 0x223   : > { %v2780_v57 = vmax.f32 %v2036_v2, 0.0  ;;  %v2039_v58 = vadd.f32 %v17687_v9, %v2038_v7  ;;  %v14719_v59 = vpop.f32.mrb[151].mxu0 }
 0x225   : > { %3022 = vst [vmem:[#allocation2 + $0x250] sm:$0xff] %v2780_v57  ;;  %v2781_v8 = vmax.f32 %v2039_v58, 0.0  ;;  %14825 = vmatmul.mubr.msk.bf16.gmra.mrb[0].mxu0 %vm1334_vm3, %v16581_v6 }
 0x226   : > { %v3262_v46 = vld [vmem:[#allocation2 + $0x240] ss:$2 sm:$0xff]  ;;  %v3504_v10 = vld [vmem:[#allocation2 + $0x241] ss:$2 sm:$0xff]  ;;  %14828 = vmatprep.mubr.msk.bf16.mxu0 %vm17264_vm2, %v17795_v14 }
 0x227   : > { %v3709_v17 = vmax.f32 %v3262_v46, %v3504_v10  ;;  %3023 = vst [vmem:[#allocation2 + $0x258] sm:$0xff] %v2781_v8 }
 0x228   : > { %v2043_v18 = vpop.f32.mrb[152].mxu0  ;;  %v3989_v50 = vld [vmem:[#allocation3 + $0x118] sm:$0x3f] }
 0x229   : > { %3830 = vst [vmem:[#allocation3 + $0x120] sm:$0xff] %v3709_v17  ;;  %v2044_v19 = vadd.f32 %v17687_v9, %v2043_v18  ;;  %v14722_v20 = vpop.f32.mrb[153].mxu0  ;;  %v16586_v17 = vld [vmem:[%s17413_s17 + $0x228] sm:$0xff]  }
 0x22a   : > { %v2046_v21 = vpop.f32.mrb[154].mxu0 }
 0x22b   : > { %v2782_v13 = vmax.f32 %v2044_v19, 0.0  ;;  %v2047_v11 = vadd.f32 %v17687_v9, %v2046_v21  ;;  %v14723_v12 = vpop.f32.mrb[155].mxu0 }
 0x22d   : > { %3024 = vst [vmem:[#allocation2 + $0x260] sm:$0xff] %v2782_v13  ;;  %v2783_v16 = vmax.f32 %v2047_v11, 0.0  ;;  %14829 = vmatmul.mubr.msk.bf16.gmra.mrb[4].mxu0 %vm1334_vm3, %v16582_v5 }
 0x22e   : > { %v3264_v15 = vld [vmem:[#allocation2 + $0x250] ss:$2 sm:$0xff]  ;;  %v3506_v25 = vld [vmem:[#allocation2 + $0x251] ss:$2 sm:$0xff]  ;;  %14832 = vmatprep.mubr.msk.bf16.mxu0 %vm17264_vm2, %v17795_v14 }
 0x22f   : > { %v3710_v30 = vmax.f32 %v3264_v15, %v3506_v25  ;;  %3025 = vst [vmem:[#allocation2 + $0x268] sm:$0xff] %v2783_v16 }
 0x230   : > { %v2051_v31 = vpop.f32.mrb[156].mxu0  ;;  %v3990_v32 = vld [vmem:[#allocation3 + $0x11e] sm:$0xff] }
 0x231   : > { %3831 = vst [vmem:[#allocation3 + $0x128] sm:$0xff] %v3710_v30  ;;  %v2052_v33 = vadd.f32 %v17687_v9, %v2051_v31  ;;  %v14726_v34 = vpop.f32.mrb[157].mxu0  ;;  %v3993_v36 = vmax.f32 %v3706_v29, %v3990_v32  ;;  %v16587_v30 = vld [vmem:[%s17413_s17 + $0x230] sm:$0xff]  }
 0x232   : > { %v2054_v37 = vpop.f32.mrb[158].mxu0 }
 0x233   : > { %v2784_v22 = vmax.f32 %v2052_v33, 0.0  ;;  %v2055_v23 = vadd.f32 %v17687_v9, %v2054_v37  ;;  %v14727_v24 = vpop.f32.mrb[159].mxu0  ;;  %3996 = vst [vmem:[#allocation4 + $0x84] sm:$0xff] %v3993_v36 }
 0x235   : > { %3026 = vst [vmem:[#allocation2 + $0x270] sm:$0xff] %v2784_v22  ;;  %v2785_v38 = vmax.f32 %v2055_v23, 0.0  ;;  %14833 = vmatmul.mubr.msk.bf16.gmra.mrb[8].mxu0 %vm1334_vm3, %v16583_v35 }
 0x236   : > { %v3266_v39 = vld [vmem:[#allocation2 + $0x260] ss:$2 sm:$0xff]  ;;  %v3508_v40 = vld [vmem:[#allocation2 + $0x261] ss:$2 sm:$0xff]  ;;  %14836 = vmatprep.mubr.msk.bf16.mxu0 %vm17264_vm2, %v17795_v14 }
 0x237   : > { %v3711_v44 = vmax.f32 %v3266_v39, %v3508_v40  ;;  %3027 = vst [vmem:[#allocation2 + $0x278] sm:$0xff] %v2785_v38  ;;  %v16588_v39 = vld [vmem:[%s17413_s17 + $0x238] sm:$0xff]  }
 0x238   : > { %v2059_v26 = vpop.f32.mrb[160].mxu0  ;;  %v3991_v27 = vld [vmem:[#allocation3 + $0x126] sm:$0xff] }
 0x239   : > { %3832 = vst [vmem:[#allocation3 + $0x130] sm:$0xff] %v3711_v44  ;;  %v2060_v29 = vadd.f32 %v17687_v9, %v2059_v26  ;;  %v14730_v45 = vpop.f32.mrb[161].mxu0  ;;  %v3994_v48 = vmax.f32 %v3707_v51, %v3991_v27 }
 0x23a   : > { %v2062_v52 = vpop.f32.mrb[162].mxu0  ;;  %v4294_v0 = vld [vmem:[#allocation4 + $0x81] sm:$0xff] }
 0x23b   : > { %v2786_v53 = vmax.f32 %v2060_v29, 0.0  ;;  %v2063_v54 = vadd.f32 %v17687_v9, %v2062_v52  ;;  %v14731_v41 = vpop.f32.mrb[163].mxu0  ;;  %3997 = vst [vmem:[#allocation4 + $0x8c] sm:$0xff] %v3994_v48 }
 0x23d   : > { %3028 = vst [vmem:[#allocation2 + $0x280] sm:$0xff] %v2786_v53  ;;  %v2787_v42 = vmax.f32 %v2063_v54, 0.0  ;;  %14837 = vmatmul.mubr.msk.bf16.gmra.mrb[12].mxu0 %vm1334_vm3, %v16584_v47 }
 0x23e   : > { %v3268_v43 = vld [vmem:[#allocation2 + $0x270] ss:$2 sm:$0xff]  ;;  %v3510_v55 = vld [vmem:[#allocation2 + $0x271] ss:$2 sm:$0xff]  ;;  %14840 = vmatprep.mubr.msk.bf16.mxu0 %vm17264_vm2, %v17795_v14 }
 0x23f   : > { %v3712_v56 = vmax.f32 %v3268_v43, %v3510_v55  ;;  %3029 = vst [vmem:[#allocation2 + $0x288] sm:$0xff] %v2787_v42  ;;  %v16589_v43 = vld [vmem:[%s17413_s17 + $0x240] sm:$0xff]  }
 0x240   : > { %v2067_v49 = vpop.f32.mrb[164].mxu0  ;;  %v3992_v51 = vld [vmem:[#allocation3 + $0x12e] sm:$0x3f] }
 0x241   : > { %3833 = vst [vmem:[#allocation3 + $0x138] sm:$0xff] %v3712_v56  ;;  %v2068_v60 = vadd.f32 %v17687_v9, %v2067_v49  ;;  %v14734_v61 = vpop.f32.mrb[165].mxu0  ;;  %v3995_v63 = vmax.f32 %v3989_v50, %v3992_v51 }
 0x242   : > { %v2070_v28 = vpop.f32.mrb[166].mxu0  ;;  %v4295_v4 = vld [vmem:[#allocation4 + $0x89] sm:$0xff] }
 0x243   : > { %v2788_v1 = vmax.f32 %v2068_v60, 0.0  ;;  %v2071_v2 = vadd.f32 %v17687_v9, %v2070_v28  ;;  %v14735_v3 = vpop.f32.mrb[167].mxu0  ;;  %v4341_v6 = vpack.c.bf16 %v4295_v4, %v4294_v0  ;;  %3998 = vst [vmem:[#allocation4 + $0x94] sm:$0x3f] %v3995_v63  ;;  %v17892_v9 = vld [vmem:[%s20353_s2] ss:$0 sm:$0xff] }
 0x245   : > { %3030 = vst [vmem:[#allocation2 + $0x290] sm:$0xff] %v2788_v1  ;;  %v2789_v7 = vmax.f32 %v2071_v2, 0.0  ;;  %14841 = vmatmul.mubr.msk.bf16.gmra.mrb[16].mxu0 %vm1334_vm3, %v16585_v62  ;;  %15084 = vmatprep.mubr.bf16.mxu1 %v4341_v6 }
 0x246   : > { %v3270_v57 = vld [vmem:[#allocation2 + $0x280] ss:$2 sm:$0xff]  ;;  %v3512_v58 = vld [vmem:[#allocation2 + $0x281] ss:$2 sm:$0xff]  ;;  %14844 = vmatprep.mubr.msk.bf16.mxu0 %vm17264_vm2, %v17795_v14 }
 0x247   : > { %v3713_v59 = vmax.f32 %v3270_v57, %v3512_v58  ;;  %3031 = vst [vmem:[#allocation2 + $0x298] sm:$0xff] %v2789_v7  ;;  %v16590_v7 = vld [vmem:[%s17413_s17 + $0x248] sm:$0xff]  }
 0x248   : > { %v2075_v8 = vpop.f32.mrb[168].mxu0  ;;  %v3999_v53 = vld [vmem:[#allocation3 + $0x134] sm:$0xff] }
 0x249   : > { %3834 = vst [vmem:[#allocation3 + $0x140] sm:$0xff] %v3713_v59  ;;  %v2076_v46 = vadd.f32 %v17892_v9, %v2075_v8  ;;  %v14738_v10 = vpop.f32.mrb[169].mxu0 }
 0x24a   : > { %v2078_v18 = vpop.f32.mrb[170].mxu0  ;;  %v4296_v8 = vld [vmem:[#allocation4 + $0x91] sm:$0xff] }
 0x24b   : > { %v2790_v19 = vmax.f32 %v2076_v46, 0.0  ;;  %v2079_v20 = vadd.f32 %v17892_v9, %v2078_v18  ;;  %v14739_v5 = vpop.f32.mrb[171].mxu0 }
 0x24d   : > { %3032 = vst [vmem:[#allocation2 + $0x2a0] sm:$0xff] %v2790_v19  ;;  %v2791_v21 = vmax.f32 %v2079_v20, 0.0  ;;  %14845 = vmatmul.mubr.msk.bf16.gmra.mrb[20].mxu0 %vm1334_vm3, %v16586_v17 }
 0x24e   : > { %v3272_v13 = vld [vmem:[#allocation2 + $0x290] ss:$2 sm:$0xff]  ;;  %v3514_v11 = vld [vmem:[#allocation2 + $0x291] ss:$2 sm:$0xff]  ;;  %14848 = vmatprep.mubr.msk.bf16.mxu0 %vm17264_vm2, %v17795_v14 }
 0x24f   : > { %v3714_v12 = vmax.f32 %v3272_v13, %v3514_v11  ;;  %3033 = vst [vmem:[#allocation2 + $0x2a8] sm:$0xff] %v2791_v21 }
 0x250   : > { %v2083_v16 = vpop.f32.mrb[172].mxu0  ;;  %v4000_v28 = vld [vmem:[#allocation3 + $0x13c] sm:$0xff] }
 0x251   : > { %3835 = vst [vmem:[#allocation3 + $0x148] sm:$0xff] %v3714_v12  ;;  %v2084_v15 = vadd.f32 %v17892_v9, %v2083_v16  ;;  %v14742_v25 = vpop.f32.mrb[173].mxu0 }
 0x252   : > { %v2086_v31 = vpop.f32.mrb[174].mxu0 }
 0x253   : > { %v2792_v32 = vmax.f32 %v2084_v15, 0.0  ;;  %v2087_v33 = vadd.f32 %v17892_v9, %v2086_v31  ;;  %v14743_v34 = vpop.f32.mrb[175].mxu0  ;;  %v16591_v15 = vld [vmem:[%s17413_s17 + $0x250] sm:$0xff]  }
 0x255   : > { %3034 = vst [vmem:[#allocation2 + $0x2b0] sm:$0xff] %v2792_v32  ;;  %v2793_v35 = vmax.f32 %v2087_v33, 0.0  ;;  %14849 = vmatmul.mubr.msk.bf16.gmra.mrb[24].mxu0 %vm1334_vm3, %v16587_v30 }
 0x256   : > { %v3274_v36 = vld [vmem:[#allocation2 + $0x2a0] ss:$2 sm:$0xff]  ;;  %v3516_v37 = vld [vmem:[#allocation2 + $0x2a1] ss:$2 sm:$0xff]  ;;  %14852 = vmatprep.mubr.msk.bf16.mxu0 %vm17264_vm2, %v17795_v14 }
 0x257   : > { %v3715_v22 = vmax.f32 %v3274_v36, %v3516_v37  ;;  %3035 = vst [vmem:[#allocation2 + $0x2b8] sm:$0xff] %v2793_v35 }
 0x258   : > { %v2091_v23 = vpop.f32.mrb[176].mxu0  ;;  %v4001_v4 = vld [vmem:[#allocation3 + $0x144] sm:$0x3f] }
 0x259   : > { %3836 = vst [vmem:[#allocation3 + $0x150] sm:$0xff] %v3715_v22  ;;  %v2092_v24 = vadd.f32 %v17892_v9, %v2091_v23  ;;  %v14746_v38 = vpop.f32.mrb[177].mxu0 }
 0x25a   : > { %v2094_v40 = vpop.f32.mrb[178].mxu0 }
 0x25b   : > { %v2794_v44 = vmax.f32 %v2092_v24, 0.0  ;;  %v2095_v26 = vadd.f32 %v17892_v9, %v2094_v40  ;;  %v14747_v27 = vpop.f32.mrb[179].mxu0  ;;  %v16592_v24 = vld [vmem:[%s17413_s17 + $0x258] sm:$0xff]  }
 0x25d   : > { %3036 = vst [vmem:[#allocation2 + $0x2c0] sm:$0xff] %v2794_v44  ;;  %v2795_v29 = vmax.f32 %v2095_v26, 0.0  ;;  %14853 = vmatmul.mubr.msk.bf16.gmra.mrb[28].mxu0 %vm1334_vm3, %v16588_v39 }
 0x25e   : > { %v3276_v45 = vld [vmem:[#allocation2 + $0x2b0] ss:$2 sm:$0xff]  ;;  %v3518_v47 = vld [vmem:[#allocation2 + $0x2b1] ss:$2 sm:$0xff]  ;;  %14856 = vmatprep.mubr.msk.bf16.mxu0 %vm17264_vm2, %v17795_v14 }
 0x25f   : > { %v3716_v48 = vmax.f32 %v3276_v45, %v3518_v47  ;;  %3037 = vst [vmem:[#allocation2 + $0x2c8] sm:$0xff] %v2795_v29 }
 0x260   : > { %v2099_v52 = vpop.f32.mrb[180].mxu0  ;;  %v4002_v54 = vld [vmem:[#allocation3 + $0x14a] sm:$0xff] }
 0x261   : > { %3837 = vst [vmem:[#allocation3 + $0x158] sm:$0xff] %v3716_v48  ;;  %v2100_v41 = vadd.f32 %v17892_v9, %v2099_v52  ;;  %v14750_v42 = vpop.f32.mrb[181].mxu0  ;;  %v4005_v55 = vmax.f32 %v3999_v53, %v4002_v54  ;;  %v16593_v53 = vld [vmem:[%s17413_s17 + $0x260] sm:$0xff]  }
 0x262   : > { %v2102_v56 = vpop.f32.mrb[182].mxu0 }
 0x263   : > { %v2796_v49 = vmax.f32 %v2100_v41, 0.0  ;;  %v2103_v50 = vadd.f32 %v17892_v9, %v2102_v56  ;;  %v14751_v51 = vpop.f32.mrb[183].mxu0  ;;  %4008 = vst [vmem:[#allocation4 + $0x9a] sm:$0xff] %v4005_v55 }
 0x265   : > { %3038 = vst [vmem:[#allocation2 + $0x2d0] sm:$0xff] %v2796_v49  ;;  %v2797_v60 = vmax.f32 %v2103_v50, 0.0  ;;  %14857 = vmatmul.mubr.msk.bf16.gmra.mrb[32].mxu0 %vm1334_vm3, %v16589_v43 }
 0x266   : > { %v17916_v61 = vld [vmem:[#allocation2 + $0x2c0] ss:$2 sm:$0xff]  ;;  %v17918_v62 = vld [vmem:[#allocation2 + $0x2c1] ss:$2 sm:$0xff]  ;;  %14860 = vmatprep.mubr.msk.bf16.mxu0 %vm17264_vm2, %v17795_v14 }
 0x267   : > { %v3717_v63 = vmax.f32 %v17916_v61, %v17918_v62  ;;  %3039 = vst [vmem:[#allocation2 + $0x2d8] sm:$0xff] %v2797_v60 }
 0x268   : > { %v2107_v0 = vpop.f32.mrb[184].mxu0  ;;  %v4003_v1 = vld [vmem:[#allocation3 + $0x152] sm:$0xff]  ;;  %v4004_v2 = vld [vmem:[#allocation3 + $0x15a] sm:$0x3f] }
 0x269   : > { %v2108_v3 = vadd.f32 %v17892_v9, %v2107_v0  ;;  %v14754_v6 = vpop.f32.mrb[185].mxu0  ;;  %v4006_v57 = vmax.f32 %v4000_v28, %v4003_v1  ;;  %v4007_v58 = vmax.f32 %v4001_v4, %v4004_v2  ;;  %v16594_v4 = vld [vmem:[%s17413_s17 + $0x268] sm:$0xff]  }
 0x26a   : > { %v2110_v59 = vpop.f32.mrb[186].mxu0  ;;  %v4297_v46 = vld [vmem:[#allocation4 + $0x99] sm:$0xff] }
 0x26b   : > { %v2798_v10 = vmax.f32 %v2108_v3, 0.0  ;;  %v2111_v17 = vadd.f32 %v17892_v9, %v2110_v59  ;;  %v14755_v18 = vpop.f32.mrb[187].mxu0  ;;  %v4342_v19 = vpack.c.bf16 %v4297_v46, %v4296_v8  ;;  %4009 = vst [vmem:[#allocation4 + $0xa2] sm:$0xff] %v4006_v57  ;;  %4010 = vst [vmem:[#allocation4 + $0xaa] sm:$0x3f] %v4007_v58 }
 0x26d   : > { %3040 = vst [vmem:[#allocation2 + $0x2e0] sm:$0xff] %v2798_v10  ;;  %v2799_v20 = vmax.f32 %v2111_v17, 0.0  ;;  %14861 = vmatmul.mubr.msk.bf16.gmra.mrb[36].mxu0 %vm1334_vm3, %v16590_v7  ;;  %15085 = vmatmul.mubr.bf16.gmra.mrb[16].mxu1 %v4342_v19  ;;  %v16595_v10 = vld [vmem:[%s17413_s17 + $0x270] sm:$0xff]  }
 0x26e   : > { %v17928_v5 = vld [vmem:[#allocation2 + $0x2d0] ss:$2 sm:$0xff]  ;;  %v17930_v21 = vld [vmem:[#allocation2 + $0x2d1] ss:$2 sm:$0xff]  ;;  %14864 = vmatprep.mubr.msk.bf16.mxu0 %vm17264_vm2, %v17795_v14 }
 0x26f   : > { %v3718_v13 = vmax.f32 %v17928_v5, %v17930_v21  ;;  %3041 = vst [vmem:[#allocation2 + $0x2e8] sm:$0xff] %v2799_v20 }
 0x270   : > { %v2115_v11 = vpop.f32.mrb[188].mxu0 }
 0x271   : > { %v2116_v12 = vadd.f32 %v17892_v9, %v2115_v11  ;;  %v14758_v16 = vpop.f32.mrb[189].mxu0 }
 0x272   : > { %v2118_v25 = vpop.f32.mrb[190].mxu0  ;;  %v4298_v19 = vld [vmem:[#allocation4 + $0xa1] sm:$0xff] }
 0x273   : > { %v2800_v30 = vmax.f32 %v2116_v12, 0.0  ;;  %v2119_v31 = vadd.f32 %v17892_v9, %v2118_v25  ;;  %v14759_v32 = vpop.f32.mrb[191].mxu0 }
 0x275   : > { %3042 = vst [vmem:[#allocation2 + $0x2f0] sm:$0xff] %v2800_v30  ;;  %v2801_v33 = vmax.f32 %v2119_v31, 0.0  ;;  %14865 = vmatmul.mubr.msk.bf16.gmra.mrb[40].mxu0 %vm1334_vm3, %v16591_v15 }
 0x276   : > { %v3282_v34 = vld [vmem:[#allocation2 + $0x2e0] ss:$2 sm:$0xff]  ;;  %v3524_v35 = vld [vmem:[#allocation2 + $0x2e1] ss:$2 sm:$0xff]  ;;  %14868 = vmatprep.mubr.msk.bf16.mxu0 %vm17264_vm2, %v17795_v14 }
 0x277   : > { %v3719_v36 = vmax.f32 %v3282_v34, %v3524_v35  ;;  %3043 = vst [vmem:[#allocation2 + $0x2f8] sm:$0xff] %v2801_v33  ;;  %v16596_v35 = vld [vmem:[%s17413_s17 + $0x278] sm:$0xff]  }
 0x278   : > { %v2123_v37 = vpop.f32.mrb[192].mxu0 }
 0x279   : > { %3840 = vst [vmem:[#allocation3 + $0x170] sm:$0xff] %v3719_v36  ;;  %v2124_v22 = vadd.f32 %v17892_v9, %v2123_v37  ;;  %v14762_v23 = vpop.f32.mrb[193].mxu0 }
 0x27a   : > { %v2126_v38 = vpop.f32.mrb[194].mxu0 }
 0x27b   : > { %v2802_v39 = vmax.f32 %v2124_v22, 0.0  ;;  %v2127_v40 = vadd.f32 %v17892_v9, %v2126_v38  ;;  %v14763_v44 = vpop.f32.mrb[195].mxu0 }
 0x27d   : > { %3044 = vst [vmem:[#allocation2 + $0x300] sm:$0xff] %v2802_v39  ;;  %v2803_v26 = vmax.f32 %v2127_v40, 0.0  ;;  %14869 = vmatmul.mubr.msk.bf16.gmra.mrb[44].mxu0 %vm1334_vm3, %v16592_v24 }
 0x27e   : > { %v3284_v27 = vld [vmem:[#allocation2 + $0x2f0] ss:$2 sm:$0xff]  ;;  %v3526_v29 = vld [vmem:[#allocation2 + $0x2f1] ss:$2 sm:$0xff]  ;;  %14872 = vmatprep.mubr.msk.bf16.mxu0 %vm17264_vm2, %v17795_v14 }
 0x27f   : > { %v3720_v45 = vmax.f32 %v3284_v27, %v3526_v29  ;;  %3045 = vst [vmem:[#allocation2 + $0x308] sm:$0xff] %v2803_v26 }
 0x280   : > { %v2131_v47 = vpop.f32.mrb[196].mxu0 }
 0x281   : > { %3841 = vst [vmem:[#allocation3 + $0x178] sm:$0xff] %v3720_v45  ;;  %v2132_v48 = vadd.f32 %v17892_v9, %v2131_v47  ;;  %v14766_v52 = vpop.f32.mrb[197].mxu0  ;;  %v16597_v45 = vld [vmem:[%s17413_s17 + $0x280] sm:$0xff]  }
 0x282   : > { %v2134_v54 = vpop.f32.mrb[198].mxu0 }
 0x283   : > { %v2804_v41 = vmax.f32 %v2132_v48, 0.0  ;;  %v2135_v42 = vadd.f32 %v17892_v9, %v2134_v54  ;;  %v14767_v43 = vpop.f32.mrb[199].mxu0 }
 0x285   : > { %3046 = vst [vmem:[#allocation2 + $0x310] sm:$0xff] %v2804_v41  ;;  %v2805_v55 = vmax.f32 %v2135_v42, 0.0  ;;  %14873 = vmatmul.mubr.msk.bf16.gmra.mrb[48].mxu0 %vm1334_vm3, %v16593_v53 }
 0x286   : > { %v3286_v56 = vld [vmem:[#allocation2 + $0x300] ss:$2 sm:$0xff]  ;;  %v3528_v49 = vld [vmem:[#allocation2 + $0x301] ss:$2 sm:$0xff]  ;;  %14876 = vmatprep.mubr.msk.bf16.mxu0 %vm17264_vm2, %v17795_v14 }
 0x287   : > { %v3721_v50 = vmax.f32 %v3286_v56, %v3528_v49  ;;  %3047 = vst [vmem:[#allocation2 + $0x318] sm:$0xff] %v2805_v55 }
 0x288   : > { %v2139_v51 = vpop.f32.mrb[200].mxu0  ;;  %v4014_v60 = vld [vmem:[#allocation3 + $0x176] sm:$0xff] }
 0x289   : > { %3842 = vst [vmem:[#allocation3 + $0x180] sm:$0xff] %v3721_v50  ;;  %v2140_v28 = vadd.f32 %v17892_v9, %v2139_v51  ;;  %v14770_v0 = vpop.f32.mrb[201].mxu0  ;;  %v4017_v1 = vmax.f32 %v3717_v63, %v4014_v60 }
 0x28a   : > { %v2142_v2 = vpop.f32.mrb[202].mxu0 }
 0x28b   : > { %v2806_v3 = vmax.f32 %v2140_v28, 0.0  ;;  %v2143_v6 = vadd.f32 %v17892_v9, %v2142_v2  ;;  %v14771_v7 = vpop.f32.mrb[203].mxu0  ;;  %4020 = vst [vmem:[#allocation4 + $0xb0] sm:$0xff] %v4017_v1  ;;  %v16598_v28 = vld [vmem:[%s17413_s17 + $0x288] sm:$0xff]  }
 0x28d   : > { %3048 = vst [vmem:[#allocation2 + $0x320] sm:$0xff] %v2806_v3  ;;  %v2807_v57 = vmax.f32 %v2143_v6, 0.0  ;;  %14877 = vmatmul.mubr.msk.bf16.gmra.mrb[52].mxu0 %vm1334_vm3, %v16594_v4 }
 0x28e   : > { %v3288_v58 = vld [vmem:[#allocation2 + $0x310] ss:$2 sm:$0xff]  ;;  %v3530_v59 = vld [vmem:[#allocation2 + $0x311] ss:$2 sm:$0xff]  ;;  %14880 = vmatprep.mubr.msk.bf16.mxu0 %vm17264_vm2, %v17795_v14 }
 0x28f   : > { %v3722_v8 = vmax.f32 %v3288_v58, %v3530_v59  ;;  %3049 = vst [vmem:[#allocation2 + $0x328] sm:$0xff] %v2807_v57 }
 0x290   : > { %v2147_v61 = vpop.f32.mrb[204].mxu0  ;;  %v4015_v62 = vld [vmem:[#allocation3 + $0x17e] sm:$0xff] }
 0x291   : > { %3843 = vst [vmem:[#allocation3 + $0x188] sm:$0xff] %v3722_v8  ;;  %v2148_v63 = vadd.f32 %v17892_v9, %v2147_v61  ;;  %v14774_v46 = vpop.f32.mrb[205].mxu0  ;;  %v4018_v17 = vmax.f32 %v3718_v13, %v4015_v62  ;;  %v4013_v13 = vld [vmem:[#allocation3 + $0x170] sm:$0x3f]  ;;  %v16599_v61 = vld [vmem:[%s17413_s17 + $0x290] sm:$0xff]  }
 0x292   : > { %v2150_v18 = vpop.f32.mrb[206].mxu0  ;;  %v4299_v20 = vld [vmem:[#allocation4 + $0xa9] sm:$0xff] }
 0x293   : > { %v2808_v11 = vmax.f32 %v2148_v63, 0.0  ;;  %v2151_v12 = vadd.f32 %v17892_v9, %v2150_v18  ;;  %v14775_v16 = vpop.f32.mrb[207].mxu0  ;;  %v4343_v15 = vpack.c.bf16 %v4299_v20, %v4298_v19  ;;  %4021 = vst [vmem:[#allocation4 + $0xb8] sm:$0xff] %v4018_v17  ;;  %v17994_v19 = vld [vmem:[#allocation4 + $0x1e4] sm:$0xff] }
 0x295   : > { %3050 = vst [vmem:[#allocation2 + $0x330] sm:$0xff] %v2808_v11  ;;  %v2809_v25 = vmax.f32 %v2151_v12, 0.0  ;;  %14881 = vmatmul.mubr.msk.bf16.gmra.mrb[56].mxu0 %vm1334_vm3, %v16595_v10  ;;  %15088 = vmatprep.mubr.bf16.mxu1 %v4343_v15 }
 0x296   : > { %v3290_v30 = vld [vmem:[#allocation2 + $0x320] ss:$2 sm:$0xff]  ;;  %v3532_v31 = vld [vmem:[#allocation2 + $0x321] ss:$2 sm:$0xff]  ;;  %14884 = vmatprep.mubr.msk.bf16.mxu0 %vm17264_vm2, %v17795_v14 }
 0x297   : > { %v3723_v5 = vmax.f32 %v3290_v30, %v3532_v31  ;;  %3051 = vst [vmem:[#allocation2 + $0x338] sm:$0xff] %v2809_v25  ;;  %v16600_v30 = vld [vmem:[%s17413_s17 + $0x298] sm:$0xff]  }
 0x298   : > { %v2155_v21 = vpop.f32.mrb[208].mxu0  ;;  %v4016_v32 = vld [vmem:[#allocation3 + $0x186] sm:$0x3f] }
 0x299   : > { %3844 = vst [vmem:[#allocation3 + $0x190] sm:$0xff] %v3723_v5  ;;  %v2156_v33 = vadd.f32 %v17892_v9, %v2155_v21  ;;  %v14778_v34 = vpop.f32.mrb[209].mxu0  ;;  %v4019_v36 = vmax.f32 %v4013_v13, %v4016_v32 }
 0x29a   : > { %v2158_v37 = vpop.f32.mrb[210].mxu0  ;;  %v4300_v48 = vld [vmem:[#allocation4 + $0xb1] sm:$0xff] }
 0x29b   : > { %v2810_v22 = vmax.f32 %v2156_v33, 0.0  ;;  %v2159_v23 = vadd.f32 %v17892_v9, %v2158_v37  ;;  %v14779_v24 = vpop.f32.mrb[211].mxu0  ;;  %4022 = vst [vmem:[#allocation4 + $0xc0] sm:$0x3f] %v4019_v36 }
 0x29d   : > { %3052 = vst [vmem:[#allocation2 + $0x340] sm:$0xff] %v2810_v22  ;;  %v2811_v38 = vmax.f32 %v2159_v23, 0.0  ;;  %14885 = vmatmul.mubr.msk.bf16.gmra.mrb[60].mxu0 %vm1334_vm3, %v16596_v35 }
 0x29e   : > { %v3292_v39 = vld [vmem:[#allocation2 + $0x330] ss:$2 sm:$0xff]  ;;  %v3534_v40 = vld [vmem:[#allocation2 + $0x331] ss:$2 sm:$0xff]  ;;  %14888 = vmatprep.mubr.msk.bf16.mxu0 %vm17264_vm2, %v17795_v14 }
 0x29f   : > { %v3724_v44 = vmax.f32 %v3292_v39, %v3534_v40  ;;  %3053 = vst [vmem:[#allocation2 + $0x348] sm:$0xff] %v2811_v38 }
 0x2a0   : > { %v2163_v26 = vpop.f32.mrb[212].mxu0  ;;  %v4023_v12 = vld [vmem:[#allocation3 + $0x18c] sm:$0xff] }
 0x2a1   : > { %3845 = vst [vmem:[#allocation3 + $0x198] sm:$0xff] %v3724_v44  ;;  %v2164_v27 = vadd.f32 %v17892_v9, %v2163_v26  ;;  %v14782_v29 = vpop.f32.mrb[213].mxu0  ;;  %v16601_v44 = vld [vmem:[%s17413_s17 + $0x2a0] sm:$0xff]  }
 0x2a2   : > { %v2166_v47 = vpop.f32.mrb[214].mxu0  ;;  %v4301_v52 = vld [vmem:[#allocation4 + $0xb9] sm:$0xff] }
 0x2a3   : > { %v2812_v53 = vmax.f32 %v2164_v27, 0.0  ;;  %v2167_v54 = vadd.f32 %v17892_v9, %v2166_v47  ;;  %v14783_v41 = vpop.f32.mrb[215].mxu0  ;;  %v4344_v42 = vpack.c.bf16 %v4301_v52, %v4300_v48 }
 0x2a5   : > { %3054 = vst [vmem:[#allocation2 + $0x350] sm:$0xff] %v2812_v53  ;;  %v2813_v43 = vmax.f32 %v2167_v54, 0.0  ;;  %14889 = vmatmul.mubr.msk.bf16.gmra.mrb[64].mxu0 %vm1334_vm3, %v16597_v45  ;;  %15089 = vmatmul.mubr.bf16.gmra.mrb[20].mxu1 %v4344_v42 }
 0x2a6   : > { %v3294_v55 = vld [vmem:[#allocation2 + $0x340] ss:$2 sm:$0xff]  ;;  %v3536_v56 = vld [vmem:[#allocation2 + $0x341] ss:$2 sm:$0xff]  ;;  %14892 = vmatprep.mubr.msk.bf16.mxu0 %vm17264_vm2, %v17795_v14 }
 0x2a7   : > { %v3725_v49 = vmax.f32 %v3294_v55, %v3536_v56  ;;  %3055 = vst [vmem:[#allocation2 + $0x358] sm:$0xff] %v2813_v43  ;;  %v16602_v56 = vld [vmem:[%s17413_s17 + $0x2a8] sm:$0xff]  }
 0x2a8   : > { %v2171_v50 = vpop.f32.mrb[216].mxu0  ;;  %v4024_v37 = vld [vmem:[#allocation3 + $0x194] sm:$0xff] }
 0x2a9   : > { %3846 = vst [vmem:[#allocation3 + $0x1a0] sm:$0xff] %v3725_v49  ;;  %v2172_v51 = vadd.f32 %v17892_v9, %v2171_v50  ;;  %v14786_v60 = vpop.f32.mrb[217].mxu0 }
 0x2aa   : > { %v2174_v0 = vpop.f32.mrb[218].mxu0 }
 0x2ab   : > { %v2814_v4 = vmax.f32 %v2172_v51, 0.0  ;;  %v2175_v1 = vadd.f32 %v17892_v9, %v2174_v0  ;;  %v14787_v2 = vpop.f32.mrb[219].mxu0 }
 0x2ad   : > { %3056 = vst [vmem:[#allocation2 + $0x360] sm:$0xff] %v2814_v4  ;;  %v2815_v3 = vmax.f32 %v2175_v1, 0.0  ;;  %14893 = vmatmul.mubr.msk.bf16.gmra.mrb[68].mxu0 %vm1334_vm3, %v16598_v28 }
 0x2ae   : > { %v3296_v6 = vld [vmem:[#allocation2 + $0x350] ss:$2 sm:$0xff]  ;;  %v3538_v7 = vld [vmem:[#allocation2 + $0x351] ss:$2 sm:$0xff]  ;;  %14896 = vmatprep.mubr.msk.bf16.mxu0 %vm17264_vm2, %v17795_v14 }
 0x2af   : > { %v3726_v57 = vmax.f32 %v3296_v6, %v3538_v7  ;;  %3057 = vst [vmem:[#allocation2 + $0x368] sm:$0xff] %v2815_v3 }
 0x2b0   : > { %v2179_v58 = vpop.f32.mrb[220].mxu0  ;;  %v4025_v24 = vld [vmem:[#allocation3 + $0x19c] sm:$0x3f] }
 0x2b1   : > { %3847 = vst [vmem:[#allocation3 + $0x1a8] sm:$0xff] %v3726_v57  ;;  %v2180_v59 = vadd.f32 %v17892_v9, %v2179_v58  ;;  %v14790_v8 = vpop.f32.mrb[221].mxu0 }
 0x2b2   : > { %v2182_v62 = vpop.f32.mrb[222].mxu0 }
 0x2b3   : > { %v2816_v63 = vmax.f32 %v2180_v59, 0.0  ;;  %v2183_v46 = vadd.f32 %v17892_v9, %v2182_v62  ;;  %v14791_v10 = vpop.f32.mrb[223].mxu0  ;;  %v16603_v59 = vld [vmem:[%s17413_s17 + $0x2b0] sm:$0xff]  }
 0x2b5   : > { %3058 = vst [vmem:[#allocation2 + $0x370] sm:$0xff] %v2816_v63  ;;  %v2817_v17 = vmax.f32 %v2183_v46, 0.0  ;;  %14897 = vmatmul.mubr.msk.bf16.gmra.mrb[72].mxu0 %vm1334_vm3, %v16599_v61 }
 0x2b6   : > { %v3298_v18 = vld [vmem:[#allocation2 + $0x360] ss:$2 sm:$0xff]  ;;  %v3540_v14 = vld [vmem:[#allocation2 + $0x361] ss:$2 sm:$0xff]  ;;  %14900 = vmatprep.mubr.msk.bf16.mxu0 %vm17264_vm2, %v17994_v19 }
 0x2b7   : > { %v3727_v20 = vmax.f32 %v3298_v18, %v3540_v14  ;;  %3059 = vst [vmem:[#allocation2 + $0x378] sm:$0xff] %v2817_v17 }
 0x2b8   : > { %v2187_v11 = vpop.f32.mrb[224].mxu0  ;;  %v4026_v16 = vld [vmem:[#allocation3 + $0x1a2] sm:$0xff] }
 0x2b9   : > { %3848 = vst [vmem:[#allocation3 + $0x1b0] sm:$0xff] %v3727_v20  ;;  %v2188_v15 = vadd.f32 %v17892_v9, %v2187_v11  ;;  %v14794_v25 = vpop.f32.mrb[225].mxu0  ;;  %v4029_v31 = vmax.f32 %v4023_v12, %v4026_v16  ;;  %v16604_v12 = vld [vmem:[%s17413_s17 + $0x2b8] sm:$0xff]  }
 0x2ba   : > { %v2190_v5 = vpop.f32.mrb[226].mxu0 }
 0x2bb   : > { %v2818_v21 = vmax.f32 %v2188_v15, 0.0  ;;  %v2191_v13 = vadd.f32 %v17892_v9, %v2190_v5  ;;  %v14795_v32 = vpop.f32.mrb[227].mxu0  ;;  %4032 = vst [vmem:[#allocation4 + $0xc6] sm:$0xff] %v4029_v31 }
 0x2bd   : > { %3060 = vst [vmem:[#allocation2 + $0x380] sm:$0xff] %v2818_v21  ;;  %v2819_v33 = vmax.f32 %v2191_v13, 0.0  ;;  %14901 = vmatmul.mubr.msk.bf16.gmra.mrb[76].mxu0 %vm1334_vm3, %v16600_v30 }
 0x2be   : > { %v18002_v34 = vld [vmem:[#allocation2 + $0x370] ss:$2 sm:$0xff]  ;;  %v18004_v35 = vld [vmem:[#allocation2 + $0x371] ss:$2 sm:$0xff]  ;;  %14904 = vmatprep.mubr.msk.bf16.mxu0 %vm17264_vm2, %v17994_v19 }
 0x2bf   : > { %v3728_v36 = vmax.f32 %v18002_v34, %v18004_v35  ;;  %3061 = vst [vmem:[#allocation2 + $0x388] sm:$0xff] %v2819_v33 }
 0x2c0   : > { %v2195_v22 = vpop.f32.mrb[228].mxu0  ;;  %v4027_v23 = vld [vmem:[#allocation3 + $0x1aa] sm:$0xff]  ;;  %v4028_v38 = vld [vmem:[#allocation3 + $0x1b2] sm:$0x3f] }
 0x2c1   : > { %v2196_v39 = vadd.f32 %v17892_v9, %v2195_v22  ;;  %v14798_v40 = vpop.f32.mrb[229].mxu0  ;;  %v4030_v26 = vmax.f32 %v4024_v37, %v4027_v23  ;;  %v4031_v27 = vmax.f32 %v4025_v24, %v4028_v38  ;;  %v16605_v23 = vld [vmem:[%s17413_s17 + $0x2c0] sm:$0xff]  }
 0x2c2   : > { %v2198_v29 = vpop.f32.mrb[230].mxu0  ;;  %v4302_v50 = vld [vmem:[#allocation4 + $0xc1] sm:$0xff] }
 0x2c3   : > { %v2820_v45 = vmax.f32 %v2196_v39, 0.0  ;;  %v2199_v47 = vadd.f32 %v17892_v9, %v2198_v29  ;;  %v14799_v48 = vpop.f32.mrb[231].mxu0  ;;  %4033 = vst [vmem:[#allocation4 + $0xce] sm:$0xff] %v4030_v26  ;;  %4034 = vst [vmem:[#allocation4 + $0xd6] sm:$0x3f] %v4031_v27 }
 0x2c4   : > { %v16606_v48 = vld [vmem:[%s17413_s17 + $0x2c8] sm:$0xff]  }
 0x2c5   : > { %3062 = vst [vmem:[#allocation2 + $0x390] sm:$0xff] %v2820_v45  ;;  %v2821_v52 = vmax.f32 %v2199_v47, 0.0  ;;  %14905 = vmatmul.mubr.msk.bf16.gmra.mrb[80].mxu0 %vm1334_vm3, %v16601_v44 }
 0x2c6   : > { %v18014_v53 = vld [vmem:[#allocation2 + $0x380] ss:$2 sm:$0xff]  ;;  %v18016_v54 = vld [vmem:[#allocation2 + $0x381] ss:$2 sm:$0xff]  ;;  %14908 = vmatprep.mubr.msk.bf16.mxu0 %vm17264_vm2, %v17994_v19 }
 0x2c7   : > { %v3729_v41 = vmax.f32 %v18014_v53, %v18016_v54  ;;  %3063 = vst [vmem:[#allocation2 + $0x398] sm:$0xff] %v2821_v52 }
 0x2c8   : > { %v2203_v42 = vpop.f32.mrb[232].mxu0 }
 0x2c9   : > { %v2204_v43 = vadd.f32 %v17892_v9, %v2203_v42  ;;  %v14802_v55 = vpop.f32.mrb[233].mxu0 }
 0x2ca   : > { %v2206_v49 = vpop.f32.mrb[234].mxu0  ;;  %v4303_v51 = vld [vmem:[#allocation4 + $0xc9] sm:$0xff] }
 0x2cb   : > { %v2822_v60 = vmax.f32 %v2204_v43, 0.0  ;;  %v2207_v28 = vadd.f32 %v17892_v9, %v2206_v49  ;;  %v14803_v0 = vpop.f32.mrb[235].mxu0  ;;  %v4345_v4 = vpack.c.bf16 %v4303_v51, %v4302_v50  ;;  %v4304_v43 = vld [vmem:[#allocation4 + $0xd1] sm:$0xff] }
 0x2cd   : > { %3064 = vst [vmem:[#allocation2 + $0x3a0] sm:$0xff] %v2822_v60  ;;  %v2823_v1 = vmax.f32 %v2207_v28, 0.0  ;;  %14909 = vmatmul.mubr.msk.bf16.gmra.mrb[84].mxu0 %vm1334_vm3, %v16602_v56  ;;  %15092 = vmatprep.mubr.bf16.mxu1 %v4345_v4 }
 0x2ce   : > { %v3304_v2 = vld [vmem:[#allocation2 + $0x390] ss:$2 sm:$0xff]  ;;  %v3546_v3 = vld [vmem:[#allocation2 + $0x391] ss:$2 sm:$0xff]  ;;  %14912 = vmatprep.mubr.msk.bf16.mxu0 %vm17264_vm2, %v17994_v19 }
 0x2cf   : > { %v3730_v6 = vmax.f32 %v3304_v2, %v3546_v3  ;;  %3065 = vst [vmem:[#allocation2 + $0x3a8] sm:$0xff] %v2823_v1  ;;  %v16607_v3 = vld [vmem:[%s17413_s17 + $0x2d0] sm:$0xff]  }
 0x2d0   : > { %v2211_v7 = vpop.f32.mrb[236].mxu0 }
 0x2d1   : > { %3851 = vst [vmem:[#allocation3 + $0x1c8] sm:$0xff] %v3730_v6  ;;  %v2212_v57 = vadd.f32 %v17892_v9, %v2211_v7  ;;  %v14806_v58 = vpop.f32.mrb[237].mxu0 }
 0x2d2   : > { %v2214_v8 = vpop.f32.mrb[238].mxu0 }
 0x2d3   : > { %v2824_v61 = vmax.f32 %v2212_v57, 0.0  ;;  %v2215_v62 = vadd.f32 %v17892_v9, %v2214_v8  ;;  %v14807_v63 = vpop.f32.mrb[239].mxu0 }
 0x2d5   : > { %3066 = vst [vmem:[#allocation2 + $0x3b0] sm:$0xff] %v2824_v61  ;;  %v2825_v46 = vmax.f32 %v2215_v62, 0.0  ;;  %14913 = vmatmul.mubr.msk.bf16.gmra.mrb[88].mxu0 %vm1334_vm3, %v16603_v59 }
 0x2d6   : > { %v3306_v10 = vld [vmem:[#allocation2 + $0x3a0] ss:$2 sm:$0xff]  ;;  %v3548_v17 = vld [vmem:[#allocation2 + $0x3a1] ss:$2 sm:$0xff]  ;;  %14916 = vmatprep.mubr.msk.bf16.mxu0 %vm17264_vm2, %v17994_v19 }
 0x2d7   : > { %v3731_v18 = vmax.f32 %v3306_v10, %v3548_v17  ;;  %3067 = vst [vmem:[#allocation2 + $0x3b8] sm:$0xff] %v2825_v46 }
 0x2d8   : > { %v2219_v14 = vpop.f32.mrb[240].mxu0 }
 0x2d9   : > { %3852 = vst [vmem:[#allocation3 + $0x1d0] sm:$0xff] %v3731_v18  ;;  %v2220_v20 = vadd.f32 %v17892_v9, %v2219_v14  ;;  %v14810_v11 = vpop.f32.mrb[241].mxu0  ;;  %v16608_v18 = vld [vmem:[%s17413_s17 + $0x2d8] sm:$0xff]  }
 0x2da   : > { %v2222_v16 = vpop.f32.mrb[242].mxu0 }
 0x2db   : > { %v2826_v15 = vmax.f32 %v2220_v20, 0.0  ;;  %v2223_v25 = vadd.f32 %v17892_v9, %v2222_v16  ;;  %v14811_v30 = vpop.f32.mrb[243].mxu0 }
 0x2dd   : > { %3068 = vst [vmem:[#allocation2 + $0x3c0] sm:$0xff] %v2826_v15  ;;  %v2827_v31 = vmax.f32 %v2223_v25, 0.0  ;;  %14917 = vmatmul.mubr.msk.bf16.gmra.mrb[92].mxu0 %vm1334_vm3, %v16604_v12 }
 0x2de   : > { %v3308_v5 = vld [vmem:[#allocation2 + $0x3b0] ss:$2 sm:$0xff]  ;;  %v3550_v21 = vld [vmem:[#allocation2 + $0x3b1] ss:$2 sm:$0xff]  ;;  %14920 = vmatprep.mubr.msk.bf16.mxu0 %vm17264_vm2, %v17994_v19 }
 0x2df   : > { %v3732_v13 = vmax.f32 %v3308_v5, %v3550_v21  ;;  %3069 = vst [vmem:[#allocation2 + $0x3c8] sm:$0xff] %v2827_v31 }
 0x2e0   : > { %v2227_v32 = vpop.f32.mrb[244].mxu0  ;;  %v4038_v33 = vld [vmem:[#allocation3 + $0x1ce] sm:$0xff] }
 0x2e1   : > { %3853 = vst [vmem:[#allocation3 + $0x1d8] sm:$0xff] %v3732_v13  ;;  %v2228_v37 = vadd.f32 %v17892_v9, %v2227_v32  ;;  %v14814_v22 = vpop.f32.mrb[245].mxu0  ;;  %v4041_v24 = vmax.f32 %v3728_v36, %v4038_v33 }
 0x2e2   : > { %v2230_v38 = vpop.f32.mrb[246].mxu0 }
 0x2e3   : > { %v2828_v39 = vmax.f32 %v2228_v37, 0.0  ;;  %v2231_v40 = vadd.f32 %v17892_v9, %v2230_v38  ;;  %v14815_v44 = vpop.f32.mrb[247].mxu0  ;;  %4044 = vst [vmem:[#allocation4 + $0xdc] sm:$0xff] %v4041_v24  ;;  %v16609_v37 = vld [vmem:[%s17413_s17 + $0x2e0] sm:$0xff]  }
 0x2e5   : > { %3070 = vst [vmem:[#allocation2 + $0x3d0] sm:$0xff] %v2828_v39  ;;  %v2829_v26 = vmax.f32 %v2231_v40, 0.0  ;;  %14921 = vmatmul.mubr.msk.bf16.gmra.mrb[96].mxu0 %vm1334_vm3, %v16605_v23 }
 0x2e6   : > { %v3310_v27 = vld [vmem:[#allocation2 + $0x3c0] ss:$2 sm:$0xff]  ;;  %v3552_v29 = vld [vmem:[#allocation2 + $0x3c1] ss:$2 sm:$0xff]  ;;  %14924 = vmatprep.mubr.msk.bf16.mxu0 %vm17264_vm2, %v17994_v19 }
 0x2e7   : > { %v3733_v45 = vmax.f32 %v3310_v27, %v3552_v29  ;;  %3071 = vst [vmem:[#allocation2 + $0x3d8] sm:$0xff] %v2829_v26 }
 0x2e8   : > { %v2235_v34 = vpop.f32.mrb[248].mxu0  ;;  %v4039_v35 = vld [vmem:[#allocation3 + $0x1d6] sm:$0xff] }
 0x2e9   : > { %3854 = vst [vmem:[#allocation3 + $0x1e0] sm:$0xff] %v3733_v45  ;;  %v2236_v36 = vadd.f32 %v17892_v9, %v2235_v34  ;;  %v14818_v47 = vpop.f32.mrb[249].mxu0  ;;  %v4042_v52 = vmax.f32 %v3729_v41, %v4039_v35  ;;  %v4037_v41 = vld [vmem:[#allocation3 + $0x1c8] sm:$0x3f]  ;;  %v16610_v34 = vld [vmem:[%s17413_s17 + $0x2e8] sm:$0xff]  }
 0x2ea   : > { %v2238_v42 = vpop.f32.mrb[250].mxu0  ;;  %v4305_v55 = vld [vmem:[#allocation4 + $0xd9] sm:$0xff] }
 0x2eb   : > { %v2830_v56 = vmax.f32 %v2236_v36, 0.0  ;;  %v2239_v49 = vadd.f32 %v17892_v9, %v2238_v42  ;;  %v14819_v50 = vpop.f32.mrb[251].mxu0  ;;  %v4346_v51 = vpack.c.bf16 %v4305_v55, %v4304_v43  ;;  %4045 = vst [vmem:[#allocation4 + $0xe4] sm:$0xff] %v4042_v52 }
 0x2ed   : > { %3072 = vst [vmem:[#allocation2 + $0x3e0] sm:$0xff] %v2830_v56  ;;  %v2831_v60 = vmax.f32 %v2239_v49, 0.0  ;;  %14925 = vmatmul.mubr.msk.bf16.gmra.mrb[100].mxu0 %vm1334_vm3, %v16606_v48  ;;  %15093 = vmatmul.mubr.bf16.gmra.mrb[24].mxu1 %v4346_v51 }
 0x2ee   : > { %v3312_v28 = vld [vmem:[#allocation2 + $0x3d0] ss:$2 sm:$0xff]  ;;  %v3554_v0 = vld [vmem:[#allocation2 + $0x3d1] ss:$2 sm:$0xff]  ;;  %14928 = vmatprep.mubr.msk.bf16.mxu0 %vm17264_vm2, %v17994_v19 }
 0x2ef   : > { %v3734_v53 = vmax.f32 %v3312_v28, %v3554_v0  ;;  %3073 = vst [vmem:[#allocation2 + $0x3e8] sm:$0xff] %v2831_v60  ;;  %v16611_v28 = vld [vmem:[%s17413_s17 + $0x2f0] sm:$0xff]  }
 0x2f0   : > { %v2243_v54 = vpop.f32.mrb[252].mxu0  ;;  %v4040_v4 = vld [vmem:[#allocation3 + $0x1de] sm:$0x3f] }
 0x2f1   : > { %3855 = vst [vmem:[#allocation3 + $0x1e8] sm:$0xff] %v3734_v53  ;;  %v2244_v1 = vadd.f32 %v17892_v9, %v2243_v54  ;;  %v14822_v2 = vpop.f32.mrb[253].mxu0  ;;  %v4043_v6 = vmax.f32 %v4037_v41, %v4040_v4 }
 0x2f2   : > { %v2246_v7 = vpop.f32.mrb[254].mxu0  ;;  %v4306_v20 = vld [vmem:[#allocation4 + $0xe1] sm:$0xff] }
 0x2f3   : > { %v2832_v57 = vmax.f32 %v2244_v1, 0.0  ;;  %v2247_v58 = vadd.f32 %v17892_v9, %v2246_v7  ;;  %v14823_v59 = vpop.f32.mrb[255].mxu0  ;;  %4046 = vst [vmem:[#allocation4 + $0xec] sm:$0x3f] %v4043_v6 }
 0x2f5   : > { %3074 = vst [vmem:[#allocation2 + $0x3f0] sm:$0xff] %v2832_v57  ;;  %v2833_v8 = vmax.f32 %v2247_v58, 0.0  ;;  %14929 = vmatmul.mubr.msk.bf16.gmra.mrb[104].mxu0 %vm1334_vm3, %v16607_v3 }
 0x2f6   : > { %v3314_v61 = vld [vmem:[#allocation2 + $0x3e0] ss:$2 sm:$0xff]  ;;  %v3556_v62 = vld [vmem:[#allocation2 + $0x3e1] ss:$2 sm:$0xff]  ;;  %14932 = vmatprep.mubr.msk.bf16.mxu0 %vm17264_vm2, %v17994_v19 }
 0x2f7   : > { %v3735_v63 = vmax.f32 %v3314_v61, %v3556_v62  ;;  %3075 = vst [vmem:[#allocation2 + $0x3f8] sm:$0xff] %v2833_v8  ;;  %v18097_v8 = vld [vmem:[%s20353_s2] ss:$0 sm:$0xff] }
 0x2f8   : > { %v2251_v46 = vpop.f32.mrb[0].mxu0  ;;  %v4047_v49 = vld [vmem:[#allocation3 + $0x1e4] sm:$0xff] }
 0x2f9   : > { %3856 = vst [vmem:[#allocation3 + $0x1f0] sm:$0xff] %v3735_v63  ;;  %v2252_v10 = vadd.f32 %v17892_v9, %v2251_v46  ;;  %v14826_v17 = vpop.f32.mrb[1].mxu0  ;;  %v16612_v63 = vld [vmem:[%s17413_s17 + $0x2f8] sm:$0xff]  }
 0x2fa   : > { %v2254_v14 = vpop.f32.mrb[2].mxu0  ;;  %v4307_v11 = vld [vmem:[#allocation4 + $0xe9] sm:$0xff] }
 0x2fb   : > { %v2834_v12 = vmax.f32 %v2252_v10, 0.0  ;;  %v2255_v16 = vadd.f32 %v17892_v9, %v2254_v14  ;;  %v14827_v15 = vpop.f32.mrb[3].mxu0  ;;  %v4347_v25 = vpack.c.bf16 %v4307_v11, %v4306_v20 }
 0x2fd   : > { %3076 = vst [vmem:[#allocation2 + $0x400] sm:$0xff] %v2834_v12  ;;  %v2835_v30 = vmax.f32 %v2255_v16, 0.0  ;;  %14933 = vmatmul.mubr.msk.bf16.gmra.mrb[108].mxu0 %vm1334_vm3, %v16608_v18  ;;  %15096 = vmatprep.mubr.bf16.mxu1 %v4347_v25 }
 0x2fe   : > { %v3316_v31 = vld [vmem:[#allocation2 + $0x3f0] ss:$2 sm:$0xff]  ;;  %v3558_v5 = vld [vmem:[#allocation2 + $0x3f1] ss:$2 sm:$0xff]  ;;  %14936 = vmatprep.mubr.msk.bf16.mxu0 %vm17264_vm2, %v17994_v19 }
 0x2ff   : > { %v3736_v21 = vmax.f32 %v3316_v31, %v3558_v5  ;;  %3077 = vst [vmem:[#allocation2 + $0x408] sm:$0xff] %v2835_v30  ;;  %v16613_v5 = vld [vmem:[%s17413_s17 + $0x300] sm:$0xff]  }
 0x300   : > { %v2259_v13 = vpop.f32.mrb[4].mxu0  ;;  %v4048_v7 = vld [vmem:[#allocation3 + $0x1ec] sm:$0xff] }
 0x301   : > { %3857 = vst [vmem:[#allocation3 + $0x1f8] sm:$0xff] %v3736_v21  ;;  %v2260_v32 = vadd.f32 %v17892_v9, %v2259_v13  ;;  %v14830_v33 = vpop.f32.mrb[5].mxu0 }
 0x302   : > { %v2262_v22 = vpop.f32.mrb[6].mxu0 }
 0x303   : > { %v2836_v23 = vmax.f32 %v2260_v32, 0.0  ;;  %v2263_v24 = vadd.f32 %v17892_v9, %v2262_v22  ;;  %v14831_v38 = vpop.f32.mrb[7].mxu0 }
 0x305   : > { %3078 = vst [vmem:[#allocation2 + $0x410] sm:$0xff] %v2836_v23  ;;  %v2837_v39 = vmax.f32 %v2263_v24, 0.0  ;;  %14937 = vmatmul.mubr.msk.bf16.gmra.mrb[112].mxu0 %vm1334_vm3, %v16609_v37 }
 0x306   : > { %v3318_v40 = vld [vmem:[#allocation2 + $0x400] ss:$2 sm:$0xff]  ;;  %v3560_v44 = vld [vmem:[#allocation2 + $0x401] ss:$2 sm:$0xff]  ;;  %14940 = vmatprep.mubr.msk.bf16.mxu0 %vm17264_vm2, %v17994_v19 }
 0x307   : > { %v3737_v26 = vmax.f32 %v3318_v40, %v3560_v44  ;;  %3079 = vst [vmem:[#allocation2 + $0x418] sm:$0xff] %v2837_v39 }
 0x308   : > { %v2267_v27 = vpop.f32.mrb[8].mxu0  ;;  %v4049_v58 = vld [vmem:[#allocation3 + $0x1f4] sm:$0x3f] }
 0x309   : > { %3858 = vst [vmem:[#allocation3 + $0x200] sm:$0xff] %v3737_v26  ;;  %v2268_v29 = vadd.f32 %v17892_v9, %v2267_v27  ;;  %v14834_v45 = vpop.f32.mrb[9].mxu0 }
 0x30a   : > { %v2270_v35 = vpop.f32.mrb[10].mxu0 }
 0x30b   : > { %v2838_v36 = vmax.f32 %v2268_v29, 0.0  ;;  %v2271_v47 = vadd.f32 %v17892_v9, %v2270_v35  ;;  %v14835_v48 = vpop.f32.mrb[11].mxu0  ;;  %v16614_v29 = vld [vmem:[%s17413_s17 + $0x308] sm:$0xff]  }
 0x30d   : > { %3080 = vst [vmem:[#allocation2 + $0x420] sm:$0xff] %v2838_v36  ;;  %v2839_v52 = vmax.f32 %v2271_v47, 0.0  ;;  %14941 = vmatmul.mubr.msk.bf16.gmra.mrb[116].mxu0 %vm1334_vm3, %v16610_v34 }
 0x30e   : > { %v3320_v42 = vld [vmem:[#allocation2 + $0x410] ss:$2 sm:$0xff]  ;;  %v3562_v43 = vld [vmem:[#allocation2 + $0x411] ss:$2 sm:$0xff]  ;;  %14944 = vmatprep.mubr.msk.bf16.mxu0 %vm17264_vm2, %v17994_v19 }
 0x30f   : > { %v3738_v55 = vmax.f32 %v3320_v42, %v3562_v43  ;;  %3081 = vst [vmem:[#allocation2 + $0x428] sm:$0xff] %v2839_v52 }
 0x310   : > { %v2275_v56 = vpop.f32.mrb[12].mxu0  ;;  %v4050_v50 = vld [vmem:[#allocation3 + $0x1fa] sm:$0xff] }
 0x311   : > { %3859 = vst [vmem:[#allocation3 + $0x208] sm:$0xff] %v3738_v55  ;;  %v2276_v51 = vadd.f32 %v17892_v9, %v2275_v56  ;;  %v14838_v60 = vpop.f32.mrb[13].mxu0  ;;  %v4053_v0 = vmax.f32 %v4047_v49, %v4050_v50  ;;  %v16615_v49 = vld [vmem:[%s17413_s17 + $0x310] sm:$0xff]  }
 0x312   : > { %v2278_v53 = vpop.f32.mrb[14].mxu0 }
 0x313   : > { %v2840_v54 = vmax.f32 %v2276_v51, 0.0  ;;  %v2279_v41 = vadd.f32 %v17892_v9, %v2278_v53  ;;  %v14839_v4 = vpop.f32.mrb[15].mxu0  ;;  %4056 = vst [vmem:[#allocation4 + $0xf2] sm:$0xff] %v4053_v0 }
 0x315   : > { %3082 = vst [vmem:[#allocation2 + $0x430] sm:$0xff] %v2840_v54  ;;  %v2841_v1 = vmax.f32 %v2279_v41, 0.0  ;;  %14945 = vmatmul.mubr.msk.bf16.gmra.mrb[120].mxu0 %vm1334_vm3, %v16611_v28 }
 0x316   : > { %v18086_v2 = vld [vmem:[#allocation2 + $0x420] ss:$2 sm:$0xff]  ;;  %v18088_v3 = vld [vmem:[#allocation2 + $0x421] ss:$2 sm:$0xff]  ;;  %14948 = vmatprep.mubr.msk.bf16.mxu0 %vm17264_vm2, %v17994_v19 }
 0x317   : > { %v3739_v6 = vmax.f32 %v18086_v2, %v18088_v3  ;;  %3083 = vst [vmem:[#allocation2 + $0x438] sm:$0xff] %v2841_v1 }
 0x318   : > { %v2283_v9 = vpop.f32.mrb[16].mxu0  ;;  %v4051_v57 = vld [vmem:[#allocation3 + $0x202] sm:$0xff]  ;;  %v4052_v59 = vld [vmem:[#allocation3 + $0x20a] sm:$0x3f] }
 0x319   : > { %v2284_v61 = vadd.f32 %v18097_v8, %v2283_v9  ;;  %v14842_v62 = vpop.f32.mrb[17].mxu0  ;;  %v4054_v46 = vmax.f32 %v4048_v7, %v4051_v57  ;;  %v4055_v10 = vmax.f32 %v4049_v58, %v4052_v59  ;;  %v16616_v57 = vld [vmem:[%s17413_s17 + $0x318] sm:$0xff]  }
 0x31a   : > { %v2286_v17 = vpop.f32.mrb[18].mxu0  ;;  %v4308_v13 = vld [vmem:[#allocation4 + $0xf1] sm:$0xff] }
 0x31b   : > { %v2842_v18 = vmax.f32 %v2284_v61, 0.0  ;;  %v2287_v14 = vadd.f32 %v18097_v8, %v2286_v17  ;;  %v14843_v20 = vpop.f32.mrb[19].mxu0  ;;  %4057 = vst [vmem:[#allocation4 + $0xfa] sm:$0xff] %v4054_v46  ;;  %4058 = vst [vmem:[#allocation4 + $0x102] sm:$0x3f] %v4055_v10 }
 0x31c   : > { %v16617_v20 = vld [vmem:[%s17413_s17 + $0x320] sm:$0xff]  }
 0x31d   : > { %3084 = vst [vmem:[#allocation2 + $0x440] sm:$0xff] %v2842_v18  ;;  %v2843_v11 = vmax.f32 %v2287_v14, 0.0  ;;  %14949 = vmatmul.mubr.msk.bf16.gmra.mrb[124].mxu0 %vm1334_vm3, %v16612_v63 }
 0x31e   : > { %v18103_v12 = vld [vmem:[#allocation2 + $0x430] ss:$2 sm:$0xff]  ;;  %v18105_v16 = vld [vmem:[#allocation2 + $0x431] ss:$2 sm:$0xff]  ;;  %14952 = vmatprep.mubr.msk.bf16.mxu0 %vm17264_vm2, %v17994_v19 }
 0x31f   : > { %v3740_v15 = vmax.f32 %v18103_v12, %v18105_v16  ;;  %3085 = vst [vmem:[#allocation2 + $0x448] sm:$0xff] %v2843_v11 }
 0x320   : > { %v2291_v25 = vpop.f32.mrb[20].mxu0 }
 0x321   : > { %v2292_v30 = vadd.f32 %v18097_v8, %v2291_v25  ;;  %v14846_v31 = vpop.f32.mrb[21].mxu0 }
 0x322   : > { %v2294_v21 = vpop.f32.mrb[22].mxu0  ;;  %v4309_v32 = vld [vmem:[#allocation4 + $0xf9] sm:$0xff] }
 0x323   : > { %v2844_v33 = vmax.f32 %v2292_v30, 0.0  ;;  %v2295_v37 = vadd.f32 %v18097_v8, %v2294_v21  ;;  %v14847_v22 = vpop.f32.mrb[23].mxu0  ;;  %v4348_v23 = vpack.c.bf16 %v4309_v32, %v4308_v13 }
 0x325   : > { %3086 = vst [vmem:[#allocation2 + $0x450] sm:$0xff] %v2844_v33  ;;  %v2845_v24 = vmax.f32 %v2295_v37, 0.0  ;;  %14953 = vmatmul.mubr.msk.bf16.gmra.mrb[128].mxu0 %vm1334_vm3, %v16613_v5  ;;  %15097 = vmatmul.mubr.bf16.gmra.mrb[28].mxu1 %v4348_v23  ;;  %v16618_v23 = vld [vmem:[%s17413_s17 + $0x328] sm:$0xff]  }
 0x326   : > { %v3326_v38 = vld [vmem:[#allocation2 + $0x440] ss:$2 sm:$0xff]  ;;  %v3568_v39 = vld [vmem:[#allocation2 + $0x441] ss:$2 sm:$0xff]  ;;  %14956 = vmatprep.mubr.msk.bf16.mxu0 %vm17264_vm2, %v17994_v19 }
 0x327   : > { %v3741_v40 = vmax.f32 %v3326_v38, %v3568_v39  ;;  %3087 = vst [vmem:[#allocation2 + $0x458] sm:$0xff] %v2845_v24 }
 0x328   : > { %v2299_v44 = vpop.f32.mrb[24].mxu0 }
 0x329   : > { %3862 = vst [vmem:[#allocation3 + $0x220] sm:$0xff] %v3741_v40  ;;  %v2300_v26 = vadd.f32 %v18097_v8, %v2299_v44  ;;  %v14850_v27 = vpop.f32.mrb[25].mxu0 }
 0x32a   : > { %v2302_v45 = vpop.f32.mrb[26].mxu0 }
 0x32b   : > { %v2846_v34 = vmax.f32 %v2300_v26, 0.0  ;;  %v2303_v35 = vadd.f32 %v18097_v8, %v2302_v45  ;;  %v14851_v36 = vpop.f32.mrb[27].mxu0 }
 0x32d   : > { %3088 = vst [vmem:[#allocation2 + $0x460] sm:$0xff] %v2846_v34  ;;  %v2847_v47 = vmax.f32 %v2303_v35, 0.0  ;;  %14957 = vmatmul.mubr.msk.bf16.gmra.mrb[132].mxu0 %vm1334_vm3, %v16614_v29 }
 0x32e   : > { %v3328_v48 = vld [vmem:[#allocation2 + $0x450] ss:$2 sm:$0xff]  ;;  %v3570_v52 = vld [vmem:[#allocation2 + $0x451] ss:$2 sm:$0xff]  ;;  %14960 = vmatprep.mubr.msk.bf16.mxu0 %vm17264_vm2, %v17994_v19 }
 0x32f   : > { %v3742_v42 = vmax.f32 %v3328_v48, %v3570_v52  ;;  %3089 = vst [vmem:[#allocation2 + $0x468] sm:$0xff] %v2847_v47 }
 0x330   : > { %v2307_v43 = vpop.f32.mrb[28].mxu0  ;;  %v4061_v16 = vld [vmem:[#allocation3 + $0x220] sm:$0x3f] }
 0x331   : > { %3863 = vst [vmem:[#allocation3 + $0x228] sm:$0xff] %v3742_v42  ;;  %v2308_v55 = vadd.f32 %v18097_v8, %v2307_v43  ;;  %v14854_v56 = vpop.f32.mrb[29].mxu0  ;;  %v16619_v42 = vld [vmem:[%s17413_s17 + $0x330] sm:$0xff]  }
 0x332   : > { %v2310_v50 = vpop.f32.mrb[30].mxu0 }
 0x333   : > { %v2848_v51 = vmax.f32 %v2308_v55, 0.0  ;;  %v2311_v60 = vadd.f32 %v18097_v8, %v2310_v50  ;;  %v14855_v28 = vpop.f32.mrb[31].mxu0 }
 0x335   : > { %3090 = vst [vmem:[#allocation2 + $0x470] sm:$0xff] %v2848_v51  ;;  %v2849_v0 = vmax.f32 %v2311_v60, 0.0  ;;  %14961 = vmatmul.mubr.msk.bf16.gmra.mrb[136].mxu0 %vm1334_vm3, %v16615_v49 }
 0x336   : > { %v3330_v53 = vld [vmem:[#allocation2 + $0x460] ss:$2 sm:$0xff]  ;;  %v3572_v54 = vld [vmem:[#allocation2 + $0x461] ss:$2 sm:$0xff]  ;;  %14964 = vmatprep.mubr.msk.bf16.mxu0 %vm17264_vm2, %v17994_v19 }
 0x337   : > { %v3743_v41 = vmax.f32 %v3330_v53, %v3572_v54  ;;  %3091 = vst [vmem:[#allocation2 + $0x478] sm:$0xff] %v2849_v0 }
 0x338   : > { %v2315_v4 = vpop.f32.mrb[32].mxu0  ;;  %v4062_v1 = vld [vmem:[#allocation3 + $0x226] sm:$0xff] }
 0x339   : > { %3864 = vst [vmem:[#allocation3 + $0x230] sm:$0xff] %v3743_v41  ;;  %v2316_v7 = vadd.f32 %v18097_v8, %v2315_v4  ;;  %v14858_v9 = vpop.f32.mrb[33].mxu0  ;;  %v4065_v58 = vmax.f32 %v3739_v6, %v4062_v1  ;;  %v16620_v41 = vld [vmem:[%s17413_s17 + $0x338] sm:$0xff]  }
 0x33a   : > { %v2318_v59 = vpop.f32.mrb[34].mxu0 }
 0x33b   : > { %v2850_v61 = vmax.f32 %v2316_v7, 0.0  ;;  %v2319_v62 = vadd.f32 %v18097_v8, %v2318_v59  ;;  %v14859_v63 = vpop.f32.mrb[35].mxu0  ;;  %4068 = vst [vmem:[#allocation4 + $0x108] sm:$0xff] %v4065_v58 }
 0x33d   : > { %3092 = vst [vmem:[#allocation2 + $0x480] sm:$0xff] %v2850_v61  ;;  %v2851_v46 = vmax.f32 %v2319_v62, 0.0  ;;  %14965 = vmatmul.mubr.msk.bf16.gmra.mrb[140].mxu0 %vm1334_vm3, %v16616_v57 }
 0x33e   : > { %v3332_v10 = vld [vmem:[#allocation2 + $0x470] ss:$2 sm:$0xff]  ;;  %v3574_v17 = vld [vmem:[#allocation2 + $0x471] ss:$2 sm:$0xff]  ;;  %14968 = vmatprep.mubr.msk.bf16.mxu0 %vm17264_vm2, %v17994_v19 }
 0x33f   : > { %v3744_v18 = vmax.f32 %v3332_v10, %v3574_v17  ;;  %3093 = vst [vmem:[#allocation2 + $0x488] sm:$0xff] %v2851_v46  ;;  %v16621_v10 = vld [vmem:[%s17413_s17 + $0x340] sm:$0xff]  }
 0x340   : > { %v2323_v2 = vpop.f32.mrb[36].mxu0  ;;  %v4063_v3 = vld [vmem:[#allocation3 + $0x22e] sm:$0xff] }
 0x341   : > { %3865 = vst [vmem:[#allocation3 + $0x238] sm:$0xff] %v3744_v18  ;;  %v2324_v6 = vadd.f32 %v18097_v8, %v2323_v2  ;;  %v14862_v14 = vpop.f32.mrb[37].mxu0  ;;  %v4066_v11 = vmax.f32 %v3740_v15, %v4063_v3 }
 0x342   : > { %v2326_v25 = vpop.f32.mrb[38].mxu0  ;;  %v4310_v39 = vld [vmem:[#allocation4 + $0x101] sm:$0xff] }
 0x343   : > { %v2852_v30 = vmax.f32 %v2324_v6, 0.0  ;;  %v2327_v31 = vadd.f32 %v18097_v8, %v2326_v25  ;;  %v14863_v5 = vpop.f32.mrb[39].mxu0  ;;  %4069 = vst [vmem:[#allocation4 + $0x110] sm:$0xff] %v4066_v11 }
 0x345   : > { %3094 = vst [vmem:[#allocation2 + $0x490] sm:$0xff] %v2852_v30  ;;  %v2853_v21 = vmax.f32 %v2327_v31, 0.0  ;;  %14969 = vmatmul.mubr.msk.bf16.gmra.mrb[144].mxu0 %vm1334_vm3, %v16617_v20 }
 0x346   : > { %v3334_v13 = vld [vmem:[#allocation2 + $0x480] ss:$2 sm:$0xff]  ;;  %v3576_v32 = vld [vmem:[#allocation2 + $0x481] ss:$2 sm:$0xff]  ;;  %14972 = vmatprep.mubr.msk.bf16.mxu0 %vm17264_vm2, %v17994_v19 }
 0x347   : > { %v3745_v33 = vmax.f32 %v3334_v13, %v3576_v32  ;;  %3095 = vst [vmem:[#allocation2 + $0x498] sm:$0xff] %v2853_v21  ;;  %v16622_v13 = vld [vmem:[%s17413_s17 + $0x348] sm:$0xff]  }
 0x348   : > { %v2331_v12 = vpop.f32.mrb[40].mxu0  ;;  %v4064_v15 = vld [vmem:[#allocation3 + $0x236] sm:$0x3f] }
 0x349   : > { %3866 = vst [vmem:[#allocation3 + $0x240] sm:$0xff] %v3745_v33  ;;  %v2332_v37 = vadd.f32 %v18097_v8, %v2331_v12  ;;  %v14866_v22 = vpop.f32.mrb[41].mxu0  ;;  %v4067_v24 = vmax.f32 %v4061_v16, %v4064_v15 }
 0x34a   : > { %v2334_v38 = vpop.f32.mrb[42].mxu0  ;;  %v4311_v40 = vld [vmem:[#allocation4 + $0x109] sm:$0xff] }
 0x34b   : > { %v2854_v44 = vmax.f32 %v2332_v37, 0.0  ;;  %v2335_v26 = vadd.f32 %v18097_v8, %v2334_v38  ;;  %v14867_v27 = vpop.f32.mrb[43].mxu0  ;;  %v4349_v29 = vpack.c.bf16 %v4311_v40, %v4310_v39  ;;  %4070 = vst [vmem:[#allocation4 + $0x118] sm:$0x3f] %v4067_v24 }
 0x34d   : > { %3096 = vst [vmem:[#allocation2 + $0x4a0] sm:$0xff] %v2854_v44  ;;  %v2855_v45 = vmax.f32 %v2335_v26, 0.0  ;;  %14973 = vmatmul.mubr.msk.bf16.gmra.mrb[148].mxu0 %vm1334_vm3, %v16618_v23  ;;  %15100 = vmatprep.mubr.bf16.mxu1 %v4349_v29 }
 0x34e   : > { %v3336_v34 = vld [vmem:[#allocation2 + $0x490] ss:$2 sm:$0xff]  ;;  %v3578_v35 = vld [vmem:[#allocation2 + $0x491] ss:$2 sm:$0xff]  ;;  %14976 = vmatprep.mubr.msk.bf16.mxu0 %vm17264_vm2, %v17994_v19 }
 0x34f   : > { %v3746_v36 = vmax.f32 %v3336_v34, %v3578_v35  ;;  %3097 = vst [vmem:[#allocation2 + $0x4a8] sm:$0xff] %v2855_v45  ;;  %v16623_v45 = vld [vmem:[%s17413_s17 + $0x350] sm:$0xff]  }
 0x350   : > { %v2339_v47 = vpop.f32.mrb[44].mxu0  ;;  %v4071_v30 = vld [vmem:[#allocation3 + $0x23c] sm:$0xff] }
 0x351   : > { %3867 = vst [vmem:[#allocation3 + $0x248] sm:$0xff] %v3746_v36  ;;  %v2340_v48 = vadd.f32 %v18097_v8, %v2339_v47  ;;  %v14870_v52 = vpop.f32.mrb[45].mxu0 }
 0x352   : > { %v2342_v43 = vpop.f32.mrb[46].mxu0  ;;  %v4312_v47 = vld [vmem:[#allocation4 + $0x111] sm:$0xff] }
 0x353   : > { %v2856_v55 = vmax.f32 %v2340_v48, 0.0  ;;  %v2343_v56 = vadd.f32 %v18097_v8, %v2342_v43  ;;  %v14871_v49 = vpop.f32.mrb[47].mxu0 }
 0x355   : > { %3098 = vst [vmem:[#allocation2 + $0x4b0] sm:$0xff] %v2856_v55  ;;  %v2857_v50 = vmax.f32 %v2343_v56, 0.0  ;;  %14977 = vmatmul.mubr.msk.bf16.gmra.mrb[152].mxu0 %vm1334_vm3, %v16619_v42 }
 0x356   : > { %v3338_v51 = vld [vmem:[#allocation2 + $0x4a0] ss:$2 sm:$0xff]  ;;  %v3580_v60 = vld [vmem:[#allocation2 + $0x4a1] ss:$2 sm:$0xff]  ;;  %14980 = vmatprep.mubr.msk.bf16.mxu0 %vm17264_vm2, %v17994_v19 }
 0x357   : > { %v3747_v28 = vmax.f32 %v3338_v51, %v3580_v60  ;;  %3099 = vst [vmem:[#allocation2 + $0x4b8] sm:$0xff] %v2857_v50 }
 0x358   : > { %v2347_v0 = vpop.f32.mrb[48].mxu0  ;;  %v4072_v38 = vld [vmem:[#allocation3 + $0x244] sm:$0xff] }
 0x359   : > { %3868 = vst [vmem:[#allocation3 + $0x250] sm:$0xff] %v3747_v28  ;;  %v2348_v53 = vadd.f32 %v18097_v8, %v2347_v0  ;;  %v14874_v54 = vpop.f32.mrb[49].mxu0 }
 0x35a   : > { %v2350_v4 = vpop.f32.mrb[50].mxu0 }
 0x35b   : > { %v2858_v1 = vmax.f32 %v2348_v53, 0.0  ;;  %v2351_v7 = vadd.f32 %v18097_v8, %v2350_v4  ;;  %v14875_v9 = vpop.f32.mrb[51].mxu0  ;;  %v16624_v53 = vld [vmem:[%s17413_s17 + $0x358] sm:$0xff]  }
 0x35d   : > { %3100 = vst [vmem:[#allocation2 + $0x4c0] sm:$0xff] %v2858_v1  ;;  %v2859_v57 = vmax.f32 %v2351_v7, 0.0  ;;  %14981 = vmatmul.mubr.msk.bf16.gmra.mrb[156].mxu0 %vm1334_vm3, %v16620_v41 }
 0x35e   : > { %v3340_v58 = vld [vmem:[#allocation2 + $0x4b0] ss:$2 sm:$0xff]  ;;  %v3582_v59 = vld [vmem:[#allocation2 + $0x4b1] ss:$2 sm:$0xff]  ;;  %14984 = vmatprep.mubr.msk.bf16.mxu0 %vm17264_vm2, %v17994_v19 }
 0x35f   : > { %v3748_v61 = vmax.f32 %v3340_v58, %v3582_v59  ;;  %3101 = vst [vmem:[#allocation2 + $0x4c8] sm:$0xff] %v2859_v57 }
 0x360   : > { %v2355_v62 = vpop.f32.mrb[52].mxu0  ;;  %v4073_v40 = vld [vmem:[#allocation3 + $0x24c] sm:$0x3f] }
 0x361   : > { %3869 = vst [vmem:[#allocation3 + $0x258] sm:$0xff] %v3748_v61  ;;  %v2356_v63 = vadd.f32 %v18097_v8, %v2355_v62  ;;  %v14878_v46 = vpop.f32.mrb[53].mxu0 }
 0x362   : > { %v2358_v17 = vpop.f32.mrb[54].mxu0 }
 0x363   : > { %v2860_v18 = vmax.f32 %v2356_v63, 0.0  ;;  %v2359_v2 = vadd.f32 %v18097_v8, %v2358_v17  ;;  %v14879_v3 = vpop.f32.mrb[55].mxu0  ;;  %v16625_v17 = vld [vmem:[%s17413_s17 + $0x360] sm:$0xff]  }
 0x365   : > { %3102 = vst [vmem:[#allocation2 + $0x4d0] sm:$0xff] %v2860_v18  ;;  %v2861_v6 = vmax.f32 %v2359_v2, 0.0  ;;  %14985 = vmatmul.mubr.msk.bf16.gmra.mrb[160].mxu0 %vm1334_vm3, %v16621_v10 }
 0x366   : > { %v3342_v14 = vld [vmem:[#allocation2 + $0x4c0] ss:$2 sm:$0xff]  ;;  %v3584_v20 = vld [vmem:[#allocation2 + $0x4c1] ss:$2 sm:$0xff]  ;;  %14988 = vmatprep.mubr.msk.bf16.mxu0 %vm17264_vm2, %v17994_v19 }
 0x367   : > { %v3749_v11 = vmax.f32 %v3342_v14, %v3584_v20  ;;  %3103 = vst [vmem:[#allocation2 + $0x4d8] sm:$0xff] %v2861_v6 }
 0x368   : > { %v2363_v25 = vpop.f32.mrb[56].mxu0  ;;  %v4074_v31 = vld [vmem:[#allocation3 + $0x252] sm:$0xff] }
 0x369   : > { %3870 = vst [vmem:[#allocation3 + $0x260] sm:$0xff] %v3749_v11  ;;  %v2364_v5 = vadd.f32 %v18097_v8, %v2363_v25  ;;  %v14882_v21 = vpop.f32.mrb[57].mxu0  ;;  %v4077_v32 = vmax.f32 %v4071_v30, %v4074_v31  ;;  %v18205_v11 = vld [vmem:[#allocation4 + $0x1e4] sm:$0xff] }
 0x36a   : > { %v2366_v33 = vpop.f32.mrb[58].mxu0  ;;  %v16626_v21 = vld [vmem:[%s17413_s17 + $0x368] sm:$0xff]  }
 0x36b   : > { %v2862_v12 = vmax.f32 %v2364_v5, 0.0  ;;  %v2367_v16 = vadd.f32 %v18097_v8, %v2366_v33  ;;  %v14883_v15 = vpop.f32.mrb[59].mxu0  ;;  %4080 = vst [vmem:[#allocation4 + $0x11e] sm:$0xff] %v4077_v32 }
 0x36d   : > { %3104 = vst [vmem:[#allocation2 + $0x4e0] sm:$0xff] %v2862_v12  ;;  %v2863_v37 = vmax.f32 %v2367_v16, 0.0  ;;  %14989 = vmatmul.mubr.msk.bf16.gmra.mrb[164].mxu0 %vm1334_vm3, %v16622_v13 }
 0x36e   : > { %v18175_v22 = vld [vmem:[#allocation2 + $0x4d0] ss:$2 sm:$0xff]  ;;  %v18177_v23 = vld [vmem:[#allocation2 + $0x4d1] ss:$2 sm:$0xff]  ;;  %14992 = vmatprep.mubr.msk.bf16.mxu0 %vm17264_vm2, %v17994_v19 }
 0x36f   : > { %v3750_v24 = vmax.f32 %v18175_v22, %v18177_v23  ;;  %3105 = vst [vmem:[#allocation2 + $0x4e8] sm:$0xff] %v2863_v37 }
 0x370   : > { %v2371_v39 = vpop.f32.mrb[60].mxu0  ;;  %v4075_v44 = vld [vmem:[#allocation3 + $0x25a] sm:$0xff]  ;;  %v4076_v26 = vld [vmem:[#allocation3 + $0x262] sm:$0x3f] }
 0x371   : > { %v2372_v27 = vadd.f32 %v18097_v8, %v2371_v39  ;;  %v14886_v29 = vpop.f32.mrb[61].mxu0  ;;  %v4078_v34 = vmax.f32 %v4072_v38, %v4075_v44  ;;  %v4079_v35 = vmax.f32 %v4073_v40, %v4076_v26 }
 0x372   : > { %v2374_v36 = vpop.f32.mrb[62].mxu0  ;;  %v4313_v48 = vld [vmem:[#allocation4 + $0x119] sm:$0xff] }
 0x373   : > { %v2864_v52 = vmax.f32 %v2372_v27, 0.0  ;;  %v2375_v42 = vadd.f32 %v18097_v8, %v2374_v36  ;;  %v14887_v43 = vpop.f32.mrb[63].mxu0  ;;  %v4350_v55 = vpack.c.bf16 %v4313_v48, %v4312_v47  ;;  %4081 = vst [vmem:[#allocation4 + $0x126] sm:$0xff] %v4078_v34  ;;  %4082 = vst [vmem:[#allocation4 + $0x12e] sm:$0x3f] %v4079_v35  ;;  %v16627_v27 = vld [vmem:[%s17413_s17 + $0x370] sm:$0xff]  }
 0x375   : > { %3106 = vst [vmem:[#allocation2 + $0x4f0] sm:$0xff] %v2864_v52  ;;  %v2865_v56 = vmax.f32 %v2375_v42, 0.0  ;;  %14993 = vmatmul.mubr.msk.bf16.gmra.mrb[168].mxu0 %vm1334_vm3, %v16623_v45  ;;  %15101 = vmatmul.mubr.bf16.gmra.mrb[32].mxu1 %v4350_v55  ;;  %v16628_v55 = vld [vmem:[%s17413_s17 + $0x378] sm:$0xff]  }
 0x376   : > { %v18187_v49 = vld [vmem:[#allocation2 + $0x4e0] ss:$2 sm:$0xff]  ;;  %v18189_v50 = vld [vmem:[#allocation2 + $0x4e1] ss:$2 sm:$0xff]  ;;  %14996 = vmatprep.mubr.msk.bf16.mxu0 %vm17264_vm2, %v17994_v19 }
 0x377   : > { %v3751_v51 = vmax.f32 %v18187_v49, %v18189_v50  ;;  %3107 = vst [vmem:[#allocation2 + $0x4f8] sm:$0xff] %v2865_v56 }
 0x378   : > { %v2379_v60 = vpop.f32.mrb[64].mxu0 }
 0x379   : > { %v2380_v28 = vadd.f32 %v18097_v8, %v2379_v60  ;;  %v14890_v0 = vpop.f32.mrb[65].mxu0 }
 0x37a   : > { %v2382_v54 = vpop.f32.mrb[66].mxu0  ;;  %v4314_v41 = vld [vmem:[#allocation4 + $0x121] sm:$0xff]  ;;  %v4315_v4 = vld [vmem:[#allocation4 + $0x129] sm:$0xff] }
 0x37b   : > { %v2866_v1 = vmax.f32 %v2380_v28, 0.0  ;;  %v2383_v7 = vadd.f32 %v18097_v8, %v2382_v54  ;;  %v14891_v9 = vpop.f32.mrb[67].mxu0  ;;  %v4351_v57 = vpack.c.bf16 %v4315_v4, %v4314_v41 }
 0x37d   : > { %3108 = vst [vmem:[#allocation2 + $0x500] sm:$0xff] %v2866_v1  ;;  %v2867_v58 = vmax.f32 %v2383_v7, 0.0  ;;  %14997 = vmatmul.mubr.msk.bf16.gmra.mrb[172].mxu0 %vm1334_vm3, %v16624_v53  ;;  %15104 = vmatprep.mubr.bf16.mxu1 %v4351_v57  ;;  %v16629_v57 = vld [vmem:[%s17413_s17 + $0x380] sm:$0xff]  }
 0x37e   : > { %v3348_v59 = vld [vmem:[#allocation2 + $0x4f0] ss:$2 sm:$0xff]  ;;  %v3590_v61 = vld [vmem:[#allocation2 + $0x4f1] ss:$2 sm:$0xff]  ;;  %15000 = vmatprep.mubr.msk.bf16.mxu0 %vm17264_vm2, %v17994_v19 }
 0x37f   : > { %v3752_v62 = vmax.f32 %v3348_v59, %v3590_v61  ;;  %3109 = vst [vmem:[#allocation2 + $0x508] sm:$0xff] %v2867_v58 }
 0x380   : > { %v2387_v63 = vpop.f32.mrb[68].mxu0 }
 0x381   : > { %3873 = vst [vmem:[#allocation3 + $0x278] sm:$0xff] %v3752_v62  ;;  %v2388_v46 = vadd.f32 %v18097_v8, %v2387_v63  ;;  %v14894_v10 = vpop.f32.mrb[69].mxu0 }
 0x382   : > { %v2390_v18 = vpop.f32.mrb[70].mxu0 }
 0x383   : > { %v2868_v2 = vmax.f32 %v2388_v46, 0.0  ;;  %v2391_v3 = vadd.f32 %v18097_v8, %v2390_v18  ;;  %v14895_v6 = vpop.f32.mrb[71].mxu0 }
 0x385   : > { %3110 = vst [vmem:[#allocation2 + $0x510] sm:$0xff] %v2868_v2  ;;  %v2869_v14 = vmax.f32 %v2391_v3, 0.0  ;;  %15001 = vmatmul.mubr.msk.bf16.gmra.mrb[176].mxu0 %vm1334_vm3, %v16625_v17 }
 0x386   : > { %v3350_v20 = vld [vmem:[#allocation2 + $0x500] ss:$2 sm:$0xff]  ;;  %v3592_v19 = vld [vmem:[#allocation2 + $0x501] ss:$2 sm:$0xff]  ;;  %15004 = vmatprep.mubr.msk.bf16.mxu0 %vm17264_vm2, %v18205_v11 }
 0x387   : > { %v3753_v25 = vmax.f32 %v3350_v20, %v3592_v19  ;;  %3111 = vst [vmem:[#allocation2 + $0x518] sm:$0xff] %v2869_v14 }
 0x388   : > { %v2395_v30 = vpop.f32.mrb[72].mxu0  ;;  %v4085_v50 = vld [vmem:[#allocation3 + $0x278] sm:$0x3f] }
 0x389   : > { %3874 = vst [vmem:[#allocation3 + $0x280] sm:$0xff] %v3753_v25  ;;  %v2396_v31 = vadd.f32 %v18097_v8, %v2395_v30  ;;  %v14898_v5 = vpop.f32.mrb[73].mxu0  ;;  %v16630_v25 = vld [vmem:[%s17413_s17 + $0x388] sm:$0xff]  }
 0x38a   : > { %v2398_v13 = vpop.f32.mrb[74].mxu0 }
 0x38b   : > { %v2870_v32 = vmax.f32 %v2396_v31, 0.0  ;;  %v2399_v33 = vadd.f32 %v18097_v8, %v2398_v13  ;;  %v14899_v12 = vpop.f32.mrb[75].mxu0 }
 0x38d   : > { %3112 = vst [vmem:[#allocation2 + $0x520] sm:$0xff] %v2870_v32  ;;  %v2871_v16 = vmax.f32 %v2399_v33, 0.0  ;;  %15005 = vmatmul.mubr.msk.bf16.gmra.mrb[180].mxu0 %vm1334_vm3, %v16626_v21 }
 0x38e   : > { %v3352_v15 = vld [vmem:[#allocation2 + $0x510] ss:$2 sm:$0xff]  ;;  %v3594_v37 = vld [vmem:[#allocation2 + $0x511] ss:$2 sm:$0xff]  ;;  %15008 = vmatprep.mubr.msk.bf16.mxu0 %vm17264_vm2, %v18205_v11 }
 0x38f   : > { %v3754_v38 = vmax.f32 %v3352_v15, %v3594_v37  ;;  %3113 = vst [vmem:[#allocation2 + $0x528] sm:$0xff] %v2871_v16 }
 0x390   : > { %v2403_v39 = vpop.f32.mrb[76].mxu0  ;;  %v4086_v40 = vld [vmem:[#allocation3 + $0x27e] sm:$0xff] }
 0x391   : > { %3875 = vst [vmem:[#allocation3 + $0x288] sm:$0xff] %v3754_v38  ;;  %v2404_v44 = vadd.f32 %v18097_v8, %v2403_v39  ;;  %v14902_v26 = vpop.f32.mrb[77].mxu0  ;;  %v4089_v29 = vmax.f32 %v3750_v24, %v4086_v40  ;;  %v16631_v38 = vld [vmem:[%s17413_s17 + $0x390] sm:$0xff]  }
 0x392   : > { %v2406_v45 = vpop.f32.mrb[78].mxu0 }
 0x393   : > { %v2872_v34 = vmax.f32 %v2404_v44, 0.0  ;;  %v2407_v35 = vadd.f32 %v18097_v8, %v2406_v45  ;;  %v14903_v36 = vpop.f32.mrb[79].mxu0  ;;  %4092 = vst [vmem:[#allocation4 + $0x134] sm:$0xff] %v4089_v29 }
 0x395   : > { %3114 = vst [vmem:[#allocation2 + $0x530] sm:$0xff] %v2872_v34  ;;  %v2873_v47 = vmax.f32 %v2407_v35, 0.0  ;;  %15009 = vmatmul.mubr.msk.bf16.gmra.mrb[184].mxu0 %vm1334_vm3, %v16627_v27 }
 0x396   : > { %v3354_v48 = vld [vmem:[#allocation2 + $0x520] ss:$2 sm:$0xff]  ;;  %v3596_v52 = vld [vmem:[#allocation2 + $0x521] ss:$2 sm:$0xff]  ;;  %15012 = vmatprep.mubr.msk.bf16.mxu0 %vm17264_vm2, %v18205_v11 }
 0x397   : > { %v3755_v42 = vmax.f32 %v3354_v48, %v3596_v52  ;;  %3115 = vst [vmem:[#allocation2 + $0x538] sm:$0xff] %v2873_v47  ;;  %v16632_v48 = vld [vmem:[%s17413_s17 + $0x398] sm:$0xff]  }
 0x398   : > { %v2411_v22 = vpop.f32.mrb[80].mxu0  ;;  %v4087_v23 = vld [vmem:[#allocation3 + $0x286] sm:$0xff] }
 0x399   : > { %3876 = vst [vmem:[#allocation3 + $0x290] sm:$0xff] %v3755_v42  ;;  %v2412_v24 = vadd.f32 %v18097_v8, %v2411_v22  ;;  %v14906_v43 = vpop.f32.mrb[81].mxu0  ;;  %v4090_v56 = vmax.f32 %v3751_v51, %v4087_v23 }
 0x39a   : > { %v2414_v60 = vpop.f32.mrb[82].mxu0  ;;  %v4316_v61 = vld [vmem:[#allocation4 + $0x131] sm:$0xff] }
 0x39b   : > { %v2874_v28 = vmax.f32 %v2412_v24, 0.0  ;;  %v2415_v0 = vadd.f32 %v18097_v8, %v2414_v60  ;;  %v14907_v53 = vpop.f32.mrb[83].mxu0  ;;  %4093 = vst [vmem:[#allocation4 + $0x13c] sm:$0xff] %v4090_v56 }
 0x39d   : > { %3116 = vst [vmem:[#allocation2 + $0x540] sm:$0xff] %v2874_v28  ;;  %v2875_v54 = vmax.f32 %v2415_v0, 0.0  ;;  %15013 = vmatmul.mubr.msk.bf16.gmra.mrb[188].mxu0 %vm1334_vm3, %v16628_v55 }
 0x39e   : > { %v3356_v41 = vld [vmem:[#allocation2 + $0x530] ss:$2 sm:$0xff]  ;;  %v3598_v4 = vld [vmem:[#allocation2 + $0x531] ss:$2 sm:$0xff]  ;;  %15016 = vmatprep.mubr.msk.bf16.mxu0 %vm17264_vm2, %v18205_v11 }
 0x39f   : > { %v3756_v1 = vmax.f32 %v3356_v41, %v3598_v4  ;;  %3117 = vst [vmem:[#allocation2 + $0x548] sm:$0xff] %v2875_v54  ;;  %v16633_v41 = vld [vmem:[%s17413_s17 + $0x3a0] sm:$0xff]  }
 0x3a0   : > { %v2419_v49 = vpop.f32.mrb[84].mxu0  ;;  %v4088_v51 = vld [vmem:[#allocation3 + $0x28e] sm:$0x3f] }
 0x3a1   : > { %3877 = vst [vmem:[#allocation3 + $0x298] sm:$0xff] %v3756_v1  ;;  %v2420_v7 = vadd.f32 %v18097_v8, %v2419_v49  ;;  %v14910_v9 = vpop.f32.mrb[85].mxu0  ;;  %v4091_v58 = vmax.f32 %v4085_v50, %v4088_v51 }
 0x3a2   : > { %v2422_v59 = vpop.f32.mrb[86].mxu0  ;;  %v4317_v62 = vld [vmem:[#allocation4 + $0x139] sm:$0xff] }
 0x3a3   : > { %v2876_v63 = vmax.f32 %v2420_v7, 0.0  ;;  %v2423_v46 = vadd.f32 %v18097_v8, %v2422_v59  ;;  %v14911_v10 = vpop.f32.mrb[87].mxu0  ;;  %v4352_v17 = vpack.c.bf16 %v4317_v62, %v4316_v61  ;;  %4094 = vst [vmem:[#allocation4 + $0x144] sm:$0x3f] %v4091_v58 }
 0x3a5   : > { %3118 = vst [vmem:[#allocation2 + $0x550] sm:$0xff] %v2876_v63  ;;  %v2877_v18 = vmax.f32 %v2423_v46, 0.0  ;;  %15017 = vmatmul.mubr.msk.bf16.gmra.mrb[192].mxu0 %vm1334_vm3, %v16629_v57  ;;  %15105 = vmatmul.mubr.bf16.gmra.mrb[36].mxu1 %v4352_v17 }
 0x3a6   : > { %v3358_v2 = vld [vmem:[#allocation2 + $0x540] ss:$2 sm:$0xff]  ;;  %v3600_v3 = vld [vmem:[#allocation2 + $0x541] ss:$2 sm:$0xff]  ;;  %15020 = vmatprep.mubr.msk.bf16.mxu0 %vm17264_vm2, %v18205_v11 }
 0x3a7   : > { %v3757_v6 = vmax.f32 %v3358_v2, %v3600_v3  ;;  %3119 = vst [vmem:[#allocation2 + $0x558] sm:$0xff] %v2877_v18  ;;  %v16634_v18 = vld [vmem:[%s17413_s17 + $0x3a8] sm:$0xff]  }
 0x3a8   : > { %v2427_v14 = vpop.f32.mrb[88].mxu0  ;;  %v4095_v28 = vld [vmem:[#allocation3 + $0x294] sm:$0xff] }
 0x3a9   : > { %3878 = vst [vmem:[#allocation3 + $0x2a0] sm:$0xff] %v3757_v6  ;;  %v2428_v20 = vadd.f32 %v18097_v8, %v2427_v14  ;;  %v14914_v19 = vpop.f32.mrb[89].mxu0  ;;  %v16638_v6 = vld [vmem:[%s20354_s3] sm:$0xff]  }
 0x3aa   : > { %v2430_v30 = vpop.f32.mrb[90].mxu0  ;;  %15124 = vmatprep.subr.bf16.mxu1 %v16638_v6 }
 0x3ab   : > { %v2878_v31 = vmax.f32 %v2428_v20, 0.0  ;;  %v2431_v5 = vadd.f32 %v18097_v8, %v2430_v30  ;;  %v14915_v21 = vpop.f32.mrb[91].mxu0  ;;  %v4318_v20 = vld [vmem:[#allocation4 + $0x141] sm:$0xff]  ;;  %15125 = vmatpush3.bf16.msra.mxu1 %v16638_v6 }
 0x3ad   : > { %3120 = vst [vmem:[#allocation2 + $0x560] sm:$0xff] %v2878_v31  ;;  %v2879_v13 = vmax.f32 %v2431_v5, 0.0  ;;  %15021 = vmatmul.mubr.msk.bf16.gmra.mrb[196].mxu0 %vm1334_vm3, %v16630_v25 }
 0x3ae   : > { %v3360_v32 = vld [vmem:[#allocation2 + $0x550] ss:$2 sm:$0xff]  ;;  %v3602_v33 = vld [vmem:[#allocation2 + $0x551] ss:$2 sm:$0xff]  ;;  %15024 = vmatprep.mubr.msk.bf16.mxu0 %vm17264_vm2, %v18205_v11 }
 0x3af   : > { %v3758_v12 = vmax.f32 %v3360_v32, %v3602_v33  ;;  %3121 = vst [vmem:[#allocation2 + $0x568] sm:$0xff] %v2879_v13 }
 0x3b0   : > { %v2435_v16 = vpop.f32.mrb[92].mxu0  ;;  %v4096_v59 = vld [vmem:[#allocation3 + $0x29c] sm:$0xff] }
 0x3b1   : > { %3879 = vst [vmem:[#allocation3 + $0x2a8] sm:$0xff] %v3758_v12  ;;  %v2436_v15 = vadd.f32 %v18097_v8, %v2435_v16  ;;  %v14918_v37 = vpop.f32.mrb[93].mxu0 }
 0x3b2   : > { %v2438_v39 = vpop.f32.mrb[94].mxu0  ;;  %v16635_v37 = vld [vmem:[%s17413_s17 + $0x3b0] sm:$0xff]  }
 0x3b3   : > { %v2880_v40 = vmax.f32 %v2436_v15, 0.0  ;;  %v2439_v44 = vadd.f32 %v18097_v8, %v2438_v39  ;;  %v14919_v26 = vpop.f32.mrb[95].mxu0 }
 0x3b5   : > { %3122 = vst [vmem:[#allocation2 + $0x570] sm:$0xff] %v2880_v40  ;;  %v2881_v27 = vmax.f32 %v2439_v44, 0.0  ;;  %15025 = vmatmul.mubr.msk.bf16.gmra.mrb[200].mxu0 %vm1334_vm3, %v16631_v38 }
 0x3b6   : > { %v3362_v29 = vld [vmem:[#allocation2 + $0x560] ss:$2 sm:$0xff]  ;;  %v3604_v45 = vld [vmem:[#allocation2 + $0x561] ss:$2 sm:$0xff]  ;;  %15028 = vmatprep.mubr.msk.bf16.mxu0 %vm17264_vm2, %v18205_v11 }
 0x3b7   : > { %v3759_v34 = vmax.f32 %v3362_v29, %v3604_v45  ;;  %3123 = vst [vmem:[#allocation2 + $0x578] sm:$0xff] %v2881_v27 }
 0x3b8   : > { %v2443_v35 = vpop.f32.mrb[96].mxu0  ;;  %v4097_v62 = vld [vmem:[#allocation3 + $0x2a4] sm:$0x3f] }
 0x3b9   : > { %3880 = vst [vmem:[#allocation3 + $0x2b0] sm:$0xff] %v3759_v34  ;;  %v2444_v36 = vadd.f32 %v18097_v8, %v2443_v35  ;;  %v14922_v47 = vpop.f32.mrb[97].mxu0 }
 0x3ba   : > { %v2446_v52 = vpop.f32.mrb[98].mxu0  ;;  %v16636_v47 = vld [vmem:[%s17413_s17 + $0x3b8] sm:$0xff]  }
 0x3bb   : > { %v2882_v42 = vmax.f32 %v2444_v36, 0.0  ;;  %v2447_v22 = vadd.f32 %v18097_v8, %v2446_v52  ;;  %v14923_v23 = vpop.f32.mrb[99].mxu0 }
 0x3bd   : > { %3124 = vst [vmem:[#allocation2 + $0x580] sm:$0xff] %v2882_v42  ;;  %v2883_v24 = vmax.f32 %v2447_v22, 0.0  ;;  %15029 = vmatmul.mubr.msk.bf16.gmra.mrb[204].mxu0 %vm1334_vm3, %v16632_v48  ;;  %v16639_v48 = vld [vmem:[%s20354_s3 + $0x8] sm:$0xff]  }
 0x3be   : > { %v3364_v43 = vld [vmem:[#allocation2 + $0x570] ss:$2 sm:$0xff]  ;;  %v3606_v55 = vld [vmem:[#allocation2 + $0x571] ss:$2 sm:$0xff]  ;;  %15032 = vmatprep.mubr.msk.bf16.mxu0 %vm17264_vm2, %v18205_v11  ;;  %15126 = vmatprep.subr.bf16.mxu1 %v16639_v48 }
 0x3bf   : > { %v3760_v56 = vmax.f32 %v3364_v43, %v3606_v55  ;;  %3125 = vst [vmem:[#allocation2 + $0x588] sm:$0xff] %v2883_v24  ;;  %15127 = vmatpush3.bf16.msra.mxu1 %v16639_v48 }
 0x3c0   : > { %v2451_v60 = vpop.f32.mrb[100].mxu0  ;;  %v4098_v0 = vld [vmem:[#allocation3 + $0x2aa] sm:$0xff] }
 0x3c1   : > { %3881 = vst [vmem:[#allocation3 + $0x2b8] sm:$0xff] %v3760_v56  ;;  %v2452_v53 = vadd.f32 %v18097_v8, %v2451_v60  ;;  %v14926_v54 = vpop.f32.mrb[101].mxu0  ;;  %v4101_v4 = vmax.f32 %v4095_v28, %v4098_v0 }
 0x3c2   : > { %v2454_v1 = vpop.f32.mrb[102].mxu0  ;;  %v16640_v54 = vld [vmem:[%s20354_s3 + $0x10] sm:$0xff]  }
 0x3c3   : > { %v2884_v49 = vmax.f32 %v2452_v53, 0.0  ;;  %v2455_v50 = vadd.f32 %v18097_v8, %v2454_v1  ;;  %v14927_v51 = vpop.f32.mrb[103].mxu0  ;;  %4104 = vst [vmem:[#allocation4 + $0x14a] sm:$0xff] %v4101_v4  ;;  %v16637_v53 = vld [vmem:[%s17413_s17 + $0x3c0] sm:$0xff]   ;;  %15128 = vmatprep.subr.bf16.mxu1 %v16640_v54  ;;  %s12715_s17 = scalar_lea.sflag [#allocation12], %s431_s24 }
 0x3c4   : > { %15129 = vmatpush3.bf16.msra.mxu1 %v16640_v54 }
 0x3c5   : > { %3126 = vst [vmem:[#allocation2 + $0x590] sm:$0xff] %v2884_v49  ;;  %v2885_v7 = vmax.f32 %v2455_v50, 0.0  ;;  %15033 = vmatmul.mubr.msk.bf16.gmra.mrb[208].mxu0 %vm1334_vm3, %v16633_v41 }
 0x3c6   : > { %v18261_v9 = vld [vmem:[#allocation2 + $0x580] ss:$2 sm:$0xff]  ;;  %v18263_v57 = vld [vmem:[#allocation2 + $0x581] ss:$2 sm:$0xff]  ;;  %15036 = vmatprep.mubr.msk.bf16.mxu0 %vm17264_vm2, %v18205_v11 }
 0x3c7   : > { %v3761_v58 = vmax.f32 %v18261_v9, %v18263_v57  ;;  %3127 = vst [vmem:[#allocation2 + $0x598] sm:$0xff] %v2885_v7  ;;  %v16641_v57 = vld [vmem:[%s20354_s3 + $0x18] sm:$0xff]  }
 0x3c8   : > { %v2459_v61 = vpop.f32.mrb[104].mxu0  ;;  %v4099_v63 = vld [vmem:[#allocation3 + $0x2b2] sm:$0xff]  ;;  %v4100_v46 = vld [vmem:[#allocation3 + $0x2ba] sm:$0x3f]  ;;  %15130 = vmatprep.subr.bf16.mxu1 %v16641_v57 }
 0x3c9   : > { %v2460_v10 = vadd.f32 %v18097_v8, %v2459_v61  ;;  %v14930_v17 = vpop.f32.mrb[105].mxu0  ;;  %v4102_v2 = vmax.f32 %v4096_v59, %v4099_v63  ;;  %v4103_v3 = vmax.f32 %v4097_v62, %v4100_v46  ;;  %15131 = vmatpush3.bf16.msra.mxu1 %v16641_v57 }
 0x3ca   : > { %v2462_v14 = vpop.f32.mrb[106].mxu0  ;;  %v4319_v19 = vld [vmem:[#allocation4 + $0x149] sm:$0xff] }
 0x3cb   : > { %v2886_v25 = vmax.f32 %v2460_v10, 0.0  ;;  %v2463_v30 = vadd.f32 %v18097_v8, %v2462_v14  ;;  %v14931_v31 = vpop.f32.mrb[107].mxu0  ;;  %v4353_v5 = vpack.c.bf16 %v4319_v19, %v4318_v20  ;;  %4105 = vst [vmem:[#allocation4 + $0x152] sm:$0xff] %v4102_v2  ;;  %4106 = vst [vmem:[#allocation4 + $0x15a] sm:$0x3f] %v4103_v3 }
 0x3cd   : > { %3128 = vst [vmem:[#allocation2 + $0x5a0] sm:$0xff] %v2886_v25  ;;  %v2887_v21 = vmax.f32 %v2463_v30, 0.0  ;;  %15037 = vmatmul.mubr.msk.bf16.gmra.mrb[212].mxu0 %vm1334_vm3, %v16634_v18  ;;  %15108 = vmatprep.mubr.bf16.mxu1 %v4353_v5 }
 0x3ce   : > { %v18276_v13 = vld [vmem:[#allocation2 + $0x590] ss:$2 sm:$0xff]  ;;  %v18278_v32 = vld [vmem:[#allocation2 + $0x591] ss:$2 sm:$0xff]  ;;  %15040 = vmatprep.mubr.msk.bf16.mxu0 %vm17264_vm2, %v18205_v11 }
 0x3cf   : > { %v3762_v33 = vmax.f32 %v18276_v13, %v18278_v32  ;;  %3129 = vst [vmem:[#allocation2 + $0x5a8] sm:$0xff] %v2887_v21 }
 0x3d0   : > { %v2467_v12 = vpop.f32.mrb[108].mxu0 }
 0x3d1   : > { %v2468_v16 = vadd.f32 %v18097_v8, %v2467_v12  ;;  %v14934_v15 = vpop.f32.mrb[109].mxu0 }
 0x3d2   : > { %v2470_v38 = vpop.f32.mrb[110].mxu0  ;;  %v4320_v5 = vld [vmem:[#allocation4 + $0x151] sm:$0xff] }
 0x3d3   : > { %v2888_v39 = vmax.f32 %v2468_v16, 0.0  ;;  %v2471_v40 = vadd.f32 %v18097_v8, %v2470_v38  ;;  %v14935_v44 = vpop.f32.mrb[111].mxu0 }
 0x3d5   : > { %3130 = vst [vmem:[#allocation2 + $0x5b0] sm:$0xff] %v2888_v39  ;;  %v2889_v26 = vmax.f32 %v2471_v40, 0.0  ;;  %15041 = vmatmul.mubr.msk.bf16.gmra.mrb[216].mxu0 %vm1334_vm3, %v16635_v37 }
 0x3d6   : > { %v3370_v27 = vld [vmem:[#allocation2 + $0x5a0] ss:$2 sm:$0xff]  ;;  %v3612_v29 = vld [vmem:[#allocation2 + $0x5a1] ss:$2 sm:$0xff]  ;;  %15044 = vmatprep.mubr.msk.bf16.mxu0 %vm17264_vm2, %v18205_v11 }
 0x3d7   : > { %v3763_v45 = vmax.f32 %v3370_v27, %v3612_v29  ;;  %3131 = vst [vmem:[#allocation2 + $0x5b8] sm:$0xff] %v2889_v26 }
 0x3d8   : > { %v2475_v34 = vpop.f32.mrb[112].mxu0 }
 0x3d9   : > { %3884 = vst [vmem:[#allocation3 + $0x2d0] sm:$0xff] %v3763_v45  ;;  %v2476_v35 = vadd.f32 %v18097_v8, %v2475_v34  ;;  %v14938_v36 = vpop.f32.mrb[113].mxu0 }
 0x3da   : > { %v2478_v52 = vpop.f32.mrb[114].mxu0 }
 0x3db   : > { %v2890_v42 = vmax.f32 %v2476_v35, 0.0  ;;  %v2479_v22 = vadd.f32 %v18097_v8, %v2478_v52  ;;  %v14939_v23 = vpop.f32.mrb[115].mxu0 }
 0x3dd   : > { %3132 = vst [vmem:[#allocation2 + $0x5c0] sm:$0xff] %v2890_v42  ;;  %v2891_v24 = vmax.f32 %v2479_v22, 0.0  ;;  %15045 = vmatmul.mubr.msk.bf16.gmra.mrb[220].mxu0 %vm1334_vm3, %v16636_v47 }
 0x3de   : > { %v3372_v43 = vld [vmem:[#allocation2 + $0x5b0] ss:$2 sm:$0xff]  ;;  %v3614_v55 = vld [vmem:[#allocation2 + $0x5b1] ss:$2 sm:$0xff]  ;;  %15048 = vmatprep.mubr.msk.bf16.mxu0 %vm17264_vm2, %v18205_v11 }
 0x3df   : > { %v3764_v56 = vmax.f32 %v3372_v43, %v3614_v55  ;;  %3133 = vst [vmem:[#allocation2 + $0x5c8] sm:$0xff] %v2891_v24  ;;  %v16642_v43 = vld [vmem:[%s20354_s3 + $0x20] sm:$0xff]  }
 0x3e0   : > { %v2483_v60 = vpop.f32.mrb[116].mxu0  ;;  %v4109_v40 = vld [vmem:[#allocation3 + $0x2d0] sm:$0x3f]  ;;  %15132 = vmatprep.subr.bf16.mxu1 %v16642_v43 }
 0x3e1   : > { %3885 = vst [vmem:[#allocation3 + $0x2d8] sm:$0xff] %v3764_v56  ;;  %v2484_v28 = vadd.f32 %v18097_v8, %v2483_v60  ;;  %v14942_v0 = vpop.f32.mrb[117].mxu0  ;;  %15133 = vmatpush3.bf16.msra.mxu1 %v16642_v43 }
 0x3e2   : > { %v2486_v41 = vpop.f32.mrb[118].mxu0 }
 0x3e3   : > { %v2892_v4 = vmax.f32 %v2484_v28, 0.0  ;;  %v2487_v1 = vadd.f32 %v18097_v8, %v2486_v41  ;;  %v14943_v49 = vpop.f32.mrb[119].mxu0  ;;  %v18311_v8 = vld [vmem:[%s20353_s2] ss:$0 sm:$0xff] }
 0x3e5   : > { %3134 = vst [vmem:[#allocation2 + $0x5d0] sm:$0xff] %v2892_v4  ;;  %v2893_v50 = vmax.f32 %v2487_v1, 0.0  ;;  %15049 = vmatmul.mubr.msk.bf16.gmra.mrb[224].mxu0 %vm1334_vm3, %v16637_v53 }
 0x3e6   : > { %v3374_v51 = vld [vmem:[#allocation2 + $0x5c0] ss:$2 sm:$0xff]  ;;  %v3616_v7 = vld [vmem:[#allocation2 + $0x5c1] ss:$2 sm:$0xff]  ;;  %15716 = vmatprep.mubr.msk.bf16.mxu0 %vm17264_vm2, %v18205_v11 }
 0x3e7   : > { %v3765_v59 = vmax.f32 %v3374_v51, %v3616_v7  ;;  %3135 = vst [vmem:[#allocation2 + $0x5d8] sm:$0xff] %v2893_v50 }
 0x3e8   : > { %v2491_v61 = vpop.f32.mrb[120].mxu0  ;;  %v4110_v62 = vld [vmem:[#allocation3 + $0x2d6] sm:$0xff] }
 0x3e9   : > { %3886 = vst [vmem:[#allocation3 + $0x2e0] sm:$0xff] %v3765_v59  ;;  %v2492_v63 = vadd.f32 %v18311_v8, %v2491_v61  ;;  %v14946_v46 = vpop.f32.mrb[121].mxu0  ;;  %v4113_v10 = vmax.f32 %v3761_v58, %v4110_v62 }
 0x3ea   : > { %v2494_v17 = vpop.f32.mrb[122].mxu0 }
 0x3eb   : > { %v2894_v18 = vmax.f32 %v2492_v63, 0.0  ;;  %v2495_v11 = vadd.f32 %v18311_v8, %v2494_v17  ;;  %v14947_v2 = vpop.f32.mrb[123].mxu0  ;;  %4116 = vst [vmem:[#allocation4 + $0x160] sm:$0xff] %v4113_v10 }
 0x3ed   : > { %3136 = vst [vmem:[#allocation2 + $0x5e0] sm:$0xff] %v2894_v18  ;;  %v2895_v3 = vmax.f32 %v2495_v11, 0.0 }
 0x3ee   : > { %v3376_v6 = vld [vmem:[#allocation2 + $0x5d0] ss:$2 sm:$0xff]  ;;  %v3618_v14 = vld [vmem:[#allocation2 + $0x5d1] ss:$2 sm:$0xff] }
 0x3ef   : > { %v3766_v20 = vmax.f32 %v3376_v6, %v3618_v14  ;;  %3137 = vst [vmem:[#allocation2 + $0x5e8] sm:$0xff] %v2895_v3  ;;  %v16643_v6 = vld [vmem:[%s20354_s3 + $0x28] sm:$0xff]  }
 0x3f0   : > { %v2499_v19 = vpop.f32.mrb[124].mxu0  ;;  %v4111_v25 = vld [vmem:[#allocation3 + $0x2de] sm:$0xff]  ;;  %15134 = vmatprep.subr.bf16.mxu1 %v16643_v6 }
 0x3f1   : > { %3887 = vst [vmem:[#allocation3 + $0x2e8] sm:$0xff] %v3766_v20  ;;  %v2500_v30 = vadd.f32 %v18311_v8, %v2499_v19  ;;  %v14950_v31 = vpop.f32.mrb[125].mxu0  ;;  %v4114_v9 = vmax.f32 %v3762_v33, %v4111_v25  ;;  %15135 = vmatpush3.bf16.msra.mxu1 %v16643_v6 }
 0x3f2   : > { %v2502_v58 = vpop.f32.mrb[126].mxu0  ;;  %v4321_v21 = vld [vmem:[#allocation4 + $0x159] sm:$0xff] }
 0x3f3   : > { %v2896_v12 = vmax.f32 %v2500_v30, 0.0  ;;  %v2503_v16 = vadd.f32 %v18311_v8, %v2502_v58  ;;  %v14951_v15 = vpop.f32.mrb[127].mxu0  ;;  %v4354_v37 = vpack.c.bf16 %v4321_v21, %v4320_v5  ;;  %4117 = vst [vmem:[#allocation4 + $0x168] sm:$0xff] %v4114_v9 }
 0x3f5   : > { %3138 = vst [vmem:[#allocation2 + $0x5f0] sm:$0xff] %v2896_v12  ;;  %v2897_v38 = vmax.f32 %v2503_v16, 0.0  ;;  %15109 = vmatmul.mubr.bf16.gmra.mrb[40].mxu1 %v4354_v37  ;;  %v16644_v37 = vld [vmem:[%s20354_s3 + $0x30] sm:$0xff]  }
 0x3f6   : > { %v3378_v13 = vld [vmem:[#allocation2 + $0x5e0] ss:$2 sm:$0xff]  ;;  %v3620_v32 = vld [vmem:[#allocation2 + $0x5e1] ss:$2 sm:$0xff]  ;;  %15136 = vmatprep.subr.bf16.mxu1 %v16644_v37 }
 0x3f7   : > { %v3767_v33 = vmax.f32 %v3378_v13, %v3620_v32  ;;  %3139 = vst [vmem:[#allocation2 + $0x5f8] sm:$0xff] %v2897_v38  ;;  %15137 = vmatpush3.bf16.msra.mxu1 %v16644_v37 }
 0x3f8   : > { %v2507_v39 = vpop.f32.mrb[128].mxu0  ;;  %v4112_v44 = vld [vmem:[#allocation3 + $0x2e6] sm:$0x3f] }
 0x3f9   : > { %3888 = vst [vmem:[#allocation3 + $0x2f0] sm:$0xff] %v3767_v33  ;;  %v2508_v26 = vadd.f32 %v18311_v8, %v2507_v39  ;;  %v14954_v27 = vpop.f32.mrb[129].mxu0  ;;  %v4115_v29 = vmax.f32 %v4109_v40, %v4112_v44 }
 0x3fa   : > { %v2510_v45 = vpop.f32.mrb[130].mxu0  ;;  %v4322_v56 = vld [vmem:[#allocation4 + $0x161] sm:$0xff] }
 0x3fb   : > { %v2898_v34 = vmax.f32 %v2508_v26, 0.0  ;;  %v2511_v35 = vadd.f32 %v18311_v8, %v2510_v45  ;;  %v14955_v36 = vpop.f32.mrb[131].mxu0  ;;  %4118 = vst [vmem:[#allocation4 + $0x170] sm:$0x3f] %v4115_v29 }
 0x3fd   : > { %3140 = vst [vmem:[#allocation2 + $0x600] sm:$0xff] %v2898_v34  ;;  %v2899_v47 = vmax.f32 %v2511_v35, 0.0 }
 0x3fe   : > { %v3380_v48 = vld [vmem:[#allocation2 + $0x5f0] ss:$2 sm:$0xff]  ;;  %v3622_v52 = vld [vmem:[#allocation2 + $0x5f1] ss:$2 sm:$0xff] }
 0x3ff   : > { %v3768_v42 = vmax.f32 %v3380_v48, %v3622_v52  ;;  %3141 = vst [vmem:[#allocation2 + $0x608] sm:$0xff] %v2899_v47 }
 0x400   : > { %v2515_v22 = vpop.f32.mrb[132].mxu0  ;;  %v4119_v5 = vld [vmem:[#allocation3 + $0x2ec] sm:$0xff] }
 0x401   : > { %3889 = vst [vmem:[#allocation3 + $0x2f8] sm:$0xff] %v3768_v42  ;;  %v2516_v23 = vadd.f32 %v18311_v8, %v2515_v22  ;;  %v14958_v24 = vpop.f32.mrb[133].mxu0  ;;  %v16645_v42 = vld [vmem:[%s20354_s3 + $0x38] sm:$0xff]  }
 0x402   : > { %v2518_v55 = vpop.f32.mrb[134].mxu0  ;;  %v4323_v60 = vld [vmem:[#allocation4 + $0x169] sm:$0xff]  ;;  %15138 = vmatprep.subr.bf16.mxu1 %v16645_v42 }
 0x403   : > { %v2900_v28 = vmax.f32 %v2516_v23, 0.0  ;;  %v2519_v0 = vadd.f32 %v18311_v8, %v2518_v55  ;;  %v14959_v53 = vpop.f32.mrb[135].mxu0  ;;  %v4355_v54 = vpack.c.bf16 %v4323_v60, %v4322_v56  ;;  %15139 = vmatpush3.bf16.msra.mxu1 %v16645_v42 }
 0x405   : > { %3142 = vst [vmem:[#allocation2 + $0x610] sm:$0xff] %v2900_v28  ;;  %v2901_v41 = vmax.f32 %v2519_v0, 0.0  ;;  %15112 = vmatprep.mubr.bf16.mxu1 %v4355_v54 }
 0x406   : > { %v3382_v4 = vld [vmem:[#allocation2 + $0x600] ss:$2 sm:$0xff]  ;;  %v3624_v1 = vld [vmem:[#allocation2 + $0x601] ss:$2 sm:$0xff] }
 0x407   : > { %v3769_v49 = vmax.f32 %v3382_v4, %v3624_v1  ;;  %3143 = vst [vmem:[#allocation2 + $0x618] sm:$0xff] %v2901_v41 }
 0x408   : > { %v2523_v50 = vpop.f32.mrb[136].mxu0  ;;  %v4120_v27 = vld [vmem:[#allocation3 + $0x2f4] sm:$0xff] }
 0x409   : > { %3890 = vst [vmem:[#allocation3 + $0x300] sm:$0xff] %v3769_v49  ;;  %v2524_v51 = vadd.f32 %v18311_v8, %v2523_v50  ;;  %v14962_v7 = vpop.f32.mrb[137].mxu0 }
 0x40a   : > { %v2526_v59 = vpop.f32.mrb[138].mxu0 }
 0x40b   : > { %v2902_v61 = vmax.f32 %v2524_v51, 0.0  ;;  %v2527_v62 = vadd.f32 %v18311_v8, %v2526_v59  ;;  %v14963_v63 = vpop.f32.mrb[139].mxu0 }
 0x40d   : > { %3144 = vst [vmem:[#allocation2 + $0x620] sm:$0xff] %v2902_v61  ;;  %v2903_v46 = vmax.f32 %v2527_v62, 0.0 }
 0x40e   : > { %v3384_v10 = vld [vmem:[#allocation2 + $0x610] ss:$2 sm:$0xff]  ;;  %v3626_v17 = vld [vmem:[#allocation2 + $0x611] ss:$2 sm:$0xff] }
 0x40f   : > { %v3770_v18 = vmax.f32 %v3384_v10, %v3626_v17  ;;  %3145 = vst [vmem:[#allocation2 + $0x628] sm:$0xff] %v2903_v46 }
 0x410   : > { %v2531_v11 = vpop.f32.mrb[140].mxu0  ;;  %v4121_v34 = vld [vmem:[#allocation3 + $0x2fc] sm:$0x3f] }
 0x411   : > { %3891 = vst [vmem:[#allocation3 + $0x308] sm:$0xff] %v3770_v18  ;;  %v2532_v2 = vadd.f32 %v18311_v8, %v2531_v11  ;;  %v14966_v3 = vpop.f32.mrb[141].mxu0  ;;  %v18368_v18 = vld [vmem:[%s20354_s3 + $0x80] sm:$0xff]  }
 0x412   : > { %v2534_v14 = vpop.f32.mrb[142].mxu0  ;;  %15196 = vmatprep.subr.bf16.mxu1 %v18368_v18 }
 0x413   : > { %v2904_v20 = vmax.f32 %v2532_v2, 0.0  ;;  %v2535_v19 = vadd.f32 %v18311_v8, %v2534_v14  ;;  %v14967_v25 = vpop.f32.mrb[143].mxu0 }
 0x415   : > { %3146 = vst [vmem:[#allocation2 + $0x630] sm:$0xff] %v2904_v20  ;;  %v2905_v30 = vmax.f32 %v2535_v19, 0.0 }
 0x416   : > { %v3386_v31 = vld [vmem:[#allocation2 + $0x620] ss:$2 sm:$0xff]  ;;  %v3628_v9 = vld [vmem:[#allocation2 + $0x621] ss:$2 sm:$0xff] }
 0x417   : > { %v3771_v57 = vmax.f32 %v3386_v31, %v3628_v9  ;;  %3147 = vst [vmem:[#allocation2 + $0x638] sm:$0xff] %v2905_v30 }
 0x418   : > { %v2539_v58 = vpop.f32.mrb[144].mxu0  ;;  %v4122_v21 = vld [vmem:[#allocation3 + $0x302] sm:$0xff] }
 0x419   : > { %3892 = vst [vmem:[#allocation3 + $0x310] sm:$0xff] %v3771_v57  ;;  %v2540_v12 = vadd.f32 %v18311_v8, %v2539_v58  ;;  %v14970_v16 = vpop.f32.mrb[145].mxu0  ;;  %v4125_v15 = vmax.f32 %v4119_v5, %v4122_v21 }
 0x41a   : > { %v2542_v38 = vpop.f32.mrb[146].mxu0 }
 0x41b   : > { %v2906_v13 = vmax.f32 %v2540_v12, 0.0  ;;  %v2543_v32 = vadd.f32 %v18311_v8, %v2542_v38  ;;  %v14971_v33 = vpop.f32.mrb[147].mxu0  ;;  %4128 = vst [vmem:[#allocation4 + $0x176] sm:$0xff] %v4125_v15 }
 0x41d   : > { %3148 = vst [vmem:[#allocation2 + $0x640] sm:$0xff] %v2906_v13  ;;  %v2907_v39 = vmax.f32 %v2543_v32, 0.0 }
 0x41e   : > { %v18345_v40 = vld [vmem:[#allocation2 + $0x630] ss:$2 sm:$0xff]  ;;  %v18347_v44 = vld [vmem:[#allocation2 + $0x631] ss:$2 sm:$0xff] }
 0x41f   : > { %v3772_v26 = vmax.f32 %v18345_v40, %v18347_v44  ;;  %3149 = vst [vmem:[#allocation2 + $0x648] sm:$0xff] %v2907_v39 }
 0x420   : > { %v2547_v29 = vpop.f32.mrb[148].mxu0  ;;  %v4123_v45 = vld [vmem:[#allocation3 + $0x30a] sm:$0xff]  ;;  %v4124_v35 = vld [vmem:[#allocation3 + $0x312] sm:$0x3f] }
 0x421   : > { %v2548_v36 = vadd.f32 %v18311_v8, %v2547_v29  ;;  %v14974_v47 = vpop.f32.mrb[149].mxu0  ;;  %v4126_v48 = vmax.f32 %v4120_v27, %v4123_v45  ;;  %v4127_v52 = vmax.f32 %v4121_v34, %v4124_v35 }
 0x422   : > { %v2550_v22 = vpop.f32.mrb[150].mxu0  ;;  %v4324_v4 = vld [vmem:[#allocation4 + $0x171] sm:$0xff] }
 0x423   : > { %v2908_v23 = vmax.f32 %v2548_v36, 0.0  ;;  %v2551_v24 = vadd.f32 %v18311_v8, %v2550_v22  ;;  %v14975_v43 = vpop.f32.mrb[151].mxu0  ;;  %4129 = vst [vmem:[#allocation4 + $0x17e] sm:$0xff] %v4126_v48  ;;  %4130 = vst [vmem:[#allocation4 + $0x186] sm:$0x3f] %v4127_v52 }
 0x425   : > { %3150 = vst [vmem:[#allocation2 + $0x650] sm:$0xff] %v2908_v23  ;;  %v2909_v55 = vmax.f32 %v2551_v24, 0.0 }
 0x426   : > { %v18356_v56 = vld [vmem:[#allocation2 + $0x640] ss:$2 sm:$0xff]  ;;  %v18358_v60 = vld [vmem:[#allocation2 + $0x641] ss:$2 sm:$0xff] }
 0x427   : > { %v3773_v28 = vmax.f32 %v18356_v56, %v18358_v60  ;;  %3151 = vst [vmem:[#allocation2 + $0x658] sm:$0xff] %v2909_v55 }
 0x428   : > { %v2555_v0 = vpop.f32.mrb[152].mxu0 }
 0x429   : > { %v2556_v53 = vadd.f32 %v18311_v8, %v2555_v0  ;;  %v14978_v54 = vpop.f32.mrb[153].mxu0 }
 0x42a   : > { %v2558_v41 = vpop.f32.mrb[154].mxu0  ;;  %v4325_v1 = vld [vmem:[#allocation4 + $0x179] sm:$0xff] }
 0x42b   : > { %v2910_v49 = vmax.f32 %v2556_v53, 0.0  ;;  %v2559_v50 = vadd.f32 %v18311_v8, %v2558_v41  ;;  %v14979_v51 = vpop.f32.mrb[155].mxu0  ;;  %v4356_v7 = vpack.c.bf16 %v4325_v1, %v4324_v4 }
 0x42d   : > { %3152 = vst [vmem:[#allocation2 + $0x660] sm:$0xff] %v2910_v49  ;;  %v2911_v59 = vmax.f32 %v2559_v50, 0.0  ;;  %15113 = vmatmul.mubr.bf16.gmra.mrb[44].mxu1 %v4356_v7 }
 0x42e   : > { %v3392_v61 = vld [vmem:[#allocation2 + $0x650] ss:$2 sm:$0xff]  ;;  %v3634_v62 = vld [vmem:[#allocation2 + $0x651] ss:$2 sm:$0xff] }
 0x42f   : > { %v3774_v63 = vmax.f32 %v3392_v61, %v3634_v62  ;;  %3153 = vst [vmem:[#allocation2 + $0x668] sm:$0xff] %v2911_v59 }
 0x430   : > { %v2563_v46 = vpop.f32.mrb[156].mxu0 }
 0x431   : > { %3895 = vst [vmem:[#allocation3 + $0x328] sm:$0xff] %v3774_v63  ;;  %v2564_v10 = vadd.f32 %v18311_v8, %v2563_v46  ;;  %v14982_v17 = vpop.f32.mrb[157].mxu0 }
 0x432   : > { %v2566_v11 = vpop.f32.mrb[158].mxu0 }
 0x433   : > { %v2912_v2 = vmax.f32 %v2564_v10, 0.0  ;;  %v2567_v3 = vadd.f32 %v18311_v8, %v2566_v11  ;;  %v14983_v6 = vpop.f32.mrb[159].mxu0 }
 0x435   : > { %3154 = vst [vmem:[#allocation2 + $0x670] sm:$0xff] %v2912_v2  ;;  %v2913_v14 = vmax.f32 %v2567_v3, 0.0 }
 0x436   : > { %v3394_v20 = vld [vmem:[#allocation2 + $0x660] ss:$2 sm:$0xff]  ;;  %v3636_v19 = vld [vmem:[#allocation2 + $0x661] ss:$2 sm:$0xff] }
 0x437   : > { %v3775_v25 = vmax.f32 %v3394_v20, %v3636_v19  ;;  %3155 = vst [vmem:[#allocation2 + $0x678] sm:$0xff] %v2913_v14 }
 0x438   : > { %v2571_v30 = vpop.f32.mrb[160].mxu0  ;;  %v4133_v50 = vld [vmem:[#allocation3 + $0x328] sm:$0x3f] }
 0x439   : > { %3896 = vst [vmem:[#allocation3 + $0x330] sm:$0xff] %v3775_v25  ;;  %v2572_v31 = vadd.f32 %v18311_v8, %v2571_v30  ;;  %v14986_v9 = vpop.f32.mrb[161].mxu0 }
 0x43a   : > { %v2574_v57 = vpop.f32.mrb[162].mxu0 }
 0x43b   : > { %v2914_v58 = vmax.f32 %v2572_v31, 0.0  ;;  %v2575_v5 = vadd.f32 %v18311_v8, %v2574_v57  ;;  %v14987_v21 = vpop.f32.mrb[163].mxu0 }
 0x43d   : > { %3156 = vst [vmem:[#allocation2 + $0x680] sm:$0xff] %v2914_v58  ;;  %v2915_v12 = vmax.f32 %v2575_v5, 0.0 }
 0x43e   : > { %v3396_v16 = vld [vmem:[#allocation2 + $0x670] ss:$2 sm:$0xff]  ;;  %v3638_v15 = vld [vmem:[#allocation2 + $0x671] ss:$2 sm:$0xff] }
 0x43f   : > { %v3776_v37 = vmax.f32 %v3396_v16, %v3638_v15  ;;  %3157 = vst [vmem:[#allocation2 + $0x688] sm:$0xff] %v2915_v12 }
 0x440   : > { %v2579_v38 = vpop.f32.mrb[164].mxu0  ;;  %v4134_v13 = vld [vmem:[#allocation3 + $0x32e] sm:$0xff] }
 0x441   : > { %3897 = vst [vmem:[#allocation3 + $0x338] sm:$0xff] %v3776_v37  ;;  %v2580_v32 = vadd.f32 %v18311_v8, %v2579_v38  ;;  %v14990_v33 = vpop.f32.mrb[165].mxu0  ;;  %v4137_v39 = vmax.f32 %v3772_v26, %v4134_v13  ;;  %v4326_v26 = vld [vmem:[#allocation4 + $0x181] sm:$0xff] }
 0x442   : > { %v2582_v27 = vpop.f32.mrb[166].mxu0 }
 0x443   : > { %v2916_v29 = vmax.f32 %v2580_v32, 0.0  ;;  %v2583_v45 = vadd.f32 %v18311_v8, %v2582_v27  ;;  %v14991_v34 = vpop.f32.mrb[167].mxu0  ;;  %4140 = vst [vmem:[#allocation4 + $0x18c] sm:$0xff] %v4137_v39 }
 0x445   : > { %3158 = vst [vmem:[#allocation2 + $0x690] sm:$0xff] %v2916_v29  ;;  %v2917_v35 = vmax.f32 %v2583_v45, 0.0 }
 0x446   : > { %v3398_v36 = vld [vmem:[#allocation2 + $0x680] ss:$2 sm:$0xff]  ;;  %v3640_v47 = vld [vmem:[#allocation2 + $0x681] ss:$2 sm:$0xff] }
 0x447   : > { %v3777_v48 = vmax.f32 %v3398_v36, %v3640_v47  ;;  %3159 = vst [vmem:[#allocation2 + $0x698] sm:$0xff] %v2917_v35 }
 0x448   : > { %v2587_v52 = vpop.f32.mrb[168].mxu0  ;;  %v4135_v42 = vld [vmem:[#allocation3 + $0x336] sm:$0xff] }
 0x449   : > { %3898 = vst [vmem:[#allocation3 + $0x340] sm:$0xff] %v3777_v48  ;;  %v2588_v22 = vadd.f32 %v18311_v8, %v2587_v52  ;;  %v14994_v23 = vpop.f32.mrb[169].mxu0  ;;  %v4138_v40 = vmax.f32 %v3773_v28, %v4135_v42 }
 0x44a   : > { %v2590_v44 = vpop.f32.mrb[170].mxu0  ;;  %v4327_v24 = vld [vmem:[#allocation4 + $0x189] sm:$0xff] }
 0x44b   : > { %v2918_v43 = vmax.f32 %v2588_v22, 0.0  ;;  %v2591_v55 = vadd.f32 %v18311_v8, %v2590_v44  ;;  %v14995_v0 = vpop.f32.mrb[171].mxu0  ;;  %v4357_v53 = vpack.c.bf16 %v4327_v24, %v4326_v26  ;;  %4141 = vst [vmem:[#allocation4 + $0x194] sm:$0xff] %v4138_v40 }
 0x44d   : > { %3160 = vst [vmem:[#allocation2 + $0x6a0] sm:$0xff] %v2918_v43  ;;  %v2919_v54 = vmax.f32 %v2591_v55, 0.0  ;;  %15116 = vmatprep.mubr.bf16.mxu1 %v4357_v53 }
 0x44e   : > { %v3400_v41 = vld [vmem:[#allocation2 + $0x690] ss:$2 sm:$0xff]  ;;  %v3642_v4 = vld [vmem:[#allocation2 + $0x691] ss:$2 sm:$0xff] }
 0x44f   : > { %v3778_v1 = vmax.f32 %v3400_v41, %v3642_v4  ;;  %3161 = vst [vmem:[#allocation2 + $0x6a8] sm:$0xff] %v2919_v54 }
 0x450   : > { %v2595_v49 = vpop.f32.mrb[172].mxu0  ;;  %v4136_v56 = vld [vmem:[#allocation3 + $0x33e] sm:$0x3f] }
 0x451   : > { %3899 = vst [vmem:[#allocation3 + $0x348] sm:$0xff] %v3778_v1  ;;  %v2596_v60 = vadd.f32 %v18311_v8, %v2595_v49  ;;  %v14998_v28 = vpop.f32.mrb[173].mxu0  ;;  %v4139_v51 = vmax.f32 %v4133_v50, %v4136_v56 }
 0x452   : > { %v2598_v7 = vpop.f32.mrb[174].mxu0  ;;  %v4328_v14 = vld [vmem:[#allocation4 + $0x191] sm:$0xff] }
 0x453   : > { %v2920_v59 = vmax.f32 %v2596_v60, 0.0  ;;  %v2599_v61 = vadd.f32 %v18311_v8, %v2598_v7  ;;  %v14999_v62 = vpop.f32.mrb[175].mxu0  ;;  %4142 = vst [vmem:[#allocation4 + $0x19c] sm:$0x3f] %v4139_v51 }
 0x455   : > { %3162 = vst [vmem:[#allocation2 + $0x6b0] sm:$0xff] %v2920_v59  ;;  %v2921_v63 = vmax.f32 %v2599_v61, 0.0 }
 0x456   : > { %v3402_v46 = vld [vmem:[#allocation2 + $0x6a0] ss:$2 sm:$0xff]  ;;  %v3644_v10 = vld [vmem:[#allocation2 + $0x6a1] ss:$2 sm:$0xff] }
 0x457   : > { %v3779_v17 = vmax.f32 %v3402_v46, %v3644_v10  ;;  %3163 = vst [vmem:[#allocation2 + $0x6b8] sm:$0xff] %v2921_v63 }
 0x458   : > { %v2603_v11 = vpop.f32.mrb[176].mxu0  ;;  %v4143_v44 = vld [vmem:[#allocation3 + $0x344] sm:$0xff] }
 0x459   : > { %3900 = vst [vmem:[#allocation3 + $0x350] sm:$0xff] %v3779_v17  ;;  %v2604_v2 = vadd.f32 %v18311_v8, %v2603_v11  ;;  %v15002_v3 = vpop.f32.mrb[177].mxu0 }
 0x45a   : > { %v2606_v6 = vpop.f32.mrb[178].mxu0  ;;  %v4329_v20 = vld [vmem:[#allocation4 + $0x199] sm:$0xff] }
 0x45b   : > { %v2922_v19 = vmax.f32 %v2604_v2, 0.0  ;;  %v2607_v25 = vadd.f32 %v18311_v8, %v2606_v6  ;;  %v15003_v30 = vpop.f32.mrb[179].mxu0  ;;  %v4358_v31 = vpack.c.bf16 %v4329_v20, %v4328_v14 }
 0x45d   : > { %3164 = vst [vmem:[#allocation2 + $0x6c0] sm:$0xff] %v2922_v19  ;;  %v2923_v9 = vmax.f32 %v2607_v25, 0.0  ;;  %15117 = vmatmul.mubr.bf16.gmra.mrb[48].mxu1 %v4358_v31 }
 0x45e   : > { %v3404_v57 = vld [vmem:[#allocation2 + $0x6b0] ss:$2 sm:$0xff]  ;;  %v3646_v58 = vld [vmem:[#allocation2 + $0x6b1] ss:$2 sm:$0xff] }
 0x45f   : > { %v3780_v5 = vmax.f32 %v3404_v57, %v3646_v58  ;;  %3165 = vst [vmem:[#allocation2 + $0x6c8] sm:$0xff] %v2923_v9 }
 0x460   : > { %v2611_v21 = vpop.f32.mrb[180].mxu0  ;;  %v4144_v56 = vld [vmem:[#allocation3 + $0x34c] sm:$0xff] }
 0x461   : > { %3901 = vst [vmem:[#allocation3 + $0x358] sm:$0xff] %v3780_v5  ;;  %v2612_v12 = vadd.f32 %v18311_v8, %v2611_v21  ;;  %v15006_v16 = vpop.f32.mrb[181].mxu0 }
 0x462   : > { %v2614_v15 = vpop.f32.mrb[182].mxu0 }
 0x463   : > { %v2924_v37 = vmax.f32 %v2612_v12, 0.0  ;;  %v2615_v38 = vadd.f32 %v18311_v8, %v2614_v15  ;;  %v15007_v13 = vpop.f32.mrb[183].mxu0 }
 0x465   : > { %3166 = vst [vmem:[#allocation2 + $0x6d0] sm:$0xff] %v2924_v37  ;;  %v2925_v32 = vmax.f32 %v2615_v38, 0.0 }
 0x466   : > { %v3406_v33 = vld [vmem:[#allocation2 + $0x6c0] ss:$2 sm:$0xff]  ;;  %v3648_v39 = vld [vmem:[#allocation2 + $0x6c1] ss:$2 sm:$0xff] }
 0x467   : > { %v3781_v27 = vmax.f32 %v3406_v33, %v3648_v39  ;;  %3167 = vst [vmem:[#allocation2 + $0x6d8] sm:$0xff] %v2925_v32 }
 0x468   : > { %v2619_v29 = vpop.f32.mrb[184].mxu0  ;;  %v4145_v51 = vld [vmem:[#allocation3 + $0x354] sm:$0x3f] }
 0x469   : > { %3902 = vst [vmem:[#allocation3 + $0x360] sm:$0xff] %v3781_v27  ;;  %v2620_v45 = vadd.f32 %v18311_v8, %v2619_v29  ;;  %v15010_v34 = vpop.f32.mrb[185].mxu0 }
 0x46a   : > { %v2622_v35 = vpop.f32.mrb[186].mxu0 }
 0x46b   : > { %v2926_v36 = vmax.f32 %v2620_v45, 0.0  ;;  %v2623_v47 = vadd.f32 %v18311_v8, %v2622_v35  ;;  %v15011_v48 = vpop.f32.mrb[187].mxu0 }
 0x46d   : > { %3168 = vst [vmem:[#allocation2 + $0x6e0] sm:$0xff] %v2926_v36  ;;  %v2927_v52 = vmax.f32 %v2623_v47, 0.0 }
 0x46e   : > { %v3408_v42 = vld [vmem:[#allocation2 + $0x6d0] ss:$2 sm:$0xff]  ;;  %v3650_v22 = vld [vmem:[#allocation2 + $0x6d1] ss:$2 sm:$0xff] }
 0x46f   : > { %v3782_v23 = vmax.f32 %v3408_v42, %v3650_v22  ;;  %3169 = vst [vmem:[#allocation2 + $0x6e8] sm:$0xff] %v2927_v52 }
 0x470   : > { %v2627_v40 = vpop.f32.mrb[188].mxu0  ;;  %v4146_v26 = vld [vmem:[#allocation3 + $0x35a] sm:$0xff] }
 0x471   : > { %3903 = vst [vmem:[#allocation3 + $0x368] sm:$0xff] %v3782_v23  ;;  %v2628_v24 = vadd.f32 %v18311_v8, %v2627_v40  ;;  %v15014_v43 = vpop.f32.mrb[189].mxu0  ;;  %v18393_v55 = vmax.f32 %v4143_v44, %v4146_v26 }
 0x472   : > { %v2630_v0 = vpop.f32.mrb[190].mxu0 }
 0x473   : > { %v2928_v53 = vmax.f32 %v2628_v24, 0.0  ;;  %v2631_v54 = vadd.f32 %v18311_v8, %v2630_v0  ;;  %v15015_v41 = vpop.f32.mrb[191].mxu0  ;;  %4152 = vst [vmem:[#allocation4 + $0x1a2] sm:$0xff] %v18393_v55 }
 0x475   : > { %3170 = vst [vmem:[#allocation2 + $0x6f0] sm:$0xff] %v2928_v53  ;;  %v2929_v4 = vmax.f32 %v2631_v54, 0.0 }
 0x476   : > { %v18397_v1 = vld [vmem:[#allocation2 + $0x6e0] ss:$2 sm:$0xff]  ;;  %v18399_v49 = vld [vmem:[#allocation2 + $0x6e1] ss:$2 sm:$0xff] }
 0x477   : > { %v3783_v50 = vmax.f32 %v18397_v1, %v18399_v49  ;;  %3171 = vst [vmem:[#allocation2 + $0x6f8] sm:$0xff] %v2929_v4 }
 0x478   : > { %v2635_v60 = vpop.f32.mrb[192].mxu0  ;;  %v4147_v28 = vld [vmem:[#allocation3 + $0x362] sm:$0xff]  ;;  %v4148_v7 = vld [vmem:[#allocation3 + $0x36a] sm:$0x3f] }
 0x479   : > { %v2636_v59 = vadd.f32 %v18311_v8, %v2635_v60  ;;  %v15018_v61 = vpop.f32.mrb[193].mxu0  ;;  %v18404_v62 = vmax.f32 %v4144_v56, %v4147_v28  ;;  %v4151_v63 = vmax.f32 %v4145_v51, %v4148_v7 }
 0x47a   : > { %v2638_v46 = vpop.f32.mrb[194].mxu0  ;;  %v4330_v9 = vld [vmem:[#allocation4 + $0x1a1] sm:$0xff] }
 0x47b   : > { %v2930_v10 = vmax.f32 %v2636_v59, 0.0  ;;  %v2639_v17 = vadd.f32 %v18311_v8, %v2638_v46  ;;  %v15019_v11 = vpop.f32.mrb[195].mxu0  ;;  %4153 = vst [vmem:[#allocation4 + $0x1aa] sm:$0xff] %v18404_v62  ;;  %4154 = vst [vmem:[#allocation4 + $0x1b2] sm:$0x3f] %v4151_v63  ;;  %v5067_v2 = vpack.c.bf16 %v18404_v62, %v18393_v55  ;;  %v16666_v55 = vld [vmem:[%s20354_s3 + $0x110] sm:$0xff]  }
 0x47c   : > { %v5451_v62 = vld [vmem:[#allocation4 + $0x46] sm:$0xff] }
 0x47d   : > { %3172 = vst [vmem:[#allocation2 + $0x700] sm:$0xff] %v2930_v10  ;;  %v2931_v3 = vmax.f32 %v2639_v17, 0.0 }
 0x47e   : > { %v3412_v6 = vld [vmem:[#allocation2 + $0x6f0] ss:$2 sm:$0xff]  ;;  %v3654_v14 = vld [vmem:[#allocation2 + $0x6f1] ss:$2 sm:$0xff] }
 0x47f   : > { %v3784_v20 = vmax.f32 %v3412_v6, %v3654_v14  ;;  %3173 = vst [vmem:[#allocation2 + $0x708] sm:$0xff] %v2931_v3  ;;  %v4180_v3 = vld [vmem:[#allocation4 + $0x8] sm:$0xff] }
 0x480   : > { %v2643_v19 = vpop.f32.mrb[196].mxu0 }
 0x481   : > { %3905 = vst [vmem:[#allocation3 + $0x378] sm:$0xff] %v3784_v20  ;;  %v2644_v25 = vadd.f32 %v18311_v8, %v2643_v19  ;;  %v15022_v30 = vpop.f32.mrb[197].mxu0  ;;  %v4179_v19 = vld [vmem:[#allocation4] sm:$0xff] }
 0x482   : > { %v2646_v31 = vpop.f32.mrb[198].mxu0  ;;  %v4331_v57 = vld [vmem:[#allocation4 + $0x1a9] sm:$0xff] }
 0x483   : > { %v2932_v58 = vmax.f32 %v2644_v25, 0.0  ;;  %v2647_v5 = vadd.f32 %v18311_v8, %v2646_v31  ;;  %v15023_v21 = vpop.f32.mrb[199].mxu0  ;;  %v4359_v12 = vpack.c.bf16 %v4331_v57, %v4330_v9  ;;  %v4234_v9 = vpack.c.bf16 %v4180_v3, %v4179_v19  ;;  %v4190_v3 = vld [vmem:[#allocation4 + $0x58] sm:$0xff] }
 0x485   : > { %3174 = vst [vmem:[#allocation2 + $0x710] sm:$0xff] %v2932_v58  ;;  %v2933_v16 = vmax.f32 %v2647_v5, 0.0  ;;  %15120 = vmatprep.mubr.bf16.mxu1 %v4359_v12 }
 0x486   : > { %v3414_v15 = vld [vmem:[#allocation2 + $0x700] ss:$2 sm:$0xff]  ;;  %v3656_v37 = vld [vmem:[#allocation2 + $0x701] ss:$2 sm:$0xff] }
 0x487   : > { %v3785_v38 = vmax.f32 %v3414_v15, %v3656_v37  ;;  %3175 = vst [vmem:[#allocation2 + $0x718] sm:$0xff] %v2933_v16  ;;  %v4182_v16 = vld [vmem:[#allocation4 + $0x18] sm:$0xff] }
 0x488   : > { %v2651_v13 = vpop.f32.mrb[200].mxu0  ;;  %v4156_v17 = vld [vmem:[#allocation3 + $0x378] sm:$0xff] }
 0x489   : > { %3906 = vst [vmem:[#allocation3 + $0x380] sm:$0xff] %v3785_v38  ;;  %v2652_v32 = vadd.f32 %v18311_v8, %v2651_v13  ;;  %v15026_v33 = vpop.f32.mrb[201].mxu0 }
 0x48a   : > { %v2654_v39 = vpop.f32.mrb[202].mxu0 }
 0x48b   : > { %v2934_v27 = vmax.f32 %v2652_v32, 0.0  ;;  %v2655_v29 = vadd.f32 %v18311_v8, %v2654_v39  ;;  %v15027_v45 = vpop.f32.mrb[203].mxu0  ;;  %v4184_v32 = vld [vmem:[#allocation4 + $0x28] sm:$0xff]  ;;  %v4181_v39 = vld [vmem:[#allocation4 + $0x10] sm:$0xff] }
 0x48c   : > { %v4235_v45 = vpack.c.bf16 %v4182_v16, %v4181_v39  ;;  %v4193_v16 = vld [vmem:[#allocation4 + $0x70] sm:$0xff] }
 0x48d   : > { %3176 = vst [vmem:[#allocation2 + $0x720] sm:$0xff] %v2934_v27  ;;  %v2935_v34 = vmax.f32 %v2655_v29, 0.0 }
 0x48e   : > { %v3416_v35 = vld [vmem:[#allocation2 + $0x710] ss:$2 sm:$0xff]  ;;  %v3658_v36 = vld [vmem:[#allocation2 + $0x711] ss:$2 sm:$0xff] }
 0x48f   : > { %v3786_v47 = vmax.f32 %v3416_v35, %v3658_v36  ;;  %3177 = vst [vmem:[#allocation2 + $0x728] sm:$0xff] %v2935_v34  ;;  %v4183_v35 = vld [vmem:[#allocation4 + $0x20] sm:$0xff] }
 0x490   : > { %v2659_v48 = vpop.f32.mrb[204].mxu0  ;;  %v4157_v15 = vld [vmem:[#allocation3 + $0x380] sm:$0x3f] }
 0x491   : > { %3907 = vst [vmem:[#allocation3 + $0x388] sm:$0xff] %v3786_v47  ;;  %v2660_v52 = vadd.f32 %v18311_v8, %v2659_v48  ;;  %v15030_v42 = vpop.f32.mrb[205].mxu0  ;;  %v16647_v47 = vld [vmem:[%s20354_s3 + $0x88] sm:$0xff]   ;;  %v4236_v48 = vpack.c.bf16 %v4184_v32, %v4183_v35  ;;  %v16653_v32 = vld [vmem:[%s20354_s3 + $0xb8] sm:$0xff]   ;;  %v4198_v35 = vld [vmem:[#allocation4 + $0x98] sm:$0xff] }
 0x492   : > { %v2662_v22 = vpop.f32.mrb[206].mxu0 }
 0x493   : > { %v2936_v23 = vmax.f32 %v2660_v52, 0.0  ;;  %v2663_v40 = vadd.f32 %v18311_v8, %v2662_v22  ;;  %v15031_v44 = vpop.f32.mrb[207].mxu0 }
 0x494   : > { %v16648_v44 = vld [vmem:[%s20354_s3 + $0x90] sm:$0xff]  }
 0x495   : > { %3178 = vst [vmem:[#allocation2 + $0x730] sm:$0xff] %v2936_v23  ;;  %v2937_v26 = vmax.f32 %v2663_v40, 0.0  ;;  %v16656_v23 = vld [vmem:[%s20356_s5 + $0x40] sm:$0xff]  }
 0x496   : > { %v3418_v24 = vld [vmem:[#allocation2 + $0x720] ss:$2 sm:$0xff]  ;;  %v3660_v43 = vld [vmem:[#allocation2 + $0x721] ss:$2 sm:$0xff]  ;;  %15701 = vmatpush3.bf16.msra.mxu0 %v16656_v23 }
 0x497   : > { %v3787_v0 = vmax.f32 %v3418_v24, %v3660_v43  ;;  %3179 = vst [vmem:[#allocation2 + $0x738] sm:$0xff] %v2937_v26  ;;  %v4186_v24 = vld [vmem:[#allocation4 + $0x38] sm:$0xff] }
 0x498   : > { %v2667_v53 = vpop.f32.mrb[208].mxu0  ;;  %v4158_v54 = vld [vmem:[#allocation3 + $0x386] sm:$0xff] }
 0x499   : > { %3908 = vst [vmem:[#allocation3 + $0x390] sm:$0xff] %v3787_v0  ;;  %v2668_v41 = vadd.f32 %v18311_v8, %v2667_v53  ;;  %v15034_v4 = vpop.f32.mrb[209].mxu0  ;;  %v4161_v56 = vmax.f32 %v3783_v50, %v4158_v54  ;;  %v18436_v53 = vld [vmem:[#allocation4 + $0x1e4] sm:$0xff] }
 0x49a   : > { %v2670_v60 = vpop.f32.mrb[210].mxu0  ;;  %15702 = vmatprep.subr.bf16.mxu0 %v18436_v53 }
 0x49b   : > { %v2938_v28 = vmax.f32 %v2668_v41, 0.0  ;;  %4164 = vst [vmem:[#allocation4 + $0x1b8] sm:$0xff] %v4161_v56  ;;  %v2671_v51 = vadd.f32 %v18311_v8, %v2670_v60  ;;  %v15035_v7 = vpop.f32.mrb[211].mxu0  ;;  %v4185_v41 = vld [vmem:[#allocation4 + $0x30] sm:$0xff] }
 0x49c   : > { %v4237_v60 = vpack.c.bf16 %v4186_v24, %v4185_v41  ;;  %v16649_v7 = vld [vmem:[%s20354_s3 + $0x98] sm:$0xff]   ;;  %v4204_v24 = vld [vmem:[#allocation4 + $0xc8] sm:$0xff] }
 0x49d   : > { %3180 = vst [vmem:[#allocation2 + $0x740] sm:$0xff] %v2938_v28  ;;  %v2939_v59 = vmax.f32 %v2671_v51, 0.0  ;;  %v4187_v28 = vld [vmem:[#allocation4 + $0x40] sm:$0xff] }
 0x49e   : > { %v3420_v61 = vld [vmem:[#allocation2 + $0x730] ss:$2 sm:$0xff]  ;;  %v3662_v63 = vld [vmem:[#allocation2 + $0x731] ss:$2 sm:$0xff] }
 0x49f   : > { %v3788_v46 = vmax.f32 %v3420_v61, %v3662_v63  ;;  %3181 = vst [vmem:[#allocation2 + $0x748] sm:$0xff] %v2939_v59 }
 0x4a0   : > { %v2675_v10 = vpop.f32.mrb[212].mxu0  ;;  %v4159_v11 = vld [vmem:[#allocation3 + $0x38e] sm:$0xff] }
 0x4a1   : > { %3909 = vst [vmem:[#allocation3 + $0x398] sm:$0xff] %v3788_v46  ;;  %v2676_v1 = vadd.f32 %v18311_v8, %v2675_v10  ;;  %v15038_v49 = vpop.f32.mrb[213].mxu0  ;;  %v4162_v50 = vmax.f32 %v4156_v17, %v4159_v11  ;;  %v16650_v17 = vld [vmem:[%s20354_s3 + $0xa0] sm:$0xff]  }
 0x4a2   : > { %v4332_v6 = vld [vmem:[#allocation4 + $0x1b1] sm:$0xff]  ;;  %v2678_v14 = vpop.f32.mrb[214].mxu0 }
 0x4a3   : > { %v4360_v20 = vpack.c.bf16 %v4332_v6, %v4332_v6  ;;  %v2940_v25 = vmax.f32 %v2676_v1, 0.0  ;;  %v2679_v30 = vadd.f32 %v18311_v8, %v2678_v14  ;;  %v15039_v31 = vpop.f32.mrb[215].mxu0  ;;  %4165 = vst [vmem:[#allocation4 + $0x1c0] sm:$0xff] %v4162_v50  ;;  %v4192_v50 = vld [vmem:[#allocation4 + $0x68] sm:$0xff]  ;;  %v4189_v14 = vld [vmem:[#allocation4 + $0x50] sm:$0xff] }
 0x4a4   : > { %v16651_v31 = vld [vmem:[%s20354_s3 + $0xa8] sm:$0xff]  }
 0x4a5   : > { %15121 = vmatmul.mubr.bf16.gmra.mrb[52].mxu1 %v4360_v20  ;;  %3182 = vst [vmem:[#allocation2 + $0x750] sm:$0xff] %v2940_v25  ;;  %v2941_v57 = vmax.f32 %v2679_v30, 0.0  ;;  %v4239_v25 = vpack.c.bf16 %v4190_v3, %v4189_v14  ;;  %v4191_v30 = vld [vmem:[#allocation4 + $0x60] sm:$0xff]  ;;  %v4218_v14 = vld [vmem:[#allocation4 + $0x138] sm:$0xff] }
 0x4a6   : > { %v3422_v58 = vld [vmem:[#allocation2 + $0x740] ss:$2 sm:$0xff]  ;;  %v3664_v5 = vld [vmem:[#allocation2 + $0x741] ss:$2 sm:$0xff]  ;;  %15140 = vmatprep.mubr.bf16.mxu1 %v4234_v9  ;;  %v4215_v3 = vld [vmem:[#allocation4 + $0x120] sm:$0xff] }
 0x4a7   : > { %v3789_v21 = vmax.f32 %v3422_v58, %v3664_v5  ;;  %3183 = vst [vmem:[#allocation2 + $0x758] sm:$0xff] %v2941_v57  ;;  %v4240_v57 = vpack.c.bf16 %v4192_v50, %v4191_v30  ;;  %v4219_v30 = vld [vmem:[#allocation4 + $0x140] sm:$0xff] }
 0x4a8   : > { %v2683_v12 = vpop.f32.mrb[216].mxu0  ;;  %v4160_v37 = vld [vmem:[#allocation3 + $0x396] sm:$0x3f] }
 0x4a9   : > { %3910 = vst [vmem:[#allocation3 + $0x3a0] sm:$0xff] %v3789_v21  ;;  %v2684_v38 = vadd.f32 %v18311_v8, %v2683_v12  ;;  %v15042_v13 = vpop.f32.mrb[217].mxu0  ;;  %v4163_v33 = vmax.f32 %v4157_v15, %v4160_v37  ;;  %v4194_v15 = vld [vmem:[#allocation4 + $0x78] sm:$0xff]  ;;  %v4196_v37 = vld [vmem:[#allocation4 + $0x88] sm:$0xff] }
 0x4aa   : > { %v2686_v27 = vpop.f32.mrb[218].mxu0  ;;  %v4195_v13 = vld [vmem:[#allocation4 + $0x80] sm:$0xff] }
 0x4ab   : > { %v2942_v29 = vmax.f32 %v2684_v38, 0.0  ;;  %v2687_v34 = vadd.f32 %v18311_v8, %v2686_v27  ;;  %v15043_v36 = vpop.f32.mrb[219].mxu0  ;;  %4166 = vst [vmem:[#allocation4 + $0x1c8] sm:$0x3f] %v4163_v33  ;;  %v4241_v38 = vpack.c.bf16 %v4194_v15, %v4193_v16  ;;  %v4242_v33 = vpack.c.bf16 %v4196_v37, %v4195_v13  ;;  %v4228_v16 = vld [vmem:[#allocation4 + $0x188] sm:$0xff]  ;;  %v4225_v15 = vld [vmem:[#allocation4 + $0x170] sm:$0xff] }
 0x4ad   : > { %3184 = vst [vmem:[#allocation2 + $0x760] sm:$0xff] %v2942_v29  ;;  %15141 = vmatmul.mubr.bf16.vlgmr.msra.gmra.mrb[0].mxu1 %v4235_v45  ;;  %v2943_v52 = vmax.f32 %v2687_v34, 0.0  ;;  %v18460_v34 = vld [vmem:[%s20354_s3 + $0xc0] sm:$0xff]  }
 0x4ae   : > { %v3424_v42 = vld [vmem:[#allocation2 + $0x750] ss:$2 sm:$0xff]  ;;  %v3666_v22 = vld [vmem:[#allocation2 + $0x751] ss:$2 sm:$0xff]  ;;  %15197 = vmatpush3.bf16.msra.mxu1 %v18368_v18  ;;  %15144 = vmatprep.mubr.bf16.mxu1 %v4236_v48  ;;  %v4188_v18 = vld [vmem:[#allocation4 + $0x48] sm:$0xff] }
 0x4af   : > { %v3790_v40 = vmax.f32 %v3424_v42, %v3666_v22  ;;  %3185 = vst [vmem:[#allocation2 + $0x768] sm:$0xff] %v2943_v52  ;;  %15198 = vmatprep.subr.bf16.mxu1 %v16647_v47  ;;  %v4238_v59 = vpack.c.bf16 %v4188_v18, %v4187_v28  ;;  %v4200_v48 = vld [vmem:[#allocation4 + $0xa8] sm:$0xff]  ;;  %v4197_v42 = vld [vmem:[#allocation4 + $0x90] sm:$0xff] }
 0x4b0   : > { %v2691_v26 = vpop.f32.mrb[220].mxu0  ;;  %v4167_v29 = vld [vmem:[#allocation3 + $0x39c] sm:$0xff]  ;;  %v4243_v22 = vpack.c.bf16 %v4198_v35, %v4197_v42 }
 0x4b1   : > { %3911 = vst [vmem:[#allocation3 + $0x3a8] sm:$0xff] %v3790_v40  ;;  %v2692_v43 = vadd.f32 %v18311_v8, %v2691_v26  ;;  %v15046_v0 = vpop.f32.mrb[221].mxu0  ;;  %v4233_v35 = vld [vmem:[#allocation4 + $0x1b0] sm:$0xff]  ;;  %v4989_v42 = vld [vmem:[#allocation4 + $0x1a] sm:$0xff] }
 0x4b2   : > { %v2694_v54 = vpop.f32.mrb[222].mxu0  ;;  %15199 = vmatpush3.bf16.msra.mxu1 %v16647_v47  ;;  %v4199_v47 = vld [vmem:[#allocation4 + $0xa0] sm:$0xff]  ;;  %v4201_v0 = vld [vmem:[#allocation4 + $0xb0] sm:$0xff] }
 0x4b3   : > { %v2944_v4 = vmax.f32 %v2692_v43, 0.0  ;;  %v2695_v56 = vadd.f32 %v18311_v8, %v2694_v54  ;;  %v15047_v51 = vpop.f32.mrb[223].mxu0  ;;  %15200 = vmatprep.subr.bf16.mxu1 %v16648_v44  ;;  %v4244_v23 = vpack.c.bf16 %v4200_v48, %v4199_v47  ;;  %v4203_v54 = vld [vmem:[#allocation4 + $0xc0] sm:$0xff]  ;;  %v4261_v47 = vpack.c.bf16 %v4233_v35, %v4233_v35 }
 0x4b4   : > { %v4246_v41 = vpack.c.bf16 %v4204_v24, %v4203_v54  ;;  %v4207_v51 = vld [vmem:[#allocation4 + $0xe0] sm:$0xff]  ;;  %v4992_v54 = vld [vmem:[#allocation4 + $0x32] sm:$0xff] }
 0x4b5   : > { %3186 = vst [vmem:[#allocation2 + $0x770] sm:$0xff] %v2944_v4  ;;  %v2945_v61 = vmax.f32 %v2695_v56, 0.0  ;;  %15145 = vmatmul.mubr.bf16.gmra.mrb[4].mxu1 %v4237_v60  ;;  %v4206_v4 = vld [vmem:[#allocation4 + $0xd8] sm:$0xff]  ;;  %v4208_v56 = vld [vmem:[#allocation4 + $0xe8] sm:$0xff]  ;;  %v4205_v60 = vld [vmem:[#allocation4 + $0xd0] sm:$0xff] }
 0x4b6   : > { %v3426_v63 = vld [vmem:[#allocation2 + $0x760] ss:$2 sm:$0xff]  ;;  %v3668_v46 = vld [vmem:[#allocation2 + $0x761] ss:$2 sm:$0xff]  ;;  %15148 = vmatprep.mubr.bf16.mxu1 %v4238_v59  ;;  %15201 = vmatpush3.bf16.msra.mxu1 %v16648_v44  ;;  %v4202_v44 = vld [vmem:[#allocation4 + $0xb8] sm:$0xff]  ;;  %v4247_v28 = vpack.c.bf16 %v4206_v4, %v4205_v60 }
 0x4b7   : > { %v3791_v10 = vmax.f32 %v3426_v63, %v3668_v46  ;;  %3187 = vst [vmem:[#allocation2 + $0x778] sm:$0xff] %v2945_v61  ;;  %15202 = vmatprep.subr.bf16.mxu1 %v16649_v7  ;;  %v4245_v18 = vpack.c.bf16 %v4202_v44, %v4201_v0  ;;  %v4210_v59 = vld [vmem:[#allocation4 + $0xf8] sm:$0xff]  ;;  %v4212_v61 = vld [vmem:[#allocation4 + $0x108] sm:$0xff]  ;;  %v4209_v63 = vld [vmem:[#allocation4 + $0xf0] sm:$0xff] }
 0x4b8   : > { %v2699_v11 = vpop.f32.mrb[224].mxu0  ;;  %v4168_v40 = vld [vmem:[#allocation3 + $0x3a4] sm:$0xff]  ;;  %v4249_v46 = vpack.c.bf16 %v4210_v59, %v4209_v63  ;;  %v4996_v59 = vld [vmem:[#allocation4 + $0x52] sm:$0xff] }
 0x4b9   : > { %3912 = vst [vmem:[#allocation3 + $0x3b0] sm:$0xff] %v3791_v10  ;;  %v2700_v1 = vadd.f32 %v18311_v8, %v2699_v11  ;;  %v15050_v49 = vpop.f32.mrb[225].mxu0  ;;  %v4211_v10 = vld [vmem:[#allocation4 + $0x100] sm:$0xff]  ;;  %v4214_v11 = vld [vmem:[#allocation4 + $0x118] sm:$0xff] }
 0x4ba   : > { %v2702_v6 = vpop.f32.mrb[226].mxu0  ;;  %15203 = vmatpush3.bf16.msra.mxu1 %v16649_v7  ;;  %v4248_v7 = vpack.c.bf16 %v4208_v56, %v4207_v51  ;;  %v4213_v49 = vld [vmem:[#allocation4 + $0x110] sm:$0xff]  ;;  %v4986_v48 = vld [vmem:[#allocation4 + $0x2] sm:$0xff]  ;;  %v4993_v0 = vld [vmem:[#allocation4 + $0x3a] sm:$0xff] }
 0x4bb   : > { %v2946_v20 = vmax.f32 %v2700_v1, 0.0  ;;  %v2703_v19 = vadd.f32 %v18311_v8, %v2702_v6  ;;  %15204 = vmatprep.subr.bf16.mxu1 %v16650_v17  ;;  %v15051_v9 = vpop.f32.mrb[227].mxu0  ;;  %v16652_v8 = vld [vmem:[%s20354_s3 + $0xb0] sm:$0xff]   ;;  %v4216_v1 = vld [vmem:[#allocation4 + $0x128] sm:$0xff]  ;;  %v4251_v50 = vpack.c.bf16 %v4214_v11, %v4213_v49  ;;  %v16658_v56 = vld [vmem:[%s20354_s3 + $0xd8] sm:$0xff]  }
 0x4bc   : > { %v4252_v6 = vpack.c.bf16 %v4216_v1, %v4215_v3  ;;  %v4221_v9 = vld [vmem:[#allocation4 + $0x150] sm:$0xff]  ;;  %v4990_v44 = vld [vmem:[#allocation4 + $0x22] sm:$0xff]  ;;  %v4997_v51 = vld [vmem:[#allocation4 + $0x5a] sm:$0xff] }
 0x4bd   : > { %3188 = vst [vmem:[#allocation2 + $0x780] sm:$0xff] %v2946_v20  ;;  %v2947_v58 = vmax.f32 %v2703_v19, 0.0  ;;  %15149 = vmatmul.mubr.bf16.gmra.mrb[8].mxu1 %v4239_v25  ;;  %v4220_v20 = vld [vmem:[#allocation4 + $0x148] sm:$0xff]  ;;  %v4217_v19 = vld [vmem:[#allocation4 + $0x130] sm:$0xff]  ;;  %v5001_v3 = vld [vmem:[#allocation4 + $0x7a] sm:$0xff] }
 0x4be   : > { %v3428_v5 = vld [vmem:[#allocation2 + $0x770] ss:$2 sm:$0xff]  ;;  %v3670_v21 = vld [vmem:[#allocation2 + $0x771] ss:$2 sm:$0xff]  ;;  %15152 = vmatprep.mubr.bf16.mxu1 %v4240_v57  ;;  %15205 = vmatpush3.bf16.msra.mxu1 %v16650_v17  ;;  %v4250_v17 = vpack.c.bf16 %v4212_v61, %v4211_v10  ;;  %v4253_v25 = vpack.c.bf16 %v4218_v14, %v4217_v19  ;;  %v5046_v61 = vpack.c.bf16 %v4997_v51, %v4996_v59  ;;  %v5003_v1 = vld [vmem:[#allocation4 + $0x8a] sm:$0xff] }
 0x4bf   : > { %v3792_v12 = vmax.f32 %v3428_v5, %v3670_v21  ;;  %3189 = vst [vmem:[#allocation2 + $0x788] sm:$0xff] %v2947_v58  ;;  %15206 = vmatprep.subr.bf16.mxu1 %v16651_v31  ;;  %v4222_v57 = vld [vmem:[#allocation4 + $0x158] sm:$0xff]  ;;  %v4224_v58 = vld [vmem:[#allocation4 + $0x168] sm:$0xff]  ;;  %v4223_v21 = vld [vmem:[#allocation4 + $0x160] sm:$0xff] }
 0x4c0   : > { %v4255_v5 = vpack.c.bf16 %v4222_v57, %v4221_v9  ;;  %v4994_v4 = vld [vmem:[#allocation4 + $0x42] sm:$0xff]  ;;  %v5000_v11 = vld [vmem:[#allocation4 + $0x72] sm:$0xff]  ;;  %v5005_v19 = vld [vmem:[#allocation4 + $0x9a] sm:$0xff] }
 0x4c1   : > { %3913 = vst [vmem:[#allocation3 + $0x3b8] sm:$0xff] %v3792_v12  ;;  %v4256_v12 = vpack.c.bf16 %v4224_v58, %v4223_v21  ;;  %v4998_v63 = vld [vmem:[#allocation4 + $0x62] sm:$0xff]  ;;  %v5048_v49 = vpack.c.bf16 %v5001_v3, %v5000_v11  ;;  %v5009_v58 = vld [vmem:[#allocation4 + $0xba] sm:$0xff]  ;;  %v5008_v21 = vld [vmem:[#allocation4 + $0xb2] sm:$0xff] }
 0x4c2   : > { %15207 = vmatpush3.bf16.msra.mxu1 %v16651_v31  ;;  %v4254_v31 = vpack.c.bf16 %v4220_v20, %v4219_v30  ;;  %v18492_v20 = vld [vmem:[%s20354_s3 + $0x100] sm:$0xff]   ;;  %v5004_v30 = vld [vmem:[#allocation4 + $0x92] sm:$0xff] }
 0x4c3   : > { %15208 = vmatprep.subr.bf16.mxu1 %v16652_v8  ;;  %v5006_v9 = vld [vmem:[#allocation4 + $0xa2] sm:$0xff]  ;;  %v5032_v51 = vld [vmem:[#allocation4 + $0x172] sm:$0xff] }
 0x4c4   : > { %v5018_v35 = vld [vmem:[#allocation4 + $0x102] sm:$0xff]  ;;  %v5036_v11 = vld [vmem:[#allocation4 + $0x192] sm:$0xff] }
 0x4c5   : > { %15153 = vmatmul.mubr.bf16.gmra.mrb[12].mxu1 %v4241_v38  ;;  %v4227_v38 = vld [vmem:[#allocation4 + $0x180] sm:$0xff] }
 0x4c6   : > { %v3430_v39 = vld [vmem:[#allocation2 + $0x780] ss:$2 sm:$0xff]  ;;  %v3672_v27 = vld [vmem:[#allocation2 + $0x781] ss:$2 sm:$0xff]  ;;  %15156 = vmatprep.mubr.bf16.mxu1 %v4242_v33  ;;  %15209 = vmatpush3.bf16.msra.mxu1 %v16652_v8  ;;  %v4226_v8 = vld [vmem:[#allocation4 + $0x178] sm:$0xff]  ;;  %v4258_v13 = vpack.c.bf16 %v4228_v16, %v4227_v38 }
 0x4c7   : > { %v3793_v45 = vmax.f32 %v3430_v39, %v3672_v27  ;;  %15210 = vmatprep.subr.bf16.mxu1 %v16653_v32  ;;  %v4257_v37 = vpack.c.bf16 %v4226_v8, %v4225_v15  ;;  %v4232_v33 = vld [vmem:[#allocation4 + $0x1a8] sm:$0xff]  ;;  %v4229_v39 = vld [vmem:[#allocation4 + $0x190] sm:$0xff]  ;;  %v5013_v15 = vld [vmem:[#allocation4 + $0xda] sm:$0xff] }
 0x4c8   : > { %v4170_v36 = vld [vmem:[#allocation3 + $0x3b2] sm:$0xff]  ;;  %v5010_v8 = vld [vmem:[#allocation4 + $0xc2] sm:$0xff]  ;;  %v5012_v38 = vld [vmem:[#allocation4 + $0xd2] sm:$0xff] }
 0x4c9   : > { %3914 = vst [vmem:[#allocation3 + $0x3c0] sm:$0xff] %v3793_v45  ;;  %v4173_v52 = vmax.f32 %v4167_v29, %v4170_v36  ;;  %v4231_v29 = vld [vmem:[#allocation4 + $0x1a0] sm:$0xff]  ;;  %v4987_v36 = vld [vmem:[#allocation4 + $0xa] sm:$0xff] }
 0x4ca   : > { %15211 = vmatpush3.bf16.msra.mxu1 %v16653_v32  ;;  %v4230_v32 = vld [vmem:[#allocation4 + $0x198] sm:$0xff]  ;;  %v4260_v45 = vpack.c.bf16 %v4232_v33, %v4231_v29  ;;  %v5034_v59 = vld [vmem:[#allocation4 + $0x182] sm:$0xff] }
 0x4cb   : > { %15268 = vmatprep.subr.bf16.mxu1 %v18460_v34  ;;  %4176 = vst [vmem:[#allocation4 + $0x1ce] sm:$0xff] %v4173_v52  ;;  %v4259_v27 = vpack.c.bf16 %v4230_v32, %v4229_v39  ;;  %v5041_v52 = vpack.c.bf16 %v4987_v36, %v4986_v48  ;;  %v5014_v32 = vld [vmem:[#allocation4 + $0xe2] sm:$0xff]  ;;  %v5017_v39 = vld [vmem:[#allocation4 + $0xfa] sm:$0xff]  ;;  %v5016_v29 = vld [vmem:[#allocation4 + $0xf2] sm:$0xff] }
 0x4cc   : > { %v5022_v48 = vld [vmem:[#allocation4 + $0x122] sm:$0xff] }
 0x4cd   : > { %15157 = vmatmul.mubr.bf16.gmra.mrb[16].mxu1 %v4243_v22  ;;  %v4991_v22 = vld [vmem:[#allocation4 + $0x2a] sm:$0xff] }
 0x4ce   : > { %15160 = vmatprep.mubr.bf16.mxu1 %v4244_v23  ;;  %v4988_v23 = vld [vmem:[#allocation4 + $0x12] sm:$0xff]  ;;  %v5043_v24 = vpack.c.bf16 %v4991_v22, %v4990_v44  ;;  %v5027_v44 = vld [vmem:[#allocation4 + $0x14a] sm:$0xff] }
 0x4d0   : > { %v4171_v26 = vld [vmem:[#allocation3 + $0x3ba] sm:$0xff] }
 0x4d1   : > { %v4174_v43 = vmax.f32 %v4168_v40, %v4171_v26  ;;  %v5042_v40 = vpack.c.bf16 %v4989_v42, %v4988_v23  ;;  %v16655_v26 = vld [vmem:[%s20354_s3 + $0xc8] sm:$0xff]  }
 0x4d2   : > { %v5020_v42 = vld [vmem:[#allocation4 + $0x112] sm:$0xff] }
 0x4d3   : > { %4177 = vst [vmem:[#allocation4 + $0x1d6] sm:$0xff] %v4174_v43  ;;  %v16657_v43 = vld [vmem:[%s20354_s3 + $0xd0] sm:$0xff]  }
 0x4d5   : > { %15161 = vmatmul.mubr.bf16.gmra.mrb[20].mxu1 %v4245_v18  ;;  %v4995_v18 = vld [vmem:[#allocation4 + $0x4a] sm:$0xff] }
 0x4d6   : > { %15164 = vmatprep.mubr.bf16.mxu1 %v4246_v41  ;;  %v5044_v41 = vpack.c.bf16 %v4993_v0, %v4992_v54  ;;  %v5045_v60 = vpack.c.bf16 %v4995_v18, %v4994_v4  ;;  %v5029_v18 = vld [vmem:[#allocation4 + $0x15a] sm:$0xff]  ;;  %v5031_v54 = vld [vmem:[#allocation4 + $0x16a] sm:$0xff] }
 0x4dd   : > { %15165 = vmatmul.mubr.bf16.gmra.mrb[24].mxu1 %v4247_v28  ;;  %v16659_v28 = vld [vmem:[%s20354_s3 + $0xe0] sm:$0xff]  }
 0x4de   : > { %15168 = vmatprep.mubr.bf16.mxu1 %v4248_v7  ;;  %v4999_v7 = vld [vmem:[#allocation4 + $0x6a] sm:$0xff] }
 0x4df   : > { %v5047_v10 = vpack.c.bf16 %v4999_v7, %v4998_v63 }
 0x4e5   : > { %15169 = vmatmul.mubr.bf16.gmra.mrb[28].mxu1 %v4249_v46  ;;  %v16660_v46 = vld [vmem:[%s20354_s3 + $0xe8] sm:$0xff]  }
 0x4e6   : > { %15172 = vmatprep.mubr.bf16.mxu1 %v4250_v17  ;;  %v16661_v17 = vld [vmem:[%s20354_s3 + $0xf0] sm:$0xff]  }
 0x4ed   : > { %15173 = vmatmul.mubr.bf16.gmra.mrb[32].mxu1 %v4251_v50  ;;  %v5002_v50 = vld [vmem:[#allocation4 + $0x82] sm:$0xff] }
 0x4ee   : > { %15176 = vmatprep.mubr.bf16.mxu1 %v4252_v6  ;;  %v16662_v6 = vld [vmem:[%s20354_s3 + $0xf8] sm:$0xff]   ;;  %v5049_v14 = vpack.c.bf16 %v5003_v1, %v5002_v50 }
 0x4ef   : > { %v5446_v50 = vld [vmem:[#allocation4 + $0x1e] sm:$0xff] }
 0x4f5   : > { %15177 = vmatmul.mubr.bf16.gmra.mrb[36].mxu1 %v4253_v25  ;;  %v5007_v25 = vld [vmem:[#allocation4 + $0xaa] sm:$0xff] }
 0x4f6   : > { %15180 = vmatprep.mubr.bf16.mxu1 %v4254_v31  ;;  %v5050_v31 = vpack.c.bf16 %v5005_v19, %v5004_v30  ;;  %v5051_v57 = vpack.c.bf16 %v5007_v25, %v5006_v9  ;;  %v5448_v25 = vld [vmem:[#allocation4 + $0x2e] sm:$0xff]  ;;  %v5450_v30 = vld [vmem:[#allocation4 + $0x3e] sm:$0xff] }
 0x4fd   : > { %15181 = vmatmul.mubr.bf16.gmra.mrb[40].mxu1 %v4255_v5  ;;  %v5011_v5 = vld [vmem:[#allocation4 + $0xca] sm:$0xff] }
 0x4fe   : > { %15184 = vmatprep.mubr.bf16.mxu1 %v4256_v12  ;;  %v5052_v12 = vpack.c.bf16 %v5009_v58, %v5008_v21  ;;  %v5053_v16 = vpack.c.bf16 %v5011_v5, %v5010_v8  ;;  %v16664_v58 = vld [vmem:[%s20354_s3 + $0x108] sm:$0xff]   ;;  %v5454_v21 = vld [vmem:[#allocation4 + $0x5e] sm:$0xff] }
 0x4ff   : > { %v5453_v8 = vld [vmem:[#allocation4 + $0x56] sm:$0xff] }
 0x505   : > { %15185 = vmatmul.mubr.bf16.gmra.mrb[44].mxu1 %v4257_v37  ;;  %v5015_v37 = vld [vmem:[#allocation4 + $0xea] sm:$0xff] }
 0x506   : > { %15188 = vmatprep.mubr.bf16.mxu1 %v4258_v13  ;;  %v5054_v13 = vpack.c.bf16 %v5013_v15, %v5012_v38  ;;  %v5055_v33 = vpack.c.bf16 %v5015_v37, %v5014_v32  ;;  %v5504_v15 = vpack.c.bf16 %v5454_v21, %v5453_v8  ;;  %v5456_v37 = vld [vmem:[#allocation4 + $0x6e] sm:$0xff]  ;;  %v5458_v38 = vld [vmem:[#allocation4 + $0x7e] sm:$0xff]  ;;  %v5485_v21 = vld [vmem:[#allocation4 + $0x156] sm:$0xff] }
 0x507   : > { %v5488_v8 = vld [vmem:[#allocation4 + $0x16e] sm:$0xff] }
 0x50d   : > { %15189 = vmatmul.mubr.bf16.gmra.mrb[48].mxu1 %v4259_v27  ;;  %v5019_v27 = vld [vmem:[#allocation4 + $0x10a] sm:$0xff] }
 0x50e   : > { %15192 = vmatprep.mubr.bf16.mxu1 %v4260_v45  ;;  %v5056_v45 = vpack.c.bf16 %v5017_v39, %v5016_v29  ;;  %v5057_v36 = vpack.c.bf16 %v5019_v27, %v5018_v35  ;;  %v16669_v39 = vld [vmem:[%s20354_s3 + $0x128] sm:$0xff]   ;;  %v16675_v29 = vld [vmem:[%s20356_s5 + $0x50] sm:$0xff]  }
 0x50f   : > { %v5460_v35 = vld [vmem:[#allocation4 + $0x8e] sm:$0xff] }
 0x515   : > { %15193 = vmatmul.mubr.bf16.gmra.mrb[56].mxu1 %v4261_v47  ;;  %v5021_v47 = vld [vmem:[#allocation4 + $0x11a] sm:$0xff] }
 0x516   : > { %15212 = vmatprep.mubr.bf16.mxu1 %v5041_v52  ;;  %v5023_v52 = vld [vmem:[#allocation4 + $0x12a] sm:$0xff]  ;;  %v5058_v22 = vpack.c.bf16 %v5021_v47, %v5020_v42  ;;  %v16671_v42 = vld [vmem:[%s20354_s3 + $0x138] sm:$0xff]  }
 0x517   : > { %v5059_v23 = vpack.c.bf16 %v5023_v52, %v5022_v48  ;;  %v5459_v47 = vld [vmem:[#allocation4 + $0x86] sm:$0xff]  ;;  %v5461_v52 = vld [vmem:[#allocation4 + $0x96] sm:$0xff] }
 0x518   : > { %v5507_v48 = vpack.c.bf16 %v5460_v35, %v5459_v47  ;;  %v5495_v35 = vld [vmem:[#allocation4 + $0x1a6] sm:$0xff] }
 0x51d   : > { %15213 = vmatmul.mubr.bf16.vlgmr.msra.gmra.mrb[0].mxu1 %v5042_v40  ;;  %v5025_v40 = vld [vmem:[#allocation4 + $0x13a] sm:$0xff] }
 0x51e   : > { %15269 = vmatpush3.bf16.msra.mxu1 %v18460_v34  ;;  %15216 = vmatprep.mubr.bf16.mxu1 %v5043_v24  ;;  %v16665_v34 = vld [vmem:[%s20356_s5 + $0x48] sm:$0xff]  }
 0x51f   : > { %15270 = vmatprep.subr.bf16.mxu1 %v16655_v26  ;;  %15703 = vmatpush3.bf16.msra.mxu0 %v16665_v34  ;;  %v5033_v34 = vld [vmem:[#allocation4 + $0x17a] sm:$0xff] }
 0x520   : > { %15704 = vmatprep.subr.bf16.mxu0 %v18436_v53  ;;  %v5064_v7 = vpack.c.bf16 %v5033_v34, %v5032_v51  ;;  %v5472_v34 = vld [vmem:[#allocation4 + $0xee] sm:$0xff]  ;;  %v5474_v51 = vld [vmem:[#allocation4 + $0xfe] sm:$0xff] }
 0x522   : > { %15271 = vmatpush3.bf16.msra.mxu1 %v16655_v26  ;;  %v5024_v26 = vld [vmem:[#allocation4 + $0x132] sm:$0xff] }
 0x523   : > { %15272 = vmatprep.subr.bf16.mxu1 %v16657_v43  ;;  %v5060_v24 = vpack.c.bf16 %v5025_v40, %v5024_v26  ;;  %15705 = vmatpush3.bf16.msra.mxu0 %v16675_v29  ;;  %v5464_v40 = vld [vmem:[#allocation4 + $0xae] sm:$0xff]  ;;  %v5463_v26 = vld [vmem:[#allocation4 + $0xa6] sm:$0xff] }
 0x524   : > { %15706 = vmatprep.subr.bf16.mxu0 %v18436_v53 }
 0x525   : > { %15217 = vmatmul.mubr.bf16.gmra.mrb[4].mxu1 %v5044_v41  ;;  %v5028_v41 = vld [vmem:[#allocation4 + $0x152] sm:$0xff] }
 0x526   : > { %15220 = vmatprep.mubr.bf16.mxu1 %v5045_v60  ;;  %15273 = vmatpush3.bf16.msra.mxu1 %v16657_v43  ;;  %v5026_v43 = vld [vmem:[#allocation4 + $0x142] sm:$0xff]  ;;  %v5062_v4 = vpack.c.bf16 %v5029_v18, %v5028_v41  ;;  %v5468_v18 = vld [vmem:[#allocation4 + $0xce] sm:$0xff] }
 0x527   : > { %15274 = vmatprep.subr.bf16.mxu1 %v16658_v56  ;;  %v5061_v0 = vpack.c.bf16 %v5027_v44, %v5026_v43  ;;  %v5466_v44 = vld [vmem:[#allocation4 + $0xbe] sm:$0xff]  ;;  %v5465_v43 = vld [vmem:[#allocation4 + $0xb6] sm:$0xff]  ;;  %v5467_v41 = vld [vmem:[#allocation4 + $0xc6] sm:$0xff] }
 0x52a   : > { %15275 = vmatpush3.bf16.msra.mxu1 %v16658_v56  ;;  %v5030_v56 = vld [vmem:[#allocation4 + $0x162] sm:$0xff] }
 0x52b   : > { %15276 = vmatprep.subr.bf16.mxu1 %v16659_v28  ;;  %v5063_v60 = vpack.c.bf16 %v5031_v54, %v5030_v56  ;;  %v5470_v54 = vld [vmem:[#allocation4 + $0xde] sm:$0xff]  ;;  %v5469_v56 = vld [vmem:[#allocation4 + $0xd6] sm:$0xff] }
 0x52d   : > { %15221 = vmatmul.mubr.bf16.gmra.mrb[8].mxu1 %v5046_v61 }
 0x52e   : > { %15224 = vmatprep.mubr.bf16.mxu1 %v5047_v10  ;;  %15277 = vmatpush3.bf16.msra.mxu1 %v16659_v28  ;;  %v5035_v28 = vld [vmem:[#allocation4 + $0x18a] sm:$0xff] }
 0x52f   : > { %15278 = vmatprep.subr.bf16.mxu1 %v16660_v46  ;;  %v5065_v61 = vpack.c.bf16 %v5035_v28, %v5034_v59  ;;  %v5473_v28 = vld [vmem:[#allocation4 + $0xf6] sm:$0xff] }
 0x532   : > { %15279 = vmatpush3.bf16.msra.mxu1 %v16660_v46  ;;  %v5037_v46 = vld [vmem:[#allocation4 + $0x19a] sm:$0xff] }
 0x533   : > { %15280 = vmatprep.subr.bf16.mxu1 %v16661_v17  ;;  %v5066_v1 = vpack.c.bf16 %v5037_v46, %v5036_v11  ;;  %v5476_v46 = vld [vmem:[#allocation4 + $0x10e] sm:$0xff]  ;;  %v5475_v11 = vld [vmem:[#allocation4 + $0x106] sm:$0xff] }
 0x535   : > { %15225 = vmatmul.mubr.bf16.gmra.mrb[12].mxu1 %v5048_v49  ;;  %v5040_v49 = vld [vmem:[#allocation4 + $0x1b2] sm:$0xff] }
 0x536   : > { %15228 = vmatprep.mubr.bf16.mxu1 %v5049_v14  ;;  %15281 = vmatpush3.bf16.msra.mxu1 %v16661_v17  ;;  %v5445_v14 = vld [vmem:[#allocation4 + $0x16] sm:$0xff] }
 0x537   : > { %15282 = vmatprep.subr.bf16.mxu1 %v16662_v6  ;;  %v5500_v19 = vpack.c.bf16 %v5446_v50, %v5445_v14  ;;  %v4169_v50 = vld [vmem:[#allocation3 + $0x3ac] sm:$0x3f] }
 0x53a   : > { %15283 = vmatpush3.bf16.msra.mxu1 %v16662_v6  ;;  %v5068_v6 = vpack.c.bf16 %v5040_v49, %v5040_v49  ;;  %v5477_v49 = vld [vmem:[#allocation4 + $0x116] sm:$0xff] }
 0x53b   : > { %15340 = vmatprep.subr.bf16.mxu1 %v18492_v20 }
 0x53d   : > { %15229 = vmatmul.mubr.bf16.gmra.mrb[16].mxu1 %v5050_v31  ;;  %v5447_v31 = vld [vmem:[#allocation4 + $0x26] sm:$0xff] }
 0x53e   : > { %15232 = vmatprep.mubr.bf16.mxu1 %v5051_v57  ;;  %v5501_v9 = vpack.c.bf16 %v5448_v25, %v5447_v31  ;;  %v5449_v57 = vld [vmem:[#allocation4 + $0x36] sm:$0xff]  ;;  %v5480_v25 = vld [vmem:[#allocation4 + $0x12e] sm:$0xff]  ;;  %v5479_v31 = vld [vmem:[#allocation4 + $0x126] sm:$0xff] }
 0x53f   : > { %v5502_v5 = vpack.c.bf16 %v5450_v30, %v5449_v57  ;;  %v5482_v30 = vld [vmem:[#allocation4 + $0x13e] sm:$0xff]  ;;  %v5481_v57 = vld [vmem:[#allocation4 + $0x136] sm:$0xff] }
 0x545   : > { %15233 = vmatmul.mubr.bf16.gmra.mrb[20].mxu1 %v5052_v12 }
 0x546   : > { %15236 = vmatprep.mubr.bf16.mxu1 %v5053_v16  ;;  %v16667_v16 = vld [vmem:[%s20354_s3 + $0x118] sm:$0xff]  }
 0x54d   : > { %15237 = vmatmul.mubr.bf16.gmra.mrb[24].mxu1 %v5054_v13  ;;  %v5455_v13 = vld [vmem:[#allocation4 + $0x66] sm:$0xff] }
 0x54e   : > { %15240 = vmatprep.mubr.bf16.mxu1 %v5055_v33  ;;  %v5505_v32 = vpack.c.bf16 %v5456_v37, %v5455_v13  ;;  %v5457_v33 = vld [vmem:[#allocation4 + $0x76] sm:$0xff]  ;;  %v5492_v13 = vld [vmem:[#allocation4 + $0x18e] sm:$0xff] }
 0x54f   : > { %v5506_v27 = vpack.c.bf16 %v5458_v38, %v5457_v33  ;;  %v5489_v37 = vld [vmem:[#allocation4 + $0x176] sm:$0xff]  ;;  %v5491_v33 = vld [vmem:[#allocation4 + $0x186] sm:$0xff] }
 0x555   : > { %15241 = vmatmul.mubr.bf16.gmra.mrb[28].mxu1 %v5056_v45  ;;  %v16670_v45 = vld [vmem:[%s20354_s3 + $0x130] sm:$0xff]  }
 0x556   : > { %15244 = vmatprep.mubr.bf16.mxu1 %v5057_v36  ;;  %v5462_v36 = vld [vmem:[#allocation4 + $0x9e] sm:$0xff] }
 0x55d   : > { %15245 = vmatmul.mubr.bf16.gmra.mrb[32].mxu1 %v5058_v22  ;;  %v5508_v22 = vpack.c.bf16 %v5462_v36, %v5461_v52  ;;  %v5496_v36 = vld [vmem:[#allocation4 + $0x1ae] sm:$0xff]  ;;  %v5498_v52 = vld [vmem:[#allocation4 + $0x1be] sm:$0xff] }
 0x55e   : > { %15248 = vmatprep.mubr.bf16.mxu1 %v5059_v23  ;;  %v18533_v23 = vld [vmem:[%s20354_s3 + $0x140] sm:$0xff]  }
 0x565   : > { %15249 = vmatmul.mubr.bf16.gmra.mrb[36].mxu1 %v5060_v24  ;;  %v5509_v24 = vpack.c.bf16 %v5464_v40, %v5463_v26  ;;  %v5497_v26 = vld [vmem:[#allocation4 + $0x1b6] sm:$0xff] }
 0x566   : > { %15252 = vmatprep.mubr.bf16.mxu1 %v5061_v0  ;;  %v5510_v0 = vpack.c.bf16 %v5466_v44, %v5465_v43  ;;  %v5525_v44 = vpack.c.bf16 %v5496_v36, %v5495_v35  ;;  %v5526_v43 = vpack.c.bf16 %v5498_v52, %v5497_v26  ;;  %v5932_v35 = vld [vmem:[#allocation4 + $0xf7] sm:$0xff]  ;;  %v5930_v36 = vld [vmem:[#allocation4 + $0xe7] sm:$0xff] }
 0x56d   : > { %15253 = vmatmul.mubr.bf16.gmra.mrb[40].mxu1 %v5062_v4  ;;  %v5511_v4 = vpack.c.bf16 %v5468_v18, %v5467_v41  ;;  %v5904_v18 = vld [vmem:[#allocation4 + $0x17] sm:$0xff] }
 0x56e   : > { %15256 = vmatprep.mubr.bf16.mxu1 %v5063_v60  ;;  %v5512_v60 = vpack.c.bf16 %v5470_v54, %v5469_v56  ;;  %v5905_v54 = vld [vmem:[#allocation4 + $0x1f] sm:$0xff]  ;;  %v5906_v56 = vld [vmem:[#allocation4 + $0x27] sm:$0xff] }
 0x56f   : > { %v5959_v41 = vpack.c.bf16 %v5905_v54, %v5904_v18  ;;  %v5939_v18 = vld [vmem:[#allocation4 + $0x12f] sm:$0xff]  ;;  %v5941_v54 = vld [vmem:[#allocation4 + $0x13f] sm:$0xff] }
 0x575   : > { %15257 = vmatmul.mubr.bf16.gmra.mrb[44].mxu1 %v5064_v7  ;;  %v5471_v7 = vld [vmem:[#allocation4 + $0xe6] sm:$0xff] }
 0x576   : > { %15260 = vmatprep.mubr.bf16.mxu1 %v5065_v61  ;;  %v5513_v59 = vpack.c.bf16 %v5472_v34, %v5471_v7  ;;  %v5514_v61 = vpack.c.bf16 %v5474_v51, %v5473_v28  ;;  %v5908_v34 = vld [vmem:[#allocation4 + $0x37] sm:$0xff]  ;;  %v5910_v7 = vld [vmem:[#allocation4 + $0x47] sm:$0xff] }
 0x577   : > { %v16674_v51 = vld [vmem:[%s20354_s3 + $0x150] sm:$0xff]  }
 0x578   : > { %v18495_v63 = vpop.f32.mrb[52].mxu1 }
 0x579   : > { %v18497_v10 = vpop.f32.mrb[53].mxu1 }
 0x57a   : > { %v15123_v17 = vpop.f32.mrb[54].mxu1 }
 0x57b   : > { %v18499_v3 = vpop.f32.mrb[55].mxu1  ;;  %v5478_v17 = vld [vmem:[#allocation4 + $0x11e] sm:$0xff] }
 0x57c   : > { %v5516_v14 = vpack.c.bf16 %v5478_v17, %v5477_v49  ;;  %v5912_v17 = vld [vmem:[#allocation4 + $0x57] sm:$0xff]  ;;  %v5915_v49 = vld [vmem:[#allocation4 + $0x6f] sm:$0xff] }
 0x57d   : > { %15261 = vmatmul.mubr.bf16.gmra.mrb[48].mxu1 %v5066_v1  ;;  %v5515_v1 = vpack.c.bf16 %v5476_v46, %v5475_v11  ;;  %v16676_v11 = vld [vmem:[%s20354_s3 + $0x158] sm:$0xff]  }
 0x57e   : > { %15264 = vmatprep.mubr.bf16.mxu1 %v5067_v2  ;;  %v5452_v2 = vld [vmem:[#allocation4 + $0x4e] sm:$0xff] }
 0x57f   : > { %v5503_v12 = vpack.c.bf16 %v5452_v2, %v5451_v62  ;;  %v5483_v62 = vld [vmem:[#allocation4 + $0x146] sm:$0xff] }
 0x585   : > { %15265 = vmatmul.mubr.bf16.gmra.mrb[60].mxu1 %v5068_v6  ;;  %v4172_v6 = vld [vmem:[#allocation3 + $0x3c2] sm:$0x3f] }
 0x586   : > { %15284 = vmatprep.mubr.bf16.mxu1 %v5500_v19  ;;  %v4175_v19 = vmax.f32 %v4169_v50, %v4172_v6  ;;  %v5917_v50 = vld [vmem:[#allocation4 + $0x7f] sm:$0xff]  ;;  %v5914_v6 = vld [vmem:[#allocation4 + $0x67] sm:$0xff] }
 0x588   : > { %4178 = vst [vmem:[#allocation4 + $0x1de] sm:$0x3f] %v4175_v19  ;;  %v5916_v19 = vld [vmem:[#allocation4 + $0x77] sm:$0xff] }
 0x58d   : > { %15285 = vmatmul.mubr.bf16.vlgmr.msra.gmra.mrb[0].mxu1 %v5501_v9  ;;  %v5517_v9 = vpack.c.bf16 %v5480_v25, %v5479_v31  ;;  %v16678_v25 = vld [vmem:[%s20354_s3 + $0x168] sm:$0xff]   ;;  %v16679_v31 = vld [vmem:[%s20354_s3 + $0x170] sm:$0xff]  }
 0x58e   : > { %15341 = vmatpush3.bf16.msra.mxu1 %v18492_v20  ;;  %15288 = vmatprep.mubr.bf16.mxu1 %v5502_v5  ;;  %v16668_v20 = vld [vmem:[%s20354_s3 + $0x120] sm:$0xff]  }
 0x58f   : > { %15342 = vmatprep.subr.bf16.mxu1 %v16664_v58  ;;  %v5484_v5 = vld [vmem:[#allocation4 + $0x14e] sm:$0xff] }
 0x590   : > { %v5519_v2 = vpack.c.bf16 %v5484_v5, %v5483_v62  ;;  %v16680_v62 = vld [vmem:[%s20354_s3 + $0x178] sm:$0xff]  }
 0x592   : > { %15343 = vmatpush3.bf16.msra.mxu1 %v16664_v58  ;;  %v5518_v58 = vpack.c.bf16 %v5482_v30, %v5481_v57  ;;  %v5965_v30 = vpack.c.bf16 %v5917_v50, %v5916_v19  ;;  %v5921_v57 = vld [vmem:[#allocation4 + $0x9f] sm:$0xff] }
 0x593   : > { %15344 = vmatprep.subr.bf16.mxu1 %v16666_v55 }
 0x595   : > { %15289 = vmatmul.mubr.bf16.gmra.mrb[4].mxu1 %v5503_v12 }
 0x596   : > { %15292 = vmatprep.mubr.bf16.mxu1 %v5504_v15  ;;  %15345 = vmatpush3.bf16.msra.mxu1 %v16666_v55  ;;  %v5486_v55 = vld [vmem:[#allocation4 + $0x15e] sm:$0xff]  ;;  %v5487_v15 = vld [vmem:[#allocation4 + $0x166] sm:$0xff] }
 0x597   : > { %15346 = vmatprep.subr.bf16.mxu1 %v16667_v16  ;;  %v5520_v12 = vpack.c.bf16 %v5486_v55, %v5485_v21  ;;  %v5920_v55 = vld [vmem:[#allocation4 + $0x97] sm:$0xff]  ;;  %v16685_v21 = vld [vmem:[%s20356_s5 + $0x58] sm:$0xff]  }
 0x598   : > { %15707 = vmatpush3.bf16.msra.mxu0 %v16685_v21 }
 0x599   : > { %15708 = vmatprep.subr.bf16.mxu0 %v18436_v53  ;;  %v5933_v53 = vld [vmem:[#allocation4 + $0xff] sm:$0xff] }
 0x59a   : > { %15347 = vmatpush3.bf16.msra.mxu1 %v16667_v16  ;;  %v5490_v16 = vld [vmem:[#allocation4 + $0x17e] sm:$0xff]  ;;  %v5973_v52 = vpack.c.bf16 %v5933_v53, %v5932_v35 }
 0x59b   : > { %15348 = vmatprep.subr.bf16.mxu1 %v16668_v20  ;;  %v5522_v38 = vpack.c.bf16 %v5490_v16, %v5489_v37  ;;  %v5925_v16 = vld [vmem:[#allocation4 + $0xbf] sm:$0xff]  ;;  %v5924_v37 = vld [vmem:[#allocation4 + $0xb7] sm:$0xff] }
 0x59c   : > { %v6372_v35 = vld [vmem:[#allocation4 + $0x60] sm:$0xff] }
 0x59d   : > { %15293 = vmatmul.mubr.bf16.gmra.mrb[8].mxu1 %v5505_v32  ;;  %v5494_v32 = vld [vmem:[#allocation4 + $0x19e] sm:$0xff] }
 0x59e   : > { %15296 = vmatprep.mubr.bf16.mxu1 %v5506_v27  ;;  %15349 = vmatpush3.bf16.msra.mxu1 %v16668_v20  ;;  %v5521_v20 = vpack.c.bf16 %v5488_v8, %v5487_v15  ;;  %v5493_v27 = vld [vmem:[#allocation4 + $0x196] sm:$0xff]  ;;  %v5922_v15 = vld [vmem:[#allocation4 + $0xa7] sm:$0xff] }
 0x59f   : > { %15350 = vmatprep.subr.bf16.mxu1 %v16669_v39  ;;  %v5524_v29 = vpack.c.bf16 %v5494_v32, %v5493_v27  ;;  %v5923_v8 = vld [vmem:[#allocation4 + $0xaf] sm:$0xff]  ;;  %v5928_v27 = vld [vmem:[#allocation4 + $0xd7] sm:$0xff] }
 0x5a0   : > { %v5927_v32 = vld [vmem:[#allocation4 + $0xcf] sm:$0xff] }
 0x5a2   : > { %15351 = vmatpush3.bf16.msra.mxu1 %v16669_v39  ;;  %v5523_v39 = vpack.c.bf16 %v5492_v13, %v5491_v33  ;;  %v5926_v13 = vld [vmem:[#allocation4 + $0xc7] sm:$0xff]  ;;  %v5929_v33 = vld [vmem:[#allocation4 + $0xdf] sm:$0xff] }
 0x5a3   : > { %15352 = vmatprep.subr.bf16.mxu1 %v16670_v45 }
 0x5a5   : > { %15297 = vmatmul.mubr.bf16.gmra.mrb[12].mxu1 %v5507_v48 }
 0x5a6   : > { %15300 = vmatprep.mubr.bf16.mxu1 %v5508_v22  ;;  %15353 = vmatpush3.bf16.msra.mxu1 %v16670_v45 }
 0x5a7   : > { %15354 = vmatprep.subr.bf16.mxu1 %v16671_v42 }
 0x5aa   : > { %15355 = vmatpush3.bf16.msra.mxu1 %v16671_v42 }
 0x5ab   : > { %15412 = vmatprep.subr.bf16.mxu1 %v18533_v23 }
 0x5ad   : > { %15301 = vmatmul.mubr.bf16.gmra.mrb[16].mxu1 %v5509_v24 }
 0x5ae   : > { %15304 = vmatprep.mubr.bf16.mxu1 %v5510_v0  ;;  %v5499_v0 = vld [vmem:[#allocation4 + $0x1c6] sm:$0xff] }
 0x5b5   : > { %15305 = vmatmul.mubr.bf16.gmra.mrb[20].mxu1 %v5511_v4  ;;  %v5907_v4 = vld [vmem:[#allocation4 + $0x2f] sm:$0xff] }
 0x5b6   : > { %15308 = vmatprep.mubr.bf16.mxu1 %v5512_v60  ;;  %v5960_v60 = vpack.c.bf16 %v5907_v4, %v5906_v56  ;;  %v5940_v4 = vld [vmem:[#allocation4 + $0x137] sm:$0xff]  ;;  %v5943_v56 = vld [vmem:[#allocation4 + $0x14f] sm:$0xff] }
 0x5bd   : > { %15309 = vmatmul.mubr.bf16.gmra.mrb[24].mxu1 %v5513_v59  ;;  %v5911_v59 = vld [vmem:[#allocation4 + $0x4f] sm:$0xff] }
 0x5be   : > { %15312 = vmatprep.mubr.bf16.mxu1 %v5514_v61  ;;  %v5913_v61 = vld [vmem:[#allocation4 + $0x5f] sm:$0xff]  ;;  %v5962_v46 = vpack.c.bf16 %v5911_v59, %v5910_v7  ;;  %v5947_v7 = vld [vmem:[#allocation4 + $0x16f] sm:$0xff]  ;;  %v5948_v59 = vld [vmem:[#allocation4 + $0x177] sm:$0xff] }
 0x5c5   : > { %15313 = vmatmul.mubr.bf16.gmra.mrb[28].mxu1 %v5515_v1  ;;  %v5963_v1 = vpack.c.bf16 %v5913_v61, %v5912_v17  ;;  %v5949_v61 = vld [vmem:[#allocation4 + $0x17f] sm:$0xff] }
 0x5c6   : > { %15316 = vmatprep.mubr.bf16.mxu1 %v5516_v14  ;;  %v5964_v14 = vpack.c.bf16 %v5915_v49, %v5914_v6  ;;  %v5950_v49 = vld [vmem:[#allocation4 + $0x187] sm:$0xff]  ;;  %v5952_v6 = vld [vmem:[#allocation4 + $0x197] sm:$0xff] }
 0x5cd   : > { %15317 = vmatmul.mubr.bf16.gmra.mrb[32].mxu1 %v5517_v9  ;;  %v5919_v9 = vld [vmem:[#allocation4 + $0x8f] sm:$0xff] }
 0x5ce   : > { %15320 = vmatprep.mubr.bf16.mxu1 %v5518_v58  ;;  %v5918_v58 = vld [vmem:[#allocation4 + $0x87] sm:$0xff] }
 0x5cf   : > { %v5966_v5 = vpack.c.bf16 %v5919_v9, %v5918_v58 }
 0x5d5   : > { %15321 = vmatmul.mubr.bf16.gmra.mrb[36].mxu1 %v5519_v2  ;;  %v5967_v2 = vpack.c.bf16 %v5921_v57, %v5920_v55  ;;  %v5957_v57 = vld [vmem:[#allocation4 + $0x1bf] sm:$0xff] }
 0x5d6   : > { %15324 = vmatprep.mubr.bf16.mxu1 %v5520_v12  ;;  %v18573_v12 = vld [vmem:[%s20354_s3 + $0x180] sm:$0xff]  }
 0x5dd   : > { %15325 = vmatmul.mubr.bf16.gmra.mrb[40].mxu1 %v5521_v20  ;;  %v5968_v20 = vpack.c.bf16 %v5923_v8, %v5922_v15  ;;  %v6363_v15 = vld [vmem:[#allocation4 + $0x18] sm:$0xff] }
 0x5de   : > { %15328 = vmatprep.mubr.bf16.mxu1 %v5522_v38  ;;  %v5969_v38 = vpack.c.bf16 %v5925_v16, %v5924_v37  ;;  %v5958_v16 = vld [vmem:[#allocation4 + $0x1c7] sm:$0xff] }
 0x5e5   : > { %15329 = vmatmul.mubr.bf16.gmra.mrb[44].mxu1 %v5523_v39  ;;  %v5970_v39 = vpack.c.bf16 %v5927_v32, %v5926_v13  ;;  %v6365_v13 = vld [vmem:[#allocation4 + $0x28] sm:$0xff] }
 0x5e6   : > { %15332 = vmatprep.mubr.bf16.mxu1 %v5524_v29  ;;  %v5971_v29 = vpack.c.bf16 %v5929_v33, %v5928_v27  ;;  %v6367_v33 = vld [vmem:[#allocation4 + $0x38] sm:$0xff] }
 0x5e7   : > { %v16683_v27 = vld [vmem:[%s20354_s3 + $0x190] sm:$0xff]  }
 0x5e8   : > { %v15194_v45 = vpop.f32.mrb[56].mxu1 }
 0x5e9   : > { %v18537_v47 = vadd.f32 %v15194_v45, %v18495_v63  ;;  %v4972_v48 = vpop.f32.mrb[57].mxu1  ;;  %v5527_v63 = vpack.c.bf16 %v5499_v0, %v5499_v0  ;;  %v5931_v45 = vld [vmem:[#allocation4 + $0xef] sm:$0xff] }
 0x5ea   : > { %v18540_v42 = vadd.f32 %v4972_v48, %v18497_v10  ;;  %v15195_v22 = vpop.f32.mrb[58].mxu1  ;;  %v5909_v10 = vld [vmem:[#allocation4 + $0x3f] sm:$0xff]  ;;  %v5972_v48 = vpack.c.bf16 %v5931_v45, %v5930_v36  ;;  %v6370_v45 = vld [vmem:[#allocation4 + $0x50] sm:$0xff] }
 0x5eb   : > { %v4975_v40 = vpop.f32.mrb[59].mxu1  ;;  %v5961_v28 = vpack.c.bf16 %v5909_v10, %v5908_v34  ;;  %v5935_v22 = vld [vmem:[#allocation4 + $0x10f] sm:$0xff]  ;;  %v5977_v10 = vpack.c.bf16 %v5941_v54, %v5940_v4  ;;  %v5942_v34 = vld [vmem:[#allocation4 + $0x147] sm:$0xff]  ;;  %v6371_v36 = vld [vmem:[#allocation4 + $0x58] sm:$0xff] }
 0x5ec   : > { %v18543_v24 = vadd.f32 %v4975_v40, %v18499_v3  ;;  %v16673_v3 = vld [vmem:[%s20354_s3 + $0x148] sm:$0xff]   ;;  %v5937_v40 = vld [vmem:[#allocation4 + $0x11f] sm:$0xff]  ;;  %v6377_v4 = vld [vmem:[#allocation4 + $0x88] sm:$0xff] }
 0x5ed   : > { %15333 = vmatmul.mubr.bf16.gmra.mrb[48].mxu1 %v5525_v44  ;;  %v5934_v44 = vld [vmem:[#allocation4 + $0x107] sm:$0xff]  ;;  %v16688_v54 = vld [vmem:[%s20354_s3 + $0x1b0] sm:$0xff]  }
 0x5ee   : > { %15336 = vmatprep.mubr.bf16.mxu1 %v5526_v43  ;;  %v5974_v26 = vpack.c.bf16 %v5935_v22, %v5934_v44  ;;  %v5936_v43 = vld [vmem:[#allocation4 + $0x117] sm:$0xff]  ;;  %v6373_v44 = vld [vmem:[#allocation4 + $0x68] sm:$0xff] }
 0x5ef   : > { %v5975_v0 = vpack.c.bf16 %v5937_v40, %v5936_v43  ;;  %v6374_v22 = vld [vmem:[#allocation4 + $0x70] sm:$0xff]  ;;  %v6376_v40 = vld [vmem:[#allocation4 + $0x80] sm:$0xff]  ;;  %v6375_v43 = vld [vmem:[#allocation4 + $0x78] sm:$0xff] }
 0x5f5   : > { %15337 = vmatmul.mubr.bf16.gmra.mrb[64].mxu1 %v5527_v63  ;;  %v5938_v63 = vld [vmem:[#allocation4 + $0x127] sm:$0xff] }
 0x5f6   : > { %15356 = vmatprep.mubr.bf16.mxu1 %v5959_v41  ;;  %v5976_v41 = vpack.c.bf16 %v5939_v18, %v5938_v63  ;;  %v6424_v18 = vpack.c.bf16 %v6376_v40, %v6375_v43  ;;  %v6378_v63 = vld [vmem:[#allocation4 + $0x90] sm:$0xff]  ;;  %v6409_v40 = vld [vmem:[#allocation4 + $0x188] sm:$0xff] }
 0x5fd   : > { %15357 = vmatmul.mubr.bf16.vlgmr.msra.gmra.mrb[0].mxu1 %v5960_v60  ;;  %v5945_v60 = vld [vmem:[#allocation4 + $0x15f] sm:$0xff] }
 0x5fe   : > { %15413 = vmatpush3.bf16.msra.mxu1 %v18533_v23  ;;  %15360 = vmatprep.mubr.bf16.mxu1 %v5961_v28  ;;  %v16677_v23 = vld [vmem:[%s20354_s3 + $0x160] sm:$0xff]   ;;  %v5944_v28 = vld [vmem:[#allocation4 + $0x157] sm:$0xff] }
 0x5ff   : > { %15414 = vmatprep.subr.bf16.mxu1 %v16673_v3 }
 0x602   : > { %15415 = vmatpush3.bf16.msra.mxu1 %v16673_v3  ;;  %v5978_v3 = vpack.c.bf16 %v5943_v56, %v5942_v34  ;;  %v6379_v56 = vld [vmem:[#allocation4 + $0x98] sm:$0xff] }
 0x603   : > { %15416 = vmatprep.subr.bf16.mxu1 %v16674_v51 }
 0x605   : > { %15361 = vmatmul.mubr.bf16.gmra.mrb[4].mxu1 %v5962_v46  ;;  %v5946_v46 = vld [vmem:[#allocation4 + $0x167] sm:$0xff] }
 0x606   : > { %15364 = vmatprep.mubr.bf16.mxu1 %v5963_v1  ;;  %15417 = vmatpush3.bf16.msra.mxu1 %v16674_v51  ;;  %v5979_v51 = vpack.c.bf16 %v5945_v60, %v5944_v28  ;;  %v5980_v17 = vpack.c.bf16 %v5947_v7, %v5946_v46  ;;  %v5951_v1 = vld [vmem:[#allocation4 + $0x18f] sm:$0xff]  ;;  %v16689_v60 = vld [vmem:[%s20354_s3 + $0x1b8] sm:$0xff]  }
 0x607   : > { %15418 = vmatprep.subr.bf16.mxu1 %v16676_v11  ;;  %v5982_v50 = vpack.c.bf16 %v5951_v1, %v5950_v49  ;;  %v6382_v28 = vld [vmem:[#allocation4 + $0xb0] sm:$0xff]  ;;  %v6381_v7 = vld [vmem:[#allocation4 + $0xa8] sm:$0xff] }
 0x608   : > { %v6386_v1 = vld [vmem:[#allocation4 + $0xd0] sm:$0xff]  ;;  %v18617_v49 = vld [vmem:[#allocation4 + $0x1e4] sm:$0xff] }
 0x60a   : > { %15419 = vmatpush3.bf16.msra.mxu1 %v16676_v11  ;;  %v5981_v11 = vpack.c.bf16 %v5949_v61, %v5948_v59  ;;  %v6427_v59 = vpack.c.bf16 %v6382_v28, %v6381_v7  ;;  %v6383_v61 = vld [vmem:[#allocation4 + $0xb8] sm:$0xff] }
 0x60b   : > { %15420 = vmatprep.subr.bf16.mxu1 %v16677_v23 }
 0x60d   : > { %15365 = vmatmul.mubr.bf16.gmra.mrb[8].mxu1 %v5964_v14 }
 0x60e   : > { %15368 = vmatprep.mubr.bf16.mxu1 %v5965_v30  ;;  %15421 = vmatpush3.bf16.msra.mxu1 %v16677_v23  ;;  %v5953_v23 = vld [vmem:[#allocation4 + $0x19f] sm:$0xff]  ;;  %v5955_v30 = vld [vmem:[#allocation4 + $0x1af] sm:$0xff] }
 0x60f   : > { %15422 = vmatprep.subr.bf16.mxu1 %v16678_v25  ;;  %v5983_v14 = vpack.c.bf16 %v5953_v23, %v5952_v6  ;;  %v6388_v23 = vld [vmem:[#allocation4 + $0xe0] sm:$0xff]  ;;  %v6387_v6 = vld [vmem:[#allocation4 + $0xd8] sm:$0xff] }
 0x612   : > { %15423 = vmatpush3.bf16.msra.mxu1 %v16678_v25  ;;  %v5954_v25 = vld [vmem:[#allocation4 + $0x1a7] sm:$0xff] }
 0x613   : > { %15424 = vmatprep.subr.bf16.mxu1 %v16679_v31 }
 0x615   : > { %15369 = vmatmul.mubr.bf16.gmra.mrb[12].mxu1 %v5966_v5 }
 0x616   : > { %15372 = vmatprep.mubr.bf16.mxu1 %v5967_v2  ;;  %15425 = vmatpush3.bf16.msra.mxu1 %v16679_v31  ;;  %v5956_v2 = vld [vmem:[#allocation4 + $0x1b7] sm:$0xff] }
 0x617   : > { %15426 = vmatprep.subr.bf16.mxu1 %v16680_v62  ;;  %v5985_v8 = vpack.c.bf16 %v5957_v57, %v5956_v2  ;;  %v6393_v2 = vld [vmem:[#allocation4 + $0x108] sm:$0xff] }
 0x61a   : > { %15427 = vmatpush3.bf16.msra.mxu1 %v16680_v62  ;;  %v5984_v62 = vpack.c.bf16 %v5955_v30, %v5954_v25  ;;  %v6391_v25 = vld [vmem:[#allocation4 + $0xf8] sm:$0xff]  ;;  %v6392_v30 = vld [vmem:[#allocation4 + $0x100] sm:$0xff] }
 0x61b   : > { %15484 = vmatprep.subr.bf16.mxu1 %v18573_v12 }
 0x61d   : > { %15373 = vmatmul.mubr.bf16.gmra.mrb[16].mxu1 %v5968_v20  ;;  %v6364_v20 = vld [vmem:[#allocation4 + $0x20] sm:$0xff] }
 0x61e   : > { %15376 = vmatprep.mubr.bf16.mxu1 %v5969_v38  ;;  %v6418_v37 = vpack.c.bf16 %v6364_v20, %v6363_v15  ;;  %v6366_v38 = vld [vmem:[#allocation4 + $0x30] sm:$0xff] }
 0x61f   : > { %v6419_v32 = vpack.c.bf16 %v6366_v38, %v6365_v13  ;;  %v6398_v20 = vld [vmem:[#allocation4 + $0x130] sm:$0xff] }
 0x625   : > { %15377 = vmatmul.mubr.bf16.gmra.mrb[20].mxu1 %v5970_v39 }
 0x626   : > { %15380 = vmatprep.mubr.bf16.mxu1 %v5971_v29  ;;  %v6369_v29 = vld [vmem:[#allocation4 + $0x48] sm:$0xff] }
 0x627   : > { %v6421_v53 = vpack.c.bf16 %v6370_v45, %v6369_v29  ;;  %v6406_v45 = vld [vmem:[#allocation4 + $0x170] sm:$0xff] }
 0x62d   : > { %15381 = vmatmul.mubr.bf16.gmra.mrb[24].mxu1 %v5972_v48  ;;  %v16684_v48 = vld [vmem:[%s20354_s3 + $0x198] sm:$0xff]  }
 0x62e   : > { %15384 = vmatprep.mubr.bf16.mxu1 %v5973_v52  ;;  %v6422_v52 = vpack.c.bf16 %v6372_v35, %v6371_v36  ;;  %v6407_v35 = vld [vmem:[#allocation4 + $0x178] sm:$0xff]  ;;  %v6405_v36 = vld [vmem:[#allocation4 + $0x168] sm:$0xff] }
 0x635   : > { %15385 = vmatmul.mubr.bf16.gmra.mrb[28].mxu1 %v5974_v26  ;;  %v6423_v26 = vpack.c.bf16 %v6374_v22, %v6373_v44  ;;  %v6412_v22 = vld [vmem:[#allocation4 + $0x1a0] sm:$0xff] }
 0x636   : > { %15388 = vmatprep.mubr.bf16.mxu1 %v5975_v0  ;;  %v16687_v0 = vld [vmem:[%s20354_s3 + $0x1a8] sm:$0xff]  }
 0x63d   : > { %15389 = vmatmul.mubr.bf16.gmra.mrb[32].mxu1 %v5976_v41  ;;  %v6380_v41 = vld [vmem:[#allocation4 + $0xa0] sm:$0xff] }
 0x63e   : > { %15392 = vmatprep.mubr.bf16.mxu1 %v5977_v10  ;;  %v6425_v10 = vpack.c.bf16 %v6378_v63, %v6377_v4  ;;  %v6426_v34 = vpack.c.bf16 %v6380_v41, %v6379_v56  ;;  %v6415_v4 = vld [vmem:[#allocation4 + $0x1b8] sm:$0xff] }
 0x645   : > { %15393 = vmatmul.mubr.bf16.gmra.mrb[36].mxu1 %v5978_v3  ;;  %v18611_v3 = vld [vmem:[%s20354_s3 + $0x1c0] sm:$0xff]  }
 0x646   : > { %15396 = vmatprep.mubr.bf16.mxu1 %v5979_v51  ;;  %v6384_v51 = vld [vmem:[#allocation4 + $0xc0] sm:$0xff] }
 0x647   : > { %v6428_v46 = vpack.c.bf16 %v6384_v51, %v6383_v61  ;;  %v17193_v51 = vld [vmem:[#allocation4 + $0x1c0] sm:$0xff]  ;;  %v6823_v61 = vld [vmem:[#allocation4 + $0x34] sm:$0xff] }
 0x648   : > { %v6444_v7 = vpack.c.bf16 %v17193_v51, %v6415_v4  ;;  %v6850_v4 = vld [vmem:[#allocation4 + $0x10c] sm:$0xff]  ;;  %v6852_v51 = vld [vmem:[#allocation4 + $0x11c] sm:$0xff] }
 0x64d   : > { %15397 = vmatmul.mubr.bf16.gmra.mrb[40].mxu1 %v5980_v17  ;;  %v16694_v17 = vld [vmem:[%s20356_s5 + $0x60] sm:$0xff]  }
 0x64e   : > { %15400 = vmatprep.mubr.bf16.mxu1 %v5981_v11  ;;  %v6385_v11 = vld [vmem:[#allocation4 + $0xc8] sm:$0xff]  ;;  %15709 = vmatpush3.bf16.msra.mxu0 %v16694_v17 }
 0x64f   : > { %15710 = vmatprep.subr.bf16.mxu0 %v18617_v49 }
 0x655   : > { %15401 = vmatmul.mubr.bf16.gmra.mrb[44].mxu1 %v5982_v50  ;;  %v6429_v50 = vpack.c.bf16 %v6386_v1, %v6385_v11  ;;  %v6825_v11 = vld [vmem:[#allocation4 + $0x44] sm:$0xff]  ;;  %v6824_v1 = vld [vmem:[#allocation4 + $0x3c] sm:$0xff] }
 0x656   : > { %15404 = vmatprep.mubr.bf16.mxu1 %v5983_v14  ;;  %v6430_v14 = vpack.c.bf16 %v6388_v23, %v6387_v6  ;;  %v6878_v23 = vpack.c.bf16 %v6825_v11, %v6824_v1  ;;  %v6856_v11 = vld [vmem:[#allocation4 + $0x13c] sm:$0xff] }
 0x658   : > { %v15266_v19 = vpop.f32.mrb[60].mxu1 }
 0x659   : > { %v18578_v31 = vadd.f32 %v15266_v19, %v18537_v47  ;;  %v5376_v9 = vpop.f32.mrb[61].mxu1  ;;  %v5986_v47 = vpack.c.bf16 %v5958_v16, %v5958_v16  ;;  %v6390_v19 = vld [vmem:[#allocation4 + $0xf0] sm:$0xff]  ;;  %v6395_v16 = vld [vmem:[#allocation4 + $0x118] sm:$0xff] }
 0x65a   : > { %v18581_v58 = vadd.f32 %v5376_v9, %v18540_v42  ;;  %v15267_v5 = vpop.f32.mrb[62].mxu1  ;;  %v6368_v42 = vld [vmem:[#allocation4 + $0x40] sm:$0xff]  ;;  %v6389_v9 = vld [vmem:[#allocation4 + $0xe8] sm:$0xff] }
 0x65b   : > { %v5379_v55 = vpop.f32.mrb[63].mxu1  ;;  %v6420_v39 = vpack.c.bf16 %v6368_v42, %v6367_v33  ;;  %v6431_v57 = vpack.c.bf16 %v6390_v19, %v6389_v9  ;;  %v6432_v5 = vpack.c.bf16 %v6392_v30, %v6391_v25  ;;  %v6399_v42 = vld [vmem:[#allocation4 + $0x138] sm:$0xff]  ;;  %v6404_v33 = vld [vmem:[#allocation4 + $0x160] sm:$0xff] }
 0x65c   : > { %v18584_v21 = vadd.f32 %v5379_v55, %v18543_v24  ;;  %v16682_v24 = vld [vmem:[%s20354_s3 + $0x188] sm:$0xff]   ;;  %v6829_v19 = vld [vmem:[#allocation4 + $0x64] sm:$0xff]  ;;  %v6828_v30 = vld [vmem:[#allocation4 + $0x5c] sm:$0xff] }
 0x65d   : > { %15405 = vmatmul.mubr.bf16.gmra.mrb[48].mxu1 %v5984_v62  ;;  %v6394_v55 = vld [vmem:[#allocation4 + $0x110] sm:$0xff]  ;;  %v6396_v62 = vld [vmem:[#allocation4 + $0x120] sm:$0xff]  ;;  %v6880_v9 = vpack.c.bf16 %v6829_v19, %v6828_v30 }
 0x65e   : > { %15408 = vmatprep.mubr.bf16.mxu1 %v5985_v8  ;;  %v6433_v8 = vpack.c.bf16 %v6394_v55, %v6393_v2  ;;  %v6434_v15 = vpack.c.bf16 %v6396_v62, %v6395_v16  ;;  %v6831_v25 = vld [vmem:[#allocation4 + $0x74] sm:$0xff]  ;;  %v6833_v62 = vld [vmem:[#allocation4 + $0x84] sm:$0xff] }
 0x65f   : > { %v6835_v2 = vld [vmem:[#allocation4 + $0x94] sm:$0xff]  ;;  %v6865_v30 = vld [vmem:[#allocation4 + $0x184] sm:$0xff] }
 0x665   : > { %15409 = vmatmul.mubr.bf16.gmra.mrb[68].mxu1 %v5986_v47  ;;  %v6400_v47 = vld [vmem:[#allocation4 + $0x140] sm:$0xff] }
 0x666   : > { %15428 = vmatprep.mubr.bf16.mxu1 %v6418_v37  ;;  %v6397_v37 = vld [vmem:[#allocation4 + $0x128] sm:$0xff]  ;;  %v6436_v13 = vpack.c.bf16 %v6400_v47, %v6399_v42 }
 0x667   : > { %v6435_v38 = vpack.c.bf16 %v6398_v20, %v6397_v37  ;;  %v16696_v20 = vld [vmem:[%s20354_s3 + $0x1e8] sm:$0xff]   ;;  %v16697_v37 = vld [vmem:[%s20354_s3 + $0x1f0] sm:$0xff]   ;;  %v6837_v42 = vld [vmem:[#allocation4 + $0xa4] sm:$0xff] }
 0x66d   : > { %15429 = vmatmul.mubr.bf16.vlgmr.msra.gmra.mrb[0].mxu1 %v6419_v32  ;;  %v6402_v32 = vld [vmem:[#allocation4 + $0x150] sm:$0xff] }
 0x66e   : > { %15485 = vmatpush3.bf16.msra.mxu1 %v18573_v12  ;;  %15432 = vmatprep.mubr.bf16.mxu1 %v6420_v39  ;;  %v16686_v12 = vld [vmem:[%s20354_s3 + $0x1a0] sm:$0xff]  }
 0x66f   : > { %15486 = vmatprep.subr.bf16.mxu1 %v16682_v24 }
 0x672   : > { %15487 = vmatpush3.bf16.msra.mxu1 %v16682_v24  ;;  %v6401_v24 = vld [vmem:[#allocation4 + $0x148] sm:$0xff] }
 0x673   : > { %15488 = vmatprep.subr.bf16.mxu1 %v16683_v27  ;;  %v6437_v39 = vpack.c.bf16 %v6402_v32, %v6401_v24  ;;  %v16698_v24 = vld [vmem:[%s20354_s3 + $0x1f8] sm:$0xff]  }
 0x675   : > { %15433 = vmatmul.mubr.bf16.gmra.mrb[4].mxu1 %v6421_v53  ;;  %v6408_v53 = vld [vmem:[#allocation4 + $0x180] sm:$0xff] }
 0x676   : > { %15436 = vmatprep.mubr.bf16.mxu1 %v6422_v52  ;;  %15489 = vmatpush3.bf16.msra.mxu1 %v16683_v27  ;;  %v6403_v27 = vld [vmem:[#allocation4 + $0x158] sm:$0xff]  ;;  %v6440_v52 = vpack.c.bf16 %v6408_v53, %v6407_v35 }
 0x677   : > { %15490 = vmatprep.subr.bf16.mxu1 %v16684_v48  ;;  %v6438_v29 = vpack.c.bf16 %v6404_v33, %v6403_v27  ;;  %v6838_v33 = vld [vmem:[#allocation4 + $0xac] sm:$0xff]  ;;  %v6843_v35 = vld [vmem:[#allocation4 + $0xd4] sm:$0xff]  ;;  %v6840_v53 = vld [vmem:[#allocation4 + $0xbc] sm:$0xff] }
 0x678   : > { %v18654_v27 = vld [vmem:[%s20354_s3 + $0x200] sm:$0xff]  }
 0x67a   : > { %15491 = vmatpush3.bf16.msra.mxu1 %v16684_v48  ;;  %v6439_v48 = vpack.c.bf16 %v6406_v45, %v6405_v36  ;;  %v6842_v45 = vld [vmem:[#allocation4 + $0xcc] sm:$0xff] }
 0x67b   : > { %15492 = vmatprep.subr.bf16.mxu1 %v16686_v12 }
 0x67d   : > { %15437 = vmatmul.mubr.bf16.gmra.mrb[8].mxu1 %v6423_v26  ;;  %v6411_v26 = vld [vmem:[#allocation4 + $0x198] sm:$0xff] }
 0x67e   : > { %15440 = vmatprep.mubr.bf16.mxu1 %v6424_v18  ;;  %15493 = vmatpush3.bf16.msra.mxu1 %v16686_v12  ;;  %v6410_v12 = vld [vmem:[#allocation4 + $0x190] sm:$0xff]  ;;  %v6442_v43 = vpack.c.bf16 %v6412_v22, %v6411_v26  ;;  %v6413_v18 = vld [vmem:[#allocation4 + $0x1a8] sm:$0xff]  ;;  %v6844_v22 = vld [vmem:[#allocation4 + $0xdc] sm:$0xff] }
 0x67f   : > { %15494 = vmatprep.subr.bf16.mxu1 %v16687_v0  ;;  %v6441_v44 = vpack.c.bf16 %v6410_v12, %v6409_v40  ;;  %v6847_v12 = vld [vmem:[#allocation4 + $0xf4] sm:$0xff] }
 0x682   : > { %15495 = vmatpush3.bf16.msra.mxu1 %v16687_v0 }
 0x683   : > { %15496 = vmatprep.subr.bf16.mxu1 %v16688_v54 }
 0x685   : > { %15441 = vmatmul.mubr.bf16.gmra.mrb[12].mxu1 %v6425_v10 }
 0x686   : > { %15444 = vmatprep.mubr.bf16.mxu1 %v6426_v34  ;;  %15497 = vmatpush3.bf16.msra.mxu1 %v16688_v54  ;;  %v6414_v54 = vld [vmem:[#allocation4 + $0x1b0] sm:$0xff] }
 0x687   : > { %15498 = vmatprep.subr.bf16.mxu1 %v16689_v60  ;;  %v6443_v34 = vpack.c.bf16 %v6414_v54, %v6413_v18  ;;  %v6851_v18 = vld [vmem:[#allocation4 + $0x114] sm:$0xff]  ;;  %v6848_v54 = vld [vmem:[#allocation4 + $0xfc] sm:$0xff] }
 0x68a   : > { %15499 = vmatpush3.bf16.msra.mxu1 %v16689_v60 }
 0x68b   : > { %15556 = vmatprep.subr.bf16.mxu1 %v18611_v3 }
 0x68d   : > { %15445 = vmatmul.mubr.bf16.gmra.mrb[16].mxu1 %v6427_v59  ;;  %v6417_v59 = vld [vmem:[#allocation4 + $0x1c8] sm:$0xff] }
 0x68e   : > { %15448 = vmatprep.mubr.bf16.mxu1 %v6428_v46  ;;  %v6445_v46 = vpack.c.bf16 %v6417_v59, %v6417_v59  ;;  %v6854_v59 = vld [vmem:[#allocation4 + $0x12c] sm:$0xff] }
 0x695   : > { %15449 = vmatmul.mubr.bf16.gmra.mrb[20].mxu1 %v6429_v50  ;;  %v6826_v50 = vld [vmem:[#allocation4 + $0x4c] sm:$0xff] }
 0x696   : > { %15452 = vmatprep.mubr.bf16.mxu1 %v6430_v14  ;;  %v16692_v14 = vld [vmem:[%s20354_s3 + $0x1d0] sm:$0xff]  }
 0x69d   : > { %15453 = vmatmul.mubr.bf16.gmra.mrb[24].mxu1 %v6431_v57  ;;  %v6830_v57 = vld [vmem:[#allocation4 + $0x6c] sm:$0xff] }
 0x69e   : > { %15456 = vmatprep.mubr.bf16.mxu1 %v6432_v5  ;;  %v16693_v5 = vld [vmem:[%s20354_s3 + $0x1d8] sm:$0xff]   ;;  %v6881_v55 = vpack.c.bf16 %v6831_v25, %v6830_v57 }
 0x69f   : > { %v6864_v25 = vld [vmem:[#allocation4 + $0x17c] sm:$0xff] }
 0x6a0   : > { %v6898_v57 = vpack.c.bf16 %v6865_v30, %v6864_v25  ;;  %v7299_v25 = vld [vmem:[#allocation4 + $0xbd] sm:$0xff] }
 0x6a5   : > { %15457 = vmatmul.mubr.bf16.gmra.mrb[28].mxu1 %v6433_v8  ;;  %v6832_v8 = vld [vmem:[#allocation4 + $0x7c] sm:$0xff] }
 0x6a6   : > { %15460 = vmatprep.mubr.bf16.mxu1 %v6434_v15  ;;  %v6882_v16 = vpack.c.bf16 %v6833_v62, %v6832_v8  ;;  %v6834_v15 = vld [vmem:[#allocation4 + $0x8c] sm:$0xff]  ;;  %v6871_v62 = vld [vmem:[#allocation4 + $0x1b4] sm:$0xff] }
 0x6a7   : > { %v6883_v47 = vpack.c.bf16 %v6835_v2, %v6834_v15  ;;  %v6868_v2 = vld [vmem:[#allocation4 + $0x19c] sm:$0xff] }
 0x6ad   : > { %15461 = vmatmul.mubr.bf16.gmra.mrb[32].mxu1 %v6435_v38  ;;  %v6836_v38 = vld [vmem:[#allocation4 + $0x9c] sm:$0xff] }
 0x6ae   : > { %15464 = vmatprep.mubr.bf16.mxu1 %v6436_v13  ;;  %v6839_v13 = vld [vmem:[#allocation4 + $0xb4] sm:$0xff]  ;;  %v6884_v32 = vpack.c.bf16 %v6837_v42, %v6836_v38 }
 0x6af   : > { %v6875_v42 = vld [vmem:[#allocation4 + $0x1d4] sm:$0xff] }
 0x6b5   : > { %15465 = vmatmul.mubr.bf16.gmra.mrb[36].mxu1 %v6437_v39  ;;  %v6885_v39 = vpack.c.bf16 %v6839_v13, %v6838_v33  ;;  %v6872_v33 = vld [vmem:[#allocation4 + $0x1bc] sm:$0xff] }
 0x6b6   : > { %15468 = vmatprep.mubr.bf16.mxu1 %v6438_v29  ;;  %v6841_v29 = vld [vmem:[#allocation4 + $0xc4] sm:$0xff] }
 0x6b7   : > { %v6886_v36 = vpack.c.bf16 %v6841_v29, %v6840_v53  ;;  %v6874_v29 = vld [vmem:[#allocation4 + $0x1cc] sm:$0xff]  ;;  %v6876_v53 = vld [vmem:[#allocation4 + $0x1dc] sm:$0xff] }
 0x6bd   : > { %15469 = vmatmul.mubr.bf16.gmra.mrb[40].mxu1 %v6439_v48  ;;  %v6887_v48 = vpack.c.bf16 %v6843_v35, %v6842_v45  ;;  %v6903_v35 = vpack.c.bf16 %v6875_v42, %v6874_v29 }
 0x6be   : > { %15472 = vmatprep.mubr.bf16.mxu1 %v6440_v52  ;;  %v6845_v52 = vld [vmem:[#allocation4 + $0xe4] sm:$0xff] }
 0x6bf   : > { %v6888_v40 = vpack.c.bf16 %v6845_v52, %v6844_v22  ;;  %v7283_v22 = vld [vmem:[#allocation4 + $0x3d] sm:$0xff] }
 0x6c5   : > { %15473 = vmatmul.mubr.bf16.gmra.mrb[44].mxu1 %v6441_v44  ;;  %v6846_v44 = vld [vmem:[#allocation4 + $0xec] sm:$0xff] }
 0x6c6   : > { %15476 = vmatprep.mubr.bf16.mxu1 %v6442_v43  ;;  %v6889_v26 = vpack.c.bf16 %v6847_v12, %v6846_v44  ;;  %v16704_v43 = vld [vmem:[%s20356_s5 + $0x68] sm:$0xff]  }
 0x6c7   : > { %15711 = vmatpush3.bf16.msra.mxu0 %v16704_v43  ;;  %v7286_v12 = vld [vmem:[#allocation4 + $0x55] sm:$0xff]  ;;  %v7285_v44 = vld [vmem:[#allocation4 + $0x4d] sm:$0xff] }
 0x6c8   : > { %v15338_v0 = vpop.f32.mrb[64].mxu1  ;;  %15712 = vmatprep.subr.bf16.mxu0 %v18617_v49  ;;  %v16701_v43 = vld [vmem:[%s20354_s3 + $0x210] sm:$0xff]  }
 0x6c9   : > { %v18621_v63 = vadd.f32 %v15338_v0, %v18578_v31  ;;  %v5835_v41 = vpop.f32.mrb[65].mxu1  ;;  %v6822_v31 = vld [vmem:[#allocation4 + $0x2c] sm:$0xff]  ;;  %v6849_v0 = vld [vmem:[#allocation4 + $0x104] sm:$0xff] }
 0x6ca   : > { %v18624_v10 = vadd.f32 %v5835_v41, %v18581_v58  ;;  %v15339_v56 = vpop.f32.mrb[66].mxu1  ;;  %v6877_v17 = vpack.c.bf16 %v6823_v61, %v6822_v31  ;;  %v6827_v58 = vld [vmem:[#allocation4 + $0x54] sm:$0xff]  ;;  %v6890_v41 = vpack.c.bf16 %v6849_v0, %v6848_v54  ;;  %v6858_v31 = vld [vmem:[#allocation4 + $0x14c] sm:$0xff]  ;;  %v7287_v54 = vld [vmem:[#allocation4 + $0x5d] sm:$0xff] }
 0x6cb   : > { %v5838_v60 = vpop.f32.mrb[67].mxu1  ;;  %v6879_v6 = vpack.c.bf16 %v6827_v58, %v6826_v50  ;;  %v6891_v56 = vpack.c.bf16 %v6851_v18, %v6850_v4  ;;  %v6863_v50 = vld [vmem:[#allocation4 + $0x174] sm:$0xff]  ;;  %v7288_v0 = vld [vmem:[#allocation4 + $0x65] sm:$0xff] }
 0x6cc   : > { %v18627_v28 = vadd.f32 %v5838_v60, %v18584_v21  ;;  %v16691_v21 = vld [vmem:[%s20354_s3 + $0x1c8] sm:$0xff]   ;;  %v6853_v60 = vld [vmem:[#allocation4 + $0x124] sm:$0xff] }
 0x6cd   : > { %15477 = vmatmul.mubr.bf16.gmra.mrb[48].mxu1 %v6443_v34  ;;  %v6855_v34 = vld [vmem:[#allocation4 + $0x134] sm:$0xff] }
 0x6ce   : > { %15480 = vmatprep.mubr.bf16.mxu1 %v6444_v7  ;;  %v6892_v7 = vpack.c.bf16 %v6853_v60, %v6852_v51  ;;  %v6893_v61 = vpack.c.bf16 %v6855_v34, %v6854_v59  ;;  %v7290_v18 = vld [vmem:[#allocation4 + $0x75] sm:$0xff]  ;;  %v7289_v4 = vld [vmem:[#allocation4 + $0x6d] sm:$0xff]  ;;  %v7292_v34 = vld [vmem:[#allocation4 + $0x85] sm:$0xff] }
 0x6cf   : > { %v7340_v60 = vpack.c.bf16 %v7290_v18, %v7289_v4  ;;  %v7294_v51 = vld [vmem:[#allocation4 + $0x95] sm:$0xff]  ;;  %v7325_v4 = vld [vmem:[#allocation4 + $0x18d] sm:$0xff] }
 0x6d0   : > { %v7326_v18 = vld [vmem:[#allocation4 + $0x195] sm:$0xff] }
 0x6d5   : > { %15481 = vmatmul.mubr.bf16.gmra.mrb[72].mxu1 %v6445_v46  ;;  %v6857_v46 = vld [vmem:[#allocation4 + $0x144] sm:$0xff] }
 0x6d6   : > { %15500 = vmatprep.mubr.bf16.mxu1 %v6877_v17  ;;  %v6859_v17 = vld [vmem:[#allocation4 + $0x154] sm:$0xff]  ;;  %v6894_v58 = vpack.c.bf16 %v6857_v46, %v6856_v11  ;;  %v7295_v11 = vld [vmem:[#allocation4 + $0x9d] sm:$0xff] }
 0x6d7   : > { %v6895_v1 = vpack.c.bf16 %v6859_v17, %v6858_v31  ;;  %v16705_v46 = vld [vmem:[%s20354_s3 + $0x228] sm:$0xff]   ;;  %v16706_v17 = vld [vmem:[%s20354_s3 + $0x230] sm:$0xff]  }
 0x6dd   : > { %15501 = vmatmul.mubr.bf16.vlgmr.msra.gmra.mrb[0].mxu1 %v6878_v23  ;;  %v6861_v23 = vld [vmem:[#allocation4 + $0x164] sm:$0xff] }
 0x6de   : > { %15557 = vmatpush3.bf16.msra.mxu1 %v18611_v3  ;;  %15504 = vmatprep.mubr.bf16.mxu1 %v6879_v6  ;;  %v16695_v3 = vld [vmem:[%s20354_s3 + $0x1e0] sm:$0xff]  }
 0x6df   : > { %15558 = vmatprep.subr.bf16.mxu1 %v16691_v21 }
 0x6e2   : > { %15559 = vmatpush3.bf16.msra.mxu1 %v16691_v21  ;;  %v6860_v21 = vld [vmem:[#allocation4 + $0x15c] sm:$0xff] }
 0x6e3   : > { %15560 = vmatprep.subr.bf16.mxu1 %v16692_v14  ;;  %v6896_v6 = vpack.c.bf16 %v6861_v23, %v6860_v21  ;;  %v16707_v21 = vld [vmem:[%s20354_s3 + $0x238] sm:$0xff]  }
 0x6e5   : > { %15505 = vmatmul.mubr.bf16.gmra.mrb[4].mxu1 %v6880_v9  ;;  %v6867_v9 = vld [vmem:[#allocation4 + $0x194] sm:$0xff] }
 0x6e6   : > { %15508 = vmatprep.mubr.bf16.mxu1 %v6881_v55  ;;  %15561 = vmatpush3.bf16.msra.mxu1 %v16692_v14  ;;  %v6862_v14 = vld [vmem:[#allocation4 + $0x16c] sm:$0xff] }
 0x6e7   : > { %15562 = vmatprep.subr.bf16.mxu1 %v16693_v5  ;;  %v6897_v19 = vpack.c.bf16 %v6863_v50, %v6862_v14  ;;  %v7297_v50 = vld [vmem:[#allocation4 + $0xad] sm:$0xff]  ;;  %v7300_v14 = vld [vmem:[#allocation4 + $0xc5] sm:$0xff] }
 0x6e8   : > { %v7345_v30 = vpack.c.bf16 %v7300_v14, %v7299_v25  ;;  %v7333_v14 = vld [vmem:[#allocation4 + $0x1cd] sm:$0xff] }
 0x6ea   : > { %15563 = vmatpush3.bf16.msra.mxu1 %v16693_v5  ;;  %v6866_v5 = vld [vmem:[#allocation4 + $0x18c] sm:$0xff] }
 0x6eb   : > { %15564 = vmatprep.subr.bf16.mxu1 %v16695_v3  ;;  %v6899_v55 = vpack.c.bf16 %v6867_v9, %v6866_v5  ;;  %v7301_v9 = vld [vmem:[#allocation4 + $0xcd] sm:$0xff]  ;;  %v7304_v5 = vld [vmem:[#allocation4 + $0xe5] sm:$0xff] }
 0x6ed   : > { %15509 = vmatmul.mubr.bf16.gmra.mrb[8].mxu1 %v6882_v16  ;;  %v6870_v16 = vld [vmem:[#allocation4 + $0x1ac] sm:$0xff] }
 0x6ee   : > { %15512 = vmatprep.mubr.bf16.mxu1 %v6883_v47  ;;  %15565 = vmatpush3.bf16.msra.mxu1 %v16695_v3  ;;  %v6869_v3 = vld [vmem:[#allocation4 + $0x1a4] sm:$0xff]  ;;  %v6901_v15 = vpack.c.bf16 %v6871_v62, %v6870_v16 }
 0x6ef   : > { %15566 = vmatprep.subr.bf16.mxu1 %v16696_v20  ;;  %v6900_v8 = vpack.c.bf16 %v6869_v3, %v6868_v2  ;;  %v6873_v47 = vld [vmem:[#allocation4 + $0x1c4] sm:$0xff]  ;;  %v7305_v2 = vld [vmem:[#allocation4 + $0xed] sm:$0xff] }
 0x6f0   : > { %v7303_v3 = vld [vmem:[#allocation4 + $0xdd] sm:$0xff]  ;;  %v7308_v16 = vld [vmem:[#allocation4 + $0x105] sm:$0xff] }
 0x6f1   : > { %v7347_v62 = vpack.c.bf16 %v7304_v5, %v7303_v3  ;;  %v7742_v3 = vld [vmem:[#allocation4 + $0x3e] sm:$0xff] }
 0x6f2   : > { %15567 = vmatpush3.bf16.msra.mxu1 %v16696_v20 }
 0x6f3   : > { %15568 = vmatprep.subr.bf16.mxu1 %v16697_v37 }
 0x6f5   : > { %15513 = vmatmul.mubr.bf16.gmra.mrb[12].mxu1 %v6884_v32 }
 0x6f6   : > { %15516 = vmatprep.mubr.bf16.mxu1 %v6885_v39  ;;  %15569 = vmatpush3.bf16.msra.mxu1 %v16697_v37  ;;  %v6902_v39 = vpack.c.bf16 %v6873_v47, %v6872_v33  ;;  %v7312_v33 = vld [vmem:[#allocation4 + $0x125] sm:$0xff] }
 0x6f7   : > { %15570 = vmatprep.subr.bf16.mxu1 %v16698_v24 }
 0x6fa   : > { %15571 = vmatpush3.bf16.msra.mxu1 %v16698_v24 }
 0x6fb   : > { %15628 = vmatprep.subr.bf16.mxu1 %v18654_v27 }
 0x6fd   : > { %15517 = vmatmul.mubr.bf16.gmra.mrb[16].mxu1 %v6886_v36  ;;  %v7282_v36 = vld [vmem:[#allocation4 + $0x35] sm:$0xff] }
 0x6fe   : > { %15520 = vmatprep.mubr.bf16.mxu1 %v6887_v48  ;;  %v7281_v48 = vld [vmem:[#allocation4 + $0x2d] sm:$0xff] }
 0x6ff   : > { %v7336_v52 = vpack.c.bf16 %v7282_v36, %v7281_v48  ;;  %v7316_v36 = vld [vmem:[#allocation4 + $0x145] sm:$0xff]  ;;  %v7318_v48 = vld [vmem:[#allocation4 + $0x155] sm:$0xff] }
 0x705   : > { %15521 = vmatmul.mubr.bf16.gmra.mrb[20].mxu1 %v6888_v40 }
 0x706   : > { %15524 = vmatprep.mubr.bf16.mxu1 %v6889_v26  ;;  %v7338_v26 = vpack.c.bf16 %v7286_v12, %v7285_v44  ;;  %v7319_v44 = vld [vmem:[#allocation4 + $0x15d] sm:$0xff] }
 0x70d   : > { %15525 = vmatmul.mubr.bf16.gmra.mrb[24].mxu1 %v6890_v41  ;;  %v7339_v41 = vpack.c.bf16 %v7288_v0, %v7287_v54  ;;  %v7324_v0 = vld [vmem:[#allocation4 + $0x185] sm:$0xff]  ;;  %v7323_v54 = vld [vmem:[#allocation4 + $0x17d] sm:$0xff] }
 0x70e   : > { %15528 = vmatprep.mubr.bf16.mxu1 %v6891_v56  ;;  %v16702_v56 = vld [vmem:[%s20354_s3 + $0x218] sm:$0xff]  }
 0x715   : > { %15529 = vmatmul.mubr.bf16.gmra.mrb[28].mxu1 %v6892_v7  ;;  %v7291_v7 = vld [vmem:[#allocation4 + $0x7d] sm:$0xff] }
 0x716   : > { %15532 = vmatprep.mubr.bf16.mxu1 %v6893_v61  ;;  %v7341_v59 = vpack.c.bf16 %v7292_v34, %v7291_v7  ;;  %v7293_v61 = vld [vmem:[#allocation4 + $0x8d] sm:$0xff]  ;;  %v7327_v34 = vld [vmem:[#allocation4 + $0x19d] sm:$0xff] }
 0x717   : > { %v7342_v31 = vpack.c.bf16 %v7294_v51, %v7293_v61  ;;  %v7329_v7 = vld [vmem:[#allocation4 + $0x1ad] sm:$0xff]  ;;  %v16709_v61 = vld [vmem:[%s20356_s5 + $0x78] sm:$0xff]  }
 0x71d   : > { %15533 = vmatmul.mubr.bf16.gmra.mrb[32].mxu1 %v6894_v58  ;;  %v7296_v58 = vld [vmem:[#allocation4 + $0xa5] sm:$0xff] }
 0x71e   : > { %15536 = vmatprep.mubr.bf16.mxu1 %v6895_v1  ;;  %v7298_v1 = vld [vmem:[#allocation4 + $0xb5] sm:$0xff]  ;;  %v7343_v23 = vpack.c.bf16 %v7296_v58, %v7295_v11 }
 0x71f   : > { %v7334_v58 = vld [vmem:[#allocation4 + $0x1d5] sm:$0xff] }
 0x720   : > { %v7362_v25 = vpack.c.bf16 %v7334_v58, %v7333_v14  ;;  %v7775_v58 = vld [vmem:[#allocation4 + $0x146] sm:$0xff] }
 0x725   : > { %15537 = vmatmul.mubr.bf16.gmra.mrb[36].mxu1 %v6896_v6  ;;  %v7344_v6 = vpack.c.bf16 %v7298_v1, %v7297_v50  ;;  %v7331_v50 = vld [vmem:[#allocation4 + $0x1bd] sm:$0xff] }
 0x726   : > { %15540 = vmatprep.mubr.bf16.mxu1 %v6897_v19  ;;  %v7302_v19 = vld [vmem:[#allocation4 + $0xd5] sm:$0xff] }
 0x72d   : > { %15541 = vmatmul.mubr.bf16.gmra.mrb[40].mxu1 %v6898_v57  ;;  %v7346_v57 = vpack.c.bf16 %v7302_v19, %v7301_v9  ;;  %v7741_v9 = vld [vmem:[#allocation4 + $0x36] sm:$0xff] }
 0x72e   : > { %15544 = vmatprep.mubr.bf16.mxu1 %v6899_v55  ;;  %v7306_v55 = vld [vmem:[#allocation4 + $0xf5] sm:$0xff] }
 0x735   : > { %15545 = vmatmul.mubr.bf16.gmra.mrb[44].mxu1 %v6900_v8  ;;  %v7348_v8 = vpack.c.bf16 %v7306_v55, %v7305_v2  ;;  %v7745_v55 = vld [vmem:[#allocation4 + $0x56] sm:$0xff]  ;;  %v7744_v2 = vld [vmem:[#allocation4 + $0x4e] sm:$0xff] }
 0x736   : > { %15548 = vmatprep.mubr.bf16.mxu1 %v6901_v15  ;;  %v7310_v15 = vld [vmem:[#allocation4 + $0x115] sm:$0xff] }
 0x738   : > { %v15410_v20 = vpop.f32.mrb[68].mxu1 }
 0x739   : > { %v18662_v37 = vadd.f32 %v15410_v20, %v18621_v63  ;;  %v6294_v38 = vpop.f32.mrb[69].mxu1  ;;  %v6904_v63 = vpack.c.bf16 %v6876_v53, %v6876_v53  ;;  %v7307_v20 = vld [vmem:[#allocation4 + $0xfd] sm:$0xff] }
 0x73a   : > { %v18665_v13 = vadd.f32 %v6294_v38, %v18624_v10  ;;  %v15411_v32 = vpop.f32.mrb[70].mxu1  ;;  %v7284_v10 = vld [vmem:[#allocation4 + $0x45] sm:$0xff]  ;;  %v7349_v47 = vpack.c.bf16 %v7308_v16, %v7307_v20  ;;  %v7309_v38 = vld [vmem:[#allocation4 + $0x10d] sm:$0xff]  ;;  %v7749_v16 = vld [vmem:[#allocation4 + $0x76] sm:$0xff] }
 0x73b   : > { %v6297_v24 = vpop.f32.mrb[71].mxu1  ;;  %v7337_v40 = vpack.c.bf16 %v7284_v10, %v7283_v22  ;;  %v7350_v42 = vpack.c.bf16 %v7310_v15, %v7309_v38  ;;  %v16708_v32 = vld [vmem:[%s20356_s5 + $0x70] sm:$0xff]   ;;  %v7320_v22 = vld [vmem:[#allocation4 + $0x165] sm:$0xff] }
 0x73c   : > { %v18668_v45 = vadd.f32 %v6297_v24, %v18627_v28  ;;  %v16700_v28 = vld [vmem:[%s20354_s3 + $0x208] sm:$0xff]   ;;  %15713 = vmatpush3.bf16.msra.mxu0 %v16708_v32  ;;  %v7746_v15 = vld [vmem:[#allocation4 + $0x5e] sm:$0xff] }
 0x73d   : > { %15549 = vmatmul.mubr.bf16.gmra.mrb[48].mxu1 %v6902_v39  ;;  %v7314_v24 = vld [vmem:[#allocation4 + $0x135] sm:$0xff]  ;;  %15714 = vmatprep.subr.bf16.mxu0 %v18617_v49  ;;  %v7311_v39 = vld [vmem:[#allocation4 + $0x11d] sm:$0xff] }
 0x73e   : > { %15552 = vmatprep.mubr.bf16.mxu1 %v6903_v35  ;;  %v7351_v29 = vpack.c.bf16 %v7312_v33, %v7311_v39  ;;  %v7313_v35 = vld [vmem:[#allocation4 + $0x12d] sm:$0xff]  ;;  %v7753_v32 = vld [vmem:[#allocation4 + $0x96] sm:$0xff]  ;;  %v7750_v33 = vld [vmem:[#allocation4 + $0x7e] sm:$0xff] }
 0x73f   : > { %v7352_v53 = vpack.c.bf16 %v7314_v24, %v7313_v35  ;;  %v7752_v39 = vld [vmem:[#allocation4 + $0x8e] sm:$0xff]  ;;  %v7754_v35 = vld [vmem:[#allocation4 + $0x9e] sm:$0xff] }
 0x740   : > { %15715 = vmatpush3.bf16.msra.mxu0 %v16709_v61  ;;  %v7770_v61 = vld [vmem:[#allocation4 + $0x11e] sm:$0xff] }
 0x741   : > { %15736 = vmatprep.subr.bf16.mxu0 %v18617_v49 }
 0x745   : > { %15553 = vmatmul.mubr.bf16.gmra.mrb[76].mxu1 %v6904_v63  ;;  %v7317_v63 = vld [vmem:[#allocation4 + $0x14d] sm:$0xff] }
 0x746   : > { %15572 = vmatprep.mubr.bf16.mxu1 %v7336_v52  ;;  %v7315_v52 = vld [vmem:[#allocation4 + $0x13d] sm:$0xff]  ;;  %v7354_v12 = vpack.c.bf16 %v7318_v48, %v7317_v63  ;;  %v7756_v48 = vld [vmem:[#allocation4 + $0xae] sm:$0xff] }
 0x747   : > { %v7353_v10 = vpack.c.bf16 %v7316_v36, %v7315_v52  ;;  %v7757_v36 = vld [vmem:[#allocation4 + $0xb6] sm:$0xff] }
 0x748   : > { %v7803_v52 = vpack.c.bf16 %v7757_v36, %v7756_v48 }
 0x74d   : > { %15573 = vmatmul.mubr.bf16.vlgmr.msra.gmra.mrb[0].mxu1 %v7337_v40  ;;  %v7322_v40 = vld [vmem:[#allocation4 + $0x175] sm:$0xff] }
 0x74e   : > { %15629 = vmatpush3.bf16.msra.mxu1 %v18654_v27  ;;  %15576 = vmatprep.mubr.bf16.mxu1 %v7338_v26  ;;  %v16703_v27 = vld [vmem:[%s20354_s3 + $0x220] sm:$0xff]  }
 0x74f   : > { %15630 = vmatprep.subr.bf16.mxu1 %v16700_v28  ;;  %v7321_v26 = vld [vmem:[#allocation4 + $0x16d] sm:$0xff] }
 0x752   : > { %15631 = vmatpush3.bf16.msra.mxu1 %v16700_v28  ;;  %v7355_v28 = vpack.c.bf16 %v7320_v22, %v7319_v44  ;;  %v7758_v22 = vld [vmem:[#allocation4 + $0xbe] sm:$0xff]  ;;  %v7760_v44 = vld [vmem:[#allocation4 + $0xce] sm:$0xff] }
 0x753   : > { %15632 = vmatprep.subr.bf16.mxu1 %v16701_v43 }
 0x755   : > { %15577 = vmatmul.mubr.bf16.gmra.mrb[4].mxu1 %v7339_v41  ;;  %v7357_v41 = vpack.c.bf16 %v7324_v0, %v7323_v54  ;;  %v7762_v0 = vld [vmem:[#allocation4 + $0xde] sm:$0xff]  ;;  %v7764_v54 = vld [vmem:[#allocation4 + $0xee] sm:$0xff] }
 0x756   : > { %15580 = vmatprep.mubr.bf16.mxu1 %v7340_v60  ;;  %15633 = vmatpush3.bf16.msra.mxu1 %v16701_v43  ;;  %v7356_v43 = vpack.c.bf16 %v7322_v40, %v7321_v26  ;;  %v7328_v60 = vld [vmem:[#allocation4 + $0x1a5] sm:$0xff] }
 0x757   : > { %15634 = vmatprep.subr.bf16.mxu1 %v16702_v56  ;;  %v7359_v51 = vpack.c.bf16 %v7328_v60, %v7327_v34  ;;  %v7763_v26 = vld [vmem:[#allocation4 + $0xe6] sm:$0xff]  ;;  %v7766_v60 = vld [vmem:[#allocation4 + $0xfe] sm:$0xff]  ;;  %v7768_v34 = vld [vmem:[#allocation4 + $0x10e] sm:$0xff] }
 0x75a   : > { %15635 = vmatpush3.bf16.msra.mxu1 %v16702_v56  ;;  %v7358_v56 = vpack.c.bf16 %v7326_v18, %v7325_v4  ;;  %v7806_v18 = vpack.c.bf16 %v7763_v26, %v7762_v0  ;;  %v7767_v4 = vld [vmem:[#allocation4 + $0x106] sm:$0xff]  ;;  %v16716_v26 = vld [vmem:[%s20356_s5 + $0xb0] sm:$0xff]  }
 0x75b   : > { %15636 = vmatprep.subr.bf16.mxu1 %v16703_v27 }
 0x75d   : > { %15581 = vmatmul.mubr.bf16.gmra.mrb[8].mxu1 %v7341_v59 }
 0x75e   : > { %15584 = vmatprep.mubr.bf16.mxu1 %v7342_v31  ;;  %15637 = vmatpush3.bf16.msra.mxu1 %v16703_v27  ;;  %v7330_v27 = vld [vmem:[#allocation4 + $0x1b5] sm:$0xff]  ;;  %v7332_v31 = vld [vmem:[#allocation4 + $0x1c5] sm:$0xff] }
 0x75f   : > { %15638 = vmatprep.subr.bf16.mxu1 %v16705_v46  ;;  %v7360_v59 = vpack.c.bf16 %v7330_v27, %v7329_v7  ;;  %v7808_v27 = vpack.c.bf16 %v7767_v4, %v7766_v60  ;;  %v7771_v7 = vld [vmem:[#allocation4 + $0x126] sm:$0xff] }
 0x762   : > { %15639 = vmatpush3.bf16.msra.mxu1 %v16705_v46 }
 0x763   : > { %15640 = vmatprep.subr.bf16.mxu1 %v16706_v17 }
 0x765   : > { %15585 = vmatmul.mubr.bf16.gmra.mrb[12].mxu1 %v7343_v23 }
 0x766   : > { %15588 = vmatprep.mubr.bf16.mxu1 %v7344_v6  ;;  %15641 = vmatpush3.bf16.msra.mxu1 %v16706_v17  ;;  %v7361_v6 = vpack.c.bf16 %v7332_v31, %v7331_v50  ;;  %v7772_v31 = vld [vmem:[#allocation4 + $0x12e] sm:$0xff]  ;;  %v7777_v50 = vld [vmem:[#allocation4 + $0x156] sm:$0xff] }
 0x767   : > { %15642 = vmatprep.subr.bf16.mxu1 %v16707_v21 }
 0x76a   : > { %15643 = vmatpush3.bf16.msra.mxu1 %v16707_v21 }
 0x76b   : > { %15772 = vmatprep.subr.bf16.mxu1 %v18617_v49 }
 0x76d   : > { %15589 = vmatmul.mubr.bf16.gmra.mrb[16].mxu1 %v7345_v30  ;;  %v7335_v30 = vld [vmem:[#allocation4 + $0x1dd] sm:$0xff] }
 0x76e   : > { %15592 = vmatprep.mubr.bf16.mxu1 %v7346_v57  ;;  %v7740_v57 = vld [vmem:[#allocation4 + $0x2e] sm:$0xff] }
 0x76f   : > { %v7795_v5 = vpack.c.bf16 %v7741_v9, %v7740_v57  ;;  %v7778_v9 = vld [vmem:[#allocation4 + $0x15e] sm:$0xff]  ;;  %v7780_v57 = vld [vmem:[#allocation4 + $0x16e] sm:$0xff] }
 0x775   : > { %15593 = vmatmul.mubr.bf16.gmra.mrb[20].mxu1 %v7347_v62 }
 0x776   : > { %15596 = vmatprep.mubr.bf16.mxu1 %v7348_v8  ;;  %v7797_v8 = vpack.c.bf16 %v7745_v55, %v7744_v2  ;;  %v7785_v55 = vld [vmem:[#allocation4 + $0x196] sm:$0xff]  ;;  %v7784_v2 = vld [vmem:[#allocation4 + $0x18e] sm:$0xff] }
 0x77d   : > { %15597 = vmatmul.mubr.bf16.gmra.mrb[24].mxu1 %v7349_v47  ;;  %v7748_v47 = vld [vmem:[#allocation4 + $0x6e] sm:$0xff] }
 0x77e   : > { %15600 = vmatprep.mubr.bf16.mxu1 %v7350_v42  ;;  %v7799_v38 = vpack.c.bf16 %v7749_v16, %v7748_v47  ;;  %v7751_v42 = vld [vmem:[#allocation4 + $0x86] sm:$0xff]  ;;  %v7789_v16 = vld [vmem:[#allocation4 + $0x1b6] sm:$0xff]  ;;  %v7788_v47 = vld [vmem:[#allocation4 + $0x1ae] sm:$0xff] }
 0x77f   : > { %v7800_v24 = vpack.c.bf16 %v7751_v42, %v7750_v33 }
 0x785   : > { %15601 = vmatmul.mubr.bf16.gmra.mrb[28].mxu1 %v7351_v29  ;;  %v7801_v29 = vpack.c.bf16 %v7753_v32, %v7752_v39  ;;  %v7791_v32 = vld [vmem:[#allocation4 + $0x1c6] sm:$0xff]  ;;  %v7792_v39 = vld [vmem:[#allocation4 + $0x1ce] sm:$0xff] }
 0x786   : > { %15604 = vmatprep.mubr.bf16.mxu1 %v7352_v53  ;;  %v7755_v53 = vld [vmem:[#allocation4 + $0xa6] sm:$0xff] }
 0x787   : > { %v7802_v63 = vpack.c.bf16 %v7755_v53, %v7754_v35  ;;  %v7790_v53 = vld [vmem:[#allocation4 + $0x1be] sm:$0xff] }
 0x78d   : > { %15605 = vmatmul.mubr.bf16.gmra.mrb[32].mxu1 %v7353_v10  ;;  %v7759_v10 = vld [vmem:[#allocation4 + $0xc6] sm:$0xff] }
 0x78e   : > { %15608 = vmatprep.mubr.bf16.mxu1 %v7354_v12  ;;  %v7761_v12 = vld [vmem:[#allocation4 + $0xd6] sm:$0xff]  ;;  %v7804_v40 = vpack.c.bf16 %v7759_v10, %v7758_v22 }
 0x795   : > { %15609 = vmatmul.mubr.bf16.gmra.mrb[36].mxu1 %v7355_v28  ;;  %v7805_v28 = vpack.c.bf16 %v7761_v12, %v7760_v44  ;;  %v7794_v12 = vld [vmem:[#allocation4 + $0x1de] sm:$0xff]  ;;  %v16714_v44 = vld [vmem:[%s20356_s5 + $0xa0] sm:$0xff]  }
 0x796   : > { %15612 = vmatprep.mubr.bf16.mxu1 %v7356_v43  ;;  %v7765_v43 = vld [vmem:[#allocation4 + $0xf6] sm:$0xff]  ;;  %v7822_v22 = vpack.c.bf16 %v7794_v12, %v7794_v12 }
 0x79d   : > { %15613 = vmatmul.mubr.bf16.gmra.mrb[40].mxu1 %v7357_v41  ;;  %v7807_v41 = vpack.c.bf16 %v7765_v43, %v7764_v54  ;;  %v16717_v43 = vld [vmem:[%s20356_s5 + $0xb8] sm:$0xff]  }
 0x79e   : > { %15616 = vmatprep.mubr.bf16.mxu1 %v7358_v56  ;;  %v7769_v56 = vld [vmem:[#allocation4 + $0x116] sm:$0xff] }
 0x7a5   : > { %15617 = vmatmul.mubr.bf16.gmra.mrb[44].mxu1 %v7359_v51  ;;  %v7809_v51 = vpack.c.bf16 %v7769_v56, %v7768_v34 }
 0x7a6   : > { %15620 = vmatprep.mubr.bf16.mxu1 %v7360_v59  ;;  %v7773_v59 = vld [vmem:[#allocation4 + $0x136] sm:$0xff] }
 0x7a8   : > { %v15482_v46 = vpop.f32.mrb[72].mxu1 }
 0x7a9   : > { %v18702_v17 = vadd.f32 %v15482_v46, %v18662_v37  ;;  %v6753_v11 = vpop.f32.mrb[73].mxu1  ;;  %v7363_v37 = vpack.c.bf16 %v7335_v30, %v7335_v30  ;;  %v7810_v46 = vpack.c.bf16 %v7771_v7, %v7770_v61  ;;  %v7781_v30 = vld [vmem:[#allocation4 + $0x176] sm:$0xff] }
 0x7aa   : > { %v18705_v1 = vadd.f32 %v6753_v11, %v18665_v13  ;;  %v15483_v23 = vpop.f32.mrb[74].mxu1  ;;  %v7743_v13 = vld [vmem:[#allocation4 + $0x46] sm:$0xff]  ;;  %v7811_v11 = vpack.c.bf16 %v7773_v59, %v7772_v31 }
 0x7ab   : > { %v6756_v21 = vpop.f32.mrb[75].mxu1  ;;  %v7796_v62 = vpack.c.bf16 %v7743_v13, %v7742_v3  ;;  %v7776_v23 = vld [vmem:[#allocation4 + $0x14e] sm:$0xff]  ;;  %v7783_v13 = vld [vmem:[#allocation4 + $0x186] sm:$0xff]  ;;  %v7782_v3 = vld [vmem:[#allocation4 + $0x17e] sm:$0xff] }
 0x7ac   : > { %v18708_v19 = vadd.f32 %v6756_v21, %v18668_v45  ;;  %v7747_v45 = vld [vmem:[#allocation4 + $0x66] sm:$0xff]  ;;  %v7774_v21 = vld [vmem:[#allocation4 + $0x13e] sm:$0xff]  ;;  %v7813_v14 = vpack.c.bf16 %v7777_v50, %v7776_v23 }
 0x7ad   : > { %15621 = vmatmul.mubr.bf16.gmra.mrb[48].mxu1 %v7361_v6  ;;  %v7798_v20 = vpack.c.bf16 %v7747_v45, %v7746_v15  ;;  %v7812_v6 = vpack.c.bf16 %v7775_v58, %v7774_v21  ;;  %v7787_v45 = vld [vmem:[#allocation4 + $0x1a6] sm:$0xff]  ;;  %v7786_v15 = vld [vmem:[#allocation4 + $0x19e] sm:$0xff] }
 0x7ae   : > { %15624 = vmatprep.mubr.bf16.mxu1 %v7362_v25  ;;  %v7779_v25 = vld [vmem:[#allocation4 + $0x166] sm:$0xff] }
 0x7b5   : > { %15625 = vmatmul.mubr.bf16.gmra.mrb[80].mxu1 %v7363_v37  ;;  %v7814_v37 = vpack.c.bf16 %v7779_v25, %v7778_v9 }
 0x7b6   : > { %15644 = vmatprep.mubr.bf16.mxu1 %v7795_v5  ;;  %v7815_v5 = vpack.c.bf16 %v7781_v30, %v7780_v57 }
 0x7bd   : > { %15645 = vmatmul.mubr.bf16.vlgmr.msra.gmra.mrb[0].mxu1 %v7796_v62  ;;  %v7816_v62 = vpack.c.bf16 %v7783_v13, %v7782_v3 }
 0x7be   : > { %15648 = vmatprep.mubr.bf16.mxu1 %v7797_v8  ;;  %v7817_v8 = vpack.c.bf16 %v7785_v55, %v7784_v2 }
 0x7c5   : > { %15649 = vmatmul.mubr.bf16.gmra.mrb[4].mxu1 %v7798_v20  ;;  %v7818_v20 = vpack.c.bf16 %v7787_v45, %v7786_v15 }
 0x7c6   : > { %15652 = vmatprep.mubr.bf16.mxu1 %v7799_v38  ;;  %v7819_v38 = vpack.c.bf16 %v7789_v16, %v7788_v47 }
 0x7cd   : > { %15653 = vmatmul.mubr.bf16.gmra.mrb[8].mxu1 %v7800_v24 }
 0x7ce   : > { %15656 = vmatprep.mubr.bf16.mxu1 %v7801_v29 }
 0x7d5   : > { %15657 = vmatmul.mubr.bf16.gmra.mrb[12].mxu1 %v7802_v63  ;;  %v7820_v63 = vpack.c.bf16 %v7791_v32, %v7790_v53 }
 0x7d6   : > { %15660 = vmatprep.mubr.bf16.mxu1 %v7803_v52  ;;  %v17194_v52 = vld [vmem:[#allocation4 + $0x1d6] sm:$0xff] }
 0x7d7   : > { %v7821_v10 = vpack.c.bf16 %v17194_v52, %v7792_v39 }
 0x7dd   : > { %15661 = vmatmul.mubr.bf16.gmra.mrb[16].mxu1 %v7804_v40  ;;  %v16713_v40 = vld [vmem:[%s20356_s5 + $0x98] sm:$0xff]  }
 0x7de   : > { %15664 = vmatprep.mubr.bf16.mxu1 %v7805_v28  ;;  %v16715_v28 = vld [vmem:[%s20356_s5 + $0xa8] sm:$0xff]  }
 0x7e5   : > { %15665 = vmatmul.mubr.bf16.gmra.mrb[20].mxu1 %v7806_v18 }
 0x7e6   : > { %15668 = vmatprep.mubr.bf16.mxu1 %v7807_v41 }
 0x7ed   : > { %15669 = vmatmul.mubr.bf16.gmra.mrb[24].mxu1 %v7808_v27  ;;  %v18756_v27 = vld [vmem:[%s20355_s4] ss:$0 sm:$0xff] }
 0x7ee   : > { %15672 = vmatprep.mubr.bf16.mxu1 %v7809_v51 }
 0x7f5   : > { %15673 = vmatmul.mubr.bf16.gmra.mrb[28].mxu1 %v7810_v46 }
 0x7f6   : > { %15676 = vmatprep.mubr.bf16.mxu1 %v7811_v11 }
 0x7fd   : > { %15677 = vmatmul.mubr.bf16.gmra.mrb[32].mxu1 %v7812_v6 }
 0x7fe   : > { %15680 = vmatprep.mubr.bf16.mxu1 %v7813_v14 }
 0x805   : > { %15681 = vmatmul.mubr.bf16.gmra.mrb[36].mxu1 %v7814_v37 }
 0x806   : > { %15684 = vmatprep.mubr.bf16.mxu1 %v7815_v5 }
 0x80d   : > { %15685 = vmatmul.mubr.bf16.gmra.mrb[40].mxu1 %v7816_v62 }
 0x80e   : > { %15688 = vmatprep.mubr.bf16.mxu1 %v7817_v8 }
 0x815   : > { %15689 = vmatmul.mubr.bf16.gmra.mrb[44].mxu1 %v7818_v20 }
 0x816   : > { %15692 = vmatprep.mubr.bf16.mxu1 %v7819_v38 }
 0x818   : > { %v15554_v42 = vpop.f32.mrb[76].mxu1 }
 0x819   : > { %v7280_v33 = vadd.f32 %v15554_v42, %v18702_v17  ;;  %v7212_v24 = vpop.f32.mrb[77].mxu1  ;;  %v16710_v17 = vld [vmem:[%s20356_s5 + $0x80] sm:$0xff]  }
 0x81a   : > { %v7278_v29 = vadd.f32 %v7212_v24, %v18705_v1  ;;  %v15555_v35 = vpop.f32.mrb[78].mxu1  ;;  %15773 = vmatpush3.bf16.msra.mxu1 %v16710_v17  ;;  %v16711_v1 = vld [vmem:[%s20356_s5 + $0x88] sm:$0xff]  }
 0x81b   : > { %v7215_v36 = vpop.f32.mrb[79].mxu1  ;;  %15774 = vmatprep.subr.bf16.mxu1 %v18617_v49 }
 0x81c   : > { %v7279_v48 = vadd.f32 %v7215_v36, %v18708_v19  ;;  %v16712_v19 = vld [vmem:[%s20356_s5 + $0x90] sm:$0xff]  }
 0x81d   : > { %15693 = vmatmul.mubr.bf16.gmra.mrb[48].mxu1 %v7820_v63 }
 0x81e   : > { %15696 = vmatprep.mubr.bf16.mxu1 %v7821_v10  ;;  %15775 = vmatpush3.bf16.msra.mxu1 %v16711_v1 }
 0x81f   : > { %15776 = vmatprep.subr.bf16.mxu1 %v18617_v49 }
 0x822   : > { %15777 = vmatpush3.bf16.msra.mxu1 %v16712_v19 }
 0x823   : > { %15778 = vmatprep.subr.bf16.mxu1 %v18617_v49 }
 0x825   : > { %15697 = vmatmul.mubr.bf16.gmra.mrb[84].mxu1 %v7822_v22 }
 0x826   : > { %15788 = vmatprep.mubr.msk.bf16.mxu1 %vm17264_vm2, %v18617_v49  ;;  %15779 = vmatpush3.bf16.msra.mxu1 %v16713_v40 }
 0x827   : > { %15780 = vmatprep.subr.bf16.mxu1 %v18617_v49 }
 0x82a   : > { %15781 = vmatpush3.bf16.msra.mxu1 %v16714_v44 }
 0x82b   : > { %15782 = vmatprep.subr.bf16.mxu1 %v18617_v49 }
 0x82e   : > { %15783 = vmatpush3.bf16.msra.mxu1 %v16715_v28 }
 0x82f   : > { %15784 = vmatprep.subr.bf16.mxu1 %v18617_v49 }
 0x832   : > { %15785 = vmatpush3.bf16.msra.mxu1 %v16716_v26 }
 0x833   : > { %15786 = vmatprep.subr.bf16.mxu1 %v18617_v49 }
 0x836   : > { %15787 = vmatpush3.bf16.msra.mxu1 %v16717_v43 }
 0x837   : > { %15844 = vmatprep.subr.bf16.mxu1 %v18617_v49 }
 0x888   : > { %v15626_v0 = vpop.f32.mrb[80].mxu1 }
 0x889   : > { %v18747_v18 = vadd.f32 %v15626_v0, %v7280_v33  ;;  %v7671_v54 = vpop.f32.mrb[81].mxu1 }
 0x88a   : > { %v18749_v41 = vadd.f32 %v7671_v54, %v7278_v29  ;;  %v15627_v4 = vpop.f32.mrb[82].mxu1 }
 0x88b   : > { %v7674_v56 = vpop.f32.mrb[83].mxu1 }
 0x88c   : > { %v18751_v60 = vadd.f32 %v7674_v56, %v7279_v48 }
 0x890   : > { %v15646_v34 = vpop.f32.mrb[0].mxu1 }
 0x891   : > { %v8208_v51 = vadd.f32 %v15646_v34, %v18756_v27  ;;  %v7922_v7 = vpop.f32.mrb[1].mxu1 }
 0x892   : > { %v8206_v49 = vadd.f32 %v18756_v27, %v7922_v7  ;;  %v15647_v59 = vpop.f32.mrb[2].mxu1 }
 0x893   : > { %v8263_v61 = vmax.f32 %v8208_v51, 0.0  ;;  %v8209_v46 = vadd.f32 %v15647_v59, %v18756_v27  ;;  %v7925_v31 = vpop.f32.mrb[3].mxu1 }
 0x894   : > { %v8261_v11 = vmax.f32 %v8206_v49, 0.0  ;;  %v8207_v58 = vadd.f32 %v18756_v27, %v7925_v31 }
 0x895   : > { %8318 = vst [vmem:[#allocation5 + $0x10] sm:$0xff] %v8263_v61  ;;  %v8264_v23 = vmax.f32 %v8209_v46, 0.0 }
 0x896   : > { %8316 = vst [vmem:[#allocation5] sm:$0xff] %v8261_v11  ;;  %v8262_v50 = vmax.f32 %v8207_v58, 0.0 }
 0x897   : > { %8319 = vst [vmem:[#allocation5 + $0x18] sm:$0xff] %v8264_v23 }
 0x898   : > { %8317 = vst [vmem:[#allocation5 + $0x8] sm:$0xff] %v8262_v50  ;;  %v15650_v21 = vpop.f32.mrb[4].mxu1 }
 0x899   : > { %v8212_v6 = vadd.f32 %v15650_v21, %v18756_v27  ;;  %v7938_v14 = vpop.f32.mrb[5].mxu1 }
 0x89a   : > { %v8210_v25 = vadd.f32 %v18756_v27, %v7938_v14  ;;  %v15651_v30 = vpop.f32.mrb[6].mxu1 }
 0x89b   : > { %v8267_v9 = vmax.f32 %v8212_v6, 0.0  ;;  %v8213_v37 = vadd.f32 %v15651_v30, %v18756_v27  ;;  %v7941_v57 = vpop.f32.mrb[7].mxu1 }
 0x89c   : > { %v8265_v5 = vmax.f32 %v8210_v25, 0.0  ;;  %v8211_v13 = vadd.f32 %v18756_v27, %v7941_v57 }
 0x89d   : > { %8322 = vst [vmem:[#allocation5 + $0x30] sm:$0xff] %v8267_v9  ;;  %v8268_v55 = vmax.f32 %v8213_v37, 0.0 }
 0x89e   : > { %v8373_v3 = vld [vmem:[#allocation5 + $0x10] ss:$2 sm:$0xff]  ;;  %v8429_v62 = vld [vmem:[#allocation5 + $0x11] ss:$2 sm:$0xff]  ;;  %8320 = vst [vmem:[#allocation5 + $0x20] sm:$0xff] %v8265_v5  ;;  %v8266_v2 = vmax.f32 %v8211_v13, 0.0 }
 0x89f   : > { %v8483_v8 = vmax.f32 %v8373_v3, %v8429_v62  ;;  %v8371_v45 = vld [vmem:[#allocation5] ss:$2 sm:$0xff]  ;;  %v8427_v16 = vld [vmem:[#allocation5 + $0x1] ss:$2 sm:$0xff]  ;;  %8323 = vst [vmem:[#allocation5 + $0x38] sm:$0xff] %v8268_v55 }
 0x8a0   : > { %v8482_v15 = vmax.f32 %v8371_v45, %v8427_v16  ;;  %8321 = vst [vmem:[#allocation5 + $0x28] sm:$0xff] %v8266_v2  ;;  %v15654_v20 = vpop.f32.mrb[8].mxu1 }
 0x8a1   : > { %8511 = vst [vmem:[#allocation6 + $0x8] sm:$0xff] %v8483_v8  ;;  %v8216_v47 = vadd.f32 %v15654_v20, %v18756_v27  ;;  %v7954_v38 = vpop.f32.mrb[9].mxu1 }
 0x8a2   : > { %v8214_v42 = vadd.f32 %v18756_v27, %v7954_v38  ;;  %v15655_v32 = vpop.f32.mrb[10].mxu1 }
 0x8a3   : > { %v8271_v33 = vmax.f32 %v8216_v47, 0.0  ;;  %v8217_v24 = vadd.f32 %v15655_v32, %v18756_v27  ;;  %v7957_v39 = vpop.f32.mrb[11].mxu1 }
 0x8a4   : > { %v8269_v29 = vmax.f32 %v8214_v42, 0.0  ;;  %v8215_v35 = vadd.f32 %v18756_v27, %v7957_v39 }
 0x8a5   : > { %8326 = vst [vmem:[#allocation5 + $0x50] sm:$0xff] %v8271_v33  ;;  %v8272_v53 = vmax.f32 %v8217_v24, 0.0 }
 0x8a6   : > { %v8377_v36 = vld [vmem:[#allocation5 + $0x30] ss:$2 sm:$0xff]  ;;  %v8433_v63 = vld [vmem:[#allocation5 + $0x31] ss:$2 sm:$0xff]  ;;  %8324 = vst [vmem:[#allocation5 + $0x40] sm:$0xff] %v8269_v29  ;;  %v8270_v48 = vmax.f32 %v8215_v35, 0.0 }
 0x8a7   : > { %v8485_v52 = vmax.f32 %v8377_v36, %v8433_v63  ;;  %v8375_v10 = vld [vmem:[#allocation5 + $0x20] ss:$2 sm:$0xff]  ;;  %v8431_v12 = vld [vmem:[#allocation5 + $0x21] ss:$2 sm:$0xff]  ;;  %8327 = vst [vmem:[#allocation5 + $0x58] sm:$0xff] %v8272_v53 }
 0x8a8   : > { %v8484_v22 = vmax.f32 %v8375_v10, %v8431_v12  ;;  %8325 = vst [vmem:[#allocation5 + $0x48] sm:$0xff] %v8270_v48  ;;  %v15658_v17 = vpop.f32.mrb[12].mxu1  ;;  %v8539_v31 = vld [vmem:[#allocation6 + $0x8] sm:$0x7] }
 0x8a9   : > { %8513 = vst [vmem:[#allocation6 + $0x18] sm:$0xff] %v8485_v52  ;;  %v8220_v1 = vadd.f32 %v15658_v17, %v18756_v27  ;;  %v7970_v19 = vpop.f32.mrb[13].mxu1  ;;  %v16720_v52 = vld [vmem:[%s20356_s5 + $0x100] sm:$0xff]  }
 0x8aa   : > { %8512 = vst [vmem:[#allocation6 + $0x10] sm:$0xff] %v8484_v22  ;;  %v8218_v40 = vadd.f32 %v18756_v27, %v7970_v19  ;;  %v15659_v44 = vpop.f32.mrb[14].mxu1 }
 0x8ab   : > { %v8275_v28 = vmax.f32 %v8220_v1, 0.0  ;;  %v8221_v26 = vadd.f32 %v15659_v44, %v18756_v27  ;;  %v7973_v43 = vpop.f32.mrb[15].mxu1 }
 0x8ac   : > { %v8273_v0 = vmax.f32 %v8218_v40, 0.0  ;;  %v8219_v54 = vadd.f32 %v18756_v27, %v7973_v43  ;;  %v18785_v43 = vld [vmem:[#allocation4 + $0x1e4] sm:$0xff] }
 0x8ad   : > { %8330 = vst [vmem:[#allocation5 + $0x70] sm:$0xff] %v8275_v28  ;;  %v8276_v4 = vmax.f32 %v8221_v26, 0.0 }
 0x8ae   : > { %v8381_v56 = vld [vmem:[#allocation5 + $0x50] ss:$2 sm:$0xff]  ;;  %v8437_v34 = vld [vmem:[#allocation5 + $0x51] ss:$2 sm:$0xff]  ;;  %8328 = vst [vmem:[#allocation5 + $0x60] sm:$0xff] %v8273_v0  ;;  %v8274_v51 = vmax.f32 %v8219_v54, 0.0 }
 0x8af   : > { %v8487_v7 = vmax.f32 %v8381_v56, %v8437_v34  ;;  %v8379_v49 = vld [vmem:[#allocation5 + $0x40] ss:$2 sm:$0xff]  ;;  %v8435_v59 = vld [vmem:[#allocation5 + $0x41] ss:$2 sm:$0xff]  ;;  %8331 = vst [vmem:[#allocation5 + $0x78] sm:$0xff] %v8276_v4 }
 0x8b0   : > { %v8486_v61 = vmax.f32 %v8379_v49, %v8435_v59  ;;  %8329 = vst [vmem:[#allocation5 + $0x68] sm:$0xff] %v8274_v51  ;;  %v15662_v46 = vpop.f32.mrb[16].mxu1  ;;  %v16722_v0 = vld [vmem:[%s20356_s5 + $0x108] sm:$0xff]  }
 0x8b1   : > { %v8540_v11 = vld [vmem:[#allocation6 + $0xb] sm:$0xff]  ;;  %v8541_v58 = vld [vmem:[#allocation6 + $0x13] sm:$0x7]  ;;  %8515 = vst [vmem:[#allocation6 + $0x28] sm:$0xff] %v8487_v7  ;;  %v8224_v23 = vadd.f32 %v15662_v46, %v18756_v27  ;;  %v7986_v50 = vpop.f32.mrb[17].mxu1  ;;  %v8546_v47 = vld [vmem:[#allocation6 + $0x16] sm:$0xff] }
 0x8b2   : > { %v8542_v21 = vmax.f32 %v8482_v15, %v8540_v11  ;;  %v8543_v6 = vmax.f32 %v8539_v31, %v8541_v58  ;;  %8514 = vst [vmem:[#allocation6 + $0x20] sm:$0xff] %v8486_v61  ;;  %v8222_v14 = vadd.f32 %v18756_v27, %v7986_v50  ;;  %v15663_v25 = vpop.f32.mrb[18].mxu1  ;;  %v16718_v50 = vld [vmem:[%s20356_s5] sm:$0xff]  }
 0x8b3   : > { %v8279_v30 = vmax.f32 %v8224_v23, 0.0  ;;  %v8225_v9 = vadd.f32 %v15663_v25, %v18756_v27  ;;  %v7989_v37 = vpop.f32.mrb[19].mxu1  ;;  %v16724_v25 = vld [vmem:[%s20356_s5 + $0x110] sm:$0xff]  }
 0x8b4   : > { %8544 = vst [vmem:[#allocation7] sm:$0xff] %v8542_v21  ;;  %8545 = vst [vmem:[#allocation7 + $0x8] sm:$0x3] %v8543_v6  ;;  %v8277_v57 = vmax.f32 %v8222_v14, 0.0  ;;  %v8223_v5 = vadd.f32 %v18756_v27, %v7989_v37 }
 0x8b5   : > { %8334 = vst [vmem:[#allocation5 + $0x90] sm:$0xff] %v8279_v30  ;;  %v8280_v13 = vmax.f32 %v8225_v9, 0.0 }
 0x8b6   : > { %v8385_v55 = vld [vmem:[#allocation5 + $0x70] ss:$2 sm:$0xff]  ;;  %v8441_v3 = vld [vmem:[#allocation5 + $0x71] ss:$2 sm:$0xff]  ;;  %8332 = vst [vmem:[#allocation5 + $0x80] sm:$0xff] %v8277_v57  ;;  %v8278_v62 = vmax.f32 %v8223_v5, 0.0 }
 0x8b7   : > { %v8489_v2 = vmax.f32 %v8385_v55, %v8441_v3  ;;  %v8383_v8 = vld [vmem:[#allocation5 + $0x60] ss:$2 sm:$0xff]  ;;  %v8439_v45 = vld [vmem:[#allocation5 + $0x61] ss:$2 sm:$0xff]  ;;  %8335 = vst [vmem:[#allocation5 + $0x98] sm:$0xff] %v8280_v13 }
 0x8b8   : > { %v8488_v16 = vmax.f32 %v8383_v8, %v8439_v45  ;;  %8333 = vst [vmem:[#allocation5 + $0x88] sm:$0xff] %v8278_v62  ;;  %v15666_v15 = vpop.f32.mrb[20].mxu1  ;;  %v8549_v20 = vld [vmem:[#allocation6 + $0x29] sm:$0x7]  ;;  %v16726_v8 = vld [vmem:[%s20356_s5 + $0x118] sm:$0xff]  }
 0x8b9   : > { %v8548_v38 = vld [vmem:[#allocation6 + $0x21] sm:$0xff]  ;;  %8517 = vst [vmem:[#allocation6 + $0x38] sm:$0xff] %v8489_v2  ;;  %v8228_v42 = vadd.f32 %v15666_v15, %v18756_v27  ;;  %v8002_v32 = vpop.f32.mrb[21].mxu1  ;;  %v8547_v33 = vld [vmem:[#allocation6 + $0x1e] sm:$0x7] }
 0x8ba   : > { %v8550_v24 = vmax.f32 %v8546_v47, %v8548_v38  ;;  %8516 = vst [vmem:[#allocation6 + $0x30] sm:$0xff] %v8488_v16  ;;  %v8226_v39 = vadd.f32 %v18756_v27, %v8002_v32  ;;  %v15667_v29 = vpop.f32.mrb[22].mxu1  ;;  %v8551_v35 = vmax.f32 %v8547_v33, %v8549_v20  ;;  %v16719_v3 = vld [vmem:[%s20356_s5 + $0x8] sm:$0xff]  }
 0x8bb   : > { %v8283_v53 = vmax.f32 %v8228_v42, 0.0  ;;  %v8229_v36 = vadd.f32 %v15667_v29, %v18756_v27  ;;  %v8005_v63 = vpop.f32.mrb[23].mxu1  ;;  %v8923_v48 = vld [vmem:[#allocation7 + $0x2] sm:$0xff] }
 0x8bc   : > { %8552 = vst [vmem:[#allocation7 + $0xa] sm:$0xff] %v8550_v24  ;;  %v8281_v10 = vmax.f32 %v8226_v39, 0.0  ;;  %v8227_v12 = vadd.f32 %v18756_v27, %v8005_v63  ;;  %v8933_v22 = vpack.c.bf16 %v8550_v24, %v8923_v48  ;;  %8553 = vst [vmem:[#allocation7 + $0x12] sm:$0x3] %v8551_v35  ;;  %v8649_v58 = vld [vmem:[#allocation7 + $0x1] sm:$0xff]  ;;  %v16721_v39 = vld [vmem:[%s20356_s5 + $0x10] sm:$0xff]  }
 0x8bd   : > { %8338 = vst [vmem:[#allocation5 + $0xb0] sm:$0xff] %v8283_v53  ;;  %v8284_v17 = vmax.f32 %v8229_v36, 0.0  ;;  %v16728_v53 = vld [vmem:[%s20356_s5 + $0x120] sm:$0xff]  }
 0x8be   : > { %v8389_v1 = vld [vmem:[#allocation5 + $0x90] ss:$2 sm:$0xff]  ;;  %v8445_v19 = vld [vmem:[#allocation5 + $0x91] ss:$2 sm:$0xff]  ;;  %8336 = vst [vmem:[#allocation5 + $0xa0] sm:$0xff] %v8281_v10  ;;  %v8282_v40 = vmax.f32 %v8227_v12, 0.0  ;;  %15789 = vmatmul.mubr.bf16.vlgmr.msra.gmra.mrb[88].mxu1 %v8933_v22 }
 0x8bf   : > { %v8491_v44 = vmax.f32 %v8389_v1, %v8445_v19  ;;  %v8387_v28 = vld [vmem:[#allocation5 + $0x80] ss:$2 sm:$0xff]  ;;  %v8443_v26 = vld [vmem:[#allocation5 + $0x81] ss:$2 sm:$0xff]  ;;  %8339 = vst [vmem:[#allocation5 + $0xb8] sm:$0xff] %v8284_v17  ;;  %15792 = vmatprep.mubr.msk.bf16.mxu1 %vm17264_vm2, %v18785_v43  ;;  %15845 = vmatpush3.bf16.msra.mxu1 %v16720_v52  ;;  %v16723_v17 = vld [vmem:[%s20356_s5 + $0x18] sm:$0xff]  }
 0x8c0   : > { %v8490_v54 = vmax.f32 %v8387_v28, %v8443_v26  ;;  %8337 = vst [vmem:[#allocation5 + $0xa8] sm:$0xff] %v8282_v40  ;;  %v15670_v4 = vpop.f32.mrb[24].mxu1  ;;  %15846 = vmatprep.subr.bf16.mxu1 %v18785_v43 }
 0x8c1   : > { %8519 = vst [vmem:[#allocation6 + $0x48] sm:$0xff] %v8491_v44  ;;  %v8232_v56 = vadd.f32 %v15670_v4, %v18756_v27  ;;  %v8018_v34 = vpop.f32.mrb[25].mxu1  ;;  %v8554_v51 = vld [vmem:[#allocation6 + $0x2c] sm:$0xff]  ;;  %v8556_v7 = vld [vmem:[#allocation6 + $0x37] sm:$0xff]  ;;  %v8555_v15 = vld [vmem:[#allocation6 + $0x34] sm:$0x7] }
 0x8c2   : > { %8518 = vst [vmem:[#allocation6 + $0x40] sm:$0xff] %v8490_v54  ;;  %v8230_v49 = vadd.f32 %v18756_v27, %v8018_v34  ;;  %v15671_v59 = vpop.f32.mrb[26].mxu1  ;;  %v18795_v61 = vmax.f32 %v8554_v51, %v8556_v7  ;;  %v16729_v44 = vld [vmem:[%s20356_s5 + $0x128] sm:$0xff]  }
 0x8c3   : > { %v8287_v46 = vmax.f32 %v8232_v56, 0.0  ;;  %v8233_v31 = vadd.f32 %v15671_v59, %v18756_v27  ;;  %v8021_v11 = vpop.f32.mrb[27].mxu1  ;;  %v8650_v23 = vld [vmem:[#allocation7 + $0x9] sm:$0xff]  ;;  %15847 = vmatpush3.bf16.msra.mxu1 %v16722_v0 }
 0x8c4   : > { %v8285_v21 = vmax.f32 %v8230_v49, 0.0  ;;  %v8231_v6 = vadd.f32 %v18756_v27, %v8021_v11  ;;  %v8659_v14 = vpack.c.bf16 %v8650_v23, %v8649_v58  ;;  %8560 = vst [vmem:[#allocation7 + $0x14] sm:$0xff] %v18795_v61  ;;  %15848 = vmatprep.subr.bf16.mxu1 %v18785_v43  ;;  %v16731_v23 = vld [vmem:[%s20356_s5 + $0x130] sm:$0xff]  }
 0x8c5   : > { %8342 = vst [vmem:[#allocation5 + $0xd0] sm:$0xff] %v8287_v46  ;;  %v8288_v30 = vmax.f32 %v8233_v31, 0.0  ;;  %v16725_v31 = vld [vmem:[%s20356_s5 + $0x20] sm:$0xff]  }
 0x8c6   : > { %v18807_v9 = vld [vmem:[#allocation5 + $0xb0] ss:$2 sm:$0xff]  ;;  %v18809_v37 = vld [vmem:[#allocation5 + $0xb1] ss:$2 sm:$0xff]  ;;  %8340 = vst [vmem:[#allocation5 + $0xc0] sm:$0xff] %v8285_v21  ;;  %v8286_v57 = vmax.f32 %v8231_v6, 0.0  ;;  %15717 = vmatmul.mubr.bf16.vlgmr.msra.gmra.mrb[228].mxu0 %v8659_v14 }
 0x8c7   : > { %v8493_v5 = vmax.f32 %v18807_v9, %v18809_v37  ;;  %v8391_v13 = vld [vmem:[#allocation5 + $0xa0] ss:$2 sm:$0xff]  ;;  %v8447_v55 = vld [vmem:[#allocation5 + $0xa1] ss:$2 sm:$0xff]  ;;  %8343 = vst [vmem:[#allocation5 + $0xd8] sm:$0xff] %v8288_v30  ;;  %15720 = vmatprep.mubr.msk.bf16.mxu0 %vm17264_vm2, %v18785_v43  ;;  %15737 = vmatpush3.bf16.msra.mxu0 %v16718_v50 }
 0x8c8   : > { %v8492_v62 = vmax.f32 %v8391_v13, %v8447_v55  ;;  %8341 = vst [vmem:[#allocation5 + $0xc8] sm:$0xff] %v8286_v57  ;;  %v15674_v2 = vpop.f32.mrb[28].mxu1  ;;  %15738 = vmatprep.subr.bf16.mxu0 %v18785_v43  ;;  %15849 = vmatpush3.bf16.msra.mxu1 %v16724_v25  ;;  %v8563_v40 = vld [vmem:[#allocation6 + $0x4a] sm:$0x7]  ;;  %v16730_v37 = vld [vmem:[%s20356_s5 + $0x30] sm:$0xff]  }
 0x8c9   : > { %v8236_v45 = vadd.f32 %v15674_v2, %v18756_v27  ;;  %v8034_v16 = vpop.f32.mrb[29].mxu1  ;;  %v8557_v20 = vld [vmem:[#allocation6 + $0x3f] sm:$0x7]  ;;  %15850 = vmatprep.subr.bf16.mxu1 %v18785_v43  ;;  %v8562_v0 = vld [vmem:[#allocation6 + $0x42] sm:$0xff] }
 0x8ca   : > { %8520 = vst [vmem:[#allocation6 + $0x50] sm:$0xff] %v8492_v62  ;;  %v8234_v47 = vadd.f32 %v18756_v27, %v8034_v16  ;;  %v15675_v38 = vpop.f32.mrb[30].mxu1  ;;  %v8559_v42 = vmax.f32 %v8555_v15, %v8557_v20  ;;  %v16727_v13 = vld [vmem:[%s20356_s5 + $0x28] sm:$0xff]   ;;  %v16733_v2 = vld [vmem:[%s20356_s5 + $0x138] sm:$0xff]  }
 0x8cb   : > { %v8291_v32 = vmax.f32 %v8236_v45, 0.0  ;;  %v8237_v33 = vadd.f32 %v15675_v38, %v18756_v27  ;;  %v8037_v24 = vpop.f32.mrb[31].mxu1  ;;  %15739 = vmatpush3.bf16.msra.mxu0 %v16719_v3  ;;  %v8651_v38 = vld [vmem:[#allocation7 + $0x11] sm:$0xff] }
 0x8cc   : > { %v8289_v29 = vmax.f32 %v8234_v47, 0.0  ;;  %v8235_v35 = vadd.f32 %v18756_v27, %v8037_v24  ;;  %8561 = vst [vmem:[#allocation7 + $0x1c] sm:$0x3] %v8559_v42  ;;  %15740 = vmatprep.subr.bf16.mxu0 %v18785_v43  ;;  %15851 = vmatpush3.bf16.msra.mxu1 %v16726_v8 }
 0x8cd   : > { %8346 = vst [vmem:[#allocation5 + $0xf0] sm:$0xff] %v8291_v32  ;;  %v8292_v36 = vmax.f32 %v8237_v33, 0.0  ;;  %15852 = vmatprep.subr.bf16.mxu1 %v18785_v43 }
 0x8ce   : > { %v8397_v63 = vld [vmem:[#allocation5 + $0xd0] ss:$2 sm:$0xff]  ;;  %v8453_v48 = vld [vmem:[#allocation5 + $0xd1] ss:$2 sm:$0xff]  ;;  %8344 = vst [vmem:[#allocation5 + $0xe0] sm:$0xff] %v8289_v29  ;;  %v8290_v52 = vmax.f32 %v8235_v35, 0.0 }
 0x8cf   : > { %v8495_v10 = vmax.f32 %v8397_v63, %v8453_v48  ;;  %v8395_v12 = vld [vmem:[#allocation5 + $0xc0] ss:$2 sm:$0xff]  ;;  %v8451_v22 = vld [vmem:[#allocation5 + $0xc1] ss:$2 sm:$0xff]  ;;  %8347 = vst [vmem:[#allocation5 + $0xf8] sm:$0xff] %v8292_v36  ;;  %15741 = vmatpush3.bf16.msra.mxu0 %v16721_v39 }
 0x8d0   : > { %v8494_v1 = vmax.f32 %v8395_v12, %v8451_v22  ;;  %8345 = vst [vmem:[#allocation5 + $0xe8] sm:$0xff] %v8290_v52  ;;  %v15678_v19 = vpop.f32.mrb[32].mxu1  ;;  %15742 = vmatprep.subr.bf16.mxu0 %v18785_v43  ;;  %15853 = vmatpush3.bf16.msra.mxu1 %v16728_v53  ;;  %v18871_v35 = vld [vmem:[#allocation7 + $0x12] sm:$0xff] }
 0x8d1   : > { %8523 = vst [vmem:[#allocation6 + $0x68] sm:$0xff] %v8495_v10  ;;  %v8240_v28 = vadd.f32 %v15678_v19, %v18756_v27  ;;  %v8050_v26 = vpop.f32.mrb[33].mxu1  ;;  %v8564_v54 = vld [vmem:[#allocation6 + $0x4d] sm:$0xff]  ;;  %v8565_v4 = vld [vmem:[#allocation6 + $0x55] sm:$0x7]  ;;  %15854 = vmatprep.subr.bf16.mxu1 %v18785_v43 }
 0x8d2   : > { %8522 = vst [vmem:[#allocation6 + $0x60] sm:$0xff] %v8494_v1  ;;  %v8238_v56 = vadd.f32 %v18756_v27, %v8050_v26  ;;  %v15679_v34 = vpop.f32.mrb[34].mxu1  ;;  %v8566_v51 = vmax.f32 %v8562_v0, %v8564_v54  ;;  %v8567_v7 = vmax.f32 %v8563_v40, %v8565_v4 }
 0x8d3   : > { %v8295_v49 = vmax.f32 %v8240_v28, 0.0  ;;  %v8241_v59 = vadd.f32 %v15679_v34, %v18756_v27  ;;  %v8053_v46 = vpop.f32.mrb[35].mxu1  ;;  %15743 = vmatpush3.bf16.msra.mxu0 %v16723_v17 }
 0x8d4   : > { %v8293_v11 = vmax.f32 %v8238_v56, 0.0  ;;  %v8239_v58 = vadd.f32 %v18756_v27, %v8053_v46  ;;  %8568 = vst [vmem:[#allocation7 + $0x1e] sm:$0xff] %v8566_v51  ;;  %8569 = vst [vmem:[#allocation7 + $0x26] sm:$0x3] %v8567_v7  ;;  %15744 = vmatprep.subr.bf16.mxu0 %v18785_v43  ;;  %15855 = vmatpush3.bf16.msra.mxu1 %v16729_v44  ;;  %v16732_v44 = vld [vmem:[%s20356_s5 + $0x38] sm:$0xff]  }
 0x8d5   : > { %8350 = vst [vmem:[#allocation5 + $0x110] sm:$0xff] %v8295_v49  ;;  %v8296_v50 = vmax.f32 %v8241_v59, 0.0  ;;  %15856 = vmatprep.subr.bf16.mxu1 %v18785_v43 }
 0x8d6   : > { %v8401_v21 = vld [vmem:[#allocation5 + $0xf0] ss:$2 sm:$0xff]  ;;  %v8457_v6 = vld [vmem:[#allocation5 + $0xf1] ss:$2 sm:$0xff]  ;;  %8348 = vst [vmem:[#allocation5 + $0x100] sm:$0xff] %v8293_v11  ;;  %v8294_v14 = vmax.f32 %v8239_v58, 0.0 }
 0x8d7   : > { %v8497_v25 = vmax.f32 %v8401_v21, %v8457_v6  ;;  %v8399_v30 = vld [vmem:[#allocation5 + $0xe0] ss:$2 sm:$0xff]  ;;  %v8455_v57 = vld [vmem:[#allocation5 + $0xe1] ss:$2 sm:$0xff]  ;;  %8351 = vst [vmem:[#allocation5 + $0x118] sm:$0xff] %v8296_v50  ;;  %15745 = vmatpush3.bf16.msra.mxu0 %v16725_v31 }
 0x8d8   : > { %v8496_v55 = vmax.f32 %v8399_v30, %v8455_v57  ;;  %8349 = vst [vmem:[#allocation5 + $0x108] sm:$0xff] %v8294_v14  ;;  %v15682_v3 = vpop.f32.mrb[36].mxu1  ;;  %v8573_v62 = vld [vmem:[#allocation6 + $0x6b] sm:$0x7]  ;;  %15746 = vmatprep.subr.bf16.mxu0 %v18785_v43  ;;  %15857 = vmatpush3.bf16.msra.mxu1 %v16731_v23 }
 0x8d9   : > { %8525 = vst [vmem:[#allocation6 + $0x78] sm:$0xff] %v8497_v25  ;;  %v8244_v8 = vadd.f32 %v15682_v3, %v18756_v27  ;;  %v8066_v45 = vpop.f32.mrb[37].mxu1  ;;  %v8571_v16 = vld [vmem:[#allocation6 + $0x60] sm:$0x7]  ;;  %v8572_v15 = vld [vmem:[#allocation6 + $0x63] sm:$0xff]  ;;  %15858 = vmatprep.subr.bf16.mxu1 %v18785_v43 }
 0x8da   : > { %8524 = vst [vmem:[#allocation6 + $0x70] sm:$0xff] %v8496_v55  ;;  %v8242_v20 = vadd.f32 %v18756_v27, %v8066_v45  ;;  %v15683_v47 = vpop.f32.mrb[38].mxu1  ;;  %v18868_v42 = vmax.f32 %v8493_v5, %v8572_v15  ;;  %v8575_v32 = vmax.f32 %v8571_v16, %v8573_v62 }
 0x8db   : > { %v8299_v33 = vmax.f32 %v8244_v8, 0.0  ;;  %v8245_v24 = vadd.f32 %v15683_v47, %v18756_v27  ;;  %v8069_v39 = vpop.f32.mrb[39].mxu1  ;;  %v8652_v29 = vld [vmem:[#allocation7 + $0x19] sm:$0xff]  ;;  %15747 = vmatpush3.bf16.msra.mxu0 %v16727_v13 }
 0x8dc   : > { %v18873_v53 = vld [vmem:[#allocation7 + $0x1a] sm:$0xff]  ;;  %v8297_v36 = vmax.f32 %v8242_v20, 0.0  ;;  %v8243_v63 = vadd.f32 %v18756_v27, %v8069_v39  ;;  %v8660_v48 = vpack.c.bf16 %v8652_v29, %v8651_v38  ;;  %8576 = vst [vmem:[#allocation7 + $0x28] sm:$0xff] %v18868_v42  ;;  %8577 = vst [vmem:[#allocation7 + $0x30] sm:$0x3] %v8575_v32  ;;  %15748 = vmatprep.subr.bf16.mxu0 %v18785_v43  ;;  %15859 = vmatpush3.bf16.msra.mxu1 %v16733_v2 }
 0x8dd   : > { %v8934_v9 = vpack.c.bf16 %v18873_v53, %v18871_v35  ;;  %8354 = vst [vmem:[#allocation5 + $0x130] sm:$0xff] %v8299_v33  ;;  %v8300_v5 = vmax.f32 %v8245_v24, 0.0  ;;  %15916 = vmatprep.subr.bf16.mxu1 %v18785_v43 }
 0x8de   : > { %v8405_v52 = vld [vmem:[#allocation5 + $0x110] ss:$2 sm:$0xff]  ;;  %v8461_v10 = vld [vmem:[#allocation5 + $0x111] ss:$2 sm:$0xff]  ;;  %8352 = vst [vmem:[#allocation5 + $0x120] sm:$0xff] %v8297_v36  ;;  %v8298_v12 = vmax.f32 %v8243_v63, 0.0  ;;  %15721 = vmatmul.mubr.bf16.gmra.mrb[232].mxu0 %v8660_v48 }
 0x8df   : > { %15793 = vmatmul.mubr.bf16.gmra.mrb[92].mxu1 %v8934_v9  ;;  %v8499_v22 = vmax.f32 %v8405_v52, %v8461_v10  ;;  %v8403_v17 = vld [vmem:[#allocation5 + $0x100] ss:$2 sm:$0xff]  ;;  %v8459_v1 = vld [vmem:[#allocation5 + $0x101] ss:$2 sm:$0xff]  ;;  %8355 = vst [vmem:[#allocation5 + $0x138] sm:$0xff] %v8300_v5  ;;  %15724 = vmatprep.mubr.msk.bf16.mxu0 %vm17264_vm2, %v18785_v43 }
 0x8e0   : > { %15796 = vmatprep.mubr.msk.bf16.mxu1 %vm17264_vm2, %v18785_v43  ;;  %v8498_v19 = vmax.f32 %v8403_v17, %v8459_v1  ;;  %8353 = vst [vmem:[#allocation5 + $0x128] sm:$0xff] %v8298_v12  ;;  %v15686_v40 = vpop.f32.mrb[40].mxu1  ;;  %15749 = vmatpush3.bf16.msra.mxu0 %v16730_v37 }
 0x8e1   : > { %8527 = vst [vmem:[#allocation6 + $0x88] sm:$0xff] %v8499_v22  ;;  %v8248_v28 = vadd.f32 %v15686_v40, %v18756_v27  ;;  %v8082_v26 = vpop.f32.mrb[41].mxu1  ;;  %15750 = vmatprep.subr.bf16.mxu0 %v18785_v43  ;;  %v8578_v3 = vld [vmem:[#allocation6 + $0x6e] sm:$0xff]  ;;  %v8579_v8 = vld [vmem:[#allocation6 + $0x76] sm:$0x7] }
 0x8e2   : > { %8526 = vst [vmem:[#allocation6 + $0x80] sm:$0xff] %v8498_v19  ;;  %v8246_v0 = vadd.f32 %v18756_v27, %v8082_v26  ;;  %v15687_v54 = vpop.f32.mrb[42].mxu1 }
 0x8e3   : > { %v8303_v4 = vmax.f32 %v8248_v28, 0.0  ;;  %v8249_v56 = vadd.f32 %v15687_v54, %v18756_v27  ;;  %v8085_v34 = vpop.f32.mrb[43].mxu1  ;;  %v8653_v51 = vld [vmem:[#allocation7 + $0x21] sm:$0xff]  ;;  %v8654_v7 = vld [vmem:[#allocation7 + $0x29] sm:$0xff] }
 0x8e4   : > { %v18895_v49 = vld [vmem:[#allocation7 + $0x22] sm:$0xff]  ;;  %v8301_v59 = vmax.f32 %v8246_v0, 0.0  ;;  %v8247_v46 = vadd.f32 %v18756_v27, %v8085_v34  ;;  %v8661_v31 = vpack.c.bf16 %v8654_v7, %v8653_v51  ;;  %v18898_v11 = vld [vmem:[#allocation7 + $0x2a] sm:$0xff]  ;;  %15751 = vmatpush3.bf16.msra.mxu0 %v16732_v44 }
 0x8e5   : > { %v9097_v58 = vpack.c.bf16 %v18895_v49, %v18873_v53  ;;  %8358 = vst [vmem:[#allocation5 + $0x150] sm:$0xff] %v8303_v4  ;;  %v8304_v23 = vmax.f32 %v8249_v56, 0.0  ;;  %v8935_v50 = vpack.c.bf16 %v18898_v11, %v18895_v49  ;;  %15808 = vmatprep.subr.bf16.mxu0 %v18785_v43  ;;  %v16757_v49 = vld [vmem:[%s20356_s5 + $0x160] sm:$0xff]  }
 0x8e6   : > { %v8409_v21 = vld [vmem:[#allocation5 + $0x130] ss:$2 sm:$0xff]  ;;  %v8465_v6 = vld [vmem:[#allocation5 + $0x131] ss:$2 sm:$0xff]  ;;  %8356 = vst [vmem:[#allocation5 + $0x140] sm:$0xff] %v8301_v59  ;;  %v8302_v14 = vmax.f32 %v8247_v46, 0.0  ;;  %15725 = vmatmul.mubr.bf16.gmra.mrb[236].mxu0 %v8661_v31 }
 0x8e7   : > { %v8501_v25 = vmax.f32 %v8409_v21, %v8465_v6  ;;  %v8407_v30 = vld [vmem:[#allocation5 + $0x120] ss:$2 sm:$0xff]  ;;  %v8463_v57 = vld [vmem:[#allocation5 + $0x121] ss:$2 sm:$0xff]  ;;  %8359 = vst [vmem:[#allocation5 + $0x158] sm:$0xff] %v8304_v23  ;;  %15797 = vmatmul.mubr.bf16.gmra.mrb[96].mxu1 %v8935_v50  ;;  %15728 = vmatprep.mubr.msk.bf16.mxu0 %vm17264_vm2, %v18785_v43 }
 0x8e8   : > { %v8500_v13 = vmax.f32 %v8407_v30, %v8463_v57  ;;  %8357 = vst [vmem:[#allocation5 + $0x148] sm:$0xff] %v8302_v14  ;;  %v15690_v55 = vpop.f32.mrb[44].mxu1  ;;  %15800 = vmatprep.mubr.msk.bf16.mxu1 %vm17264_vm2, %v18785_v43  ;;  %v8587_v17 = vld [vmem:[#allocation6 + $0x8c] sm:$0x7] }
 0x8e9   : > { %8529 = vst [vmem:[#allocation6 + $0x98] sm:$0xff] %v8501_v25  ;;  %v8252_v62 = vadd.f32 %v15690_v55, %v18756_v27  ;;  %v8098_v2 = vpop.f32.mrb[45].mxu1  ;;  %v8580_v45 = vld [vmem:[#allocation6 + $0x79] sm:$0xff]  ;;  %v8581_v16 = vld [vmem:[#allocation6 + $0x81] sm:$0x7]  ;;  %v8586_v40 = vld [vmem:[#allocation6 + $0x84] sm:$0xff] }
 0x8ea   : > { %8528 = vst [vmem:[#allocation6 + $0x90] sm:$0xff] %v8500_v13  ;;  %v8250_v15 = vadd.f32 %v18756_v27, %v8098_v2  ;;  %v15691_v20 = vpop.f32.mrb[46].mxu1  ;;  %v18911_v47 = vmax.f32 %v8578_v3, %v8580_v45  ;;  %v8583_v38 = vmax.f32 %v8579_v8, %v8581_v16 }
 0x8eb   : > { %v8307_v32 = vmax.f32 %v8252_v62, 0.0  ;;  %v8253_v33 = vadd.f32 %v15691_v20, %v18756_v27  ;;  %v8101_v24 = vpop.f32.mrb[47].mxu1 }
 0x8ec   : > { %v8305_v39 = vmax.f32 %v8250_v15, 0.0  ;;  %v8251_v29 = vadd.f32 %v18756_v27, %v8101_v24  ;;  %8584 = vst [vmem:[#allocation7 + $0x32] sm:$0xff] %v18911_v47  ;;  %8585 = vst [vmem:[#allocation7 + $0x3a] sm:$0x3] %v8583_v38  ;;  %v9098_v36 = vpack.c.bf16 %v18911_v47, %v18898_v11 }
 0x8ed   : > { %8362 = vst [vmem:[#allocation5 + $0x170] sm:$0xff] %v8307_v32  ;;  %v8308_v63 = vmax.f32 %v8253_v33, 0.0 }
 0x8ee   : > { %v8413_v48 = vld [vmem:[#allocation5 + $0x150] ss:$2 sm:$0xff]  ;;  %v8469_v9 = vld [vmem:[#allocation5 + $0x151] ss:$2 sm:$0xff]  ;;  %8360 = vst [vmem:[#allocation5 + $0x160] sm:$0xff] %v8305_v39  ;;  %v8306_v37 = vmax.f32 %v8251_v29, 0.0 }
 0x8ef   : > { %v8503_v5 = vmax.f32 %v8413_v48, %v8469_v9  ;;  %v8411_v52 = vld [vmem:[#allocation5 + $0x140] ss:$2 sm:$0xff]  ;;  %v8467_v10 = vld [vmem:[#allocation5 + $0x141] ss:$2 sm:$0xff]  ;;  %8363 = vst [vmem:[#allocation5 + $0x178] sm:$0xff] %v8308_v63 }
 0x8f0   : > { %v8502_v12 = vmax.f32 %v8411_v52, %v8467_v10  ;;  %8361 = vst [vmem:[#allocation5 + $0x168] sm:$0xff] %v8306_v37  ;;  %v15694_v22 = vpop.f32.mrb[48].mxu1 }
 0x8f1   : > { %8531 = vst [vmem:[#allocation6 + $0xa8] sm:$0xff] %v8503_v5  ;;  %v8256_v1 = vadd.f32 %v15694_v22, %v18756_v27  ;;  %v8114_v19 = vpop.f32.mrb[49].mxu1  ;;  %v8588_v44 = vld [vmem:[#allocation6 + $0x8f] sm:$0xff]  ;;  %v8589_v28 = vld [vmem:[#allocation6 + $0x97] sm:$0x7] }
 0x8f2   : > { %8530 = vst [vmem:[#allocation6 + $0xa0] sm:$0xff] %v8502_v12  ;;  %v8254_v26 = vadd.f32 %v18756_v27, %v8114_v19  ;;  %v15695_v0 = vpop.f32.mrb[50].mxu1  ;;  %v18920_v54 = vmax.f32 %v8586_v40, %v8588_v44  ;;  %v8591_v4 = vmax.f32 %v8587_v17, %v8589_v28 }
 0x8f3   : > { %v8311_v56 = vmax.f32 %v8256_v1, 0.0  ;;  %v8257_v34 = vadd.f32 %v15695_v0, %v18756_v27  ;;  %v8117_v51 = vpop.f32.mrb[51].mxu1  ;;  %v8655_v32 = vld [vmem:[#allocation7 + $0x31] sm:$0xff] }
 0x8f4   : > { %v8309_v7 = vmax.f32 %v8254_v26, 0.0  ;;  %v8255_v59 = vadd.f32 %v18756_v27, %v8117_v51  ;;  %8592 = vst [vmem:[#allocation7 + $0x3c] sm:$0xff] %v18920_v54  ;;  %8593 = vst [vmem:[#allocation7 + $0x44] sm:$0x3] %v8591_v4  ;;  %v19086_v53 = vld [vmem:[#allocation7 + $0x34] sm:$0xff] }
 0x8f5   : > { %8366 = vst [vmem:[#allocation5 + $0x190] sm:$0xff] %v8311_v56  ;;  %v8312_v46 = vmax.f32 %v8257_v34, 0.0 }
 0x8f6   : > { %v8417_v31 = vld [vmem:[#allocation5 + $0x170] ss:$2 sm:$0xff]  ;;  %v8473_v23 = vld [vmem:[#allocation5 + $0x171] ss:$2 sm:$0xff]  ;;  %8364 = vst [vmem:[#allocation5 + $0x180] sm:$0xff] %v8309_v7  ;;  %v8310_v50 = vmax.f32 %v8255_v59, 0.0 }
 0x8f7   : > { %v8505_v21 = vmax.f32 %v8417_v31, %v8473_v23  ;;  %v8415_v6 = vld [vmem:[#allocation5 + $0x160] ss:$2 sm:$0xff]  ;;  %v8471_v14 = vld [vmem:[#allocation5 + $0x161] ss:$2 sm:$0xff]  ;;  %8367 = vst [vmem:[#allocation5 + $0x198] sm:$0xff] %v8312_v46 }
 0x8f8   : > { %v8504_v25 = vmax.f32 %v8415_v6, %v8471_v14  ;;  %8365 = vst [vmem:[#allocation5 + $0x188] sm:$0xff] %v8310_v50  ;;  %v15698_v30 = vpop.f32.mrb[84].mxu1  ;;  %v8597_v57 = vld [vmem:[#allocation6 + $0xad] sm:$0x7] }
 0x8f9   : > { %8533 = vst [vmem:[#allocation6 + $0xb8] sm:$0xff] %v8505_v21  ;;  %v8198_v13 = vadd.f32 %v15698_v30, %v18747_v18  ;;  %v8130_v55 = vpop.f32.mrb[85].mxu1  ;;  %v8594_v3 = vld [vmem:[#allocation6 + $0x9a] sm:$0xff]  ;;  %v8595_v62 = vld [vmem:[#allocation6 + $0xa2] sm:$0x7]  ;;  %v8596_v2 = vld [vmem:[#allocation6 + $0xa5] sm:$0xff] }
 0x8fa   : > { %v8196_v8 = vadd.f32 %v8130_v55, %v18749_v41  ;;  %v15699_v45 = vpop.f32.mrb[86].mxu1  ;;  %v18927_v16 = vmax.f32 %v8594_v3, %v8596_v2  ;;  %v8599_v15 = vmax.f32 %v8595_v62, %v8597_v57  ;;  %v8619_v57 = vld [vmem:[#allocation7 + $0x8] sm:$0xff]  ;;  %v8618_v55 = vld [vmem:[#allocation7] sm:$0xff] }
 0x8fb   : > { %v8260_v20 = vadd.f32 %v18756_v27, %v8198_v13  ;;  %v8133_v38 = vpop.f32.mrb[87].mxu1  ;;  %v8656_v33 = vld [vmem:[#allocation7 + $0x39] sm:$0xff]  ;;  %v9249_v62 = vld [vmem:[#allocation7 + $0xb] sm:$0xff]  ;;  %v8628_v2 = vpack.c.bf16 %v8619_v57, %v8618_v55 }
 0x8fc   : > { %v18930_v24 = vld [vmem:[#allocation7 + $0x3a] sm:$0xff]  ;;  %v8258_v39 = vadd.f32 %v18756_v27, %v8196_v8  ;;  %v8197_v18 = vadd.f32 %v8133_v38, %v18751_v60  ;;  %v8662_v29 = vpack.c.bf16 %v8656_v33, %v8655_v32  ;;  %8600 = vst [vmem:[#allocation7 + $0x46] sm:$0xff] %v18927_v16  ;;  %8601 = vst [vmem:[#allocation7 + $0x4e] sm:$0x3] %v8599_v15  ;;  %v16735_v15 = vld [vmem:[%s20356_s5 + $0xc8] sm:$0xff]  }
 0x8fd   : > { %v8936_v63 = vpack.c.bf16 %v18930_v24, %v18911_v47  ;;  %v8315_v41 = vmax.f32 %v8260_v20, 0.0  ;;  %v9250_v13 = vld [vmem:[#allocation7 + $0x13] sm:$0xff]  ;;  %v16734_v3 = vld [vmem:[%s20356_s5 + $0xc0] sm:$0xff]   ;;  %v16738_v32 = vld [vmem:[%s20356_s5 + $0x188] sm:$0xff]  }
 0x8fe   : > { %v8421_v48 = vld [vmem:[#allocation5 + $0x190] ss:$2 sm:$0xff]  ;;  %v8477_v9 = vld [vmem:[#allocation5 + $0x191] ss:$2 sm:$0xff]  ;;  %v8313_v37 = vmax.f32 %v8258_v39, 0.0  ;;  %v8259_v5 = vadd.f32 %v18756_v27, %v8197_v18  ;;  %15729 = vmatmul.mubr.bf16.gmra.mrb[240].mxu0 %v8662_v29  ;;  %v9259_v8 = vpack.c.bf16 %v9250_v13, %v9249_v62  ;;  %v8620_v33 = vld [vmem:[#allocation7 + $0x10] sm:$0xff] }
 0x8ff   : > { %15801 = vmatmul.mubr.bf16.gmra.mrb[100].mxu1 %v8936_v63  ;;  %v8507_v52 = vmax.f32 %v8421_v48, %v8477_v9  ;;  %v8419_v10 = vld [vmem:[#allocation5 + $0x180] ss:$2 sm:$0xff]  ;;  %v8475_v12 = vld [vmem:[#allocation5 + $0x181] ss:$2 sm:$0xff]  ;;  %8370 = vst [vmem:[#allocation5 + $0x1b0] sm:$0xff] %v8315_v41  ;;  %15732 = vmatprep.mubr.msk.bf16.mxu0 %vm17264_vm2, %v18785_v43  ;;  %v16736_v45 = vld [vmem:[%s20356_s5 + $0x180] sm:$0xff]  }
 0x900   : > { %15804 = vmatprep.mubr.msk.bf16.mxu1 %vm17264_vm2, %v18785_v43  ;;  %v8506_v60 = vmax.f32 %v8419_v10, %v8475_v12  ;;  %8368 = vst [vmem:[#allocation5 + $0x1a0] sm:$0xff] %v8313_v37  ;;  %v8314_v22 = vmax.f32 %v8259_v5, 0.0  ;;  %v8603_v56 = vld [vmem:[#allocation6 + $0xb8] sm:$0x7]  ;;  %v9252_v38 = vld [vmem:[#allocation7 + $0x23] sm:$0xff]  ;;  %v9251_v39 = vld [vmem:[#allocation7 + $0x1b] sm:$0xff] }
 0x901   : > { %8535 = vst [vmem:[#allocation6 + $0xc8] sm:$0xff] %v8507_v52  ;;  %v8621_v20 = vld [vmem:[#allocation7 + $0x18] sm:$0xff]  ;;  %v16737_v18 = vld [vmem:[%s20356_s5 + $0xd0] sm:$0xff]   ;;  %v9260_v63 = vpack.c.bf16 %v9252_v38, %v9251_v39  ;;  %v8622_v9 = vld [vmem:[#allocation7 + $0x20] sm:$0xff] }
 0x902   : > { %8534 = vst [vmem:[#allocation6 + $0xc0] sm:$0xff] %v8506_v60  ;;  %8369 = vst [vmem:[#allocation5 + $0x1a8] sm:$0xff] %v8314_v22  ;;  %v8629_v29 = vpack.c.bf16 %v8621_v20, %v8620_v33  ;;  %v16740_v41 = vld [vmem:[%s20356_s5 + $0x190] sm:$0xff]   ;;  %v16739_v48 = vld [vmem:[%s20356_s5 + $0xd8] sm:$0xff]   ;;  %v8630_v12 = vpack.c.bf16 %v18868_v42, %v8622_v9 }
 0x903   : > { %v18942_v17 = vld [vmem:[#allocation7 + $0x42] sm:$0xff]  ;;  %v9253_v37 = vld [vmem:[#allocation7 + $0x2b] sm:$0xff]  ;;  %v9254_v5 = vld [vmem:[#allocation7 + $0x33] sm:$0xff] }
 0x904   : > { %v9099_v27 = vpack.c.bf16 %v18942_v17, %v18930_v24  ;;  %v8657_v7 = vld [vmem:[#allocation7 + $0x41] sm:$0xff]  ;;  %v16742_v10 = vld [vmem:[%s20356_s5 + $0x198] sm:$0xff]   ;;  %v9261_v60 = vpack.c.bf16 %v9254_v5, %v9253_v37  ;;  %v16753_v62 = vld [vmem:[%s20356_s5 + $0x150] sm:$0xff]  }
 0x905   : > { %v16741_v52 = vld [vmem:[%s20356_s5 + $0xe0] sm:$0xff]   ;;  %v16743_v22 = vld [vmem:[%s20356_s5 + $0xe8] sm:$0xff]   ;;  %v8625_v42 = vld [vmem:[#allocation7 + $0x38] sm:$0xff] }
 0x906   : > { %v8425_v1 = vld [vmem:[#allocation5 + $0x1b0] ss:$2 sm:$0xf]  ;;  %v8481_v19 = vld [vmem:[#allocation5 + $0x1b1] ss:$2 sm:$0xf] }
 0x907   : > { %v8509_v40 = vmax.f32 %v8425_v1, %v8481_v19  ;;  %v16744_v1 = vld [vmem:[%s20356_s5 + $0x1a0] sm:$0xff]   ;;  %v16751_v55 = vld [vmem:[%s20356_s5 + $0x148] sm:$0xff]   ;;  %v9901_v5 = vld [vmem:[#allocation7 + $0x16] sm:$0xff] }
 0x908   : > { %v9256_v19 = vld [vmem:[#allocation7 + $0x43] sm:$0xff]  ;;  %v9412_v37 = vld [vmem:[#allocation7 + $0xc] sm:$0xff] }
 0x909   : > { %8537 = vst [vmem:[#allocation6 + $0xd8] sm:$0xf] %v8509_v40  ;;  %v8423_v44 = vld [vmem:[#allocation5 + $0x1a0] ss:$2 sm:$0xff]  ;;  %v8479_v28 = vld [vmem:[#allocation5 + $0x1a1] ss:$2 sm:$0xff] }
 0x90a   : > { %v8604_v26 = vld [vmem:[#allocation6 + $0xbb] sm:$0xff]  ;;  %v8508_v0 = vmax.f32 %v8423_v44, %v8479_v28  ;;  %v8605_v34 = vld [vmem:[#allocation6 + $0xc3] sm:$0x7]  ;;  %v8610_v59 = vld [vmem:[#allocation6 + $0xc6] sm:$0xff] }
 0x90b   : > { %v8606_v4 = vmax.f32 %v8504_v25, %v8604_v26  ;;  %v8607_v51 = vmax.f32 %v8603_v56, %v8605_v34  ;;  %v16745_v40 = vld [vmem:[%s20356_s5 + $0x1a8] sm:$0xff]   ;;  %v8624_v44 = vld [vmem:[#allocation7 + $0x30] sm:$0xff]  ;;  %v9255_v28 = vld [vmem:[#allocation7 + $0x3b] sm:$0xff] }
 0x90c   : > { %8536 = vst [vmem:[#allocation6 + $0xd0] sm:$0xff] %v8508_v0  ;;  %v16746_v26 = vld [vmem:[%s20356_s5 + $0xf0] sm:$0xff]   ;;  %v8631_v0 = vpack.c.bf16 %v8625_v42, %v8624_v44  ;;  %v16748_v34 = vld [vmem:[%s20356_s5 + $0xf8] sm:$0xff]   ;;  %v16752_v13 = vld [vmem:[%s20356_s5 + $0x200] sm:$0xff]  }
 0x90d   : > { %8608 = vst [vmem:[#allocation7 + $0x50] sm:$0xff] %v8606_v4  ;;  %8609 = vst [vmem:[#allocation7 + $0x58] sm:$0x3] %v8607_v51  ;;  %v9262_v4 = vpack.c.bf16 %v9256_v19, %v9255_v28  ;;  %v16747_v56 = vld [vmem:[%s20356_s5 + $0x1b0] sm:$0xff]   ;;  %v8626_v51 = vld [vmem:[#allocation7 + $0x40] sm:$0xff] }
 0x90e   : > { %v16759_v20 = vld [vmem:[%s20356_s5 + $0x168] sm:$0xff]   ;;  %v16760_v38 = vld [vmem:[%s20356_s5 + $0x220] sm:$0xff]   ;;  %v9905_v44 = vld [vmem:[#allocation7 + $0x36] sm:$0xff] }
 0x90f   : > { %v19116_v47 = vld [vmem:[#allocation7 + $0x44] sm:$0xff]  ;;  %v19126_v39 = vld [vmem:[#allocation4 + $0x1e4] sm:$0xff] }
 0x910   : > { %v8613_v30 = vld [vmem:[#allocation6 + $0xd9] sm:$0x7]  ;;  %v9902_v9 = vld [vmem:[#allocation7 + $0x1e] sm:$0xff] }
 0x911   : > { %v9906_v28 = vld [vmem:[#allocation7 + $0x3e] sm:$0xff] }
 0x913   : > { %v8612_v23 = vld [vmem:[#allocation6 + $0xd1] sm:$0xff]  ;;  %v8611_v14 = vld [vmem:[#allocation6 + $0xce] sm:$0x7] }
 0x914   : > { %v8658_v46 = vld [vmem:[#allocation7 + $0x49] sm:$0xff]  ;;  %v8614_v6 = vmax.f32 %v8610_v59, %v8612_v23  ;;  %v8615_v25 = vmax.f32 %v8611_v14, %v8613_v30  ;;  %v16749_v23 = vld [vmem:[%s20356_s5 + $0x1b8] sm:$0xff]   ;;  %v16750_v30 = vld [vmem:[%s20356_s5 + $0x140] sm:$0xff]  }
 0x915   : > { %v18946_v31 = vld [vmem:[#allocation7 + $0x4a] sm:$0xff]  ;;  %v8663_v50 = vpack.c.bf16 %v8658_v46, %v8657_v7 }
 0x916   : > { %v8937_v21 = vpack.c.bf16 %v18946_v31, %v18942_v17  ;;  %8616 = vst [vmem:[#allocation7 + $0x5a] sm:$0xff] %v8614_v6  ;;  %8617 = vst [vmem:[#allocation7 + $0x62] sm:$0x3] %v8615_v25  ;;  %v8627_v7 = vld [vmem:[#allocation7 + $0x48] sm:$0xff]  ;;  %v19039_v6 = vld [vmem:[#allocation7 + $0x1c] sm:$0xff] }
 0x917   : > { %15733 = vmatmul.mubr.bf16.gmra.mrb[244].mxu0 %v8663_v50  ;;  %v9257_v46 = vld [vmem:[#allocation7 + $0x4b] sm:$0xff]  ;;  %v8632_v50 = vpack.c.bf16 %v8627_v7, %v8626_v51  ;;  %v9585_v57 = vpack.c.bf16 %v19039_v6, %v18795_v61  ;;  %v9425_v7 = vpack.c.bf16 %v19116_v47, %v18920_v54 }
 0x918   : > { %15805 = vmatmul.mubr.bf16.gmra.mrb[104].mxu1 %v8937_v21  ;;  %15752 = vmatprep.mubr.msk.bf16.mxu0 %vm17264_vm2, %v18785_v43  ;;  %v9086_v14 = vld [vmem:[#allocation7 + $0xa] sm:$0xff] }
 0x919   : > { %15860 = vmatprep.mubr.msk.bf16.mxu1 %vm17264_vm2, %v18785_v43  ;;  %v9096_v25 = vpack.c.bf16 %v18871_v35, %v9086_v14  ;;  %v19058_v61 = vld [vmem:[#allocation7 + $0x2c] sm:$0xff] }
 0x91a   : > { %v16754_v35 = vld [vmem:[%s20356_s5 + $0x208] sm:$0xff]   ;;  %v16772_v51 = vld [vmem:[%s20356_s5 + $0x1f0] sm:$0xff]  }
 0x91b   : > { %v19113_v11 = vld [vmem:[#allocation7 + $0x4c] sm:$0xff] }
 0x91c   : > { %v9588_v33 = vpack.c.bf16 %v19113_v11, %v19116_v47 }
 0x91d   : > { %v9258_v59 = vld [vmem:[#allocation7 + $0x53] sm:$0xff]  ;;  %v9584_v17 = vld [vmem:[#allocation7 + $0x5c] sm:$0xff] }
 0x91e   : > { %v9263_v21 = vpack.c.bf16 %v9258_v59, %v9257_v46  ;;  %v19143_v24 = vld [vmem:[#allocation7 + $0x54] sm:$0xff] }
 0x91f   : > { %15753 = vmatmul.mubr.bf16.vlgmr.msra.gmra.mrb[248].mxu0 %v8628_v2  ;;  %v16773_v46 = vld [vmem:[%s20356_s5 + $0x1f8] sm:$0xff]  }
 0x920   : > { %15861 = vmatmul.mubr.bf16.vlgmr.msra.gmra.mrb[108].mxu1 %v9259_v8  ;;  %15809 = vmatpush3.bf16.msra.mxu0 %v16734_v3  ;;  %v19064_v3 = vld [vmem:[#allocation7 + $0x24] sm:$0xff]  ;;  %v16756_v8 = vld [vmem:[%s20356_s5 + $0x210] sm:$0xff]  }
 0x921   : > { %15756 = vmatprep.mubr.msk.bf16.mxu0 %vm17264_vm2, %v18785_v43  ;;  %15810 = vmatprep.subr.bf16.mxu0 %v18785_v43  ;;  %v9586_v2 = vpack.c.bf16 %v19058_v61, %v19064_v3  ;;  %v9423_v42 = vpack.c.bf16 %v19064_v3, %v19039_v6  ;;  %v9746_v47 = vld [vmem:[#allocation7 + $0x55] sm:$0xff] }
 0x922   : > { %15864 = vmatprep.mubr.msk.bf16.mxu1 %vm17264_vm2, %v18785_v43  ;;  %15917 = vmatpush3.bf16.msra.mxu1 %v16736_v45  ;;  %v16755_v45 = vld [vmem:[%s20356_s5 + $0x158] sm:$0xff]  }
 0x923   : > { %15918 = vmatprep.subr.bf16.mxu1 %v18785_v43 }
 0x924   : > { %15811 = vmatpush3.bf16.msra.mxu0 %v16735_v15  ;;  %v9587_v15 = vpack.c.bf16 %v18920_v54, %v19086_v53  ;;  %v9909_v54 = vld [vmem:[#allocation7 + $0x56] sm:$0xff] }
 0x925   : > { %15812 = vmatprep.subr.bf16.mxu0 %v18785_v43 }
 0x926   : > { %15919 = vmatpush3.bf16.msra.mxu1 %v16738_v32  ;;  %v16762_v32 = vld [vmem:[%s20356_s5 + $0x170] sm:$0xff]  }
 0x927   : > { %15757 = vmatmul.mubr.bf16.gmra.mrb[252].mxu0 %v8629_v29  ;;  %15920 = vmatprep.subr.bf16.mxu1 %v18785_v43  ;;  %v9095_v29 = vld [vmem:[#allocation7 + $0x52] sm:$0xff] }
 0x928   : > { %15865 = vmatmul.mubr.bf16.gmra.mrb[112].mxu1 %v9260_v63  ;;  %15813 = vmatpush3.bf16.msra.mxu0 %v16737_v18  ;;  %v16764_v18 = vld [vmem:[%s20356_s5 + $0x178] sm:$0xff]   ;;  %v9100_v63 = vpack.c.bf16 %v9095_v29, %v18946_v31  ;;  %v16766_v31 = vld [vmem:[%s20356_s5 + $0x1c0] sm:$0xff]  }
 0x929   : > { %15760 = vmatprep.mubr.msk.bf16.mxu0 %vm17264_vm2, %v18785_v43  ;;  %15814 = vmatprep.subr.bf16.mxu0 %v18785_v43 }
 0x92a   : > { %15868 = vmatprep.mubr.msk.bf16.mxu1 %vm17264_vm2, %v18785_v43  ;;  %15921 = vmatpush3.bf16.msra.mxu1 %v16740_v41  ;;  %v9589_v41 = vpack.c.bf16 %v9584_v17, %v19143_v24 }
 0x92b   : > { %15922 = vmatprep.subr.bf16.mxu1 %v18785_v43 }
 0x92c   : > { %15815 = vmatpush3.bf16.msra.mxu0 %v16739_v48  ;;  %v9413_v48 = vld [vmem:[#allocation7 + $0x14] sm:$0xff] }
 0x92d   : > { %15816 = vmatprep.subr.bf16.mxu0 %v18785_v43 }
 0x92e   : > { %15923 = vmatpush3.bf16.msra.mxu1 %v16742_v10  ;;  %v9911_v10 = vpack.c.bf16 %v9902_v9, %v9901_v5 }
 0x92f   : > { %15761 = vmatmul.mubr.bf16.gmra.mrb[0].mxu0 %v8630_v12  ;;  %15924 = vmatprep.subr.bf16.mxu1 %v18785_v43  ;;  %v16767_v12 = vld [vmem:[%s20356_s5 + $0x1c8] sm:$0xff]  }
 0x930   : > { %15869 = vmatmul.mubr.bf16.gmra.mrb[116].mxu1 %v9261_v60  ;;  %15817 = vmatpush3.bf16.msra.mxu0 %v16741_v52  ;;  %v9422_v52 = vpack.c.bf16 %v9413_v48, %v9412_v37  ;;  %v9904_v60 = vld [vmem:[#allocation7 + $0x2e] sm:$0xff] }
 0x931   : > { %15764 = vmatprep.mubr.msk.bf16.mxu0 %vm17264_vm2, %v18785_v43  ;;  %15872 = vmatprep.mubr.msk.bf16.mxu1 %vm17264_vm2, %v18785_v43 }
 0x932   : > { %15818 = vmatprep.subr.bf16.mxu0 %v18785_v43  ;;  %15925 = vmatpush3.bf16.msra.mxu1 %v16744_v1  ;;  %v16768_v1 = vld [vmem:[%s20356_s5 + $0x1d0] sm:$0xff]  }
 0x933   : > { %15926 = vmatprep.subr.bf16.mxu1 %v18785_v43 }
 0x934   : > { %15819 = vmatpush3.bf16.msra.mxu0 %v16743_v22  ;;  %v9903_v22 = vld [vmem:[#allocation7 + $0x26] sm:$0xff] }
 0x935   : > { %15820 = vmatprep.subr.bf16.mxu0 %v18785_v43  ;;  %v9912_v19 = vpack.c.bf16 %v9904_v60, %v9903_v22 }
 0x936   : > { %15927 = vmatpush3.bf16.msra.mxu1 %v16745_v40  ;;  %v16769_v40 = vld [vmem:[%s20356_s5 + $0x1d8] sm:$0xff]  }
 0x937   : > { %15765 = vmatmul.mubr.bf16.gmra.mrb[4].mxu0 %v8631_v0  ;;  %15928 = vmatprep.subr.bf16.mxu1 %v18785_v43  ;;  %v9424_v0 = vpack.c.bf16 %v19086_v53, %v19058_v61  ;;  %v9741_v61 = vld [vmem:[#allocation7 + $0x2d] sm:$0xff]  ;;  %v9743_v53 = vld [vmem:[#allocation7 + $0x3d] sm:$0xff] }
 0x938   : > { %15873 = vmatmul.mubr.bf16.gmra.mrb[120].mxu1 %v9262_v4  ;;  %15821 = vmatpush3.bf16.msra.mxu0 %v16746_v26  ;;  %v16770_v26 = vld [vmem:[%s20356_s5 + $0x1e0] sm:$0xff]   ;;  %v9913_v4 = vpack.c.bf16 %v9906_v28, %v9905_v44 }
 0x939   : > { %15768 = vmatprep.mubr.msk.bf16.mxu0 %vm17264_vm2, %v18785_v43  ;;  %15876 = vmatprep.mubr.msk.bf16.mxu1 %vm17264_vm2, %v18785_v43 }
 0x93a   : > { %15822 = vmatprep.subr.bf16.mxu0 %v18785_v43  ;;  %15929 = vmatpush3.bf16.msra.mxu1 %v16747_v56  ;;  %v16771_v56 = vld [vmem:[%s20356_s5 + $0x1e8] sm:$0xff]  }
 0x93b   : > { %15930 = vmatprep.subr.bf16.mxu1 %v18785_v43 }
 0x93c   : > { %15823 = vmatpush3.bf16.msra.mxu0 %v16748_v34  ;;  %v9908_v34 = vld [vmem:[#allocation7 + $0x4e] sm:$0xff] }
 0x93d   : > { %15880 = vmatprep.subr.bf16.mxu0 %v18785_v43  ;;  %v9914_v59 = vpack.c.bf16 %v9908_v34, %v18927_v16  ;;  %v9426_v16 = vpack.c.bf16 %v19143_v24, %v19113_v11 }
 0x93e   : > { %15931 = vmatpush3.bf16.msra.mxu1 %v16749_v23  ;;  %v9910_v23 = vld [vmem:[#allocation7 + $0x5e] sm:$0xff] }
 0x93f   : > { %15769 = vmatmul.mubr.bf16.gmra.mrb[8].mxu0 %v8632_v50  ;;  %15988 = vmatprep.subr.bf16.mxu1 %v18785_v43  ;;  %v9915_v50 = vpack.c.bf16 %v9910_v23, %v9909_v54 }
 0x940   : > { %15877 = vmatmul.mubr.bf16.gmra.mrb[124].mxu1 %v9263_v21  ;;  %15824 = vmatprep.mubr.msk.bf16.mxu0 %vm17264_vm2, %v18785_v43  ;;  %v9739_v21 = vld [vmem:[#allocation7 + $0x1d] sm:$0xff] }
 0x941   : > { %15932 = vmatprep.mubr.msk.bf16.mxu1 %vm17264_vm2, %v18785_v43 }
 0x947   : > { %15825 = vmatmul.mubr.bf16.vlgmr.msra.gmra.mrb[12].mxu0 %v9096_v25 }
 0x948   : > { %15933 = vmatmul.mubr.bf16.vlgmr.msra.gmra.mrb[128].mxu1 %v9585_v57  ;;  %15881 = vmatpush3.bf16.msra.mxu0 %v16750_v30  ;;  %v9738_v30 = vld [vmem:[#allocation7 + $0x15] sm:$0xff] }
 0x949   : > { %15828 = vmatprep.mubr.msk.bf16.mxu0 %vm17264_vm2, %v18785_v43  ;;  %15882 = vmatprep.subr.bf16.mxu0 %v18785_v43  ;;  %v9748_v57 = vpack.c.bf16 %v9739_v21, %v9738_v30 }
 0x94a   : > { %15936 = vmatprep.mubr.msk.bf16.mxu1 %vm17264_vm2, %v18785_v43  ;;  %15989 = vmatpush3.bf16.msra.mxu1 %v16752_v13 }
 0x94b   : > { %15990 = vmatprep.subr.bf16.mxu1 %v18785_v43 }
 0x94c   : > { %15883 = vmatpush3.bf16.msra.mxu0 %v16751_v55 }
 0x94d   : > { %15884 = vmatprep.subr.bf16.mxu0 %v18785_v43 }
 0x94e   : > { %15991 = vmatpush3.bf16.msra.mxu1 %v16754_v35 }
 0x94f   : > { %15829 = vmatmul.mubr.bf16.gmra.mrb[16].mxu0 %v9097_v58  ;;  %15992 = vmatprep.subr.bf16.mxu1 %v18785_v43  ;;  %v16758_v58 = vld [vmem:[%s20356_s5 + $0x218] sm:$0xff]  }
 0x950   : > { %15937 = vmatmul.mubr.bf16.gmra.mrb[132].mxu1 %v9586_v2  ;;  %15885 = vmatpush3.bf16.msra.mxu0 %v16753_v62  ;;  %v9740_v62 = vld [vmem:[#allocation7 + $0x25] sm:$0xff] }
 0x951   : > { %15832 = vmatprep.mubr.msk.bf16.mxu0 %vm17264_vm2, %v18785_v43  ;;  %15886 = vmatprep.subr.bf16.mxu0 %v18785_v43 }
 0x952   : > { %15940 = vmatprep.mubr.msk.bf16.mxu1 %vm17264_vm2, %v18785_v43  ;;  %15993 = vmatpush3.bf16.msra.mxu1 %v16756_v8  ;;  %v9749_v8 = vpack.c.bf16 %v9741_v61, %v9740_v62 }
 0x953   : > { %15994 = vmatprep.subr.bf16.mxu1 %v18785_v43 }
 0x954   : > { %15887 = vmatpush3.bf16.msra.mxu0 %v16755_v45  ;;  %v9742_v45 = vld [vmem:[#allocation7 + $0x35] sm:$0xff] }
 0x955   : > { %15888 = vmatprep.subr.bf16.mxu0 %v18785_v43 }
 0x956   : > { %15995 = vmatpush3.bf16.msra.mxu1 %v16758_v58  ;;  %v9745_v58 = vld [vmem:[#allocation7 + $0x4d] sm:$0xff] }
 0x957   : > { %15833 = vmatmul.mubr.bf16.gmra.mrb[20].mxu0 %v9098_v36  ;;  %15996 = vmatprep.subr.bf16.mxu1 %v18785_v43  ;;  %v16761_v36 = vld [vmem:[%s20356_s5 + $0x228] sm:$0xff]  }
 0x958   : > { %15941 = vmatmul.mubr.bf16.gmra.mrb[136].mxu1 %v9587_v15  ;;  %15889 = vmatpush3.bf16.msra.mxu0 %v16757_v49  ;;  %v9750_v49 = vpack.c.bf16 %v9743_v53, %v9742_v45  ;;  %v9744_v15 = vld [vmem:[#allocation7 + $0x45] sm:$0xff] }
 0x959   : > { %15836 = vmatprep.mubr.msk.bf16.mxu0 %vm17264_vm2, %v18785_v43  ;;  %15944 = vmatprep.mubr.msk.bf16.mxu1 %vm17264_vm2, %v18785_v43 }
 0x95a   : > { %15890 = vmatprep.subr.bf16.mxu0 %v18785_v43  ;;  %15997 = vmatpush3.bf16.msra.mxu1 %v16760_v38  ;;  %v16763_v43 = vld [vmem:[%s20356_s5 + $0x230] sm:$0xff]  }
 0x95b   : > { %15998 = vmatprep.subr.bf16.mxu1 %v19126_v39 }
 0x95c   : > { %15891 = vmatpush3.bf16.msra.mxu0 %v16759_v20  ;;  %v9751_v20 = vpack.c.bf16 %v9745_v58, %v9744_v15 }
 0x95d   : > { %15892 = vmatprep.subr.bf16.mxu0 %v19126_v39 }
 0x95e   : > { %15999 = vmatpush3.bf16.msra.mxu1 %v16761_v36  ;;  %v9747_v36 = vld [vmem:[#allocation7 + $0x5d] sm:$0xff] }
 0x95f   : > { %15837 = vmatmul.mubr.bf16.gmra.mrb[24].mxu0 %v9099_v27  ;;  %16000 = vmatprep.subr.bf16.mxu1 %v19126_v39  ;;  %v16765_v27 = vld [vmem:[%s20356_s5 + $0x238] sm:$0xff]   ;;  %v9752_v17 = vpack.c.bf16 %v9747_v36, %v9746_v47 }
 0x960   : > { %15945 = vmatmul.mubr.bf16.gmra.mrb[140].mxu1 %v9588_v33  ;;  %15893 = vmatpush3.bf16.msra.mxu0 %v16762_v32 }
 0x961   : > { %15840 = vmatprep.mubr.msk.bf16.mxu0 %vm17264_vm2, %v19126_v39  ;;  %15948 = vmatprep.mubr.msk.bf16.mxu1 %vm17264_vm2, %v19126_v39 }
 0x962   : > { %15894 = vmatprep.subr.bf16.mxu0 %v19126_v39  ;;  %16001 = vmatpush3.bf16.msra.mxu1 %v16763_v43 }
 0x963   : > { %16002 = vmatprep.subr.bf16.mxu1 %v19126_v39 }
 0x964   : > { %15895 = vmatpush3.bf16.msra.mxu0 %v16764_v18 }
 0x965   : > { %15952 = vmatprep.subr.bf16.mxu0 %v19126_v39 }
 0x966   : > { %16003 = vmatpush3.bf16.msra.mxu1 %v16765_v27 }
 0x967   : > { %15841 = vmatmul.mubr.bf16.gmra.mrb[28].mxu0 %v9100_v63 }
 0x968   : > { %15949 = vmatmul.mubr.bf16.gmra.mrb[144].mxu1 %v9589_v41  ;;  %15896 = vmatprep.mubr.msk.bf16.mxu0 %vm17264_vm2, %v19126_v39 }
 0x969   : > { %16004 = vmatprep.mubr.msk.bf16.mxu1 %vm17264_vm2, %v19126_v39 }
 0x96f   : > { %15897 = vmatmul.mubr.bf16.vlgmr.msra.gmra.mrb[32].mxu0 %v9422_v52 }
 0x970   : > { %16005 = vmatmul.mubr.bf16.vlgmr.msra.gmra.mrb[148].mxu1 %v9911_v10  ;;  %15953 = vmatpush3.bf16.msra.mxu0 %v16766_v31 }
 0x971   : > { %15900 = vmatprep.mubr.msk.bf16.mxu0 %vm17264_vm2, %v19126_v39  ;;  %15954 = vmatprep.subr.bf16.mxu0 %v19126_v39 }
 0x972   : > { %16008 = vmatprep.mubr.msk.bf16.mxu1 %vm17264_vm2, %v19126_v39 }
 0x974   : > { %15955 = vmatpush3.bf16.msra.mxu0 %v16767_v12 }
 0x975   : > { %15956 = vmatprep.subr.bf16.mxu0 %v19126_v39 }
 0x977   : > { %15901 = vmatmul.mubr.bf16.gmra.mrb[36].mxu0 %v9423_v42 }
 0x978   : > { %16009 = vmatmul.mubr.bf16.gmra.mrb[152].mxu1 %v9912_v19  ;;  %15957 = vmatpush3.bf16.msra.mxu0 %v16768_v1 }
 0x979   : > { %15904 = vmatprep.mubr.msk.bf16.mxu0 %vm17264_vm2, %v19126_v39  ;;  %15958 = vmatprep.subr.bf16.mxu0 %v19126_v39 }
 0x97a   : > { %16012 = vmatprep.mubr.msk.bf16.mxu1 %vm17264_vm2, %v19126_v39 }
 0x97c   : > { %15959 = vmatpush3.bf16.msra.mxu0 %v16769_v40 }
 0x97d   : > { %15960 = vmatprep.subr.bf16.mxu0 %v19126_v39 }
 0x97f   : > { %15905 = vmatmul.mubr.bf16.gmra.mrb[40].mxu0 %v9424_v0 }
 0x980   : > { %16013 = vmatmul.mubr.bf16.gmra.mrb[156].mxu1 %v9913_v4  ;;  %15961 = vmatpush3.bf16.msra.mxu0 %v16770_v26 }
 0x981   : > { %15908 = vmatprep.mubr.msk.bf16.mxu0 %vm17264_vm2, %v19126_v39  ;;  %16016 = vmatprep.mubr.msk.bf16.mxu1 %vm17264_vm2, %v19126_v39 }
 0x982   : > { %15962 = vmatprep.subr.bf16.mxu0 %v19126_v39 }
 0x984   : > { %15963 = vmatpush3.bf16.msra.mxu0 %v16771_v56 }
 0x985   : > { %15964 = vmatprep.subr.bf16.mxu0 %v19126_v39 }
 0x987   : > { %15909 = vmatmul.mubr.bf16.gmra.mrb[44].mxu0 %v9425_v7 }
 0x988   : > { %16017 = vmatmul.mubr.bf16.gmra.mrb[160].mxu1 %v9914_v59  ;;  %15965 = vmatpush3.bf16.msra.mxu0 %v16772_v51 }
 0x989   : > { %15912 = vmatprep.mubr.msk.bf16.mxu0 %vm17264_vm2, %v19126_v39  ;;  %16020 = vmatprep.mubr.msk.bf16.mxu1 %vm17264_vm2, %v19126_v39 }
 0x98a   : > { %15966 = vmatprep.subr.bf16.mxu0 %v19126_v39 }
 0x98c   : > { %15967 = vmatpush3.bf16.msra.mxu0 %v16773_v46 }
 0x98f   : > { %15913 = vmatmul.mubr.bf16.gmra.mrb[48].mxu0 %v9426_v16 }
 0x990   : > { %16021 = vmatmul.mubr.bf16.gmra.mrb[164].mxu1 %v9915_v50  ;;  %15968 = vmatprep.mubr.msk.bf16.mxu0 %vm17264_vm2, %v19126_v39 }
 0x991   : > { %v19216_v6 = vpop.f32.mrb[88].mxu1 }
 0x992   : > { %v15790_v14 = vpop.f32.mrb[89].mxu1 }
 0x993   : > { %v19218_v25 = vpop.f32.mrb[90].mxu1 }
 0x994   : > { %v15791_v13 = vpop.f32.mrb[91].mxu1 }
 0x997   : > { %15969 = vmatmul.mubr.bf16.vlgmr.msra.gmra.mrb[52].mxu0 %v9748_v57 }
 0x998   : > { %15972 = vmatprep.mubr.msk.bf16.mxu0 %vm17264_vm2, %v19126_v39 }
 0x999   : > { %v8763_v55 = vpop.f32.mrb[228].mxu0 }
 0x99a   : > { %v15718_v35 = vpop.f32.mrb[229].mxu0 }
 0x99b   : > { %v8766_v3 = vpop.f32.mrb[230].mxu0 }
 0x99c   : > { %v15719_v2 = vpop.f32.mrb[231].mxu0 }
 0x99f   : > { %15973 = vmatmul.mubr.bf16.gmra.mrb[56].mxu0 %v9749_v8 }
 0x9a0   : > { %15976 = vmatprep.mubr.msk.bf16.mxu0 %vm17264_vm2, %v19126_v39 }
 0x9a7   : > { %15977 = vmatmul.mubr.bf16.gmra.mrb[60].mxu0 %v9750_v49 }
 0x9a8   : > { %15980 = vmatprep.mubr.msk.bf16.mxu0 %vm17264_vm2, %v19126_v39 }
 0x9af   : > { %15981 = vmatmul.mubr.bf16.gmra.mrb[64].mxu0 %v9751_v20 }
 0x9b0   : > { %15984 = vmatprep.mubr.msk.bf16.mxu0 %vm17264_vm2, %v19126_v39 }
 0x9b1   : > { %v8771_v38 = vpop.f32.mrb[232].mxu0 }
 0x9b2   : > { %v9045_v11 = vpop.f32.mrb[92].mxu1  ;;  %v15722_v32 = vpop.f32.mrb[233].mxu0 }
 0x9b3   : > { %v15794_v33 = vpop.f32.mrb[93].mxu1  ;;  %v8774_v43 = vpop.f32.mrb[234].mxu0 }
 0x9b4   : > { %v9048_v18 = vpop.f32.mrb[94].mxu1  ;;  %v15723_v29 = vpop.f32.mrb[235].mxu0 }
 0x9b5   : > { %v15795_v24 = vpop.f32.mrb[95].mxu1 }
 0x9b6   : > { %v16776_v24 = vld [vmem:[%s20358_s7 + $0x84] ss:$8 sps:$4 sm:$0xff]  }
 0x9b7   : > { %15985 = vmatmul.mubr.bf16.gmra.mrb[68].mxu0 %v9752_v17  ;;  %v16774_v17 = vld [vmem:[%s20358_s7 + $0x80] ss:$8 sps:$4 sm:$0xff]   ;;  %10266 = vmatprep.subr.bf16.mxu0 %v16776_v24 }
 0x9b8   : > { %10267 = vmatpush1.bf16.msra.mxu0 %v16774_v17 }
 0x9b9   : > { %v8779_v27 = vpop.f32.mrb[236].mxu0 }
 0x9ba   : > { %v9053_v63 = vpop.f32.mrb[96].mxu1  ;;  %v15726_v41 = vpop.f32.mrb[237].mxu0 }
 0x9bb   : > { %v15798_v48 = vpop.f32.mrb[97].mxu1  ;;  %v8782_v9 = vpop.f32.mrb[238].mxu0  ;;  %v16785_v41 = vld [vmem:[%s20358_s7 + $0x14] ss:$8 sps:$4 sm:$0xff]  }
 0x9bc   : > { %v9056_v37 = vpop.f32.mrb[98].mxu1  ;;  %v15727_v31 = vpop.f32.mrb[239].mxu0 }
 0x9bd   : > { %v15799_v39 = vpop.f32.mrb[99].mxu1  ;;  %v16783_v31 = vld [vmem:[%s20358_s7 + $0x10] ss:$8 sps:$4 sm:$0xff]  }
 0x9d1   : > { %v8787_v5 = vpop.f32.mrb[240].mxu0 }
 0x9d2   : > { %v19228_v52 = vpop.f32.mrb[100].mxu1  ;;  %v15730_v10 = vpop.f32.mrb[241].mxu0 }
 0x9d3   : > { %v15802_v12 = vpop.f32.mrb[101].mxu1  ;;  %v19230_v60 = vpop.f32.mrb[242].mxu0 }
 0x9d4   : > { %v19232_v22 = vpop.f32.mrb[102].mxu1  ;;  %v15731_v1 = vpop.f32.mrb[243].mxu0  ;;  %v16782_v12 = vld [vmem:[%s20358_s7 + $0x94] ss:$8 sps:$4 sm:$0xff]  }
 0x9d5   : > { %v15803_v42 = vpop.f32.mrb[103].mxu1  ;;  %10268 = vmatprep.subr.bf16.mxu0 %v16782_v12 }
 0x9ea   : > { %v19234_v19 = vpop.f32.mrb[244].mxu0 }
 0x9eb   : > { %v19236_v40 = vpop.f32.mrb[104].mxu1  ;;  %v15734_v44 = vpop.f32.mrb[245].mxu0 }
 0x9ec   : > { %v15806_v28 = vpop.f32.mrb[105].mxu1  ;;  %v19238_v26 = vpop.f32.mrb[246].mxu0 }
 0x9ed   : > { %v19240_v0 = vpop.f32.mrb[106].mxu1  ;;  %v15735_v4 = vpop.f32.mrb[247].mxu0  ;;  %v16780_v28 = vld [vmem:[%s20358_s7 + $0x90] ss:$8 sps:$4 sm:$0xff]  }
 0x9ee   : > { %v15807_v56 = vpop.f32.mrb[107].mxu1  ;;  %v16791_v4 = vld [vmem:[%s20358_s7 + $0x24] ss:$8 sps:$4 sm:$0xff]   ;;  %10269 = vmatpush1.bf16.msra.mxu0 %v16780_v28 }
 0x9f2   : > { %v8884_v34 = vpop.f32.mrb[248].mxu0 }
 0x9f3   : > { %v19242_v51 = vpop.f32.mrb[108].mxu1  ;;  %v8885_v7 = vadd.f32 %v8884_v34, %v8763_v55  ;;  %v15754_v59 = vpop.f32.mrb[249].mxu0  ;;  %v16786_v34 = vld [vmem:[%s20358_s7 + $0xa0] ss:$8 sps:$4 sm:$0xff]  }
 0x9f4   : > { %v15862_v46 = vpop.f32.mrb[109].mxu1  ;;  %v8887_v54 = vpop.f32.mrb[250].mxu0 }
 0x9f5   : > { %v19244_v23 = vpop.f32.mrb[110].mxu1  ;;  %v8888_v16 = vadd.f32 %v8887_v54, %v8766_v3  ;;  %v15755_v50 = vpop.f32.mrb[251].mxu0  ;;  %v19247_v14 = vadd.f32 %v19216_v6, %v8885_v7 }
 0x9f6   : > { %v15863_v21 = vpop.f32.mrb[111].mxu1  ;;  %v16795_v50 = vld [vmem:[%s20358_s7 + $0x30] ss:$8 sps:$4 sm:$0xff]  }
 0x9f7   : > { %v19250_v30 = vadd.f32 %v19218_v25, %v8888_v16 }
 0x9fa   : > { %v8892_v57 = vpop.f32.mrb[252].mxu0 }
 0x9fb   : > { %v19252_v13 = vpop.f32.mrb[112].mxu1  ;;  %v8893_v61 = vadd.f32 %v8892_v57, %v8771_v38  ;;  %v15758_v35 = vpop.f32.mrb[253].mxu0 }
 0x9fc   : > { %v15866_v55 = vpop.f32.mrb[113].mxu1  ;;  %v8895_v62 = vpop.f32.mrb[254].mxu0 }
 0x9fd   : > { %v19254_v2 = vpop.f32.mrb[114].mxu1  ;;  %v8896_v8 = vadd.f32 %v8895_v62, %v8774_v43  ;;  %v15759_v45 = vpop.f32.mrb[255].mxu0  ;;  %v19256_v53 = vadd.f32 %v9045_v11, %v8893_v61  ;;  %v16779_v11 = vld [vmem:[%s20358_s7 + $0x4] ss:$8 sps:$4 sm:$0xff]   ;;  %v16794_v61 = vld [vmem:[%s20358_s7 + $0xb4] ss:$8 sps:$4 sm:$0xff]  }
 0x9fe   : > { %v15867_v3 = vpop.f32.mrb[115].mxu1  ;;  %10387 = vmatprep.subr.bf16.mxu1 %v16779_v11  ;;  %v16803_v45 = vld [vmem:[%s20358_s7 + $0x44] ss:$8 sps:$4 sm:$0xff]  }
 0x9ff   : > { %v19258_v49 = vadd.f32 %v9048_v18, %v8896_v8  ;;  %v16777_v18 = vld [vmem:[%s20358_s7] ss:$8 sps:$4 sm:$0xff]   ;;  %v16792_v8 = vld [vmem:[%s20358_s7 + $0xb0] ss:$8 sps:$4 sm:$0xff]  }
 0xa00   : > { %10388 = vmatpush1.bf16.msra.mxu1 %v16777_v18  ;;  %v16806_v18 = vld [vmem:[%s20358_s7 + $0xd4] ss:$8 sps:$4 sm:$0xff]  }
 0xa01   : > { %10389 = vmatprep.subr.bf16.mxu1 %v16785_v41  ;;  %v16804_v41 = vld [vmem:[%s20358_s7 + $0xd0] ss:$8 sps:$4 sm:$0xff]  }
 0xa02   : > { %v8900_v6 = vpop.f32.mrb[0].mxu0 }
 0xa03   : > { %v19260_v58 = vpop.f32.mrb[116].mxu1  ;;  %v8901_v25 = vadd.f32 %v8900_v6, %v8779_v27  ;;  %v15762_v15 = vpop.f32.mrb[1].mxu0  ;;  %v16798_v6 = vld [vmem:[%s20358_s7 + $0xc0] ss:$8 sps:$4 sm:$0xff]  }
 0xa04   : > { %v15870_v20 = vpop.f32.mrb[117].mxu1  ;;  %v8903_v47 = vpop.f32.mrb[2].mxu0  ;;  %10390 = vmatpush1.bf16.msra.mxu1 %v16783_v31  ;;  %v16818_v31 = vld [vmem:[%s20358_s7 + $0x74] ss:$8 sps:$4 sm:$0xff]  }
 0xa05   : > { %v19262_v38 = vpop.f32.mrb[118].mxu1  ;;  %v8904_v36 = vadd.f32 %v8903_v47, %v8782_v9  ;;  %v15763_v32 = vpop.f32.mrb[3].mxu0  ;;  %v19264_v29 = vadd.f32 %v9053_v63, %v8901_v25  ;;  %10391 = vmatprep.subr.bf16.mxu1 %v16791_v4 }
 0xa06   : > { %v15871_v33 = vpop.f32.mrb[119].mxu1  ;;  %v16807_v32 = vld [vmem:[%s20358_s7 + $0x50] ss:$8 sps:$4 sm:$0xff]  }
 0xa07   : > { %v19269_v43 = vadd.f32 %v9056_v37, %v8904_v36 }
 0xa0a   : > { %v8908_v27 = vpop.f32.mrb[4].mxu0 }
 0xa0b   : > { %v19280_v63 = vpop.f32.mrb[120].mxu1  ;;  %v8909_v48 = vadd.f32 %v8908_v27, %v8787_v5  ;;  %v15766_v9 = vpop.f32.mrb[5].mxu0 }
 0xa0c   : > { %v15874_v37 = vpop.f32.mrb[121].mxu1  ;;  %v8911_v39 = vpop.f32.mrb[6].mxu0 }
 0xa0d   : > { %v19288_v10 = vpop.f32.mrb[122].mxu1  ;;  %v8912_v1 = vadd.f32 %v8911_v39, %v19230_v60  ;;  %v15767_v42 = vpop.f32.mrb[7].mxu0  ;;  %v19295_v5 = vadd.f32 %v19228_v52, %v8909_v48  ;;  %v16789_v60 = vld [vmem:[%s20358_s7 + $0x20] ss:$8 sps:$4 sm:$0xff]   ;;  %v16788_v52 = vld [vmem:[%s20358_s7 + $0xa4] ss:$8 sps:$4 sm:$0xff]  }
 0xa0e   : > { %v15875_v44 = vpop.f32.mrb[123].mxu1  ;;  %10392 = vmatpush1.bf16.msra.mxu1 %v16789_v60  ;;  %10270 = vmatprep.subr.bf16.mxu0 %v16788_v52  ;;  %v16815_v48 = vld [vmem:[%s20358_s7 + $0x64] ss:$8 sps:$4 sm:$0xff]   ;;  %v16813_v37 = vld [vmem:[%s20358_s7 + $0x60] ss:$8 sps:$4 sm:$0xff]   ;;  %v17265_v42 = vmov 0  }
 0xa0f   : > { %v19304_v56 = vadd.f32 %v19232_v22, %v8912_v1  ;;  %v16797_v22 = vld [vmem:[%s20358_s7 + $0x34] ss:$8 sps:$4 sm:$0xff]   ;;  %10271 = vmatpush1.bf16.msra.mxu0 %v16786_v34  ;;  %10419 = vmatprep.mubr.bf16.mxu1 %v17265_v42  ;;  %v16824_v44 = vld [vmem:[%s20358_s7 + $0x184] ss:$8 sps:$4 sm:$0xff]   ;;  %v16819_v52 = vld [vmem:[%s20358_s7 + $0xf0] ss:$8 sps:$4 sm:$0xff]  }
 0xa10   : > { %10393 = vmatprep.subr.bf16.mxu1 %v16797_v22  ;;  %10272 = vmatprep.subr.bf16.mxu0 %v16794_v61  ;;  %v16821_v39 = vld [vmem:[%s20358_s7 + $0xf4] ss:$8 sps:$4 sm:$0xff]   ;;  %v16827_v22 = vld [vmem:[%s20358_s7 + $0x104] ss:$8 sps:$4 sm:$0xff]  }
 0xa11   : > { %10298 = vmatprep.mubr.bf16.mxu0 %v17265_v42 }
 0xa12   : > { %v8916_v7 = vpop.f32.mrb[8].mxu0  ;;  %10394 = vmatpush1.bf16.msra.mxu1 %v16795_v50 }
 0xa13   : > { %v19315_v59 = vpop.f32.mrb[124].mxu1  ;;  %v8917_v46 = vadd.f32 %v8916_v7, %v19234_v19  ;;  %v15770_v54 = vpop.f32.mrb[9].mxu0  ;;  %10273 = vmatpush1.bf16.msra.mxu0 %v16792_v8  ;;  %10395 = vmatprep.subr.bf16.mxu1 %v16803_v45 }
 0xa14   : > { %v15878_v16 = vpop.f32.mrb[125].mxu1  ;;  %v8919_v21 = vpop.f32.mrb[10].mxu0 }
 0xa15   : > { %v19324_v57 = vpop.f32.mrb[126].mxu1  ;;  %v8920_v35 = vadd.f32 %v8919_v21, %v19238_v26  ;;  %v15771_v55 = vpop.f32.mrb[11].mxu0  ;;  %v19331_v19 = vadd.f32 %v19236_v40, %v8917_v46  ;;  %v16801_v26 = vld [vmem:[%s20358_s7 + $0x40] ss:$8 sps:$4 sm:$0xff]   ;;  %v16800_v40 = vld [vmem:[%s20358_s7 + $0xc4] ss:$8 sps:$4 sm:$0xff]  }
 0xa16   : > { %v15879_v62 = vpop.f32.mrb[127].mxu1  ;;  %10396 = vmatpush1.bf16.msra.mxu1 %v16801_v26  ;;  %10274 = vmatprep.subr.bf16.mxu0 %v16800_v40 }
 0xa17   : > { %v19340_v3 = vadd.f32 %v19240_v0, %v8920_v35  ;;  %v16809_v0 = vld [vmem:[%s20358_s7 + $0x54] ss:$8 sps:$4 sm:$0xff]   ;;  %10275 = vmatpush1.bf16.msra.mxu0 %v16798_v6 }
 0xa18   : > { %10397 = vmatprep.subr.bf16.mxu1 %v16809_v0  ;;  %10276 = vmatprep.subr.bf16.mxu0 %v16806_v18 }
 0xa1a   : > { %v9200_v25 = vpop.f32.mrb[12].mxu0  ;;  %10398 = vmatpush1.bf16.msra.mxu1 %v16807_v32 }
 0xa1b   : > { %v19351_v15 = vpop.f32.mrb[128].mxu1  ;;  %v9239_v20 = vadd.f32 %v9200_v25, %v19247_v14  ;;  %v15826_v47 = vpop.f32.mrb[13].mxu0  ;;  %10277 = vmatpush1.bf16.msra.mxu0 %v16804_v41  ;;  %10399 = vmatprep.subr.bf16.mxu1 %v16815_v48 }
 0xa1c   : > { %v15934_v36 = vpop.f32.mrb[129].mxu1  ;;  %v9203_v33 = vpop.f32.mrb[14].mxu0 }
 0xa1d   : > { %v19360_v11 = vpop.f32.mrb[130].mxu1  ;;  %v9240_v24 = vadd.f32 %v9203_v33, %v19250_v30  ;;  %v15827_v17 = vpop.f32.mrb[15].mxu0  ;;  %v19367_v14 = vadd.f32 %v19242_v51, %v9239_v20  ;;  %v16810_v30 = vld [vmem:[%s20358_s7 + $0xe0] ss:$8 sps:$4 sm:$0xff]   ;;  %v16812_v51 = vld [vmem:[%s20358_s7 + $0xe4] ss:$8 sps:$4 sm:$0xff]  }
 0xa1e   : > { %v15935_v27 = vpop.f32.mrb[131].mxu1  ;;  %10278 = vmatprep.subr.bf16.mxu0 %v16812_v51  ;;  %10400 = vmatpush1.bf16.msra.mxu1 %v16813_v37 }
 0xa1f   : > { %v19376_v9 = vadd.f32 %v19244_v23, %v9240_v24  ;;  %v16816_v23 = vld [vmem:[%s20358_s7 + $0x70] ss:$8 sps:$4 sm:$0xff]   ;;  %10401 = vmatprep.subr.bf16.mxu1 %v16818_v31  ;;  %10279 = vmatpush1.bf16.msra.mxu0 %v16810_v30 }
 0xa20   : > { %10280 = vmatprep.subr.bf16.mxu0 %v16821_v39 }
 0xa22   : > { %v9208_v12 = vpop.f32.mrb[16].mxu0  ;;  %10402 = vmatpush1.bf16.msra.mxu1 %v16816_v23 }
 0xa23   : > { %v19396_v1 = vpop.f32.mrb[132].mxu1  ;;  %v9241_v28 = vadd.f32 %v9208_v12, %v19256_v53  ;;  %v15830_v4 = vpop.f32.mrb[17].mxu0  ;;  %10670 = vmatprep.subr.bf16.mxu1 %v16824_v44  ;;  %10281 = vmatpush1.bf16.msra.mxu0 %v16819_v52 }
 0xa24   : > { %v15938_v60 = vpop.f32.mrb[133].mxu1  ;;  %v9211_v34 = vpop.f32.mrb[18].mxu0  ;;  %10528 = vmatprep.subr.bf16.mxu0 %v16827_v22 }
 0xa25   : > { %v19407_v7 = vpop.f32.mrb[134].mxu1  ;;  %v9242_v46 = vadd.f32 %v9211_v34, %v19258_v49  ;;  %v15831_v53 = vpop.f32.mrb[19].mxu0  ;;  %v9404_v16 = vadd.f32 %v19252_v13, %v9241_v28 }
 0xa26   : > { %v15939_v54 = vpop.f32.mrb[135].mxu1 }
 0xa27   : > { %v9405_v50 = vadd.f32 %v19254_v2, %v9242_v46 }
 0xa2a   : > { %v9216_v21 = vpop.f32.mrb[20].mxu0 }
 0xa2b   : > { %v19415_v61 = vpop.f32.mrb[136].mxu1  ;;  %v9243_v35 = vadd.f32 %v9216_v21, %v19264_v29  ;;  %v15834_v55 = vpop.f32.mrb[21].mxu0 }
 0xa2c   : > { %v15942_v62 = vpop.f32.mrb[137].mxu1  ;;  %v9219_v8 = vpop.f32.mrb[22].mxu0 }
 0xa2d   : > { %v19418_v45 = vpop.f32.mrb[138].mxu1  ;;  %v9244_v49 = vadd.f32 %v9219_v8, %v19269_v43  ;;  %v15835_v26 = vpop.f32.mrb[23].mxu0  ;;  %v9406_v40 = vadd.f32 %v19260_v58, %v9243_v35 }
 0xa2e   : > { %v15943_v13 = vpop.f32.mrb[139].mxu1 }
 0xa2f   : > { %v9407_v2 = vadd.f32 %v19262_v38, %v9244_v49 }
 0xa32   : > { %v9224_v6 = vpop.f32.mrb[24].mxu0 }
 0xa33   : > { %v19423_v25 = vpop.f32.mrb[140].mxu1  ;;  %v9245_v0 = vadd.f32 %v9224_v6, %v19295_v5  ;;  %v15838_v20 = vpop.f32.mrb[25].mxu0 }
 0xa34   : > { %v15946_v29 = vpop.f32.mrb[141].mxu1  ;;  %v9227_v47 = vpop.f32.mrb[26].mxu0 }
 0xa35   : > { %v19426_v36 = vpop.f32.mrb[142].mxu1  ;;  %v9246_v32 = vadd.f32 %v9227_v47, %v19304_v56  ;;  %v15839_v33 = vpop.f32.mrb[27].mxu0  ;;  %v9408_v18 = vadd.f32 %v19280_v63, %v9245_v0 }
 0xa36   : > { %v15947_v43 = vpop.f32.mrb[143].mxu1 }
 0xa37   : > { %v9409_v58 = vadd.f32 %v19288_v10, %v9246_v32 }
 0xa3a   : > { %v9232_v24 = vpop.f32.mrb[28].mxu0 }
 0xa3b   : > { %v19431_v38 = vpop.f32.mrb[144].mxu1  ;;  %v9247_v17 = vadd.f32 %v9232_v24, %v19331_v19  ;;  %v15842_v27 = vpop.f32.mrb[29].mxu0 }
 0xa3c   : > { %v15950_v5 = vpop.f32.mrb[145].mxu1  ;;  %v9235_v41 = vpop.f32.mrb[30].mxu0 }
 0xa3d   : > { %v19434_v48 = vpop.f32.mrb[146].mxu1  ;;  %v9248_v30 = vadd.f32 %v9235_v41, %v19340_v3  ;;  %v15843_v51 = vpop.f32.mrb[31].mxu0  ;;  %v9410_v37 = vadd.f32 %v19315_v59, %v9247_v17 }
 0xa3e   : > { %v15951_v56 = vpop.f32.mrb[147].mxu1 }
 0xa3f   : > { %v9411_v63 = vadd.f32 %v19324_v57, %v9248_v30 }
 0xa42   : > { %v9526_v31 = vpop.f32.mrb[32].mxu0 }
 0xa43   : > { %v19439_v10 = vpop.f32.mrb[148].mxu1  ;;  %v9565_v23 = vadd.f32 %v9526_v31, %v19367_v14  ;;  %v15898_v39 = vpop.f32.mrb[33].mxu0 }
 0xa44   : > { %v16006_v19 = vpop.f32.mrb[149].mxu1  ;;  %v9529_v12 = vpop.f32.mrb[34].mxu0 }
 0xa45   : > { %v19442_v44 = vpop.f32.mrb[150].mxu1  ;;  %v9566_v28 = vadd.f32 %v9529_v12, %v19376_v9  ;;  %v15899_v4 = vpop.f32.mrb[35].mxu0  ;;  %v9728_v60 = vadd.f32 %v19351_v15, %v9565_v23 }
 0xa46   : > { %v16007_v3 = vpop.f32.mrb[151].mxu1 }
 0xa47   : > { %v9729_v59 = vadd.f32 %v19360_v11, %v9566_v28 }
 0xa4a   : > { %v9534_v52 = vpop.f32.mrb[36].mxu0 }
 0xa4b   : > { %v19447_v57 = vpop.f32.mrb[152].mxu1  ;;  %v9567_v34 = vadd.f32 %v9534_v52, %v9404_v16  ;;  %v15902_v22 = vpop.f32.mrb[37].mxu0 }
 0xa4c   : > { %v16010_v46 = vpop.f32.mrb[153].mxu1  ;;  %v9537_v14 = vpop.f32.mrb[38].mxu0 }
 0xa4d   : > { %v19449_v53 = vpop.f32.mrb[154].mxu1  ;;  %v9568_v54 = vadd.f32 %v9537_v14, %v9405_v50  ;;  %v15903_v21 = vpop.f32.mrb[39].mxu0  ;;  %v9730_v9 = vadd.f32 %v19396_v1, %v9567_v34 }
 0xa4e   : > { %v16011_v35 = vpop.f32.mrb[155].mxu1 }
 0xa4f   : > { %v9731_v55 = vadd.f32 %v19407_v7, %v9568_v54 }
 0xa52   : > { %v9542_v62 = vpop.f32.mrb[40].mxu0 }
 0xa53   : > { %v19453_v15 = vpop.f32.mrb[156].mxu1  ;;  %v9569_v11 = vadd.f32 %v9542_v62, %v9406_v40  ;;  %v15906_v8 = vpop.f32.mrb[41].mxu0 }
 0xa54   : > { %v16014_v49 = vpop.f32.mrb[157].mxu1  ;;  %v9545_v26 = vpop.f32.mrb[42].mxu0 }
 0xa55   : > { %v19455_v16 = vpop.f32.mrb[158].mxu1  ;;  %v9570_v13 = vadd.f32 %v9545_v26, %v9407_v2  ;;  %v15907_v6 = vpop.f32.mrb[43].mxu0  ;;  %v9732_v50 = vadd.f32 %v19415_v61, %v9569_v11 }
 0xa56   : > { %v16015_v0 = vpop.f32.mrb[159].mxu1 }
 0xa57   : > { %v9733_v20 = vadd.f32 %v19418_v45, %v9570_v13 }
 0xa5a   : > { %v9550_v29 = vpop.f32.mrb[44].mxu0 }
 0xa5b   : > { %v19459_v1 = vpop.f32.mrb[160].mxu1  ;;  %v9571_v7 = vadd.f32 %v9550_v29, %v9408_v18  ;;  %v15910_v47 = vpop.f32.mrb[45].mxu0 }
 0xa5c   : > { %v16018_v32 = vpop.f32.mrb[161].mxu1  ;;  %v9553_v33 = vpop.f32.mrb[46].mxu0 }
 0xa5d   : > { %v19461_v40 = vpop.f32.mrb[162].mxu1  ;;  %v9572_v43 = vadd.f32 %v9553_v33, %v9409_v58  ;;  %v15911_v24 = vpop.f32.mrb[47].mxu0  ;;  %v9734_v2 = vadd.f32 %v19423_v25, %v9571_v7 }
 0xa5e   : > { %v16019_v17 = vpop.f32.mrb[163].mxu1 }
 0xa5f   : > { %v19465_v27 = vadd.f32 %v19426_v36, %v9572_v43 }
 0xa62   : > { %v9558_v61 = vpop.f32.mrb[48].mxu0 }
 0xa63   : > { %v19467_v5 = vpop.f32.mrb[164].mxu1  ;;  %v9573_v45 = vadd.f32 %v9558_v61, %v9410_v37  ;;  %v15914_v41 = vpop.f32.mrb[49].mxu0  ;;  %v19480_v37 = vld [vmem:[%s20357_s6] ss:$0 sm:$0xff] }
 0xa64   : > { %v16022_v30 = vpop.f32.mrb[165].mxu1  ;;  %v9561_v18 = vpop.f32.mrb[50].mxu0 }
 0xa65   : > { %v19469_v51 = vpop.f32.mrb[166].mxu1  ;;  %v9574_v56 = vadd.f32 %v9561_v18, %v9411_v63  ;;  %v15915_v31 = vpop.f32.mrb[51].mxu0  ;;  %v19472_v58 = vadd.f32 %v19431_v38, %v9573_v45 }
 0xa66   : > { %v16023_v23 = vpop.f32.mrb[167].mxu1 }
 0xa67   : > { %v19475_v25 = vadd.f32 %v19434_v48, %v9574_v56 }
 0xa6a   : > { %v9852_v36 = vpop.f32.mrb[52].mxu0 }
 0xa6b   : > { %v9891_v39 = vadd.f32 %v9852_v36, %v9728_v60  ;;  %v15970_v19 = vpop.f32.mrb[53].mxu0 }
 0xa6c   : > { %v9855_v12 = vpop.f32.mrb[54].mxu0 }
 0xa6d   : > { %v10054_v28 = vadd.f32 %v19439_v10, %v9891_v39  ;;  %v9892_v63 = vadd.f32 %v9855_v12, %v9729_v59  ;;  %v15971_v4 = vpop.f32.mrb[55].mxu0 }
 0xa6f   : > { %v10071_v3 = vadd.f32 %v19480_v37, %v10054_v28  ;;  %v10055_v38 = vadd.f32 %v19442_v44, %v9892_v63 }
 0xa71   : > { %v10081_v52 = vmax.f32 %v10071_v3, 0.0  ;;  %v10072_v48 = vadd.f32 %v19480_v37, %v10055_v38 }
 0xa72   : > { %v9860_v34 = vpop.f32.mrb[56].mxu0 }
 0xa73   : > { %10091 = vst [vmem:[#allocation8] sm:$0xff] %v10081_v52  ;;  %v10082_v60 = vmax.f32 %v10072_v48, 0.0  ;;  %v9893_v22 = vadd.f32 %v9860_v34, %v9730_v9  ;;  %v15974_v46 = vpop.f32.mrb[57].mxu0 }
 0xa74   : > { %v9863_v14 = vpop.f32.mrb[58].mxu0 }
 0xa75   : > { %10092 = vst [vmem:[#allocation8 + $0x8] sm:$0xff] %v10082_v60  ;;  %v10056_v54 = vadd.f32 %v19447_v57, %v9893_v22  ;;  %v9894_v21 = vadd.f32 %v9863_v14, %v9731_v55  ;;  %v15975_v10 = vpop.f32.mrb[59].mxu0 }
 0xa77   : > { %v10073_v59 = vadd.f32 %v19480_v37, %v10056_v54  ;;  %v10057_v35 = vadd.f32 %v19449_v53, %v9894_v21 }
 0xa79   : > { %v10083_v62 = vmax.f32 %v10073_v59, 0.0  ;;  %v10074_v44 = vadd.f32 %v19480_v37, %v10057_v35 }
 0xa7a   : > { %v9868_v11 = vpop.f32.mrb[60].mxu0 }
 0xa7b   : > { %10093 = vst [vmem:[#allocation8 + $0x10] sm:$0xff] %v10083_v62  ;;  %v10084_v8 = vmax.f32 %v10074_v44, 0.0  ;;  %v9895_v49 = vadd.f32 %v9868_v11, %v9732_v50  ;;  %v15978_v26 = vpop.f32.mrb[61].mxu0 }
 0xa7c   : > { %v10101_v9 = vld [vmem:[#allocation8] ss:$2 sm:$0xff]  ;;  %v10111_v13 = vld [vmem:[#allocation8 + $0x1] ss:$2 sm:$0xff]  ;;  %v9871_v6 = vpop.f32.mrb[62].mxu0 }
 0xa7d   : > { %v10120_v0 = vmax.f32 %v10101_v9, %v10111_v13  ;;  %10094 = vst [vmem:[#allocation8 + $0x18] sm:$0xff] %v10084_v8  ;;  %v10058_v57 = vadd.f32 %v19453_v15, %v9895_v49  ;;  %v9896_v55 = vadd.f32 %v9871_v6, %v9733_v20  ;;  %v15979_v29 = vpop.f32.mrb[63].mxu0  ;;  %v16830_v8 = vld [vmem:[%s20358_s7 + $0x194] ss:$8 sps:$4 sm:$0xff]   ;;  %v16825_v49 = vld [vmem:[%s20358_s7 + $0x100] ss:$8 sps:$4 sm:$0xff]  }
 0xa7e   : > { %v16833_v9 = vld [vmem:[%s20358_s7 + $0x114] ss:$8 sps:$4 sm:$0xff]   ;;  %v16828_v13 = vld [vmem:[%s20358_s7 + $0x190] ss:$8 sps:$4 sm:$0xff]   ;;  %v16836_v6 = vld [vmem:[%s20358_s7 + $0x1a4] ss:$8 sps:$4 sm:$0xff]  }
 0xa7f   : > { %10125 = vst [vmem:[#allocation9] sm:$0xff] %v10120_v0  ;;  %v10075_v53 = vadd.f32 %v19480_v37, %v10058_v57  ;;  %v10059_v7 = vadd.f32 %v19455_v16, %v9896_v55  ;;  %v16831_v0 = vld [vmem:[%s20358_s7 + $0x110] ss:$8 sps:$4 sm:$0xff]   ;;  %v16839_v29 = vld [vmem:[%s20358_s7 + $0x124] ss:$8 sps:$4 sm:$0xff]  }
 0xa81   : > { %v10085_v47 = vmax.f32 %v10075_v53, 0.0  ;;  %v10076_v32 = vadd.f32 %v19480_v37, %v10059_v7  ;;  %v16834_v7 = vld [vmem:[%s20358_s7 + $0x1a0] ss:$8 sps:$4 sm:$0xff]  }
 0xa82   : > { %v9876_v33 = vpop.f32.mrb[64].mxu0 }
 0xa83   : > { %10095 = vst [vmem:[#allocation8 + $0x20] sm:$0xff] %v10085_v47  ;;  %v10086_v50 = vmax.f32 %v10076_v32, 0.0  ;;  %v9897_v43 = vadd.f32 %v9876_v33, %v9734_v2  ;;  %v15982_v24 = vpop.f32.mrb[65].mxu0  ;;  %v16842_v47 = vld [vmem:[%s20358_s7 + $0x1b4] ss:$8 sps:$4 sm:$0xff]  }
 0xa84   : > { %v10103_v17 = vld [vmem:[#allocation8 + $0x10] ss:$2 sm:$0xff]  ;;  %v10113_v61 = vld [vmem:[#allocation8 + $0x11] ss:$2 sm:$0xff]  ;;  %v9879_v45 = vpop.f32.mrb[66].mxu0 }
 0xa85   : > { %v10121_v41 = vmax.f32 %v10103_v17, %v10113_v61  ;;  %10096 = vst [vmem:[#allocation8 + $0x28] sm:$0xff] %v10086_v50  ;;  %v10060_v15 = vadd.f32 %v19459_v1, %v9897_v43  ;;  %v9898_v20 = vadd.f32 %v9879_v45, %v19465_v27  ;;  %v15983_v30 = vpop.f32.mrb[67].mxu0  ;;  %v16837_v32 = vld [vmem:[%s20358_s7 + $0x120] ss:$8 sps:$4 sm:$0xff]   ;;  %v16845_v33 = vld [vmem:[%s20358_s7 + $0x134] ss:$8 sps:$4 sm:$0xff]  }
 0xa86   : > { %v16840_v50 = vld [vmem:[%s20358_s7 + $0x1b0] ss:$8 sps:$4 sm:$0xff]   ;;  %v16848_v43 = vld [vmem:[%s20358_s7 + $0x1c4] ss:$8 sps:$4 sm:$0xff]   ;;  %v16846_v61 = vld [vmem:[%s20358_s7 + $0x1c0] ss:$8 sps:$4 sm:$0xff]  }
 0xa87   : > { %10126 = vst [vmem:[#allocation9 + $0x8] sm:$0xff] %v10121_v41  ;;  %v10077_v16 = vadd.f32 %v19480_v37, %v10060_v15  ;;  %v10061_v18 = vadd.f32 %v19461_v40, %v9898_v20  ;;  %v10130_v40 = vld [vmem:[#allocation9] sm:$0x1f]  ;;  %v16843_v24 = vld [vmem:[%s20358_s7 + $0x130] ss:$8 sps:$4 sm:$0xff]  }
 0xa88   : > { %v16851_v17 = vld [vmem:[%s20358_s7 + $0x144] ss:$8 sps:$4 sm:$0xff]   ;;  %v16854_v45 = vld [vmem:[%s20358_s7 + $0x1d4] ss:$8 sps:$4 sm:$0xff]   ;;  %v16849_v41 = vld [vmem:[%s20358_s7 + $0x140] ss:$8 sps:$4 sm:$0xff]  }
 0xa89   : > { %v10087_v56 = vmax.f32 %v10077_v16, 0.0  ;;  %v10078_v31 = vadd.f32 %v19480_v37, %v10061_v18  ;;  %v16857_v15 = vld [vmem:[%s20358_s7 + $0x154] ss:$8 sps:$4 sm:$0xff]   ;;  %v16852_v20 = vld [vmem:[%s20358_s7 + $0x1d0] ss:$8 sps:$4 sm:$0xff]  }
 0xa8a   : > { %v9884_v2 = vpop.f32.mrb[68].mxu0  ;;  %v16860_v30 = vld [vmem:[%s20358_s7 + $0x1e4] ss:$8 sps:$4 sm:$0xff]   ;;  %v16855_v16 = vld [vmem:[%s20358_s7 + $0x150] ss:$8 sps:$4 sm:$0xff]  }
 0xa8b   : > { %10097 = vst [vmem:[#allocation8 + $0x30] sm:$0xff] %v10087_v56  ;;  %v10088_v23 = vmax.f32 %v10078_v31, 0.0  ;;  %v9899_v36 = vadd.f32 %v9884_v2, %v19472_v58  ;;  %v15986_v39 = vpop.f32.mrb[69].mxu0  ;;  %v16863_v18 = vld [vmem:[%s20358_s7 + $0x164] ss:$8 sps:$4 sm:$0xff]  }
 0xa8c   : > { %v10105_v19 = vld [vmem:[#allocation8 + $0x20] ss:$2 sm:$0xff]  ;;  %v10115_v12 = vld [vmem:[#allocation8 + $0x21] ss:$2 sm:$0xff]  ;;  %v9887_v1 = vpop.f32.mrb[70].mxu0 }
 0xa8d   : > { %v10122_v28 = vmax.f32 %v10105_v19, %v10115_v12  ;;  %10098 = vst [vmem:[#allocation8 + $0x38] sm:$0xff] %v10088_v23  ;;  %v10062_v27 = vadd.f32 %v19467_v5, %v9899_v36  ;;  %v9900_v63 = vadd.f32 %v9887_v1, %v19475_v25  ;;  %v15987_v4 = vpop.f32.mrb[71].mxu0  ;;  %v16858_v56 = vld [vmem:[%s20358_s7 + $0x1e0] ss:$8 sps:$4 sm:$0xff]   ;;  %v16866_v31 = vld [vmem:[%s20358_s7 + $0x1f4] ss:$8 sps:$4 sm:$0xff]  }
 0xa8e   : > { %v10131_v3 = vld [vmem:[#allocation9 + $0x5] sm:$0x1f]  ;;  %v10134_v25 = vld [vmem:[#allocation9 + $0xa] sm:$0x1f]  ;;  %v16869_v23 = vld [vmem:[%s20358_s7 + $0x174] ss:$8 sps:$4 sm:$0xff]  }
 0xa8f   : > { %10127 = vst [vmem:[#allocation9 + $0x10] sm:$0xff] %v10122_v28  ;;  %v10079_v38 = vadd.f32 %v19480_v37, %v10062_v27  ;;  %v10063_v52 = vadd.f32 %v19469_v51, %v9900_v63  ;;  %v10132_v48 = vmax.f32 %v10130_v40, %v10131_v3  ;;  %v16861_v2 = vld [vmem:[%s20358_s7 + $0x160] ss:$8 sps:$4 sm:$0xff]   ;;  %v16864_v36 = vld [vmem:[%s20358_s7 + $0x1f0] ss:$8 sps:$4 sm:$0xff]  }
 0xa90   : > { %v16872_v39 = vld [vmem:[%s20358_s7 + $0x284] ss:$8 sps:$4 sm:$0xff]   ;;  %v16867_v19 = vld [vmem:[%s20358_s7 + $0x170] ss:$8 sps:$4 sm:$0xff]   ;;  %v16870_v1 = vld [vmem:[%s20358_s7 + $0x280] ss:$8 sps:$4 sm:$0xff]  }
 0xa91   : > { %v10089_v58 = vmax.f32 %v10079_v38, 0.0  ;;  %v10080_v34 = vadd.f32 %v19480_v37, %v10063_v52  ;;  %10133 = vst [vmem:[#allocation10] sm:$0xf] %v10132_v48  ;;  %v16822_v37 = vld [vmem:[%s20358_s7 + $0x180] ss:$8 sps:$4 sm:$0xff]  }
 0xa92   : > { %v16875_v12 = vld [vmem:[%s20358_s7 + $0x204] ss:$8 sps:$4 sm:$0xff]   ;;  %v16878_v27 = vld [vmem:[%s20358_s7 + $0x294] ss:$8 sps:$4 sm:$0xff]   ;;  %v16873_v63 = vld [vmem:[%s20358_s7 + $0x200] ss:$8 sps:$4 sm:$0xff]  }
 0xa93   : > { %10099 = vst [vmem:[#allocation8 + $0x40] sm:$0xff] %v10089_v58  ;;  %v10090_v60 = vmax.f32 %v10080_v34, 0.0  ;;  %v16881_v40 = vld [vmem:[%s20358_s7 + $0x214] ss:$8 sps:$4 sm:$0xff]   ;;  %v16876_v3 = vld [vmem:[%s20358_s7 + $0x290] ss:$8 sps:$4 sm:$0xff]  }
 0xa94   : > { %v10107_v22 = vld [vmem:[#allocation8 + $0x30] ss:$2 sm:$0xff]  ;;  %v10117_v46 = vld [vmem:[#allocation8 + $0x31] ss:$2 sm:$0xff]  ;;  %v16879_v52 = vld [vmem:[%s20358_s7 + $0x210] ss:$8 sps:$4 sm:$0xff]  }
 0xa95   : > { %v10123_v5 = vmax.f32 %v10107_v22, %v10117_v46  ;;  %10100 = vst [vmem:[#allocation8 + $0x48] sm:$0xff] %v10090_v60  ;;  %v16884_v38 = vld [vmem:[%s20358_s7 + $0x2a4] ss:$8 sps:$4 sm:$0xff]   ;;  %v16882_v58 = vld [vmem:[%s20358_s7 + $0x2a0] ss:$8 sps:$4 sm:$0xff]  }
 0xa96   : > { %v10135_v14 = vld [vmem:[#allocation9 + $0xf] sm:$0x1f]  ;;  %v16890_v34 = vld [vmem:[%s20358_s7 + $0x2b4] ss:$8 sps:$4 sm:$0xff]   ;;  %v16885_v60 = vld [vmem:[%s20358_s7 + $0x220] ss:$8 sps:$4 sm:$0xff]  }
 0xa97   : > { %10128 = vst [vmem:[#allocation9 + $0x18] sm:$0xff] %v10123_v5  ;;  %v10136_v54 = vmax.f32 %v10134_v25, %v10135_v14  ;;  %v16887_v48 = vld [vmem:[%s20358_s7 + $0x224] ss:$8 sps:$4 sm:$0xff]   ;;  %v16893_v22 = vld [vmem:[%s20358_s7 + $0x234] ss:$8 sps:$4 sm:$0xff]  }
 0xa98   : > { %v16888_v46 = vld [vmem:[%s20358_s7 + $0x2b0] ss:$8 sps:$4 sm:$0xff]   ;;  %v16896_v5 = vld [vmem:[%s20358_s7 + $0x2c4] ss:$8 sps:$4 sm:$0xff]  }
 0xa99   : > { %10137 = vst [vmem:[#allocation10 + $0x4] sm:$0xf] %v10136_v54  ;;  %v16891_v25 = vld [vmem:[%s20358_s7 + $0x230] ss:$8 sps:$4 sm:$0xff]   ;;  %v16899_v14 = vld [vmem:[%s20358_s7 + $0x244] ss:$8 sps:$4 sm:$0xff]  }
 0xa9a   : > { %v16894_v54 = vld [vmem:[%s20358_s7 + $0x2c0] ss:$8 sps:$4 sm:$0xff]  }
 0xa9c   : > { %v10109_v21 = vld [vmem:[#allocation8 + $0x40] ss:$2 sm:$0xff]  ;;  %v10119_v10 = vld [vmem:[#allocation8 + $0x41] ss:$2 sm:$0xff] }
 0xa9d   : > { %v10124_v59 = vmax.f32 %v10109_v21, %v10119_v10  ;;  %v16902_v21 = vld [vmem:[%s20358_s7 + $0x2d4] ss:$8 sps:$4 sm:$0xff]   ;;  %v16897_v10 = vld [vmem:[%s20358_s7 + $0x240] ss:$8 sps:$4 sm:$0xff]  }
 0xa9e   : > { %v10138_v51 = vld [vmem:[#allocation9 + $0x14] sm:$0x1f]  ;;  %v10139_v35 = vld [vmem:[#allocation9 + $0x19] sm:$0x1f] }
 0xa9f   : > { %10129 = vst [vmem:[#allocation9 + $0x20] sm:$0xff] %v10124_v59  ;;  %v10140_v44 = vmax.f32 %v10138_v51, %v10139_v35  ;;  %v16905_v59 = vld [vmem:[%s20358_s7 + $0x254] ss:$8 sps:$4 sm:$0xff]   ;;  %v16900_v51 = vld [vmem:[%s20358_s7 + $0x2d0] ss:$8 sps:$4 sm:$0xff]  }
 0xaa0   : > { %v10146_v62 = vld [vmem:[#allocation10] sm:$0xff] }
 0xaa1   : > { %v19508_v11 = vpack.c.bf16 %v10146_v62, %v10146_v62  ;;  %10141 = vst [vmem:[#allocation10 + $0x8] sm:$0xf] %v10140_v44  ;;  %v16908_v35 = vld [vmem:[%s20358_s7 + $0x2e4] ss:$8 sps:$4 sm:$0xff]   ;;  %v16906_v44 = vld [vmem:[%s20358_s7 + $0x2e0] ss:$8 sps:$4 sm:$0xff]  }
 0xaa2   : > { %v16911_v62 = vld [vmem:[%s20358_s7 + $0x264] ss:$8 sps:$4 sm:$0xff]  }
 0xaa3   : > { %v19517_v26 = vshrl.u32 %v19508_v11, 16  ;;  %10420 = vmatmul.mubr.bf16.vlgmr.msra.gmra.mrb[168].mxu1 %v19508_v11  ;;  %v10446_v4 = vrot.slane %v19508_v11, 1 }
 0xaa4   : > { %10671 = vmatpush1.bf16.msra.mxu1 %v16822_v37  ;;  %10702 = vmatprep.mubr.bf16.mxu1 %v17265_v42  ;;  %v16903_v37 = vld [vmem:[%s20358_s7 + $0x250] ss:$8 sps:$4 sm:$0xff]  }
 0xaa5   : > { %10299 = vmatmul.mubr.bf16.vlgmr.msra.gmra.mrb[72].mxu0 %v19517_v26  ;;  %10672 = vmatprep.subr.bf16.mxu1 %v16830_v8  ;;  %v10588_v28 = vrot.slane %v19517_v26, 1  ;;  %v16914_v8 = vld [vmem:[%s20358_s7 + $0x2f4] ss:$8 sps:$4 sm:$0xff]  }
 0xaa6   : > { %10529 = vmatpush1.bf16.msra.mxu0 %v16825_v49  ;;  %10560 = vmatprep.mubr.bf16.mxu0 %v17265_v42  ;;  %v10142_v57 = vld [vmem:[#allocation9 + $0x1e] sm:$0x1f]  ;;  %v10143_v55 = vld [vmem:[#allocation9 + $0x23] sm:$0x1f] }
 0xaa7   : > { %10530 = vmatprep.subr.bf16.mxu0 %v16833_v9  ;;  %v10144_v53 = vmax.f32 %v10142_v57, %v10143_v55  ;;  %v16909_v49 = vld [vmem:[%s20358_s7 + $0x260] ss:$8 sps:$4 sm:$0xff]   ;;  %v16917_v9 = vld [vmem:[%s20358_s7 + $0x274] ss:$8 sps:$4 sm:$0xff]   ;;  %v16923_v57 = vld [vmem:[%s20358_s7 + $0x304] ss:$8 sps:$4 sm:$0xff]  }
 0xaa8   : > { %10673 = vmatpush1.bf16.msra.mxu1 %v16828_v13  ;;  %v16912_v13 = vld [vmem:[%s20358_s7 + $0x2f0] ss:$8 sps:$4 sm:$0xff]   ;;  %v16918_v55 = vld [vmem:[%s20358_s7 + $0x380] ss:$8 sps:$4 sm:$0xff]  }
 0xaa9   : > { %10674 = vmatprep.subr.bf16.mxu1 %v16836_v6  ;;  %10145 = vst [vmem:[#allocation10 + $0xc] sm:$0xf] %v10144_v53  ;;  %v16920_v6 = vld [vmem:[%s20358_s7 + $0x384] ss:$8 sps:$4 sm:$0xff]   ;;  %v16926_v53 = vld [vmem:[%s20358_s7 + $0x394] ss:$8 sps:$4 sm:$0xff]  }
 0xaaa   : > { %10531 = vmatpush1.bf16.msra.mxu0 %v16831_v0  ;;  %v16915_v0 = vld [vmem:[%s20358_s7 + $0x270] ss:$8 sps:$4 sm:$0xff]  }
 0xaab   : > { %10532 = vmatprep.subr.bf16.mxu0 %v16839_v29  ;;  %v10872_v29 = vrot.slane %v19517_v26, 2 }
 0xaac   : > { %10675 = vmatpush1.bf16.msra.mxu1 %v16834_v7  ;;  %v16921_v7 = vld [vmem:[%s20358_s7 + $0x300] ss:$8 sps:$4 sm:$0xff]  }
 0xaad   : > { %10676 = vmatprep.subr.bf16.mxu1 %v16842_v47  ;;  %v10730_v47 = vrot.slane %v19508_v11, 2 }
 0xaae   : > { %10533 = vmatpush1.bf16.msra.mxu0 %v16837_v32  ;;  %v16929_v32 = vld [vmem:[%s20358_s7 + $0x314] ss:$8 sps:$4 sm:$0xff]  }
 0xaaf   : > { %10534 = vmatprep.subr.bf16.mxu0 %v16845_v33  ;;  %v16924_v33 = vld [vmem:[%s20358_s7 + $0x390] ss:$8 sps:$4 sm:$0xff]  }
 0xab0   : > { %10677 = vmatpush1.bf16.msra.mxu1 %v16840_v50  ;;  %v16932_v50 = vld [vmem:[%s20358_s7 + $0x3a4] ss:$8 sps:$4 sm:$0xff]  }
 0xab1   : > { %10678 = vmatprep.subr.bf16.mxu1 %v16848_v43  ;;  %v16927_v43 = vld [vmem:[%s20358_s7 + $0x310] ss:$8 sps:$4 sm:$0xff]  }
 0xab2   : > { %10535 = vmatpush1.bf16.msra.mxu0 %v16843_v24  ;;  %v16935_v24 = vld [vmem:[%s20358_s7 + $0x324] ss:$8 sps:$4 sm:$0xff]  }
 0xab3   : > { %10536 = vmatprep.subr.bf16.mxu0 %v16851_v17  ;;  %v16930_v17 = vld [vmem:[%s20358_s7 + $0x3a0] ss:$8 sps:$4 sm:$0xff]  }
 0xab4   : > { %10679 = vmatpush1.bf16.msra.mxu1 %v16846_v61  ;;  %v16938_v61 = vld [vmem:[%s20358_s7 + $0x3b4] ss:$8 sps:$4 sm:$0xff]  }
 0xab5   : > { %10680 = vmatprep.subr.bf16.mxu1 %v16854_v45  ;;  %v16933_v45 = vld [vmem:[%s20358_s7 + $0x320] ss:$8 sps:$4 sm:$0xff]  }
 0xab6   : > { %10537 = vmatpush1.bf16.msra.mxu0 %v16849_v41  ;;  %v16941_v41 = vld [vmem:[%s20358_s7 + $0x334] ss:$8 sps:$4 sm:$0xff]  }
 0xab7   : > { %10538 = vmatprep.subr.bf16.mxu0 %v16857_v15  ;;  %v16936_v15 = vld [vmem:[%s20358_s7 + $0x3b0] ss:$8 sps:$4 sm:$0xff]  }
 0xab8   : > { %10681 = vmatpush1.bf16.msra.mxu1 %v16852_v20  ;;  %v16944_v20 = vld [vmem:[%s20358_s7 + $0x3c4] ss:$8 sps:$4 sm:$0xff]  }
 0xab9   : > { %10682 = vmatprep.subr.bf16.mxu1 %v16860_v30  ;;  %v16939_v30 = vld [vmem:[%s20358_s7 + $0x330] ss:$8 sps:$4 sm:$0xff]  }
 0xaba   : > { %10539 = vmatpush1.bf16.msra.mxu0 %v16855_v16  ;;  %v16947_v16 = vld [vmem:[%s20358_s7 + $0x344] ss:$8 sps:$4 sm:$0xff]  }
 0xabb   : > { %10540 = vmatprep.subr.bf16.mxu0 %v16863_v18  ;;  %v16942_v18 = vld [vmem:[%s20358_s7 + $0x3c0] ss:$8 sps:$4 sm:$0xff]  }
 0xabc   : > { %10683 = vmatpush1.bf16.msra.mxu1 %v16858_v56  ;;  %v16950_v56 = vld [vmem:[%s20358_s7 + $0x3d4] ss:$8 sps:$4 sm:$0xff]  }
 0xabd   : > { %10684 = vmatprep.subr.bf16.mxu1 %v16866_v31  ;;  %v16945_v31 = vld [vmem:[%s20358_s7 + $0x340] ss:$8 sps:$4 sm:$0xff]  }
 0xabe   : > { %10541 = vmatpush1.bf16.msra.mxu0 %v16861_v2  ;;  %v16953_v2 = vld [vmem:[%s20358_s7 + $0x354] ss:$8 sps:$4 sm:$0xff]  }
 0xabf   : > { %10542 = vmatprep.subr.bf16.mxu0 %v16869_v23  ;;  %v16948_v23 = vld [vmem:[%s20358_s7 + $0x3d0] ss:$8 sps:$4 sm:$0xff]  }
 0xac0   : > { %10685 = vmatpush1.bf16.msra.mxu1 %v16864_v36  ;;  %v16956_v36 = vld [vmem:[%s20358_s7 + $0x3e4] ss:$8 sps:$4 sm:$0xff]  }
 0xac1   : > { %10954 = vmatprep.subr.bf16.mxu1 %v16872_v39  ;;  %v16951_v39 = vld [vmem:[%s20358_s7 + $0x350] ss:$8 sps:$4 sm:$0xff]  }
 0xac2   : > { %10543 = vmatpush1.bf16.msra.mxu0 %v16867_v19  ;;  %v16959_v19 = vld [vmem:[%s20358_s7 + $0x364] ss:$8 sps:$4 sm:$0xff]  }
 0xac3   : > { %10703 = vmatmul.mubr.bf16.vlgmr.msra.gmra.mrb[172].mxu1 %v10588_v28  ;;  %10812 = vmatprep.subr.bf16.mxu0 %v16875_v12  ;;  %v16954_v12 = vld [vmem:[%s20358_s7 + $0x3e0] ss:$8 sps:$4 sm:$0xff]  }
 0xac4   : > { %10955 = vmatpush1.bf16.msra.mxu1 %v16870_v1  ;;  %10986 = vmatprep.mubr.bf16.mxu1 %v17265_v42  ;;  %v16962_v1 = vld [vmem:[%s20358_s7 + $0x3f4] ss:$8 sps:$4 sm:$0xff]   ;;  %v16957_v28 = vld [vmem:[%s20358_s7 + $0x360] ss:$8 sps:$4 sm:$0xff]  }
 0xac5   : > { %10561 = vmatmul.mubr.bf16.vlgmr.msra.gmra.mrb[76].mxu0 %v10446_v4  ;;  %10956 = vmatprep.subr.bf16.mxu1 %v16878_v27  ;;  %v16965_v27 = vld [vmem:[%s20358_s7 + $0x374] ss:$8 sps:$4 sm:$0xff]   ;;  %v16968_v4 = vld [vmem:[%s20358_s7 + $0x484] ss:$8 sps:$4 sm:$0xff]  }
 0xac6   : > { %10813 = vmatpush1.bf16.msra.mxu0 %v16873_v63  ;;  %10844 = vmatprep.mubr.bf16.mxu0 %v17265_v42  ;;  %v16960_v63 = vld [vmem:[%s20358_s7 + $0x3f0] ss:$8 sps:$4 sm:$0xff]  }
 0xac7   : > { %10814 = vmatprep.subr.bf16.mxu0 %v16881_v40  ;;  %v16963_v40 = vld [vmem:[%s20358_s7 + $0x370] ss:$8 sps:$4 sm:$0xff]  }
 0xac8   : > { %10957 = vmatpush1.bf16.msra.mxu1 %v16876_v3  ;;  %v16971_v3 = vld [vmem:[%s20358_s7 + $0x404] ss:$8 sps:$4 sm:$0xff]  }
 0xac9   : > { %10958 = vmatprep.subr.bf16.mxu1 %v16884_v38  ;;  %v16966_v38 = vld [vmem:[%s20358_s7 + $0x480] ss:$8 sps:$4 sm:$0xff]  }
 0xaca   : > { %10815 = vmatpush1.bf16.msra.mxu0 %v16879_v52  ;;  %v11156_v52 = vrot.slane %v19517_v26, 3  ;;  %v16972_v26 = vld [vmem:[%s20358_s7 + $0x490] ss:$8 sps:$4 sm:$0xff]  }
 0xacb   : > { %10816 = vmatprep.subr.bf16.mxu0 %v16887_v48  ;;  %v16974_v48 = vld [vmem:[%s20358_s7 + $0x494] ss:$8 sps:$4 sm:$0xff]  }
 0xacc   : > { %10959 = vmatpush1.bf16.msra.mxu1 %v16882_v58  ;;  %v16969_v58 = vld [vmem:[%s20358_s7 + $0x400] ss:$8 sps:$4 sm:$0xff]  }
 0xacd   : > { %10960 = vmatprep.subr.bf16.mxu1 %v16890_v34  ;;  %v11014_v34 = vrot.slane %v19508_v11, 3  ;;  %v16975_v11 = vld [vmem:[%s20358_s7 + $0x410] ss:$8 sps:$4 sm:$0xff]  }
 0xace   : > { %10817 = vmatpush1.bf16.msra.mxu0 %v16885_v60  ;;  %v16977_v60 = vld [vmem:[%s20358_s7 + $0x414] ss:$8 sps:$4 sm:$0xff]  }
 0xacf   : > { %10818 = vmatprep.subr.bf16.mxu0 %v16893_v22  ;;  %v16980_v22 = vld [vmem:[%s20358_s7 + $0x4a4] ss:$8 sps:$4 sm:$0xff]  }
 0xad0   : > { %10961 = vmatpush1.bf16.msra.mxu1 %v16888_v46  ;;  %v16983_v46 = vld [vmem:[%s20358_s7 + $0x424] ss:$8 sps:$4 sm:$0xff]  }
 0xad1   : > { %10962 = vmatprep.subr.bf16.mxu1 %v16896_v5  ;;  %v16978_v5 = vld [vmem:[%s20358_s7 + $0x4a0] ss:$8 sps:$4 sm:$0xff]  }
 0xad2   : > { %10819 = vmatpush1.bf16.msra.mxu0 %v16891_v25  ;;  %v16986_v25 = vld [vmem:[%s20358_s7 + $0x4b4] ss:$8 sps:$4 sm:$0xff]  }
 0xad3   : > { %10820 = vmatprep.subr.bf16.mxu0 %v16899_v14  ;;  %v16981_v14 = vld [vmem:[%s20358_s7 + $0x420] ss:$8 sps:$4 sm:$0xff]  }
 0xad4   : > { %10963 = vmatpush1.bf16.msra.mxu1 %v16894_v54  ;;  %v16989_v54 = vld [vmem:[%s20358_s7 + $0x434] ss:$8 sps:$4 sm:$0xff]  }
 0xad5   : > { %10964 = vmatprep.subr.bf16.mxu1 %v16902_v21  ;;  %v16984_v21 = vld [vmem:[%s20358_s7 + $0x4b0] ss:$8 sps:$4 sm:$0xff]  }
 0xad6   : > { %10821 = vmatpush1.bf16.msra.mxu0 %v16897_v10  ;;  %v16992_v10 = vld [vmem:[%s20358_s7 + $0x4c4] ss:$8 sps:$4 sm:$0xff]  }
 0xad7   : > { %10822 = vmatprep.subr.bf16.mxu0 %v16905_v59  ;;  %v16987_v59 = vld [vmem:[%s20358_s7 + $0x430] ss:$8 sps:$4 sm:$0xff]  }
 0xad8   : > { %10965 = vmatpush1.bf16.msra.mxu1 %v16900_v51  ;;  %v16995_v51 = vld [vmem:[%s20358_s7 + $0x444] ss:$8 sps:$4 sm:$0xff]  }
 0xad9   : > { %10966 = vmatprep.subr.bf16.mxu1 %v16908_v35  ;;  %v16990_v35 = vld [vmem:[%s20358_s7 + $0x4c0] ss:$8 sps:$4 sm:$0xff]  }
 0xada   : > { %10823 = vmatpush1.bf16.msra.mxu0 %v16903_v37  ;;  %v16998_v37 = vld [vmem:[%s20358_s7 + $0x4d4] ss:$8 sps:$4 sm:$0xff]  }
 0xadb   : > { %10824 = vmatprep.subr.bf16.mxu0 %v16911_v62  ;;  %v16993_v62 = vld [vmem:[%s20358_s7 + $0x440] ss:$8 sps:$4 sm:$0xff]  }
 0xadc   : > { %10967 = vmatpush1.bf16.msra.mxu1 %v16906_v44  ;;  %v17001_v44 = vld [vmem:[%s20358_s7 + $0x454] ss:$8 sps:$4 sm:$0xff]  }
 0xadd   : > { %10968 = vmatprep.subr.bf16.mxu1 %v16914_v8  ;;  %v16996_v8 = vld [vmem:[%s20358_s7 + $0x4d0] ss:$8 sps:$4 sm:$0xff]  }
 0xade   : > { %10825 = vmatpush1.bf16.msra.mxu0 %v16909_v49  ;;  %v17004_v49 = vld [vmem:[%s20358_s7 + $0x4e4] ss:$8 sps:$4 sm:$0xff]  }
 0xadf   : > { %10826 = vmatprep.subr.bf16.mxu0 %v16917_v9  ;;  %v16999_v9 = vld [vmem:[%s20358_s7 + $0x450] ss:$8 sps:$4 sm:$0xff]  }
 0xae0   : > { %10969 = vmatpush1.bf16.msra.mxu1 %v16912_v13  ;;  %v17007_v13 = vld [vmem:[%s20358_s7 + $0x464] ss:$8 sps:$4 sm:$0xff]  }
 0xae1   : > { %11238 = vmatprep.subr.bf16.mxu1 %v16920_v6  ;;  %v17002_v6 = vld [vmem:[%s20358_s7 + $0x4e0] ss:$8 sps:$4 sm:$0xff]  }
 0xae2   : > { %10827 = vmatpush1.bf16.msra.mxu0 %v16915_v0  ;;  %v17010_v0 = vld [vmem:[%s20358_s7 + $0x4f4] ss:$8 sps:$4 sm:$0xff]  }
 0xae3   : > { %10987 = vmatmul.mubr.bf16.vlgmr.msra.gmra.mrb[176].mxu1 %v10872_v29  ;;  %11096 = vmatprep.subr.bf16.mxu0 %v16923_v57  ;;  %v17005_v57 = vld [vmem:[%s20358_s7 + $0x460] ss:$8 sps:$4 sm:$0xff]   ;;  %v17013_v29 = vld [vmem:[%s20358_s7 + $0x474] ss:$8 sps:$4 sm:$0xff]  }
 0xae4   : > { %11239 = vmatpush1.bf16.msra.mxu1 %v16918_v55  ;;  %11270 = vmatprep.mubr.bf16.mxu1 %v17265_v42  ;;  %v10147_v55 = vld [vmem:[#allocation10 + $0x8] sm:$0xff] }
 0xae5   : > { %10845 = vmatmul.mubr.bf16.vlgmr.msra.gmra.mrb[80].mxu0 %v10730_v47  ;;  %11240 = vmatprep.subr.bf16.mxu1 %v16926_v53  ;;  %v17008_v53 = vld [vmem:[%s20358_s7 + $0x4f0] ss:$8 sps:$4 sm:$0xff]   ;;  %v17016_v47 = vld [vmem:[%s20358_s7 + $0x584] ss:$8 sps:$4 sm:$0xff]  }
 0xae6   : > { %11097 = vmatpush1.bf16.msra.mxu0 %v16921_v7  ;;  %11128 = vmatprep.mubr.bf16.mxu0 %v17265_v42  ;;  %v19901_v7 = vpack.c.bf16 %v10147_v55, %v10147_v55  ;;  %v17100_v55 = vld [vmem:[%s20358_s7 + $0x6e4] ss:$8 sps:$4 sm:$0xff]  }
 0xae7   : > { %11098 = vmatprep.subr.bf16.mxu0 %v16929_v32  ;;  %v17011_v32 = vld [vmem:[%s20358_s7 + $0x470] ss:$8 sps:$4 sm:$0xff]  }
 0xae8   : > { %11241 = vmatpush1.bf16.msra.mxu1 %v16924_v33  ;;  %v17019_v33 = vld [vmem:[%s20358_s7 + $0x504] ss:$8 sps:$4 sm:$0xff]  }
 0xae9   : > { %11242 = vmatprep.subr.bf16.mxu1 %v16932_v50  ;;  %v17014_v50 = vld [vmem:[%s20358_s7 + $0x580] ss:$8 sps:$4 sm:$0xff]  }
 0xaea   : > { %11099 = vmatpush1.bf16.msra.mxu0 %v16927_v43  ;;  %v19916_v43 = vshrl.u32 %v19901_v7, 16 }
 0xaeb   : > { %11100 = vmatprep.subr.bf16.mxu0 %v16935_v24  ;;  %v17022_v24 = vld [vmem:[%s20358_s7 + $0x594] ss:$8 sps:$4 sm:$0xff]  }
 0xaec   : > { %11243 = vmatpush1.bf16.msra.mxu1 %v16930_v17  ;;  %v17017_v17 = vld [vmem:[%s20358_s7 + $0x500] ss:$8 sps:$4 sm:$0xff]  }
 0xaed   : > { %11244 = vmatprep.subr.bf16.mxu1 %v16938_v61  ;;  %v17025_v61 = vld [vmem:[%s20358_s7 + $0x514] ss:$8 sps:$4 sm:$0xff]  }
 0xaee   : > { %11101 = vmatpush1.bf16.msra.mxu0 %v16933_v45  ;;  %v17020_v45 = vld [vmem:[%s20358_s7 + $0x590] ss:$8 sps:$4 sm:$0xff]  }
 0xaef   : > { %11102 = vmatprep.subr.bf16.mxu0 %v16941_v41  ;;  %v17028_v41 = vld [vmem:[%s20358_s7 + $0x5a4] ss:$8 sps:$4 sm:$0xff]  }
 0xaf0   : > { %11245 = vmatpush1.bf16.msra.mxu1 %v16936_v15  ;;  %v17023_v15 = vld [vmem:[%s20358_s7 + $0x510] ss:$8 sps:$4 sm:$0xff]  }
 0xaf1   : > { %11246 = vmatprep.subr.bf16.mxu1 %v16944_v20  ;;  %v17031_v20 = vld [vmem:[%s20358_s7 + $0x524] ss:$8 sps:$4 sm:$0xff]  }
 0xaf2   : > { %11103 = vmatpush1.bf16.msra.mxu0 %v16939_v30  ;;  %v17026_v30 = vld [vmem:[%s20358_s7 + $0x5a0] ss:$8 sps:$4 sm:$0xff]  }
 0xaf3   : > { %11104 = vmatprep.subr.bf16.mxu0 %v16947_v16  ;;  %v17034_v16 = vld [vmem:[%s20358_s7 + $0x5b4] ss:$8 sps:$4 sm:$0xff]  }
 0xaf4   : > { %11247 = vmatpush1.bf16.msra.mxu1 %v16942_v18  ;;  %v17029_v18 = vld [vmem:[%s20358_s7 + $0x520] ss:$8 sps:$4 sm:$0xff]  }
 0xaf5   : > { %11248 = vmatprep.subr.bf16.mxu1 %v16950_v56  ;;  %v17037_v56 = vld [vmem:[%s20358_s7 + $0x534] ss:$8 sps:$4 sm:$0xff]  }
 0xaf6   : > { %11105 = vmatpush1.bf16.msra.mxu0 %v16945_v31  ;;  %v17032_v31 = vld [vmem:[%s20358_s7 + $0x5b0] ss:$8 sps:$4 sm:$0xff]  }
 0xaf7   : > { %11106 = vmatprep.subr.bf16.mxu0 %v16953_v2  ;;  %v17040_v2 = vld [vmem:[%s20358_s7 + $0x5c4] ss:$8 sps:$4 sm:$0xff]  }
 0xaf8   : > { %11249 = vmatpush1.bf16.msra.mxu1 %v16948_v23  ;;  %v17035_v23 = vld [vmem:[%s20358_s7 + $0x530] ss:$8 sps:$4 sm:$0xff]  }
 0xaf9   : > { %11250 = vmatprep.subr.bf16.mxu1 %v16956_v36  ;;  %v17043_v36 = vld [vmem:[%s20358_s7 + $0x544] ss:$8 sps:$4 sm:$0xff]  }
 0xafa   : > { %11107 = vmatpush1.bf16.msra.mxu0 %v16951_v39  ;;  %v17038_v39 = vld [vmem:[%s20358_s7 + $0x5c0] ss:$8 sps:$4 sm:$0xff]  }
 0xafb   : > { %11108 = vmatprep.subr.bf16.mxu0 %v16959_v19  ;;  %v17046_v19 = vld [vmem:[%s20358_s7 + $0x5d4] ss:$8 sps:$4 sm:$0xff]  }
 0xafc   : > { %11251 = vmatpush1.bf16.msra.mxu1 %v16954_v12  ;;  %v17041_v12 = vld [vmem:[%s20358_s7 + $0x540] ss:$8 sps:$4 sm:$0xff]  }
 0xafd   : > { %11252 = vmatprep.subr.bf16.mxu1 %v16962_v1  ;;  %v17049_v1 = vld [vmem:[%s20358_s7 + $0x554] ss:$8 sps:$4 sm:$0xff]  }
 0xafe   : > { %11109 = vmatpush1.bf16.msra.mxu0 %v16957_v28  ;;  %v17044_v28 = vld [vmem:[%s20358_s7 + $0x5d0] ss:$8 sps:$4 sm:$0xff]  }
 0xaff   : > { %11110 = vmatprep.subr.bf16.mxu0 %v16965_v27  ;;  %v17052_v27 = vld [vmem:[%s20358_s7 + $0x5e4] ss:$8 sps:$4 sm:$0xff]  }
 0xb00   : > { %11253 = vmatpush1.bf16.msra.mxu1 %v16960_v63  ;;  %v17047_v63 = vld [vmem:[%s20358_s7 + $0x550] ss:$8 sps:$4 sm:$0xff]  }
 0xb01   : > { %11523 = vmatprep.subr.bf16.mxu1 %v16968_v4  ;;  %v17055_v4 = vld [vmem:[%s20358_s7 + $0x564] ss:$8 sps:$4 sm:$0xff]  }
 0xb02   : > { %11111 = vmatpush1.bf16.msra.mxu0 %v16963_v40  ;;  %v17050_v40 = vld [vmem:[%s20358_s7 + $0x5e0] ss:$8 sps:$4 sm:$0xff]  }
 0xb03   : > { %11271 = vmatmul.mubr.bf16.vlgmr.msra.gmra.mrb[180].mxu1 %v11156_v52  ;;  %11379 = vmatprep.subr.bf16.mxu0 %v16971_v3  ;;  %v17058_v3 = vld [vmem:[%s20358_s7 + $0x5f4] ss:$8 sps:$4 sm:$0xff]  }
 0xb04   : > { %11524 = vmatpush1.bf16.msra.mxu1 %v16966_v38  ;;  %11555 = vmatprep.mubr.bf16.mxu1 %v17265_v42  ;;  %v17053_v38 = vld [vmem:[%s20358_s7 + $0x560] ss:$8 sps:$4 sm:$0xff]   ;;  %v17061_v52 = vld [vmem:[%s20358_s7 + $0x574] ss:$8 sps:$4 sm:$0xff]  }
 0xb05   : > { %11129 = vmatmul.mubr.bf16.vlgmr.msra.gmra.mrb[84].mxu0 %v11014_v34  ;;  %11525 = vmatprep.subr.bf16.mxu1 %v16974_v48  ;;  %v17056_v48 = vld [vmem:[%s20358_s7 + $0x5f0] ss:$8 sps:$4 sm:$0xff]  }
 0xb06   : > { %11380 = vmatpush1.bf16.msra.mxu0 %v16969_v58  ;;  %11411 = vmatprep.mubr.bf16.mxu0 %v17265_v42  ;;  %v17064_v58 = vld [vmem:[%s20358_s7 + $0x684] ss:$8 sps:$4 sm:$0xff]   ;;  %v17059_v34 = vld [vmem:[%s20358_s7 + $0x570] ss:$8 sps:$4 sm:$0xff]  }
 0xb07   : > { %11381 = vmatprep.subr.bf16.mxu0 %v16977_v60  ;;  %v17067_v60 = vld [vmem:[%s20358_s7 + $0x604] ss:$8 sps:$4 sm:$0xff]  }
 0xb08   : > { %11526 = vmatpush1.bf16.msra.mxu1 %v16972_v26  ;;  %v17062_v26 = vld [vmem:[%s20358_s7 + $0x680] ss:$8 sps:$4 sm:$0xff]  }
 0xb09   : > { %11527 = vmatprep.subr.bf16.mxu1 %v16980_v22  ;;  %v11726_v22 = vrot.slane %v19916_v43, 1 }
 0xb0a   : > { %11382 = vmatpush1.bf16.msra.mxu0 %v16975_v11  ;;  %v17070_v11 = vld [vmem:[%s20358_s7 + $0x694] ss:$8 sps:$4 sm:$0xff]  }
 0xb0b   : > { %11383 = vmatprep.subr.bf16.mxu0 %v16983_v46  ;;  %v17065_v46 = vld [vmem:[%s20358_s7 + $0x600] ss:$8 sps:$4 sm:$0xff]  }
 0xb0c   : > { %11528 = vmatpush1.bf16.msra.mxu1 %v16978_v5  ;;  %v11584_v5 = vrot.slane %v19901_v7, 1 }
 0xb0d   : > { %11529 = vmatprep.subr.bf16.mxu1 %v16986_v25  ;;  %v17073_v25 = vld [vmem:[%s20358_s7 + $0x614] ss:$8 sps:$4 sm:$0xff]  }
 0xb0e   : > { %11384 = vmatpush1.bf16.msra.mxu0 %v16981_v14  ;;  %v17068_v14 = vld [vmem:[%s20358_s7 + $0x690] ss:$8 sps:$4 sm:$0xff]  }
 0xb0f   : > { %11385 = vmatprep.subr.bf16.mxu0 %v16989_v54  ;;  %v17076_v54 = vld [vmem:[%s20358_s7 + $0x6a4] ss:$8 sps:$4 sm:$0xff]  }
 0xb10   : > { %11530 = vmatpush1.bf16.msra.mxu1 %v16984_v21  ;;  %v17071_v21 = vld [vmem:[%s20358_s7 + $0x610] ss:$8 sps:$4 sm:$0xff]  }
 0xb11   : > { %11531 = vmatprep.subr.bf16.mxu1 %v16992_v10  ;;  %v17079_v10 = vld [vmem:[%s20358_s7 + $0x624] ss:$8 sps:$4 sm:$0xff]  }
 0xb12   : > { %11386 = vmatpush1.bf16.msra.mxu0 %v16987_v59  ;;  %v17074_v59 = vld [vmem:[%s20358_s7 + $0x6a0] ss:$8 sps:$4 sm:$0xff]  }
 0xb13   : > { %11387 = vmatprep.subr.bf16.mxu0 %v16995_v51  ;;  %v17082_v51 = vld [vmem:[%s20358_s7 + $0x6b4] ss:$8 sps:$4 sm:$0xff]  }
 0xb14   : > { %11532 = vmatpush1.bf16.msra.mxu1 %v16990_v35  ;;  %v17077_v35 = vld [vmem:[%s20358_s7 + $0x620] ss:$8 sps:$4 sm:$0xff]  }
 0xb15   : > { %11533 = vmatprep.subr.bf16.mxu1 %v16998_v37  ;;  %v17085_v37 = vld [vmem:[%s20358_s7 + $0x634] ss:$8 sps:$4 sm:$0xff]  }
 0xb16   : > { %11388 = vmatpush1.bf16.msra.mxu0 %v16993_v62  ;;  %v17080_v62 = vld [vmem:[%s20358_s7 + $0x6b0] ss:$8 sps:$4 sm:$0xff]  }
 0xb17   : > { %11389 = vmatprep.subr.bf16.mxu0 %v17001_v44  ;;  %v17088_v44 = vld [vmem:[%s20358_s7 + $0x6c4] ss:$8 sps:$4 sm:$0xff]  }
 0xb18   : > { %11534 = vmatpush1.bf16.msra.mxu1 %v16996_v8  ;;  %v17083_v8 = vld [vmem:[%s20358_s7 + $0x630] ss:$8 sps:$4 sm:$0xff]  }
 0xb19   : > { %11535 = vmatprep.subr.bf16.mxu1 %v17004_v49  ;;  %v17091_v49 = vld [vmem:[%s20358_s7 + $0x644] ss:$8 sps:$4 sm:$0xff]  }
 0xb1a   : > { %11390 = vmatpush1.bf16.msra.mxu0 %v16999_v9  ;;  %v17086_v9 = vld [vmem:[%s20358_s7 + $0x6c0] ss:$8 sps:$4 sm:$0xff]  }
 0xb1b   : > { %11391 = vmatprep.subr.bf16.mxu0 %v17007_v13  ;;  %v17094_v13 = vld [vmem:[%s20358_s7 + $0x6d4] ss:$8 sps:$4 sm:$0xff]  }
 0xb1c   : > { %11536 = vmatpush1.bf16.msra.mxu1 %v17002_v6  ;;  %v17089_v6 = vld [vmem:[%s20358_s7 + $0x640] ss:$8 sps:$4 sm:$0xff]  }
 0xb1d   : > { %11537 = vmatprep.subr.bf16.mxu1 %v17010_v0  ;;  %v17097_v0 = vld [vmem:[%s20358_s7 + $0x654] ss:$8 sps:$4 sm:$0xff]  }
 0xb1e   : > { %11392 = vmatpush1.bf16.msra.mxu0 %v17005_v57  ;;  %v17092_v57 = vld [vmem:[%s20358_s7 + $0x6d0] ss:$8 sps:$4 sm:$0xff]  }
 0xb1f   : > { %11393 = vmatprep.subr.bf16.mxu0 %v17013_v29  ;;  %v17095_v29 = vld [vmem:[%s20358_s7 + $0x650] ss:$8 sps:$4 sm:$0xff]  }
 0xb20   : > { %11538 = vmatpush1.bf16.msra.mxu1 %v17008_v53  ;;  %v17103_v53 = vld [vmem:[%s20358_s7 + $0x664] ss:$8 sps:$4 sm:$0xff]  }
 0xb21   : > { %11808 = vmatprep.subr.bf16.mxu1 %v17016_v47  ;;  %v17098_v47 = vld [vmem:[%s20358_s7 + $0x6e0] ss:$8 sps:$4 sm:$0xff]  }
 0xb22   : > { %11394 = vmatpush1.bf16.msra.mxu0 %v17011_v32  ;;  %v17106_v32 = vld [vmem:[%s20358_s7 + $0x6f4] ss:$8 sps:$4 sm:$0xff]  }
 0xb23   : > { %11556 = vmatmul.mubr.bf16.vlgmr.msra.gmra.mrb[184].mxu1 %v19916_v43  ;;  %11666 = vmatprep.subr.bf16.mxu0 %v17019_v33  ;;  %v17101_v33 = vld [vmem:[%s20358_s7 + $0x660] ss:$8 sps:$4 sm:$0xff]  }
 0xb24   : > { %11809 = vmatpush1.bf16.msra.mxu1 %v17014_v50  ;;  %11840 = vmatprep.mubr.bf16.mxu1 %v17265_v42  ;;  %v17109_v50 = vld [vmem:[%s20358_s7 + $0x674] ss:$8 sps:$4 sm:$0xff]  }
 0xb25   : > { %11412 = vmatmul.mubr.bf16.vlgmr.msra.gmra.mrb[88].mxu0 %v19901_v7  ;;  %11810 = vmatprep.subr.bf16.mxu1 %v17022_v24  ;;  %v17104_v24 = vld [vmem:[%s20358_s7 + $0x6f0] ss:$8 sps:$4 sm:$0xff]  }
 0xb26   : > { %11667 = vmatpush1.bf16.msra.mxu0 %v17017_v17  ;;  %11698 = vmatprep.mubr.bf16.mxu0 %v17265_v42  ;;  %v17112_v17 = vld [vmem:[%s20358_s7 + $0x784] ss:$8 sps:$4 sm:$0xff]  }
 0xb27   : > { %11668 = vmatprep.subr.bf16.mxu0 %v17025_v61  ;;  %v17107_v61 = vld [vmem:[%s20358_s7 + $0x670] ss:$8 sps:$4 sm:$0xff]  }
 0xb28   : > { %11811 = vmatpush1.bf16.msra.mxu1 %v17020_v45  ;;  %v17115_v45 = vld [vmem:[%s20358_s7 + $0x704] ss:$8 sps:$4 sm:$0xff]  }
 0xb29   : > { %11812 = vmatprep.subr.bf16.mxu1 %v17028_v41  ;;  %v17110_v41 = vld [vmem:[%s20358_s7 + $0x780] ss:$8 sps:$4 sm:$0xff]  }
 0xb2a   : > { %11669 = vmatpush1.bf16.msra.mxu0 %v17023_v15  ;;  %v12010_v15 = vrot.slane %v19916_v43, 2 }
 0xb2b   : > { %11670 = vmatprep.subr.bf16.mxu0 %v17031_v20  ;;  %v17118_v20 = vld [vmem:[%s20358_s7 + $0x794] ss:$8 sps:$4 sm:$0xff]  }
 0xb2c   : > { %11813 = vmatpush1.bf16.msra.mxu1 %v17026_v30  ;;  %v17113_v30 = vld [vmem:[%s20358_s7 + $0x700] ss:$8 sps:$4 sm:$0xff]  }
 0xb2d   : > { %11814 = vmatprep.subr.bf16.mxu1 %v17034_v16  ;;  %v11868_v16 = vrot.slane %v19901_v7, 2 }
 0xb2e   : > { %11671 = vmatpush1.bf16.msra.mxu0 %v17029_v18  ;;  %v17121_v18 = vld [vmem:[%s20358_s7 + $0x714] ss:$8 sps:$4 sm:$0xff]  }
 0xb2f   : > { %11672 = vmatprep.subr.bf16.mxu0 %v17037_v56  ;;  %v17116_v56 = vld [vmem:[%s20358_s7 + $0x790] ss:$8 sps:$4 sm:$0xff]  }
 0xb30   : > { %11815 = vmatpush1.bf16.msra.mxu1 %v17032_v31  ;;  %v17124_v31 = vld [vmem:[%s20358_s7 + $0x7a4] ss:$8 sps:$4 sm:$0xff]  }
 0xb31   : > { %11816 = vmatprep.subr.bf16.mxu1 %v17040_v2  ;;  %v17119_v2 = vld [vmem:[%s20358_s7 + $0x710] ss:$8 sps:$4 sm:$0xff]  }
 0xb32   : > { %11673 = vmatpush1.bf16.msra.mxu0 %v17035_v23  ;;  %v17127_v23 = vld [vmem:[%s20358_s7 + $0x724] ss:$8 sps:$4 sm:$0xff]  }
 0xb33   : > { %11674 = vmatprep.subr.bf16.mxu0 %v17043_v36  ;;  %v17122_v36 = vld [vmem:[%s20358_s7 + $0x7a0] ss:$8 sps:$4 sm:$0xff]  }
 0xb34   : > { %11817 = vmatpush1.bf16.msra.mxu1 %v17038_v39  ;;  %v17130_v39 = vld [vmem:[%s20358_s7 + $0x7b4] ss:$8 sps:$4 sm:$0xff]  }
 0xb35   : > { %11818 = vmatprep.subr.bf16.mxu1 %v17046_v19  ;;  %v17133_v19 = vld [vmem:[%s20358_s7 + $0x734] ss:$8 sps:$4 sm:$0xff]  }
 0xb36   : > { %11675 = vmatpush1.bf16.msra.mxu0 %v17041_v12  ;;  %v17128_v12 = vld [vmem:[%s20358_s7 + $0x7b0] ss:$8 sps:$4 sm:$0xff]  }
 0xb37   : > { %11676 = vmatprep.subr.bf16.mxu0 %v17049_v1  ;;  %v17136_v1 = vld [vmem:[%s20358_s7 + $0x7c4] ss:$8 sps:$4 sm:$0xff]  }
 0xb38   : > { %11819 = vmatpush1.bf16.msra.mxu1 %v17044_v28  ;;  %v17131_v28 = vld [vmem:[%s20358_s7 + $0x730] ss:$8 sps:$4 sm:$0xff]  }
 0xb39   : > { %11820 = vmatprep.subr.bf16.mxu1 %v17052_v27  ;;  %v17139_v27 = vld [vmem:[%s20358_s7 + $0x744] ss:$8 sps:$4 sm:$0xff]  }
 0xb3a   : > { %11677 = vmatpush1.bf16.msra.mxu0 %v17047_v63  ;;  %v17134_v63 = vld [vmem:[%s20358_s7 + $0x7c0] ss:$8 sps:$4 sm:$0xff]  }
 0xb3b   : > { %11678 = vmatprep.subr.bf16.mxu0 %v17055_v4  ;;  %v17142_v4 = vld [vmem:[%s20358_s7 + $0x7d4] ss:$8 sps:$4 sm:$0xff]  }
 0xb3c   : > { %11821 = vmatpush1.bf16.msra.mxu1 %v17050_v40  ;;  %v17137_v40 = vld [vmem:[%s20358_s7 + $0x740] ss:$8 sps:$4 sm:$0xff]  }
 0xb3d   : > { %11822 = vmatprep.subr.bf16.mxu1 %v17058_v3  ;;  %v17145_v3 = vld [vmem:[%s20358_s7 + $0x754] ss:$8 sps:$4 sm:$0xff]  }
 0xb3e   : > { %11679 = vmatpush1.bf16.msra.mxu0 %v17053_v38  ;;  %v17140_v38 = vld [vmem:[%s20358_s7 + $0x7d0] ss:$8 sps:$4 sm:$0xff]  }
 0xb3f   : > { %11680 = vmatprep.subr.bf16.mxu0 %v17061_v52  ;;  %v17148_v52 = vld [vmem:[%s20358_s7 + $0x7e4] ss:$8 sps:$4 sm:$0xff]  }
 0xb40   : > { %11823 = vmatpush1.bf16.msra.mxu1 %v17056_v48 }
 0xb41   : > { %12092 = vmatprep.subr.bf16.mxu1 %v17064_v58  ;;  %v17143_v58 = vld [vmem:[%s20358_s7 + $0x750] ss:$8 sps:$4 sm:$0xff]  }
 0xb42   : > { %11681 = vmatpush1.bf16.msra.mxu0 %v17059_v34 }
 0xb43   : > { %11841 = vmatmul.mubr.bf16.vlgmr.msra.gmra.mrb[188].mxu1 %v11726_v22  ;;  %11950 = vmatprep.subr.bf16.mxu0 %v17067_v60  ;;  %v17151_v60 = vld [vmem:[%s20358_s7 + $0x764] ss:$8 sps:$4 sm:$0xff]  }
 0xb44   : > { %12093 = vmatpush1.bf16.msra.mxu1 %v17062_v26  ;;  %12124 = vmatprep.mubr.bf16.mxu1 %v17265_v42 }
 0xb45   : > { %11699 = vmatmul.mubr.bf16.vlgmr.msra.gmra.mrb[92].mxu0 %v11584_v5  ;;  %12094 = vmatprep.subr.bf16.mxu1 %v17070_v11  ;;  %v17146_v11 = vld [vmem:[%s20358_s7 + $0x7e0] ss:$8 sps:$4 sm:$0xff]  }
 0xb46   : > { %11951 = vmatpush1.bf16.msra.mxu0 %v17065_v46  ;;  %11982 = vmatprep.mubr.bf16.mxu0 %v17265_v42 }
 0xb47   : > { %11952 = vmatprep.subr.bf16.mxu0 %v17073_v25 }
 0xb48   : > { %12095 = vmatpush1.bf16.msra.mxu1 %v17068_v14  ;;  %v17154_v14 = vld [vmem:[%s20358_s7 + $0x7f4] ss:$8 sps:$4 sm:$0xff]  }
 0xb49   : > { %12096 = vmatprep.subr.bf16.mxu1 %v17076_v54 }
 0xb4a   : > { %11953 = vmatpush1.bf16.msra.mxu0 %v17071_v21 }
 0xb4b   : > { %11954 = vmatprep.subr.bf16.mxu0 %v17079_v10  ;;  %v17149_v10 = vld [vmem:[%s20358_s7 + $0x760] ss:$8 sps:$4 sm:$0xff]  }
 0xb4c   : > { %12097 = vmatpush1.bf16.msra.mxu1 %v17074_v59 }
 0xb4d   : > { %12098 = vmatprep.subr.bf16.mxu1 %v17082_v51  ;;  %v17157_v51 = vld [vmem:[%s20358_s7 + $0x774] ss:$8 sps:$4 sm:$0xff]  }
 0xb4e   : > { %11955 = vmatpush1.bf16.msra.mxu0 %v17077_v35  ;;  %v17152_v35 = vld [vmem:[%s20358_s7 + $0x7f0] ss:$8 sps:$4 sm:$0xff]  }
 0xb4f   : > { %11956 = vmatprep.subr.bf16.mxu0 %v17085_v37  ;;  %v17155_v37 = vld [vmem:[%s20358_s7 + $0x770] ss:$8 sps:$4 sm:$0xff]  }
 0xb50   : > { %12099 = vmatpush1.bf16.msra.mxu1 %v17080_v62  ;;  %v12294_v62 = vrot.slane %v19916_v43, 3 }
 0xb51   : > { %12100 = vmatprep.subr.bf16.mxu1 %v17088_v44  ;;  %v20210_v44 = vld [vmem:[#allocation4 + $0x1e4] sm:$0xff] }
 0xb52   : > { %11957 = vmatpush1.bf16.msra.mxu0 %v17083_v8  ;;  %v12152_v8 = vrot.slane %v19901_v7, 3 }
 0xb53   : > { %11958 = vmatprep.subr.bf16.mxu0 %v17091_v49 }
 0xb54   : > { %12101 = vmatpush1.bf16.msra.mxu1 %v17086_v9 }
 0xb55   : > { %12102 = vmatprep.subr.bf16.mxu1 %v17094_v13 }
 0xb56   : > { %11959 = vmatpush1.bf16.msra.mxu0 %v17089_v6 }
 0xb57   : > { %11960 = vmatprep.subr.bf16.mxu0 %v17097_v0 }
 0xb58   : > { %12103 = vmatpush1.bf16.msra.mxu1 %v17092_v57 }
 0xb59   : > { %12104 = vmatprep.subr.bf16.mxu1 %v17100_v55 }
 0xb5a   : > { %11961 = vmatpush1.bf16.msra.mxu0 %v17095_v29 }
 0xb5b   : > { %11962 = vmatprep.subr.bf16.mxu0 %v17103_v53 }
 0xb5c   : > { %12105 = vmatpush1.bf16.msra.mxu1 %v17098_v47 }
 0xb5d   : > { %12106 = vmatprep.subr.bf16.mxu1 %v17106_v32 }
 0xb5e   : > { %11963 = vmatpush1.bf16.msra.mxu0 %v17101_v33 }
 0xb5f   : > { %11964 = vmatprep.subr.bf16.mxu0 %v17109_v50 }
 0xb60   : > { %12107 = vmatpush1.bf16.msra.mxu1 %v17104_v24 }
 0xb61   : > { %12376 = vmatprep.subr.bf16.mxu1 %v17112_v17 }
 0xb62   : > { %11965 = vmatpush1.bf16.msra.mxu0 %v17107_v61 }
 0xb63   : > { %12125 = vmatmul.mubr.bf16.vlgmr.msra.gmra.mrb[192].mxu1 %v12010_v15  ;;  %12234 = vmatprep.subr.bf16.mxu0 %v17115_v45 }
 0xb64   : > { %12377 = vmatpush1.bf16.msra.mxu1 %v17110_v41  ;;  %12408 = vmatprep.mubr.bf16.mxu1 %v17265_v42 }
 0xb65   : > { %11983 = vmatmul.mubr.bf16.vlgmr.msra.gmra.mrb[96].mxu0 %v11868_v16  ;;  %12378 = vmatprep.subr.bf16.mxu1 %v17118_v20  ;;  %v17158_v16 = vld [vmem:[%s20360_s9 + $0x40] sm:$0xff]  }
 0xb66   : > { %12235 = vmatpush1.bf16.msra.mxu0 %v17113_v30  ;;  %12266 = vmatprep.mubr.bf16.mxu0 %v17265_v42  ;;  %v17125_v42 = vld [vmem:[%s20358_s7 + $0x720] ss:$8 sps:$4 sm:$0xff]  }
 0xb67   : > { %12236 = vmatprep.subr.bf16.mxu0 %v17121_v18  ;;  %v17159_v18 = vld [vmem:[%s20360_s9] sm:$0xff]  }
 0xb68   : > { %12379 = vmatpush1.bf16.msra.mxu1 %v17116_v56  ;;  %v17160_v56 = vld [vmem:[%s20360_s9 + $0x48] sm:$0xff]  }
 0xb69   : > { %12380 = vmatprep.subr.bf16.mxu1 %v17124_v31 }
 0xb6a   : > { %12237 = vmatpush1.bf16.msra.mxu0 %v17119_v2  ;;  %v17161_v2 = vld [vmem:[%s20360_s9 + $0x8] sm:$0xff]  }
 0xb6b   : > { %12238 = vmatprep.subr.bf16.mxu0 %v17127_v23  ;;  %v17162_v23 = vld [vmem:[%s20360_s9 + $0x50] sm:$0xff]  }
 0xb6c   : > { %12381 = vmatpush1.bf16.msra.mxu1 %v17122_v36  ;;  %v17163_v36 = vld [vmem:[%s20360_s9 + $0x10] sm:$0xff]  }
 0xb6d   : > { %12382 = vmatprep.subr.bf16.mxu1 %v17130_v39  ;;  %v17164_v39 = vld [vmem:[%s20360_s9 + $0x58] sm:$0xff]  }
 0xb6e   : > { %12239 = vmatpush1.bf16.msra.mxu0 %v17125_v42  ;;  %v17165_v42 = vld [vmem:[%s20360_s9 + $0x18] sm:$0xff]  }
 0xb6f   : > { %12240 = vmatprep.subr.bf16.mxu0 %v17133_v19  ;;  %v17166_v19 = vld [vmem:[%s20360_s9 + $0x60] sm:$0xff]  }
 0xb70   : > { %12383 = vmatpush1.bf16.msra.mxu1 %v17128_v12 }
 0xb71   : > { %12384 = vmatprep.subr.bf16.mxu1 %v17136_v1  ;;  %v17167_v1 = vld [vmem:[%s20360_s9 + $0x20] sm:$0xff]  }
 0xb72   : > { %12241 = vmatpush1.bf16.msra.mxu0 %v17131_v28 }
 0xb73   : > { %12242 = vmatprep.subr.bf16.mxu0 %v17139_v27 }
 0xb74   : > { %12385 = vmatpush1.bf16.msra.mxu1 %v17134_v63 }
 0xb75   : > { %12386 = vmatprep.subr.bf16.mxu1 %v17142_v4 }
 0xb76   : > { %12243 = vmatpush1.bf16.msra.mxu0 %v17137_v40  ;;  %v10421_v48 = vpop.f32.mrb[168].mxu1 }
 0xb77   : > { %v10423_v34 = vpop.f32.mrb[169].mxu1  ;;  %12244 = vmatprep.subr.bf16.mxu0 %v17145_v3 }
 0xb78   : > { %12387 = vmatpush1.bf16.msra.mxu1 %v17140_v38  ;;  %v10300_v26 = vpop.f32.mrb[72].mxu0  ;;  %v10425_v22 = vpop.f32.mrb[170].mxu1 }
 0xb79   : > { %v10422_v46 = vadd.f32 %v10421_v48, %v10300_v26  ;;  %v10302_v5 = vpop.f32.mrb[73].mxu0  ;;  %v10426_v25 = vpop.f32.mrb[171].mxu1  ;;  %12388 = vmatprep.subr.bf16.mxu1 %v17148_v52  ;;  %v17169_v26 = vld [vmem:[%s20360_s9 + $0x28] sm:$0xff]   ;;  %v17170_v22 = vld [vmem:[%s20360_s9 + $0x70] sm:$0xff]  }
 0xb7a   : > { %v10424_v54 = vadd.f32 %v10423_v34, %v10302_v5  ;;  %12245 = vmatpush1.bf16.msra.mxu0 %v17143_v58  ;;  %v10304_v21 = vpop.f32.mrb[74].mxu0  ;;  %v17173_v5 = vld [vmem:[%s20360_s9 + $0x38] sm:$0xff]   ;;  %v17174_v25 = vld [vmem:[%s20362_s11] sm:$0xff]  }
 0xb7b   : > { %v10305_v59 = vpop.f32.mrb[75].mxu0  ;;  %12246 = vmatprep.subr.bf16.mxu0 %v17151_v60  ;;  %v17168_v60 = vld [vmem:[%s20360_s9 + $0x68] sm:$0xff]   ;;  %v17177_v21 = vld [vmem:[%s20362_s11 + $0x18] sm:$0xff]  }
 0xb7c   : > { %12389 = vmatpush1.bf16.msra.mxu1 %v17146_v11  ;;  %v17171_v11 = vld [vmem:[%s20360_s9 + $0x30] sm:$0xff]  }
 0xb7d   : > { %12390 = vmatprep.subr.bf16.mxu1 %v17154_v14  ;;  %v17175_v14 = vld [vmem:[%s20362_s11 + $0x8] sm:$0xff]  }
 0xb7e   : > { %12247 = vmatpush1.bf16.msra.mxu0 %v17149_v10  ;;  %v17178_v10 = vld [vmem:[%s20362_s11 + $0x20] sm:$0xff]  }
 0xb7f   : > { %12248 = vmatprep.subr.bf16.mxu0 %v17157_v51 }
 0xb80   : > { %12391 = vmatpush1.bf16.msra.mxu1 %v17152_v35  ;;  %v17179_v35 = vld [vmem:[%s20362_s11 + $0x28] sm:$0xff]  }
 0xb81   : > { %16024 = vmatprep.subr.bf16.mxu1 %v20210_v44 }
 0xb82   : > { %12249 = vmatpush1.bf16.msra.mxu0 %v17155_v37 }
 0xb83   : > { %12409 = vmatmul.mubr.bf16.vlgmr.msra.gmra.mrb[196].mxu1 %v12294_v62  ;;  %14527 = vmatprep.subr.bf16.mxu0 %v17158_v16 }
 0xb84   : > { %16040 = vmatprep.mubr.msk.bf16.mxu1 %vm17264_vm2, %v20210_v44  ;;  %16025 = vmatpush3.bf16.msra.mxu1 %v17174_v25 }
 0xb85   : > { %12267 = vmatmul.mubr.bf16.vlgmr.msra.gmra.mrb[100].mxu0 %v12152_v8  ;;  %16026 = vmatprep.subr.bf16.mxu1 %v20210_v44 }
 0xb86   : > { %14528 = vmatpush3.bf16.msra.mxu0 %v17159_v18 }
 0xb87   : > { %14529 = vmatprep.subr.bf16.mxu0 %v17160_v56 }
 0xb88   : > { %16027 = vmatpush3.bf16.msra.mxu1 %v17175_v14 }
 0xb89   : > { %16028 = vmatprep.subr.bf16.mxu1 %v20210_v44 }
 0xb8a   : > { %14530 = vmatpush3.bf16.msra.mxu0 %v17161_v2 }
 0xb8b   : > { %14531 = vmatprep.subr.bf16.mxu0 %v17162_v23 }
 0xb8e   : > { %14532 = vmatpush3.bf16.msra.mxu0 %v17163_v36 }
 0xb8f   : > { %14533 = vmatprep.subr.bf16.mxu0 %v17164_v39 }
 0xb92   : > { %14534 = vmatpush3.bf16.msra.mxu0 %v17165_v42  ;;  %v12421_v42 = vlaneseq }
 0xb93   : > { %14535 = vmatprep.subr.bf16.mxu0 %v17166_v19 }
 0xb94   : > { %v12422_v19 = vshrl.u32 %v12421_v42, 7 }
 0xb96   : > { %v10704_v49 = vpop.f32.mrb[172].mxu1  ;;  %14536 = vmatpush3.bf16.msra.mxu0 %v17167_v1 }
 0xb97   : > { %v10706_v9 = vpop.f32.mrb[173].mxu1  ;;  %14537 = vmatprep.subr.bf16.mxu0 %v17168_v60 }
 0xb98   : > { %v10562_v13 = vpop.f32.mrb[76].mxu0  ;;  %v10708_v6 = vpop.f32.mrb[174].mxu1 }
 0xb99   : > { %v10569_v0 = vadd.f32 %v10562_v13, %v10422_v46  ;;  %v10564_v57 = vpop.f32.mrb[77].mxu0  ;;  %v10709_v55 = vpop.f32.mrb[175].mxu1  ;;  %v17172_v46 = vld [vmem:[%s20360_s9 + $0x78] sm:$0xff]  }
 0xb9a   : > { %v10570_v43 = vadd.f32 %v10564_v57, %v10424_v54  ;;  %v10566_v29 = vpop.f32.mrb[78].mxu0  ;;  %14538 = vmatpush3.bf16.msra.mxu0 %v17169_v26  ;;  %v17176_v54 = vld [vmem:[%s20362_s11 + $0x10] sm:$0xff]  }
 0xb9b   : > { %v10567_v53 = vpop.f32.mrb[79].mxu0  ;;  %v10711_v47 = vadd.f32 %v10704_v49, %v10569_v0  ;;  %14539 = vmatprep.subr.bf16.mxu0 %v17170_v22  ;;  %16029 = vmatpush3.bf16.msra.mxu1 %v17176_v54 }
 0xb9c   : > { %v10712_v32 = vadd.f32 %v10706_v9, %v10570_v43  ;;  %16030 = vmatprep.subr.bf16.mxu1 %v20210_v44 }
 0xb9e   : > { %14540 = vmatpush3.bf16.msra.mxu0 %v17171_v11 }
 0xb9f   : > { %14541 = vmatprep.subr.bf16.mxu0 %v17172_v46  ;;  %16031 = vmatpush3.bf16.msra.mxu1 %v17177_v21 }
 0xba0   : > { %16032 = vmatprep.subr.bf16.mxu1 %v20210_v44 }
 0xba2   : > { %14542 = vmatpush3.bf16.msra.mxu0 %v17173_v5 }
 0xba3   : > { %16033 = vmatpush3.bf16.msra.mxu1 %v17178_v10  ;;  %v17180_v10 = vld [vmem:[%s20362_s11 + $0x30] sm:$0xff]  }
 0xba4   : > { %16034 = vmatprep.subr.bf16.mxu1 %v20210_v44 }
 0xba7   : > { %16035 = vmatpush3.bf16.msra.mxu1 %v17179_v35  ;;  %v12469_v35 = vld [vmem:[%s20361_s10] sm:$0x1] }
 0xba8   : > { %16036 = vmatprep.subr.bf16.mxu1 %v20210_v44 }
 0xbab   : > { %16037 = vmatpush3.bf16.msra.mxu1 %v17180_v10 }
 0xbac   : > { %16038 = vmatprep.subr.bf16.mxu1 %v20210_v44  ;;  %v12624_v44 = vld [vmem:[%s20363_s12] sm:$0x1] }
 0xbb6   : > { %v10988_v33 = vpop.f32.mrb[176].mxu1 }
 0xbb7   : > { %v10990_v50 = vpop.f32.mrb[177].mxu1 }
 0xbb8   : > { %v10846_v24 = vpop.f32.mrb[80].mxu0  ;;  %v10992_v7 = vpop.f32.mrb[178].mxu1 }
 0xbb9   : > { %v10853_v17 = vadd.f32 %v10846_v24, %v10711_v47  ;;  %v10848_v61 = vpop.f32.mrb[81].mxu0  ;;  %v10993_v45 = vpop.f32.mrb[179].mxu1 }
 0xbba   : > { %v10854_v41 = vadd.f32 %v10848_v61, %v10712_v32  ;;  %v10850_v15 = vpop.f32.mrb[82].mxu0 }
 0xbbb   : > { %v10851_v20 = vpop.f32.mrb[83].mxu0  ;;  %v10995_v30 = vadd.f32 %v10988_v33, %v10853_v17 }
 0xbbc   : > { %v10996_v31 = vadd.f32 %v10990_v50, %v10854_v41 }
 0xbd6   : > { %v11272_v12 = vpop.f32.mrb[180].mxu1 }
 0xbd7   : > { %v11274_v28 = vpop.f32.mrb[181].mxu1 }
 0xbd8   : > { %v11130_v27 = vpop.f32.mrb[84].mxu0  ;;  %v11276_v63 = vpop.f32.mrb[182].mxu1 }
 0xbd9   : > { %v11137_v4 = vadd.f32 %v11130_v27, %v10995_v30  ;;  %v11132_v40 = vpop.f32.mrb[85].mxu0  ;;  %v11277_v3 = vpop.f32.mrb[183].mxu1  ;;  %v12427_v27 = vsub.s32 1, %v12422_v19 }
 0xbda   : > { %v11138_v38 = vadd.f32 %v11132_v40, %v10996_v31  ;;  %v11134_v52 = vpop.f32.mrb[86].mxu0 }
 0xbdb   : > { %v11135_v48 = vpop.f32.mrb[87].mxu0  ;;  %v11279_v58 = vadd.f32 %v11272_v12, %v11137_v4  ;;  %v12423_v12 = vsub.s32 0, %v12422_v19 }
 0xbdc   : > { %v11280_v34 = vadd.f32 %v11274_v28, %v11138_v38  ;;  %v12419_v28 = vld [vmem:[%s20359_s8] sm:$0x3] }
 0xbdd   : > { %v12424_v38 = vrot.slane %v12419_v28, %v12423_v12 }
 0xbf6   : > { %v11557_v59 = vpop.f32.mrb[184].mxu1 }
 0xbf7   : > { %v11559_v51 = vpop.f32.mrb[185].mxu1 }
 0xbf8   : > { %v11413_v37 = vpop.f32.mrb[88].mxu0  ;;  %v11561_v62 = vpop.f32.mrb[186].mxu1 }
 0xbf9   : > { %v11420_v8 = vadd.f32 %v11413_v37, %v11279_v58  ;;  %v11415_v49 = vpop.f32.mrb[89].mxu0  ;;  %v11562_v9 = vpop.f32.mrb[187].mxu1 }
 0xbfa   : > { %v11421_v13 = vadd.f32 %v11415_v49, %v11280_v34  ;;  %v11417_v6 = vpop.f32.mrb[90].mxu0  ;;  %v12428_v34 = vrot.slane %v12419_v28, %v12427_v27 }
 0xbfb   : > { %v11418_v0 = vpop.f32.mrb[91].mxu0  ;;  %v11564_v57 = vadd.f32 %v11557_v59, %v11420_v8  ;;  %v17181_v59 = vld [vmem:[%s20362_s11 + $0x38] sm:$0xff]  }
 0xbfc   : > { %v11565_v55 = vadd.f32 %v11559_v51, %v11421_v13  ;;  %16039 = vmatpush3.bf16.msra.mxu1 %v17181_v59 }
 0xc16   : > { %v11842_v43 = vpop.f32.mrb[188].mxu1 }
 0xc17   : > { %v11844_v29 = vpop.f32.mrb[189].mxu1 }
 0xc18   : > { %v11700_v53 = vpop.f32.mrb[92].mxu0  ;;  %v11846_v47 = vpop.f32.mrb[190].mxu1 }
 0xc19   : > { %v11707_v32 = vadd.f32 %v11700_v53, %v11564_v57  ;;  %v11702_v33 = vpop.f32.mrb[93].mxu0  ;;  %v11847_v50 = vpop.f32.mrb[191].mxu1 }
 0xc1a   : > { %v11708_v24 = vadd.f32 %v11702_v33, %v11565_v55  ;;  %v11704_v7 = vpop.f32.mrb[94].mxu0 }
 0xc1b   : > { %v11705_v17 = vpop.f32.mrb[95].mxu0  ;;  %v11849_v61 = vadd.f32 %v11842_v43, %v11707_v32 }
 0xc1c   : > { %v11850_v45 = vadd.f32 %v11844_v29, %v11708_v24 }
 0xc36   : > { %v12126_v41 = vpop.f32.mrb[192].mxu1 }
 0xc37   : > { %v12128_v15 = vpop.f32.mrb[193].mxu1 }
 0xc38   : > { %v11984_v20 = vpop.f32.mrb[96].mxu0  ;;  %v12130_v30 = vpop.f32.mrb[194].mxu1 }
 0xc39   : > { %v11991_v16 = vadd.f32 %v11984_v20, %v11849_v61  ;;  %v11986_v18 = vpop.f32.mrb[97].mxu0  ;;  %v12131_v56 = vpop.f32.mrb[195].mxu1 }
 0xc3a   : > { %v11992_v31 = vadd.f32 %v11986_v18, %v11850_v45  ;;  %v11988_v2 = vpop.f32.mrb[98].mxu0 }
 0xc3b   : > { %v11989_v23 = vpop.f32.mrb[99].mxu0  ;;  %v12133_v36 = vadd.f32 %v12126_v41, %v11991_v16 }
 0xc3c   : > { %v12134_v39 = vadd.f32 %v12128_v15, %v11992_v31 }
 0xc56   : > { %v12410_v1 = vpop.f32.mrb[196].mxu1 }
 0xc57   : > { %v12412_v63 = vpop.f32.mrb[197].mxu1 }
 0xc58   : > { %v12268_v4 = vpop.f32.mrb[100].mxu0  ;;  %v12414_v40 = vpop.f32.mrb[198].mxu1 }
 0xc59   : > { %v12275_v3 = vadd.f32 %v12268_v4, %v12133_v36  ;;  %v12270_v52 = vpop.f32.mrb[101].mxu0  ;;  %v12415_v48 = vpop.f32.mrb[199].mxu1 }
 0xc5a   : > { %v12276_v58 = vadd.f32 %v12270_v52, %v12134_v39  ;;  %v12272_v60 = vpop.f32.mrb[102].mxu0 }
 0xc5b   : > { %v12417_v26 = vadd.f32 %v12410_v1, %v12275_v3  ;;  %v12273_v22 = vpop.f32.mrb[103].mxu0 }
 0xc5c   : > { %v12418_v11 = vadd.f32 %v12412_v63, %v12276_v58 }
 0xc5d   : > { %v12431_v46 = vadd.f32 %v12424_v38, %v12417_v26 }
 0xc5e   : > { %v12432_v5 = vadd.f32 %v12428_v34, %v12418_v11 }
 0xc5f   : > { %v12433_v25 = vmax.f32 %v12431_v46, 0.0 }
 0xc60   : > { %v12434_v14 = vmax.f32 %v12432_v5, 0.0 }
 0xc61   : > { %v12435_v21 = vpack.c.bf16 %v12433_v25, %v12433_v25 }
 0xc62   : > { %v12436_v54 = vpack.c.bf16 %v12434_v14, %v12434_v14 }
 0xc64   : > { %12598 = vmatprep.mubr.bf16.mxu0 %v12436_v54 }
 0xc65   : > { %12599 = vmatmul.mubr.bf16.vlgmr.msra.gmra.mrb[104].mxu0 %v12435_v21 }
 0xd38   : > { %v14543_v51 = vpop.f32.mrb[104].mxu0 }
 0xd39   : > { %v14544_v37 = vpop.f32.mrb[105].mxu0 }
 0xd3a   : > { %v14545_v62 = vadd.f32 %v14544_v37, %v14543_v51  ;;  %v14546_v8 = vpop.f32.mrb[106].mxu0 }
 0xd3b   : > { %v14547_v49 = vpop.f32.mrb[107].mxu0 }
 0xd3c   : > { %v12601_v9 = vadd.f32 %v14545_v62, %v12469_v35 }
 0xd3e   : > { %v12606_v13 = vmax.f32 %v12601_v9, 0.0 }
 0xd40   : > { %v12607_v6 = vpack.c.bf16 %v12606_v13, %v12606_v13 }
 0xd42   : > { %16041 = vmatmul.mubr.bf16.vlgmr.msra.gmra.mrb[200].mxu1 %v12607_v6 }
 0xe15   : > { %v12707_v0 = vpop.f32.mrb[200].mxu1 }
 0xe16   : > { %v12708_v57 = vadd.f32 %v12707_v0, %v12624_v44  ;;  %v16042_v55 = vpop.f32.mrb[201].mxu1 }
 0xe17   : > { %v12710_v43 = vpop.f32.mrb[202].mxu1 }
 0xe18   : > { %12713 = vst [vmem:[%s432_s20] sm:$0x1] %v12708_v57  ;;  %v16043_v29 = vpop.f32.mrb[203].mxu1 }
 0xe19   : > { %17211 = shalt.err (!%p17208_p3)
}
 0xe1a   : > { %s17212_s24 = scalar_lea.hbm %s20309_s0, 16  ;;  %s17216_s23 = scalar_lea.hbm %s20364_s13, 32 }
 0xe1b   : > { %p17213_p4 = scmp.ne.s32.totalorder %s20309_s0, %s17212_s24  ;;  %p17217_p9 = scmp.lt.u32.totalorder %s20309_s0, %s20364_s13 }
 0xe1c   : > { %p17218_p10 = scmp.lt.u32.totalorder %s17216_s23, %s17212_s24  ;;  %p17220_p12 = scmp.lt.u32.totalorder %s17212_s24, %s20309_s0 }
 0xe1d   : > { %p17214_p7 = pnand %p17213_p4, %p17375_p5 }
 0xe1e   : > { %p17219_p11 = por %p17218_p10, %p17217_p9 }
 0xe1f   : > { %p17215_p8 = pneg %p17214_p7 }
 0xe20   : > { %p17221_p13 = por %p17220_p12, %p17219_p11 }
 0xe22   : > { %p17222_p0 = pnand %p17221_p13, %p17215_p8 }
 0xe24   : > { %17225 = shalt.err (!%p17222_p0)
}
 0xe25   : > { %16461 = dma.vmem_to_hbm [thread:$0]  (%p17375_p5), %s20311_s21, 16, %s20309_s0, %s12715_s17  }
 0xe26 PF: > { %p16467_p1 = scmp.ge.s32.totalorder %s17260_s28, 2  ;;  %s12739_s29 = sand.u32 1, %s17248_s25  }
 0xe27   : > { %s12740_s22 = scalar_lea.sflag [#allocation12], %s12739_s29 }
 0xe28   : > { %p16464_p2 = pnand %p16467_p1, %p17379_p6 }
 0xe2a   : > { %17243 = dma.done.wait (!%p16464_p2), %s12740_s22, 16  }
 0xe2b   : > { %17245 = vsyncadd (!%p16464_p2), %s12740_s22, 4294967280  ;;  %s20370_s24 = sld [smem:[#allocation14_spill]]  ;;  %p23_p3 = scmp.ge.s32.totalorder %s17362_s14, 4  }
 0xe2c   : > { %s20371_s25 = smov %s17252_s26  ;;  %s20372_s26 = smov %s17256_s27 }
 0xe2d   : > { %s20374_s28 = smov %s17362_s14  ;;  %25 = sbr.rel (!%p23_p3) target bundleno = 5 (0x5), region = 443 }
 0xe31   : > { %s20373_s27 = smov %s20370_s24 }
 0xe34   :  { %12744 = vsyncpa [#allocation12], 1 }
 0xe35   :  { %12746 = vsyncpa [#allocation12 + $0x1], 1 }

</bundles_post_ra>
